<compile_context>
chip_gen: v5e
topology: v5e:2x2
jax: 0.10.0
libtpu: 0.0.40
codegen_flags: <defaults>
</compile_context>

<pallas_src>
import functools
import math

import jax
import jax.numpy as jnp
from jax.experimental import pallas as pl
from jax.experimental.pallas import tpu as pltpu


# --------------------------------------------------------------------------
# hardware queries (generation-aware VMEM budgeting / TensorCore count)
# --------------------------------------------------------------------------

def _device_kind():
    try:
        return jax.devices()[0].device_kind.lower()
    except Exception:
        return ""


def _vmem_capacity_bytes():
    try:
        return int(pltpu.get_tpu_info().vmem_capacity_bytes)
    except Exception:
        return (64 << 20) if "v7" in _device_kind() else (128 << 20)


def _num_tensorcores():
    kind = _device_kind()
    # v7x (and v4/v5p megacore) shard 'parallel' grid axes across 2 TCs;
    # v5e/v6e have a single TensorCore -> no payoff from splitting the batch.
    if "v7" in kind or "v4" in kind or "v5p" in kind:
        return 2
    return 1


# --------------------------------------------------------------------------
# kernel
# --------------------------------------------------------------------------

def _layernorm(x, gamma, beta, eps=1e-5):
    mu = jnp.mean(x, axis=-1, keepdims=True)
    var = jnp.mean(jnp.square(x - mu), axis=-1, keepdims=True)
    return (x - mu) * jax.lax.rsqrt(var + eps) * gamma + beta


def _block_kernel(x_ref,
                  ln1_g_ref, ln1_b_ref,
                  wqkv_ref, bqkv_ref,
                  wo_ref, bo_ref,
                  ln2_g_ref, ln2_b_ref,
                  wfc_ref, bfc_ref,
                  wproj_ref, bproj_ref,
                  out_ref,
                  x1_scr, x1n_scr, qkv_scr, attn_scr, acc_scr,
                  *, n_head: int, fori_heads: bool):
    f = pl.program_id(1)                     # d_ff chunk index (reduction axis)
    bt, L, D = x_ref.shape
    hd = D // n_head
    bf16 = jnp.bfloat16

    # -------- attention branch + residual: once per batch tile (f == 0) -----
    @pl.when(f == 0)
    def _attention():
        x2 = x_ref[...].astype(jnp.float32).reshape(bt * L, D)
        xn = _layernorm(x2, ln1_g_ref[...], ln1_b_ref[...])
        # 1/sqrt(hd) is folded into the Q slice of w_qkv / b_qkv at param prep.
        qkv = jnp.dot(xn.astype(bf16), wqkv_ref[...],
                      preferred_element_type=jnp.float32) + bqkv_ref[...]
        qkv_scr[...] = qkv.reshape(bt, L, 3 * D).astype(bf16)

        def one_head(qh, kh, vh):
            s = jnp.einsum("bqd,bkd->bqk", qh, kh,
                           preferred_element_type=jnp.float32)
            s = s - jnp.max(s, axis=-1, keepdims=True)
            p = jnp.exp(s)
            p = p * pl.reciprocal(jnp.sum(p, axis=-1, keepdims=True),
                                  approx=True)
            return jnp.einsum("bqk,bkd->bqd", p.astype(bf16), vh,
                              preferred_element_type=jnp.float32)

        # heads are processed in groups of `hpg` so every attn_scr store spans
        # a full multiple of 128 lanes and MXU pushes amortize when hd < 128.
        hpg = max(1, min(n_head, 128 // max(hd, 1)))
        while n_head % hpg:
            hpg -= 1
        gw = hpg * hd

        if fori_heads and D % 128 == 0 and gw % 128 == 0:
            # fori_loop bounds live ranges of the per-group score/prob tiles
            # (a full static unroll keeps every head live -> vreg spills).
            def group_body(g, carry):
                qo = pl.multiple_of(g * gw, gw)
                ko = pl.multiple_of(D + g * gw, gw)
                vo = pl.multiple_of(2 * D + g * gw, gw)
                qg = qkv_scr[:, :, pl.ds(qo, gw)]
                kg = qkv_scr[:, :, pl.ds(ko, gw)]
                vg = qkv_scr[:, :, pl.ds(vo, gw)]
                outs = []
                for j in range(hpg):
                    sl = slice(j * hd, (j + 1) * hd)
                    outs.append(one_head(qg[:, :, sl], kg[:, :, sl],
                                         vg[:, :, sl]).astype(bf16))
                slab = outs[0] if hpg == 1 else jnp.concatenate(outs, axis=-1)
                attn_scr[:, :, pl.ds(qo, gw)] = slab
                return carry
            jax.lax.fori_loop(0, n_head // hpg, group_body, 0)
        else:
            # conservative path (odd head widths / toolchain fallback)
            for h in range(n_head):
                oh = one_head(
                    qkv_scr[:, :, h * hd:(h + 1) * hd],
                    qkv_scr[:, :, D + h * hd:D + (h + 1) * hd],
                    qkv_scr[:, :, 2 * D + h * hd:2 * D + (h + 1) * hd])
                attn_scr[:, :, h * hd:(h + 1) * hd] = oh.astype(bf16)

        attn = jnp.dot(attn_scr[...].reshape(bt * L, D), wo_ref[...],
                       preferred_element_type=jnp.float32) + bo_ref[...]
        x1 = x2 + attn                                    # f32 residual
        x1_scr[...] = x1
        x1n_scr[...] = _layernorm(x1, ln2_g_ref[...],
                                  ln2_b_ref[...]).astype(bf16)
        acc_scr[...] = jnp.zeros_like(acc_scr)

    # -------- MLP: one d_ff chunk per f step (weights streamed over f) -------
    hid = jnp.dot(x1n_scr[...], wfc_ref[...],
                  preferred_element_type=jnp.float32) + bfc_ref[...]
    hid = hid * jax.nn.sigmoid(1.702 * hid)               # QuickGELU in f32
    acc_scr[...] += jnp.dot(hid.astype(bf16), wproj_ref[...],
                            preferred_element_type=jnp.float32)

    @pl.when(f == pl.num_programs(1) - 1)
    def _finalize():
        y = x1_scr[...] + acc_scr[...] + bproj_ref[...]
        out_ref[...] = y.reshape(bt, L, D).astype(out_ref.dtype)


# --------------------------------------------------------------------------
# tiling / budgeting
# --------------------------------------------------------------------------

def _pick_dff_chunk(d_ff, budget_bytes):
    """d_ff chunk (multiple of 128 dividing d_ff) so MLP weights stream."""
    max_chunk = 1024 if budget_bytes <= (48 << 20) else 4096
    if d_ff <= max_chunk:
        return d_ff
    best = None
    for c in range(128, max_chunk + 1, 128):
        if d_ff % c == 0:
            best = c
    return best if best is not None else d_ff


def _est_vmem_bytes(bt, L, D, tff, single_buffer):
    rows = bt * L
    wb = 1 if single_buffer else 2
    attn_w = wb * 2 * (D * 3 * D + D * D)          # bf16 in_proj + out_proj
    small = wb * 4 * (3 * D + 8 * D + 2 * tff)     # f32 biases + LN params
    mlp_w = 2 * 2 * (2 * D * tff)                  # bf16 fc/proj chunk, dbl buf
    io = 2 * 2 * (2 * rows * D)                    # bf16 x / out tiles, dbl buf
    scratch = rows * D * (4 + 2 + 2 + 4) + rows * 3 * D * 2
    temps = 4 * rows * max(3 * D, tff)             # largest live f32 value
    return attn_w + small + mlp_w + io + scratch + temps


def _pick_block_b(N, L, D, tff, budget_bytes, n_cores, single_buffer):
    cands = [b for b in range(1, N + 1) if N % b == 0]
    fitting = [b for b in cands
               if _est_vmem_bytes(b, L, D, tff, single_buffer) <= budget_bytes]
    if not fitting:
        fitting = [1]
    if n_cores > 1:
        # keep the batch grid divisible by the core count so all TCs get work
        multi = [b for b in fitting if (N // b) % n_cores == 0]
        if multi:
            fitting = multi
    # prefer MXU / sublane friendly row counts for the (bt*L, D) matmuls
    for align in (256, 8):
        aligned = [b for b in fitting if (b * L) % align == 0]
        if aligned:
            fitting = aligned
            break
    return max(fitting)


# --------------------------------------------------------------------------
# pallas_call wrapper
# --------------------------------------------------------------------------

def _run_block(x_nld, p, n_head, *, single_buffer, fori_heads):
    N, L, D = x_nld.shape
    d_ff = p["w_fc"].shape[1]

    cap = _vmem_capacity_bytes()
    budget = max(32 << 20, int(cap * 0.75))      # leave compiler headroom
    n_cores = _num_tensorcores()
    tff = _pick_dff_chunk(d_ff, budget)
    bt = _pick_block_b(N, L, D, tff, budget, n_cores, single_buffer)
    grid = (N // bt, d_ff // tff)

    def resident(shape):
        # These operands reuse block (0, ..., 0) on every grid step; single-
        # buffer them so they are not duplicated in VMEM.
        idx = lambda b, f: (0,) * len(shape)
        if single_buffer:
            return pl.BlockSpec(shape, idx, pipeline_mode=pl.Buffered(1))
        return pl.BlockSpec(shape, idx)

    kernel = functools.partial(_block_kernel, n_head=n_head,
                               fori_heads=fori_heads)
    return pl.pallas_call(
        kernel,
        out_shape=jax.ShapeDtypeStruct((N, L, D), x_nld.dtype),
        grid_spec=pltpu.PrefetchScalarGridSpec(
            num_scalar_prefetch=0,
            grid=grid,
            in_specs=[
                pl.BlockSpec((bt, L, D), lambda b, f: (b, 0, 0)),  # x tile
                resident((1, D)), resident((1, D)),                # ln1 g/b
                resident((D, 3 * D)), resident((1, 3 * D)),        # in_proj
                resident((D, D)), resident((1, D)),                # out_proj
                resident((1, D)), resident((1, D)),                # ln2 g/b
                pl.BlockSpec((D, tff), lambda b, f: (0, f)),       # c_fc W chunk
                pl.BlockSpec((1, tff), lambda b, f: (0, f)),       # c_fc b chunk
                pl.BlockSpec((tff, D), lambda b, f: (f, 0)),       # c_proj W chunk
                resident((1, D)),                                  # c_proj b
            ],
            out_specs=pl.BlockSpec((bt, L, D), lambda b, f: (b, 0, 0)),
            scratch_shapes=[
                pltpu.VMEM((bt * L, D), jnp.float32),      # residual after attn
                pltpu.VMEM((bt * L, D), jnp.bfloat16),     # ln2(residual)
                pltpu.VMEM((bt, L, 3 * D), jnp.bfloat16),  # q | k | v
                pltpu.VMEM((bt, L, D), jnp.bfloat16),      # head outputs
                pltpu.VMEM((bt * L, D), jnp.float32),      # MLP accumulator
            ],
        ),
        compiler_params=pltpu.CompilerParams(
            dimension_semantics=("parallel", "arbitrary"),
            vmem_limit_bytes=int(budget)),
    )(x_nld,
      p["ln1_g"], p["ln1_b"],
      p["w_qkv"], p["b_qkv"],
      p["w_o"], p["b_o"],
      p["ln2_g"], p["ln2_b"],
      p["w_fc"], p["b_fc"],
      p["w_proj"], p["b_proj"])


# Preferred -> conservative configurations.  Single-buffered resident weights
# (pl.Buffered(1)) and dynamically lane-sliced head groups are newer features;
# fall back silently if the installed toolchain rejects them so the kernel
# always compiles and runs.
_CONFIGS = (
    dict(single_buffer=True, fori_heads=True),
    dict(single_buffer=True, fori_heads=False),
    dict(single_buffer=False, fori_heads=False),
)
_config_idx = 0


def residual_block_pallas(x_nld, p, n_head):
    """One ResidualAttentionBlock.  x_nld: (N, L, D) batch-major."""
    global _config_idx
    _, _, D = x_nld.shape
    assert D % n_head == 0, "d_model must be divisible by n_head"
    while True:
        try:
            return _run_block(x_nld, p, n_head, **_CONFIGS[_config_idx])
        except Exception:
            if _config_idx >= len(_CONFIGS) - 1:
                raise
            _config_idx += 1


def transformer_forward(x_lnd, layers_params, n_head):
    """Transformer.forward: x (L, N, D) PyTorch layout -> (L, N, D).
    Activations are batch-major and bf16 between layers; a single transpose at
    each model boundary."""
    # TODO(synk): overlap next-layer weight DMA with current-layer compute
    #             (cross-call DMA future or a stacked per-layer grid axis).
    orig_dtype = x_lnd.dtype
    x = jnp.transpose(x_lnd, (1, 0, 2)).astype(jnp.bfloat16)
    for p in layers_params:
        x = residual_block_pallas(x, p, n_head)
    return jnp.transpose(x, (1, 0, 2)).astype(orig_dtype)


# --------------------------------------------------------------------------
# parameters, reference & test
# --------------------------------------------------------------------------

def _init_params(key, d_model, d_ff):
    """Raw f32 params; weights already in (in_features, out_features) layout."""
    ks = jax.random.split(key, 8)
    s = 0.02
    f32 = jnp.float32
    return {
        "ln1_g": jnp.ones((1, d_model), f32),
        "ln1_b": jnp.zeros((1, d_model), f32),
        "w_qkv": s * jax.random.normal(ks[0], (d_model, 3 * d_model), f32),
        "b_qkv": s * jax.random.normal(ks[1], (1, 3 * d_model), f32),
        "w_o":   s * jax.random.normal(ks[2], (d_model, d_model), f32),
        "b_o":   s * jax.random.normal(ks[3], (1, d_model), f32),
        "ln2_g": jnp.ones((1, d_model), f32),
        "ln2_b": jnp.zeros((1, d_model), f32),
        "w_fc":   s * jax.random.normal(ks[4], (d_model, d_ff), f32),
        "b_fc":   s * jax.random.normal(ks[5], (1, d_ff), f32),
        "w_proj": s * jax.random.normal(ks[6], (d_ff, d_model), f32),
        "b_proj": s * jax.random.normal(ks[7], (1, d_model), f32),
    }


def prepare_layer_params(p, n_head):
    """One-time param prep for the kernel: fold 1/sqrt(hd) into the Q slice of
    w_qkv / b_qkv and cast matmul weights to bf16."""
    D = p["w_o"].shape[0]
    hd = D // n_head
    qscale = jnp.concatenate([
        jnp.full((D,), 1.0 / math.sqrt(hd), jnp.float32),
        jnp.ones((2 * D,), jnp.float32)])
    out = dict(p)
    out["w_qkv"] = (p["w_qkv"] * qscale[None, :]).astype(jnp.bfloat16)
    out["b_qkv"] = p["b_qkv"] * qscale[None, :]
    for k in ("w_o", "w_fc", "w_proj"):
        out[k] = p[k].astype(jnp.bfloat16)
    return out


def _reference(x_lnd, layers_params, n_head):
    """Pure-JAX (f32) reference mirroring the PyTorch forward."""
    def ln(x, g, b):
        mu = jnp.mean(x, axis=-1, keepdims=True)
        var = jnp.mean((x - mu) ** 2, axis=-1, keepdims=True)
        return (x - mu) * jax.lax.rsqrt(var + 1e-5) * g[0] + b[0]

    L, N, D = x_lnd.shape
    hd = D // n_head
    x = x_lnd
    for p in layers_params:
        xn = ln(x, p["ln1_g"], p["ln1_b"])
        qkv = xn @ p["w_qkv"] + p["b_qkv"][0]
        q, k, v = qkv[..., :D], qkv[..., D:2 * D], qkv[..., 2 * D:]

        def split(t):  # (L, N, D) -> (N, H, L, hd)
            return jnp.transpose(t.reshape(L, N, n_head, hd), (1, 2, 0, 3))

        qh = split(q) / math.sqrt(hd)
        kh, vh = split(k), split(v)
        s = jnp.einsum("nhld,nhmd->nhlm", qh, kh)
        prob = jax.nn.softmax(s, axis=-1)
        o = jnp.einsum("nhlm,nhmd->nhld", prob, vh)
        o = jnp.transpose(o, (2, 0, 1, 3)).reshape(L, N, D)
        x = x + (o @ p["w_o"] + p["b_o"][0])

        xn2 = ln(x, p["ln2_g"], p["ln2_b"])
        h = xn2 @ p["w_fc"] + p["b_fc"][0]
        h = h * jax.nn.sigmoid(1.702 * h)
        x = x + (h @ p["w_proj"] + p["b_proj"][0])
    return x


if __name__ == "__main__":
    # small, lane-dense config: width=128 (multiple of 128), heads=4, 2 layers
    L, N, D, H, LAYERS = 8, 4, 128, 4, 2
    d_ff = 4 * D

    key = jax.random.PRNGKey(0)
    kx, kp = jax.random.split(key)
    x = jax.random.normal(kx, (L, N, D), jnp.float32)   # PyTorch (L, N, D) layout
    raw_params = [_init_params(k, D, d_ff) for k in jax.random.split(kp, LAYERS)]
    prepared = [prepare_layer_params(p, H) for p in raw_params]

    out = transformer_forward(x, prepared, n_head=H)
    out = jax.block_until_ready(out)

    ref = _reference(x, raw_params, n_head=H)
    assert out.shape == (L, N, D)
    # bf16 MXU operands + bf16 layer-boundary activations vs. an f32 reference
    max_err = float(jnp.max(jnp.abs(out - ref)))
    mean_err = float(jnp.mean(jnp.abs(out - ref)))
    assert max_err < 5e-2, max_err
    assert mean_err < 1e-2, mean_err

    print("KERNEL_OK")
</pallas_src>

<mosaic_0001>
module attributes {stable_mosaic.version = 11 : i64} {
  func.func @_block_kernel(%arg0: i32, %arg1: i32, %arg2: memref<4x8x128xbf16, #tpu.memory_space<vmem>>, %arg3: memref<1x128xf32, #tpu.memory_space<vmem>>, %arg4: memref<1x128xf32, #tpu.memory_space<vmem>>, %arg5: memref<128x384xbf16, #tpu.memory_space<vmem>>, %arg6: memref<1x384xf32, #tpu.memory_space<vmem>>, %arg7: memref<128x128xbf16, #tpu.memory_space<vmem>>, %arg8: memref<1x128xf32, #tpu.memory_space<vmem>>, %arg9: memref<1x128xf32, #tpu.memory_space<vmem>>, %arg10: memref<1x128xf32, #tpu.memory_space<vmem>>, %arg11: memref<128x512xbf16, #tpu.memory_space<vmem>>, %arg12: memref<1x512xf32, #tpu.memory_space<vmem>>, %arg13: memref<512x128xbf16, #tpu.memory_space<vmem>>, %arg14: memref<1x128xf32, #tpu.memory_space<vmem>>, %arg15: memref<4x8x128xbf16, #tpu.memory_space<vmem>>, %arg16: memref<32x128xf32, #tpu.memory_space<vmem>>, %arg17: memref<32x128xbf16, #tpu.memory_space<vmem>>, %arg18: memref<4x8x384xbf16, #tpu.memory_space<vmem>>, %arg19: memref<4x8x128xbf16, #tpu.memory_space<vmem>>, %arg20: memref<32x128xf32, #tpu.memory_space<vmem>>) attributes {dimension_semantics = [#tpu.dimension_semantics<parallel>, #tpu.dimension_semantics<arbitrary>], iteration_bounds = array<i64: 1, 1>, scalar_prefetch = 0 : i64, scratch_operands = 5 : i64, tpu.core_type = #tpu.core_type<tc>, window_params = [{transform_indices = @transform_0, window_bounds = array<i64: 4, 8, 128>}, {pipeline_mode = #tpu.pipeline_mode<synchronous>, transform_indices = @transform_1, window_bounds = array<i64: 1, 128>}, {pipeline_mode = #tpu.pipeline_mode<synchronous>, transform_indices = @transform_2, window_bounds = array<i64: 1, 128>}, {pipeline_mode = #tpu.pipeline_mode<synchronous>, transform_indices = @transform_3, window_bounds = array<i64: 128, 384>}, {pipeline_mode = #tpu.pipeline_mode<synchronous>, transform_indices = @transform_4, window_bounds = array<i64: 1, 384>}, {pipeline_mode = #tpu.pipeline_mode<synchronous>, transform_indices = @transform_5, window_bounds = array<i64: 128, 128>}, {pipeline_mode = #tpu.pipeline_mode<synchronous>, transform_indices = @transform_6, window_bounds = array<i64: 1, 128>}, {pipeline_mode = #tpu.pipeline_mode<synchronous>, transform_indices = @transform_7, window_bounds = array<i64: 1, 128>}, {pipeline_mode = #tpu.pipeline_mode<synchronous>, transform_indices = @transform_8, window_bounds = array<i64: 1, 128>}, {transform_indices = @transform_9, window_bounds = array<i64: 128, 512>}, {transform_indices = @transform_10, window_bounds = array<i64: 1, 512>}, {transform_indices = @transform_11, window_bounds = array<i64: 512, 128>}, {pipeline_mode = #tpu.pipeline_mode<synchronous>, transform_indices = @transform_12, window_bounds = array<i64: 1, 128>}, {transform_indices = @transform_13, window_bounds = array<i64: 4, 8, 128>}]} {
    %c0_i32 = arith.constant 0 : i32
    %0 = arith.cmpi eq, %arg1, %c0_i32 : i32
    %1 = arith.extui %0 : i1 to i32
    %c0_i32_0 = arith.constant 0 : i32
    %2 = arith.cmpi ne, %1, %c0_i32_0 : i32
    scf.if %2 {
      %c0_17 = arith.constant 0 : index
      %c0_18 = arith.constant 0 : index
      %c0_19 = arith.constant 0 : index
      %26 = vector.load %arg2[%c0_17, %c0_18, %c0_19] : memref<4x8x128xbf16, #tpu.memory_space<vmem>>, vector<4x8x128xbf16>
      %27 = arith.extf %26 : vector<4x8x128xbf16> to vector<4x8x128xf32>
      %28 = vector.shape_cast %27 : vector<4x8x128xf32> to vector<32x128xf32>
      %c0_20 = arith.constant 0 : index
      %c0_21 = arith.constant 0 : index
      %29 = vector.load %arg3[%c0_20, %c0_21] : memref<1x128xf32, #tpu.memory_space<vmem>>, vector<1x128xf32>
      %c0_22 = arith.constant 0 : index
      %c0_23 = arith.constant 0 : index
      %30 = vector.load %arg4[%c0_22, %c0_23] : memref<1x128xf32, #tpu.memory_space<vmem>>, vector<1x128xf32>
      %cst_24 = arith.constant dense<0.000000e+00> : vector<32xf32>
      %31 = vector.multi_reduction <add>, %28, %cst_24 [1] : vector<32x128xf32> to vector<32xf32>
      %32 = vector.shape_cast %31 : vector<32xf32> to vector<32x1xf32>
      %cst_25 = arith.constant 1.280000e+02 : f32
      %33 = vector.broadcast %cst_25 : f32 to vector<32x1xf32>
      %34 = arith.divf %32, %33 : vector<32x1xf32>
      %35 = vector.broadcast %34 : vector<32x1xf32> to vector<32x128xf32>
      %36 = arith.subf %28, %35 : vector<32x128xf32>
      %37 = arith.mulf %36, %36 : vector<32x128xf32>
      %cst_26 = arith.constant dense<0.000000e+00> : vector<32xf32>
      %38 = vector.multi_reduction <add>, %37, %cst_26 [1] : vector<32x128xf32> to vector<32xf32>
      %39 = vector.shape_cast %38 : vector<32xf32> to vector<32x1xf32>
      %cst_27 = arith.constant 1.280000e+02 : f32
      %40 = vector.broadcast %cst_27 : f32 to vector<32x1xf32>
      %41 = arith.divf %39, %40 : vector<32x1xf32>
      %42 = vector.broadcast %34 : vector<32x1xf32> to vector<32x128xf32>
      %43 = arith.subf %28, %42 : vector<32x128xf32>
      %cst_28 = arith.constant 9.99999974E-6 : f32
      %44 = vector.broadcast %cst_28 : f32 to vector<32x1xf32>
      %45 = arith.addf %41, %44 : vector<32x1xf32>
      %46 = math.rsqrt %45 : vector<32x1xf32>
      %47 = vector.broadcast %46 : vector<32x1xf32> to vector<32x128xf32>
      %48 = arith.mulf %43, %47 : vector<32x128xf32>
      %49 = vector.broadcast %29 : vector<1x128xf32> to vector<32x128xf32>
      %50 = arith.mulf %48, %49 : vector<32x128xf32>
      %51 = vector.broadcast %30 : vector<1x128xf32> to vector<32x128xf32>
      %52 = arith.addf %50, %51 : vector<32x128xf32>
      %53 = arith.truncf %52 : vector<32x128xf32> to vector<32x128xbf16>
      %c0_29 = arith.constant 0 : index
      %c0_30 = arith.constant 0 : index
      %54 = vector.load %arg5[%c0_29, %c0_30] : memref<128x384xbf16, #tpu.memory_space<vmem>>, vector<128x384xbf16>
      %cst_31 = arith.constant dense<0.000000e+00> : vector<32x384xf32>
      %55 = tpu.matmul %53, %54, %cst_31 {dimension_numbers = #tpu.dot_dimension_numbers<[1], [0], [0], [1], [0, 0, 1, 1], [], []>} : vector<32x128xbf16>, vector<128x384xbf16>, vector<32x384xf32> -> vector<32x384xf32>
      %c0_32 = arith.constant 0 : index
      %c0_33 = arith.constant 0 : index
      %56 = vector.load %arg6[%c0_32, %c0_33] : memref<1x384xf32, #tpu.memory_space<vmem>>, vector<1x384xf32>
      %57 = vector.broadcast %56 : vector<1x384xf32> to vector<32x384xf32>
      %58 = arith.addf %55, %57 : vector<32x384xf32>
      %59 = vector.shape_cast %58 : vector<32x384xf32> to vector<4x8x384xf32>
      %60 = arith.truncf %59 : vector<4x8x384xf32> to vector<4x8x384xbf16>
      %c0_34 = arith.constant 0 : index
      %c0_35 = arith.constant 0 : index
      %c0_36 = arith.constant 0 : index
      %61 = vector.load %arg18[%c0_34, %c0_35, %c0_36] : memref<4x8x384xbf16, #tpu.memory_space<vmem>>, vector<4x8x384xbf16>
      tpu.vector_store %arg18[%c0_34, %c0_35, %c0_36], %60 {strides = array<i32>} : memref<4x8x384xbf16, #tpu.memory_space<vmem>>, vector<4x8x384xbf16>,
      %c0_i32_37 = arith.constant 0 : i32
      %c128_i32 = arith.constant 128 : i32
      %62 = arith.muli %c0_i32_37, %c128_i32 : i32
      %63 = tpu.assume_multiple %62, 128 : i32
      %c128_i32_38 = arith.constant 128 : i32
      %64 = arith.muli %c0_i32_37, %c128_i32_38 : i32
      %c128_i32_39 = arith.constant 128 : i32
      %65 = arith.addi %c128_i32_39, %64 : i32
      %66 = tpu.assume_multiple %65, 128 : i32
      %c128_i32_40 = arith.constant 128 : i32
      %67 = arith.muli %c0_i32_37, %c128_i32_40 : i32
      %c256_i32 = arith.constant 256 : i32
      %68 = arith.addi %c256_i32, %67 : i32
      %69 = tpu.assume_multiple %68, 128 : i32
      %c0_41 = arith.constant 0 : index
      %c0_42 = arith.constant 0 : index
      %70 = arith.index_cast %63 : i32 to index
      %71 = vector.load %arg18[%c0_41, %c0_42, %70] : memref<4x8x384xbf16, #tpu.memory_space<vmem>>, vector<4x8x128xbf16>
      %c0_43 = arith.constant 0 : index
      %c0_44 = arith.constant 0 : index
      %72 = arith.index_cast %66 : i32 to index
      %73 = vector.load %arg18[%c0_43, %c0_44, %72] : memref<4x8x384xbf16, #tpu.memory_space<vmem>>, vector<4x8x128xbf16>
      %c0_45 = arith.constant 0 : index
      %c0_46 = arith.constant 0 : index
      %74 = arith.index_cast %69 : i32 to index
      %75 = vector.load %arg18[%c0_45, %c0_46, %74] : memref<4x8x384xbf16, #tpu.memory_space<vmem>>, vector<4x8x128xbf16>
      %76 = vector.extract_strided_slice %71 {offsets = [0, 0, 0], sizes = [4, 8, 32], strides = [1, 1, 1]} : vector<4x8x128xbf16> to vector<4x8x32xbf16>
      %77 = vector.extract_strided_slice %73 {offsets = [0, 0, 0], sizes = [4, 8, 32], strides = [1, 1, 1]} : vector<4x8x128xbf16> to vector<4x8x32xbf16>
      %78 = vector.extract_strided_slice %75 {offsets = [0, 0, 0], sizes = [4, 8, 32], strides = [1, 1, 1]} : vector<4x8x128xbf16> to vector<4x8x32xbf16>
      "tpu.trace_start"() <{level = 10 : i32, message = "bqd,bkd->bqk"}> : () -> ()
      %cst_47 = arith.constant dense<0.000000e+00> : vector<4x8x8xf32>
      %79 = tpu.matmul %76, %77, %cst_47 {dimension_numbers = #tpu.dot_dimension_numbers<[2], [2], [1], [1], [0, 0, 0, 1, 1, 1], [0], [0]>} : vector<4x8x32xbf16>, vector<4x8x32xbf16>, vector<4x8x8xf32> -> vector<4x8x8xf32>
      "tpu.trace_stop"() : () -> ()
      %cst_48 = arith.constant dense<0xFF800000> : vector<4x8xf32>
      %80 = vector.multi_reduction <maximumf>, %79, %cst_48 [2] : vector<4x8x8xf32> to vector<4x8xf32>
      %81 = vector.shape_cast %80 : vector<4x8xf32> to vector<4x8x1xf32>
      %82 = vector.broadcast %81 : vector<4x8x1xf32> to vector<4x8x8xf32>
      %83 = arith.subf %79, %82 : vector<4x8x8xf32>
      %84 = math.exp %83 : vector<4x8x8xf32>
      %cst_49 = arith.constant dense<0.000000e+00> : vector<4x8xf32>
      %85 = vector.multi_reduction <add>, %84, %cst_49 [2] : vector<4x8x8xf32> to vector<4x8xf32>
      %86 = vector.shape_cast %85 : vector<4x8xf32> to vector<4x8x1xf32>
      %87 = tpu.reciprocal %86 {approx = true} : vector<4x8x1xf32> -> vector<4x8x1xf32>
      %88 = vector.broadcast %87 : vector<4x8x1xf32> to vector<4x8x8xf32>
      %89 = arith.mulf %84, %88 : vector<4x8x8xf32>
      %90 = arith.truncf %89 : vector<4x8x8xf32> to vector<4x8x8xbf16>
      "tpu.trace_start"() <{level = 10 : i32, message = "bqk,bkd->bqd"}> : () -> ()
      %cst_50 = arith.constant dense<0.000000e+00> : vector<4x8x32xf32>
      %91 = tpu.matmul %90, %78, %cst_50 {dimension_numbers = #tpu.dot_dimension_numbers<[2], [1], [1], [2], [0, 0, 0, 1, 1, 2], [0], [0]>} : vector<4x8x8xbf16>, vector<4x8x32xbf16>, vector<4x8x32xf32> -> vector<4x8x32xf32>
      "tpu.trace_stop"() : () -> ()
      %92 = arith.truncf %91 : vector<4x8x32xf32> to vector<4x8x32xbf16>
      %93 = vector.extract_strided_slice %71 {offsets = [0, 0, 32], sizes = [4, 8, 32], strides = [1, 1, 1]} : vector<4x8x128xbf16> to vector<4x8x32xbf16>
      %94 = vector.extract_strided_slice %73 {offsets = [0, 0, 32], sizes = [4, 8, 32], strides = [1, 1, 1]} : vector<4x8x128xbf16> to vector<4x8x32xbf16>
      %95 = vector.extract_strided_slice %75 {offsets = [0, 0, 32], sizes = [4, 8, 32], strides = [1, 1, 1]} : vector<4x8x128xbf16> to vector<4x8x32xbf16>
      "tpu.trace_start"() <{level = 10 : i32, message = "bqd,bkd->bqk"}> : () -> ()
      %cst_51 = arith.constant dense<0.000000e+00> : vector<4x8x8xf32>
      %96 = tpu.matmul %93, %94, %cst_51 {dimension_numbers = #tpu.dot_dimension_numbers<[2], [2], [1], [1], [0, 0, 0, 1, 1, 1], [0], [0]>} : vector<4x8x32xbf16>, vector<4x8x32xbf16>, vector<4x8x8xf32> -> vector<4x8x8xf32>
      "tpu.trace_stop"() : () -> ()
      %cst_52 = arith.constant dense<0xFF800000> : vector<4x8xf32>
      %97 = vector.multi_reduction <maximumf>, %96, %cst_52 [2] : vector<4x8x8xf32> to vector<4x8xf32>
      %98 = vector.shape_cast %97 : vector<4x8xf32> to vector<4x8x1xf32>
      %99 = vector.broadcast %98 : vector<4x8x1xf32> to vector<4x8x8xf32>
      %100 = arith.subf %96, %99 : vector<4x8x8xf32>
      %101 = math.exp %100 : vector<4x8x8xf32>
      %cst_53 = arith.constant dense<0.000000e+00> : vector<4x8xf32>
      %102 = vector.multi_reduction <add>, %101, %cst_53 [2] : vector<4x8x8xf32> to vector<4x8xf32>
      %103 = vector.shape_cast %102 : vector<4x8xf32> to vector<4x8x1xf32>
      %104 = tpu.reciprocal %103 {approx = true} : vector<4x8x1xf32> -> vector<4x8x1xf32>
      %105 = vector.broadcast %104 : vector<4x8x1xf32> to vector<4x8x8xf32>
      %106 = arith.mulf %101, %105 : vector<4x8x8xf32>
      %107 = arith.truncf %106 : vector<4x8x8xf32> to vector<4x8x8xbf16>
      "tpu.trace_start"() <{level = 10 : i32, message = "bqk,bkd->bqd"}> : () -> ()
      %cst_54 = arith.constant dense<0.000000e+00> : vector<4x8x32xf32>
      %108 = tpu.matmul %107, %95, %cst_54 {dimension_numbers = #tpu.dot_dimension_numbers<[2], [1], [1], [2], [0, 0, 0, 1, 1, 2], [0], [0]>} : vector<4x8x8xbf16>, vector<4x8x32xbf16>, vector<4x8x32xf32> -> vector<4x8x32xf32>
      "tpu.trace_stop"() : () -> ()
      %109 = arith.truncf %108 : vector<4x8x32xf32> to vector<4x8x32xbf16>
      %110 = vector.extract_strided_slice %71 {offsets = [0, 0, 64], sizes = [4, 8, 32], strides = [1, 1, 1]} : vector<4x8x128xbf16> to vector<4x8x32xbf16>
      %111 = vector.extract_strided_slice %73 {offsets = [0, 0, 64], sizes = [4, 8, 32], strides = [1, 1, 1]} : vector<4x8x128xbf16> to vector<4x8x32xbf16>
      %112 = vector.extract_strided_slice %75 {offsets = [0, 0, 64], sizes = [4, 8, 32], strides = [1, 1, 1]} : vector<4x8x128xbf16> to vector<4x8x32xbf16>
      "tpu.trace_start"() <{level = 10 : i32, message = "bqd,bkd->bqk"}> : () -> ()
      %cst_55 = arith.constant dense<0.000000e+00> : vector<4x8x8xf32>
      %113 = tpu.matmul %110, %111, %cst_55 {dimension_numbers = #tpu.dot_dimension_numbers<[2], [2], [1], [1], [0, 0, 0, 1, 1, 1], [0], [0]>} : vector<4x8x32xbf16>, vector<4x8x32xbf16>, vector<4x8x8xf32> -> vector<4x8x8xf32>
      "tpu.trace_stop"() : () -> ()
      %cst_56 = arith.constant dense<0xFF800000> : vector<4x8xf32>
      %114 = vector.multi_reduction <maximumf>, %113, %cst_56 [2] : vector<4x8x8xf32> to vector<4x8xf32>
      %115 = vector.shape_cast %114 : vector<4x8xf32> to vector<4x8x1xf32>
      %116 = vector.broadcast %115 : vector<4x8x1xf32> to vector<4x8x8xf32>
      %117 = arith.subf %113, %116 : vector<4x8x8xf32>
      %118 = math.exp %117 : vector<4x8x8xf32>
      %cst_57 = arith.constant dense<0.000000e+00> : vector<4x8xf32>
      %119 = vector.multi_reduction <add>, %118, %cst_57 [2] : vector<4x8x8xf32> to vector<4x8xf32>
      %120 = vector.shape_cast %119 : vector<4x8xf32> to vector<4x8x1xf32>
      %121 = tpu.reciprocal %120 {approx = true} : vector<4x8x1xf32> -> vector<4x8x1xf32>
      %122 = vector.broadcast %121 : vector<4x8x1xf32> to vector<4x8x8xf32>
      %123 = arith.mulf %118, %122 : vector<4x8x8xf32>
      %124 = arith.truncf %123 : vector<4x8x8xf32> to vector<4x8x8xbf16>
      "tpu.trace_start"() <{level = 10 : i32, message = "bqk,bkd->bqd"}> : () -> ()
      %cst_58 = arith.constant dense<0.000000e+00> : vector<4x8x32xf32>
      %125 = tpu.matmul %124, %112, %cst_58 {dimension_numbers = #tpu.dot_dimension_numbers<[2], [1], [1], [2], [0, 0, 0, 1, 1, 2], [0], [0]>} : vector<4x8x8xbf16>, vector<4x8x32xbf16>, vector<4x8x32xf32> -> vector<4x8x32xf32>
      "tpu.trace_stop"() : () -> ()
      %126 = arith.truncf %125 : vector<4x8x32xf32> to vector<4x8x32xbf16>
      %127 = vector.extract_strided_slice %71 {offsets = [0, 0, 96], sizes = [4, 8, 32], strides = [1, 1, 1]} : vector<4x8x128xbf16> to vector<4x8x32xbf16>
      %128 = vector.extract_strided_slice %73 {offsets = [0, 0, 96], sizes = [4, 8, 32], strides = [1, 1, 1]} : vector<4x8x128xbf16> to vector<4x8x32xbf16>
      %129 = vector.extract_strided_slice %75 {offsets = [0, 0, 96], sizes = [4, 8, 32], strides = [1, 1, 1]} : vector<4x8x128xbf16> to vector<4x8x32xbf16>
      "tpu.trace_start"() <{level = 10 : i32, message = "bqd,bkd->bqk"}> : () -> ()
      %cst_59 = arith.constant dense<0.000000e+00> : vector<4x8x8xf32>
      %130 = tpu.matmul %127, %128, %cst_59 {dimension_numbers = #tpu.dot_dimension_numbers<[2], [2], [1], [1], [0, 0, 0, 1, 1, 1], [0], [0]>} : vector<4x8x32xbf16>, vector<4x8x32xbf16>, vector<4x8x8xf32> -> vector<4x8x8xf32>
      "tpu.trace_stop"() : () -> ()
      %cst_60 = arith.constant dense<0xFF800000> : vector<4x8xf32>
      %131 = vector.multi_reduction <maximumf>, %130, %cst_60 [2] : vector<4x8x8xf32> to vector<4x8xf32>
      %132 = vector.shape_cast %131 : vector<4x8xf32> to vector<4x8x1xf32>
      %133 = vector.broadcast %132 : vector<4x8x1xf32> to vector<4x8x8xf32>
      %134 = arith.subf %130, %133 : vector<4x8x8xf32>
      %135 = math.exp %134 : vector<4x8x8xf32>
      %cst_61 = arith.constant dense<0.000000e+00> : vector<4x8xf32>
      %136 = vector.multi_reduction <add>, %135, %cst_61 [2] : vector<4x8x8xf32> to vector<4x8xf32>
      %137 = vector.shape_cast %136 : vector<4x8xf32> to vector<4x8x1xf32>
      %138 = tpu.reciprocal %137 {approx = true} : vector<4x8x1xf32> -> vector<4x8x1xf32>
      %139 = vector.broadcast %138 : vector<4x8x1xf32> to vector<4x8x8xf32>
      %140 = arith.mulf %135, %139 : vector<4x8x8xf32>
      %141 = arith.truncf %140 : vector<4x8x8xf32> to vector<4x8x8xbf16>
      "tpu.trace_start"() <{level = 10 : i32, message = "bqk,bkd->bqd"}> : () -> ()
      %cst_62 = arith.constant dense<0.000000e+00> : vector<4x8x32xf32>
      %142 = tpu.matmul %141, %129, %cst_62 {dimension_numbers = #tpu.dot_dimension_numbers<[2], [1], [1], [2], [0, 0, 0, 1, 1, 2], [0], [0]>} : vector<4x8x8xbf16>, vector<4x8x32xbf16>, vector<4x8x32xf32> -> vector<4x8x32xf32>
      "tpu.trace_stop"() : () -> ()
      %143 = arith.truncf %142 : vector<4x8x32xf32> to vector<4x8x32xbf16>
      %144 = tpu.concatenate %92, %109, %126, %143 in 2 : vector<4x8x32xbf16>, vector<4x8x32xbf16>, vector<4x8x32xbf16>, vector<4x8x32xbf16> -> vector<4x8x128xbf16>
      %c0_63 = arith.constant 0 : index
      %c0_64 = arith.constant 0 : index
      %145 = arith.index_cast %63 : i32 to index
      %146 = vector.load %arg19[%c0_63, %c0_64, %145] : memref<4x8x128xbf16, #tpu.memory_space<vmem>>, vector<4x8x128xbf16>
      tpu.vector_store %arg19[%c0_63, %c0_64, %145], %144 {strides = array<i32>} : memref<4x8x128xbf16, #tpu.memory_space<vmem>>, vector<4x8x128xbf16>,
      %c1_i32 = arith.constant 1 : i32
      %c0_65 = arith.constant 0 : index
      %c0_66 = arith.constant 0 : index
      %c0_67 = arith.constant 0 : index
      %147 = vector.load %arg19[%c0_65, %c0_66, %c0_67] : memref<4x8x128xbf16, #tpu.memory_space<vmem>>, vector<4x8x128xbf16>
      %148 = vector.shape_cast %147 : vector<4x8x128xbf16> to vector<32x128xbf16>
      %c0_68 = arith.constant 0 : index
      %c0_69 = arith.constant 0 : index
      %149 = vector.load %arg7[%c0_68, %c0_69] : memref<128x128xbf16, #tpu.memory_space<vmem>>, vector<128x128xbf16>
      %cst_70 = arith.constant dense<0.000000e+00> : vector<32x128xf32>
      %150 = tpu.matmul %148, %149, %cst_70 {dimension_numbers = #tpu.dot_dimension_numbers<[1], [0], [0], [1], [0, 0, 1, 1], [], []>} : vector<32x128xbf16>, vector<128x128xbf16>, vector<32x128xf32> -> vector<32x128xf32>
      %c0_71 = arith.constant 0 : index
      %c0_72 = arith.constant 0 : index
      %151 = vector.load %arg8[%c0_71, %c0_72] : memref<1x128xf32, #tpu.memory_space<vmem>>, vector<1x128xf32>
      %152 = vector.broadcast %151 : vector<1x128xf32> to vector<32x128xf32>
      %153 = arith.addf %150, %152 : vector<32x128xf32>
      %154 = arith.addf %28, %153 : vector<32x128xf32>
      %c0_73 = arith.constant 0 : index
      %c0_74 = arith.constant 0 : index
      %155 = vector.load %arg16[%c0_73, %c0_74] : memref<32x128xf32, #tpu.memory_space<vmem>>, vector<32x128xf32>
      tpu.vector_store %arg16[%c0_73, %c0_74], %154 {strides = array<i32>} : memref<32x128xf32, #tpu.memory_space<vmem>>, vector<32x128xf32>,
      %c0_75 = arith.constant 0 : index
      %c0_76 = arith.constant 0 : index
      %156 = vector.load %arg9[%c0_75, %c0_76] : memref<1x128xf32, #tpu.memory_space<vmem>>, vector<1x128xf32>
      %c0_77 = arith.constant 0 : index
      %c0_78 = arith.constant 0 : index
      %157 = vector.load %arg10[%c0_77, %c0_78] : memref<1x128xf32, #tpu.memory_space<vmem>>, vector<1x128xf32>
      %cst_79 = arith.constant dense<0.000000e+00> : vector<32xf32>
      %158 = vector.multi_reduction <add>, %154, %cst_79 [1] : vector<32x128xf32> to vector<32xf32>
      %159 = vector.shape_cast %158 : vector<32xf32> to vector<32x1xf32>
      %cst_80 = arith.constant 1.280000e+02 : f32
      %160 = vector.broadcast %cst_80 : f32 to vector<32x1xf32>
      %161 = arith.divf %159, %160 : vector<32x1xf32>
      %162 = vector.broadcast %161 : vector<32x1xf32> to vector<32x128xf32>
      %163 = arith.subf %154, %162 : vector<32x128xf32>
      %164 = arith.mulf %163, %163 : vector<32x128xf32>
      %cst_81 = arith.constant dense<0.000000e+00> : vector<32xf32>
      %165 = vector.multi_reduction <add>, %164, %cst_81 [1] : vector<32x128xf32> to vector<32xf32>
      %166 = vector.shape_cast %165 : vector<32xf32> to vector<32x1xf32>
      %cst_82 = arith.constant 1.280000e+02 : f32
      %167 = vector.broadcast %cst_82 : f32 to vector<32x1xf32>
      %168 = arith.divf %166, %167 : vector<32x1xf32>
      %169 = vector.broadcast %161 : vector<32x1xf32> to vector<32x128xf32>
      %170 = arith.subf %154, %169 : vector<32x128xf32>
      %cst_83 = arith.constant 9.99999974E-6 : f32
      %171 = vector.broadcast %cst_83 : f32 to vector<32x1xf32>
      %172 = arith.addf %168, %171 : vector<32x1xf32>
      %173 = math.rsqrt %172 : vector<32x1xf32>
      %174 = vector.broadcast %173 : vector<32x1xf32> to vector<32x128xf32>
      %175 = arith.mulf %170, %174 : vector<32x128xf32>
      %176 = vector.broadcast %156 : vector<1x128xf32> to vector<32x128xf32>
      %177 = arith.mulf %175, %176 : vector<32x128xf32>
      %178 = vector.broadcast %157 : vector<1x128xf32> to vector<32x128xf32>
      %179 = arith.addf %177, %178 : vector<32x128xf32>
      %180 = arith.truncf %179 : vector<32x128xf32> to vector<32x128xbf16>
      %c0_84 = arith.constant 0 : index
      %c0_85 = arith.constant 0 : index
      %181 = vector.load %arg17[%c0_84, %c0_85] : memref<32x128xbf16, #tpu.memory_space<vmem>>, vector<32x128xbf16>
      tpu.vector_store %arg17[%c0_84, %c0_85], %180 {strides = array<i32>} : memref<32x128xbf16, #tpu.memory_space<vmem>>, vector<32x128xbf16>,
      %cst_86 = arith.constant 0.000000e+00 : f32
      %182 = vector.broadcast %cst_86 : f32 to vector<32x128xf32>
      %c0_87 = arith.constant 0 : index
      %c0_88 = arith.constant 0 : index
      %183 = vector.load %arg20[%c0_87, %c0_88] : memref<32x128xf32, #tpu.memory_space<vmem>>, vector<32x128xf32>
      tpu.vector_store %arg20[%c0_87, %c0_88], %182 {strides = array<i32>} : memref<32x128xf32, #tpu.memory_space<vmem>>, vector<32x128xf32>,
    } else {
    }
    %c0 = arith.constant 0 : index
    %c0_1 = arith.constant 0 : index
    %3 = vector.load %arg17[%c0, %c0_1] : memref<32x128xbf16, #tpu.memory_space<vmem>>, vector<32x128xbf16>
    %c0_2 = arith.constant 0 : index
    %c0_3 = arith.constant 0 : index
    %4 = vector.load %arg11[%c0_2, %c0_3] : memref<128x512xbf16, #tpu.memory_space<vmem>>, vector<128x512xbf16>
    %cst = arith.constant dense<0.000000e+00> : vector<32x512xf32>
    %5 = tpu.matmul %3, %4, %cst {dimension_numbers = #tpu.dot_dimension_numbers<[1], [0], [0], [1], [0, 0, 1, 1], [], []>} : vector<32x128xbf16>, vector<128x512xbf16>, vector<32x512xf32> -> vector<32x512xf32>
    %c0_4 = arith.constant 0 : index
    %c0_5 = arith.constant 0 : index
    %6 = vector.load %arg12[%c0_4, %c0_5] : memref<1x512xf32, #tpu.memory_space<vmem>>, vector<1x512xf32>
    %7 = vector.broadcast %6 : vector<1x512xf32> to vector<32x512xf32>
    %8 = arith.addf %5, %7 : vector<32x512xf32>
    %cst_6 = arith.constant 1.702000e+00 : f32
    %9 = vector.broadcast %cst_6 : f32 to vector<32x512xf32>
    %10 = arith.mulf %9, %8 : vector<32x512xf32>
    %11 = arith.negf %10 : vector<32x512xf32>
    %12 = math.exp %11 : vector<32x512xf32>
    %cst_7 = arith.constant 1.000000e+00 : f32
    %13 = vector.broadcast %cst_7 : f32 to vector<32x512xf32>
    %14 = arith.addf %13, %12 : vector<32x512xf32>
    %15 = arith.divf %13, %14 : vector<32x512xf32>
    %16 = arith.mulf %8, %15 : vector<32x512xf32>
    %c0_8 = arith.constant 0 : index
    %c0_9 = arith.constant 0 : index
    %17 = vector.load %arg20[%c0_8, %c0_9] : memref<32x128xf32, #tpu.memory_space<vmem>>, vector<32x128xf32>
    %18 = arith.truncf %16 : vector<32x512xf32> to vector<32x512xbf16>
    %c0_10 = arith.constant 0 : index
    %c0_11 = arith.constant 0 : index
    %19 = vector.load %arg13[%c0_10, %c0_11] : memref<512x128xbf16, #tpu.memory_space<vmem>>, vector<512x128xbf16>
    %cst_12 = arith.constant dense<0.000000e+00> : vector<32x128xf32>
    %20 = tpu.matmul %18, %19, %cst_12 {dimension_numbers = #tpu.dot_dimension_numbers<[1], [0], [0], [1], [0, 0, 1, 1], [], []>} : vector<32x512xbf16>, vector<512x128xbf16>, vector<32x128xf32> -> vector<32x128xf32>
    %21 = arith.addf %17, %20 : vector<32x128xf32>
    %c0_13 = arith.constant 0 : index
    %c0_14 = arith.constant 0 : index
    %22 = vector.load %arg20[%c0_13, %c0_14] : memref<32x128xf32, #tpu.memory_space<vmem>>, vector<32x128xf32>
    tpu.vector_store %arg20[%c0_13, %c0_14], %21 {strides = array<i32>} : memref<32x128xf32, #tpu.memory_space<vmem>>, vector<32x128xf32>,
    %c0_i32_15 = arith.constant 0 : i32
    %23 = arith.cmpi eq, %arg1, %c0_i32_15 : i32
    %24 = arith.extui %23 : i1 to i32
    %c0_i32_16 = arith.constant 0 : i32
    %25 = arith.cmpi ne, %24, %c0_i32_16 : i32
    scf.if %25 {
      %c0_17 = arith.constant 0 : index
      %c0_18 = arith.constant 0 : index
      %26 = vector.load %arg16[%c0_17, %c0_18] : memref<32x128xf32, #tpu.memory_space<vmem>>, vector<32x128xf32>
      %c0_19 = arith.constant 0 : index
      %c0_20 = arith.constant 0 : index
      %27 = vector.load %arg20[%c0_19, %c0_20] : memref<32x128xf32, #tpu.memory_space<vmem>>, vector<32x128xf32>
      %28 = arith.addf %26, %27 : vector<32x128xf32>
      %c0_21 = arith.constant 0 : index
      %c0_22 = arith.constant 0 : index
      %29 = vector.load %arg14[%c0_21, %c0_22] : memref<1x128xf32, #tpu.memory_space<vmem>>, vector<1x128xf32>
      %30 = vector.broadcast %29 : vector<1x128xf32> to vector<32x128xf32>
      %31 = arith.addf %28, %30 : vector<32x128xf32>
      %32 = vector.shape_cast %31 : vector<32x128xf32> to vector<4x8x128xf32>
      %33 = arith.truncf %32 : vector<4x8x128xf32> to vector<4x8x128xbf16>
      %c0_23 = arith.constant 0 : index
      %c0_24 = arith.constant 0 : index
      %c0_25 = arith.constant 0 : index
      %34 = vector.load %arg15[%c0_23, %c0_24, %c0_25] : memref<4x8x128xbf16, #tpu.memory_space<vmem>>, vector<4x8x128xbf16>
      tpu.vector_store %arg15[%c0_23, %c0_24, %c0_25], %33 {strides = array<i32>} : memref<4x8x128xbf16, #tpu.memory_space<vmem>>, vector<4x8x128xbf16>,
    } else {
    }
    return
  }
  func.func @transform_0(%arg0: i32, %arg1: i32) -> (i32, i32, i32) {
    %c0_i32 = arith.constant 0 : i32
    %c0_i32_0 = arith.constant 0 : i32
    %c0_i32_1 = arith.constant 0 : i32
    return %arg0, %c0_i32, %c0_i32_0 : i32, i32, i32
  }
  func.func @transform_1(%arg0: i32, %arg1: i32) -> (i32, i32) {
    %c0_i32 = arith.constant 0 : i32
    %c0_i32_0 = arith.constant 0 : i32
    %c0_i32_1 = arith.constant 0 : i32
    return %c0_i32, %c0_i32_0 : i32, i32
  }
  func.func @transform_2(%arg0: i32, %arg1: i32) -> (i32, i32) {
    %c0_i32 = arith.constant 0 : i32
    %c0_i32_0 = arith.constant 0 : i32
    %c0_i32_1 = arith.constant 0 : i32
    return %c0_i32, %c0_i32_0 : i32, i32
  }
  func.func @transform_3(%arg0: i32, %arg1: i32) -> (i32, i32) {
    %c0_i32 = arith.constant 0 : i32
    %c0_i32_0 = arith.constant 0 : i32
    %c0_i32_1 = arith.constant 0 : i32
    return %c0_i32, %c0_i32_0 : i32, i32
  }
  func.func @transform_4(%arg0: i32, %arg1: i32) -> (i32, i32) {
    %c0_i32 = arith.constant 0 : i32
    %c0_i32_0 = arith.constant 0 : i32
    %c0_i32_1 = arith.constant 0 : i32
    return %c0_i32, %c0_i32_0 : i32, i32
  }
  func.func @transform_5(%arg0: i32, %arg1: i32) -> (i32, i32) {
    %c0_i32 = arith.constant 0 : i32
    %c0_i32_0 = arith.constant 0 : i32
    %c0_i32_1 = arith.constant 0 : i32
    return %c0_i32, %c0_i32_0 : i32, i32
  }
  func.func @transform_6(%arg0: i32, %arg1: i32) -> (i32, i32) {
    %c0_i32 = arith.constant 0 : i32
    %c0_i32_0 = arith.constant 0 : i32
    %c0_i32_1 = arith.constant 0 : i32
    return %c0_i32, %c0_i32_0 : i32, i32
  }
  func.func @transform_7(%arg0: i32, %arg1: i32) -> (i32, i32) {
    %c0_i32 = arith.constant 0 : i32
    %c0_i32_0 = arith.constant 0 : i32
    %c0_i32_1 = arith.constant 0 : i32
    return %c0_i32, %c0_i32_0 : i32, i32
  }
  func.func @transform_8(%arg0: i32, %arg1: i32) -> (i32, i32) {
    %c0_i32 = arith.constant 0 : i32
    %c0_i32_0 = arith.constant 0 : i32
    %c0_i32_1 = arith.constant 0 : i32
    return %c0_i32, %c0_i32_0 : i32, i32
  }
  func.func @transform_9(%arg0: i32, %arg1: i32) -> (i32, i32) {
    %c0_i32 = arith.constant 0 : i32
    %c0_i32_0 = arith.constant 0 : i32
    return %c0_i32, %arg1 : i32, i32
  }
  func.func @transform_10(%arg0: i32, %arg1: i32) -> (i32, i32) {
    %c0_i32 = arith.constant 0 : i32
    %c0_i32_0 = arith.constant 0 : i32
    return %c0_i32, %arg1 : i32, i32
  }
  func.func @transform_11(%arg0: i32, %arg1: i32) -> (i32, i32) {
    %c0_i32 = arith.constant 0 : i32
    %c0_i32_0 = arith.constant 0 : i32
    return %arg1, %c0_i32 : i32, i32
  }
  func.func @transform_12(%arg0: i32, %arg1: i32) -> (i32, i32) {
    %c0_i32 = arith.constant 0 : i32
    %c0_i32_0 = arith.constant 0 : i32
    %c0_i32_1 = arith.constant 0 : i32
    return %c0_i32, %c0_i32_0 : i32, i32
  }
  func.func @transform_13(%arg0: i32, %arg1: i32) -> (i32, i32, i32) {
    %c0_i32 = arith.constant 0 : i32
    %c0_i32_0 = arith.constant 0 : i32
    %c0_i32_1 = arith.constant 0 : i32
    return %arg0, %c0_i32, %c0_i32_0 : i32, i32, i32
  }
}

module attributes {stable_mosaic.version = 11 : i64} {
  func.func @_block_kernel(%arg0: i32, %arg1: i32, %arg2: memref<4x8x128xbf16, #tpu.memory_space<vmem>>, %arg3: memref<1x128xf32, #tpu.memory_space<vmem>>, %arg4: memref<1x128xf32, #tpu.memory_space<vmem>>, %arg5: memref<128x384xbf16, #tpu.memory_space<vmem>>, %arg6: memref<1x384xf32, #tpu.memory_space<vmem>>, %arg7: memref<128x128xbf16, #tpu.memory_space<vmem>>, %arg8: memref<1x128xf32, #tpu.memory_space<vmem>>, %arg9: memref<1x128xf32, #tpu.memory_space<vmem>>, %arg10: memref<1x128xf32, #tpu.memory_space<vmem>>, %arg11: memref<128x512xbf16, #tpu.memory_space<vmem>>, %arg12: memref<1x512xf32, #tpu.memory_space<vmem>>, %arg13: memref<512x128xbf16, #tpu.memory_space<vmem>>, %arg14: memref<1x128xf32, #tpu.memory_space<vmem>>, %arg15: memref<4x8x128xbf16, #tpu.memory_space<vmem>>, %arg16: memref<32x128xf32, #tpu.memory_space<vmem>>, %arg17: memref<32x128xbf16, #tpu.memory_space<vmem>>, %arg18: memref<4x8x384xbf16, #tpu.memory_space<vmem>>, %arg19: memref<4x8x128xbf16, #tpu.memory_space<vmem>>, %arg20: memref<32x128xf32, #tpu.memory_space<vmem>>) attributes {dimension_semantics = [#tpu.dimension_semantics<parallel>, #tpu.dimension_semantics<arbitrary>], iteration_bounds = array<i64: 1, 1>, scalar_prefetch = 0 : i64, scratch_operands = 5 : i64, tpu.core_type = #tpu.core_type<tc>, window_params = [{transform_indices = @transform_0, window_bounds = array<i64: 4, 8, 128>}, {pipeline_mode = #tpu.pipeline_mode<synchronous>, transform_indices = @transform_1, window_bounds = array<i64: 1, 128>}, {pipeline_mode = #tpu.pipeline_mode<synchronous>, transform_indices = @transform_2, window_bounds = array<i64: 1, 128>}, {pipeline_mode = #tpu.pipeline_mode<synchronous>, transform_indices = @transform_3, window_bounds = array<i64: 128, 384>}, {pipeline_mode = #tpu.pipeline_mode<synchronous>, transform_indices = @transform_4, window_bounds = array<i64: 1, 384>}, {pipeline_mode = #tpu.pipeline_mode<synchronous>, transform_indices = @transform_5, window_bounds = array<i64: 128, 128>}, {pipeline_mode = #tpu.pipeline_mode<synchronous>, transform_indices = @transform_6, window_bounds = array<i64: 1, 128>}, {pipeline_mode = #tpu.pipeline_mode<synchronous>, transform_indices = @transform_7, window_bounds = array<i64: 1, 128>}, {pipeline_mode = #tpu.pipeline_mode<synchronous>, transform_indices = @transform_8, window_bounds = array<i64: 1, 128>}, {transform_indices = @transform_9, window_bounds = array<i64: 128, 512>}, {transform_indices = @transform_10, window_bounds = array<i64: 1, 512>}, {transform_indices = @transform_11, window_bounds = array<i64: 512, 128>}, {pipeline_mode = #tpu.pipeline_mode<synchronous>, transform_indices = @transform_12, window_bounds = array<i64: 1, 128>}, {transform_indices = @transform_13, window_bounds = array<i64: 4, 8, 128>}]} {
    %c0_i32 = arith.constant 0 : i32
    %0 = arith.cmpi eq, %arg1, %c0_i32 : i32
    %1 = arith.extui %0 : i1 to i32
    %c0_i32_0 = arith.constant 0 : i32
    %2 = arith.cmpi ne, %1, %c0_i32_0 : i32
    scf.if %2 {
      %c0_17 = arith.constant 0 : index
      %c0_18 = arith.constant 0 : index
      %c0_19 = arith.constant 0 : index
      %26 = vector.load %arg2[%c0_17, %c0_18, %c0_19] : memref<4x8x128xbf16, #tpu.memory_space<vmem>>, vector<4x8x128xbf16>
      %27 = arith.extf %26 : vector<4x8x128xbf16> to vector<4x8x128xf32>
      %28 = vector.shape_cast %27 : vector<4x8x128xf32> to vector<32x128xf32>
      %c0_20 = arith.constant 0 : index
      %c0_21 = arith.constant 0 : index
      %29 = vector.load %arg3[%c0_20, %c0_21] : memref<1x128xf32, #tpu.memory_space<vmem>>, vector<1x128xf32>
      %c0_22 = arith.constant 0 : index
      %c0_23 = arith.constant 0 : index
      %30 = vector.load %arg4[%c0_22, %c0_23] : memref<1x128xf32, #tpu.memory_space<vmem>>, vector<1x128xf32>
      %cst_24 = arith.constant dense<0.000000e+00> : vector<32xf32>
      %31 = vector.multi_reduction <add>, %28, %cst_24 [1] : vector<32x128xf32> to vector<32xf32>
      %32 = vector.shape_cast %31 : vector<32xf32> to vector<32x1xf32>
      %cst_25 = arith.constant 1.280000e+02 : f32
      %33 = vector.broadcast %cst_25 : f32 to vector<32x1xf32>
      %34 = arith.divf %32, %33 : vector<32x1xf32>
      %35 = vector.broadcast %34 : vector<32x1xf32> to vector<32x128xf32>
      %36 = arith.subf %28, %35 : vector<32x128xf32>
      %37 = arith.mulf %36, %36 : vector<32x128xf32>
      %cst_26 = arith.constant dense<0.000000e+00> : vector<32xf32>
      %38 = vector.multi_reduction <add>, %37, %cst_26 [1] : vector<32x128xf32> to vector<32xf32>
      %39 = vector.shape_cast %38 : vector<32xf32> to vector<32x1xf32>
      %cst_27 = arith.constant 1.280000e+02 : f32
      %40 = vector.broadcast %cst_27 : f32 to vector<32x1xf32>
      %41 = arith.divf %39, %40 : vector<32x1xf32>
      %42 = vector.broadcast %34 : vector<32x1xf32> to vector<32x128xf32>
      %43 = arith.subf %28, %42 : vector<32x128xf32>
      %cst_28 = arith.constant 9.99999974E-6 : f32
      %44 = vector.broadcast %cst_28 : f32 to vector<32x1xf32>
      %45 = arith.addf %41, %44 : vector<32x1xf32>
      %46 = math.rsqrt %45 : vector<32x1xf32>
      %47 = vector.broadcast %46 : vector<32x1xf32> to vector<32x128xf32>
      %48 = arith.mulf %43, %47 : vector<32x128xf32>
      %49 = vector.broadcast %29 : vector<1x128xf32> to vector<32x128xf32>
      %50 = arith.mulf %48, %49 : vector<32x128xf32>
      %51 = vector.broadcast %30 : vector<1x128xf32> to vector<32x128xf32>
      %52 = arith.addf %50, %51 : vector<32x128xf32>
      %53 = arith.truncf %52 : vector<32x128xf32> to vector<32x128xbf16>
      %c0_29 = arith.constant 0 : index
      %c0_30 = arith.constant 0 : index
      %54 = vector.load %arg5[%c0_29, %c0_30] : memref<128x384xbf16, #tpu.memory_space<vmem>>, vector<128x384xbf16>
      %cst_31 = arith.constant dense<0.000000e+00> : vector<32x384xf32>
      %55 = tpu.matmul %53, %54, %cst_31 {dimension_numbers = #tpu.dot_dimension_numbers<[1], [0], [0], [1], [0, 0, 1, 1], [], []>} : vector<32x128xbf16>, vector<128x384xbf16>, vector<32x384xf32> -> vector<32x384xf32>
      %c0_32 = arith.constant 0 : index
      %c0_33 = arith.constant 0 : index
      %56 = vector.load %arg6[%c0_32, %c0_33] : memref<1x384xf32, #tpu.memory_space<vmem>>, vector<1x384xf32>
      %57 = vector.broadcast %56 : vector<1x384xf32> to vector<32x384xf32>
      %58 = arith.addf %55, %57 : vector<32x384xf32>
      %59 = vector.shape_cast %58 : vector<32x384xf32> to vector<4x8x384xf32>
      %60 = arith.truncf %59 : vector<4x8x384xf32> to vector<4x8x384xbf16>
      %c0_34 = arith.constant 0 : index
      %c0_35 = arith.constant 0 : index
      %c0_36 = arith.constant 0 : index
      %61 = vector.load %arg18[%c0_34, %c0_35, %c0_36] : memref<4x8x384xbf16, #tpu.memory_space<vmem>>, vector<4x8x384xbf16>
      tpu.vector_store %arg18[%c0_34, %c0_35, %c0_36], %60 {strides = array<i32>} : memref<4x8x384xbf16, #tpu.memory_space<vmem>>, vector<4x8x384xbf16>,
      %c0_37 = arith.constant 0 : index
      %c0_38 = arith.constant 0 : index
      %c0_39 = arith.constant 0 : index
      %62 = vector.load %arg18[%c0_37, %c0_38, %c0_39] : memref<4x8x384xbf16, #tpu.memory_space<vmem>>, vector<4x8x32xbf16>
      %c0_40 = arith.constant 0 : index
      %c0_41 = arith.constant 0 : index
      %c128 = arith.constant 128 : index
      %63 = vector.load %arg18[%c0_40, %c0_41, %c128] : memref<4x8x384xbf16, #tpu.memory_space<vmem>>, vector<4x8x32xbf16>
      %c0_42 = arith.constant 0 : index
      %c0_43 = arith.constant 0 : index
      %c256 = arith.constant 256 : index
      %64 = vector.load %arg18[%c0_42, %c0_43, %c256] : memref<4x8x384xbf16, #tpu.memory_space<vmem>>, vector<4x8x32xbf16>
      "tpu.trace_start"() <{level = 10 : i32, message = "bqd,bkd->bqk"}> : () -> ()
      %cst_44 = arith.constant dense<0.000000e+00> : vector<4x8x8xf32>
      %65 = tpu.matmul %62, %63, %cst_44 {dimension_numbers = #tpu.dot_dimension_numbers<[2], [2], [1], [1], [0, 0, 0, 1, 1, 1], [0], [0]>} : vector<4x8x32xbf16>, vector<4x8x32xbf16>, vector<4x8x8xf32> -> vector<4x8x8xf32>
      "tpu.trace_stop"() : () -> ()
      %cst_45 = arith.constant dense<0xFF800000> : vector<4x8xf32>
      %66 = vector.multi_reduction <maximumf>, %65, %cst_45 [2] : vector<4x8x8xf32> to vector<4x8xf32>
      %67 = vector.shape_cast %66 : vector<4x8xf32> to vector<4x8x1xf32>
      %68 = vector.broadcast %67 : vector<4x8x1xf32> to vector<4x8x8xf32>
      %69 = arith.subf %65, %68 : vector<4x8x8xf32>
      %70 = math.exp %69 : vector<4x8x8xf32>
      %cst_46 = arith.constant dense<0.000000e+00> : vector<4x8xf32>
      %71 = vector.multi_reduction <add>, %70, %cst_46 [2] : vector<4x8x8xf32> to vector<4x8xf32>
      %72 = vector.shape_cast %71 : vector<4x8xf32> to vector<4x8x1xf32>
      %73 = tpu.reciprocal %72 {approx = true} : vector<4x8x1xf32> -> vector<4x8x1xf32>
      %74 = vector.broadcast %73 : vector<4x8x1xf32> to vector<4x8x8xf32>
      %75 = arith.mulf %70, %74 : vector<4x8x8xf32>
      %76 = arith.truncf %75 : vector<4x8x8xf32> to vector<4x8x8xbf16>
      "tpu.trace_start"() <{level = 10 : i32, message = "bqk,bkd->bqd"}> : () -> ()
      %cst_47 = arith.constant dense<0.000000e+00> : vector<4x8x32xf32>
      %77 = tpu.matmul %76, %64, %cst_47 {dimension_numbers = #tpu.dot_dimension_numbers<[2], [1], [1], [2], [0, 0, 0, 1, 1, 2], [0], [0]>} : vector<4x8x8xbf16>, vector<4x8x32xbf16>, vector<4x8x32xf32> -> vector<4x8x32xf32>
      "tpu.trace_stop"() : () -> ()
      %78 = arith.truncf %77 : vector<4x8x32xf32> to vector<4x8x32xbf16>
      %c0_48 = arith.constant 0 : index
      %c0_49 = arith.constant 0 : index
      %c0_50 = arith.constant 0 : index
      %79 = vector.load %arg19[%c0_48, %c0_49, %c0_50] : memref<4x8x128xbf16, #tpu.memory_space<vmem>>, vector<4x8x32xbf16>
      tpu.vector_store %arg19[%c0_48, %c0_49, %c0_50], %78 {strides = array<i32>} : memref<4x8x128xbf16, #tpu.memory_space<vmem>>, vector<4x8x32xbf16>,
      %c0_51 = arith.constant 0 : index
      %c0_52 = arith.constant 0 : index
      %c32 = arith.constant 32 : index
      %80 = vector.load %arg18[%c0_51, %c0_52, %c32] : memref<4x8x384xbf16, #tpu.memory_space<vmem>>, vector<4x8x32xbf16>
      %c0_53 = arith.constant 0 : index
      %c0_54 = arith.constant 0 : index
      %c160 = arith.constant 160 : index
      %81 = vector.load %arg18[%c0_53, %c0_54, %c160] : memref<4x8x384xbf16, #tpu.memory_space<vmem>>, vector<4x8x32xbf16>
      %c0_55 = arith.constant 0 : index
      %c0_56 = arith.constant 0 : index
      %c288 = arith.constant 288 : index
      %82 = vector.load %arg18[%c0_55, %c0_56, %c288] : memref<4x8x384xbf16, #tpu.memory_space<vmem>>, vector<4x8x32xbf16>
      "tpu.trace_start"() <{level = 10 : i32, message = "bqd,bkd->bqk"}> : () -> ()
      %cst_57 = arith.constant dense<0.000000e+00> : vector<4x8x8xf32>
      %83 = tpu.matmul %80, %81, %cst_57 {dimension_numbers = #tpu.dot_dimension_numbers<[2], [2], [1], [1], [0, 0, 0, 1, 1, 1], [0], [0]>} : vector<4x8x32xbf16>, vector<4x8x32xbf16>, vector<4x8x8xf32> -> vector<4x8x8xf32>
      "tpu.trace_stop"() : () -> ()
      %cst_58 = arith.constant dense<0xFF800000> : vector<4x8xf32>
      %84 = vector.multi_reduction <maximumf>, %83, %cst_58 [2] : vector<4x8x8xf32> to vector<4x8xf32>
      %85 = vector.shape_cast %84 : vector<4x8xf32> to vector<4x8x1xf32>
      %86 = vector.broadcast %85 : vector<4x8x1xf32> to vector<4x8x8xf32>
      %87 = arith.subf %83, %86 : vector<4x8x8xf32>
      %88 = math.exp %87 : vector<4x8x8xf32>
      %cst_59 = arith.constant dense<0.000000e+00> : vector<4x8xf32>
      %89 = vector.multi_reduction <add>, %88, %cst_59 [2] : vector<4x8x8xf32> to vector<4x8xf32>
      %90 = vector.shape_cast %89 : vector<4x8xf32> to vector<4x8x1xf32>
      %91 = tpu.reciprocal %90 {approx = true} : vector<4x8x1xf32> -> vector<4x8x1xf32>
      %92 = vector.broadcast %91 : vector<4x8x1xf32> to vector<4x8x8xf32>
      %93 = arith.mulf %88, %92 : vector<4x8x8xf32>
      %94 = arith.truncf %93 : vector<4x8x8xf32> to vector<4x8x8xbf16>
      "tpu.trace_start"() <{level = 10 : i32, message = "bqk,bkd->bqd"}> : () -> ()
      %cst_60 = arith.constant dense<0.000000e+00> : vector<4x8x32xf32>
      %95 = tpu.matmul %94, %82, %cst_60 {dimension_numbers = #tpu.dot_dimension_numbers<[2], [1], [1], [2], [0, 0, 0, 1, 1, 2], [0], [0]>} : vector<4x8x8xbf16>, vector<4x8x32xbf16>, vector<4x8x32xf32> -> vector<4x8x32xf32>
      "tpu.trace_stop"() : () -> ()
      %96 = arith.truncf %95 : vector<4x8x32xf32> to vector<4x8x32xbf16>
      %c0_61 = arith.constant 0 : index
      %c0_62 = arith.constant 0 : index
      %c32_63 = arith.constant 32 : index
      %97 = vector.load %arg19[%c0_61, %c0_62, %c32_63] : memref<4x8x128xbf16, #tpu.memory_space<vmem>>, vector<4x8x32xbf16>
      tpu.vector_store %arg19[%c0_61, %c0_62, %c32_63], %96 {strides = array<i32>} : memref<4x8x128xbf16, #tpu.memory_space<vmem>>, vector<4x8x32xbf16>,
      %c0_64 = arith.constant 0 : index
      %c0_65 = arith.constant 0 : index
      %c64 = arith.constant 64 : index
      %98 = vector.load %arg18[%c0_64, %c0_65, %c64] : memref<4x8x384xbf16, #tpu.memory_space<vmem>>, vector<4x8x32xbf16>
      %c0_66 = arith.constant 0 : index
      %c0_67 = arith.constant 0 : index
      %c192 = arith.constant 192 : index
      %99 = vector.load %arg18[%c0_66, %c0_67, %c192] : memref<4x8x384xbf16, #tpu.memory_space<vmem>>, vector<4x8x32xbf16>
      %c0_68 = arith.constant 0 : index
      %c0_69 = arith.constant 0 : index
      %c320 = arith.constant 320 : index
      %100 = vector.load %arg18[%c0_68, %c0_69, %c320] : memref<4x8x384xbf16, #tpu.memory_space<vmem>>, vector<4x8x32xbf16>
      "tpu.trace_start"() <{level = 10 : i32, message = "bqd,bkd->bqk"}> : () -> ()
      %cst_70 = arith.constant dense<0.000000e+00> : vector<4x8x8xf32>
      %101 = tpu.matmul %98, %99, %cst_70 {dimension_numbers = #tpu.dot_dimension_numbers<[2], [2], [1], [1], [0, 0, 0, 1, 1, 1], [0], [0]>} : vector<4x8x32xbf16>, vector<4x8x32xbf16>, vector<4x8x8xf32> -> vector<4x8x8xf32>
      "tpu.trace_stop"() : () -> ()
      %cst_71 = arith.constant dense<0xFF800000> : vector<4x8xf32>
      %102 = vector.multi_reduction <maximumf>, %101, %cst_71 [2] : vector<4x8x8xf32> to vector<4x8xf32>
      %103 = vector.shape_cast %102 : vector<4x8xf32> to vector<4x8x1xf32>
      %104 = vector.broadcast %103 : vector<4x8x1xf32> to vector<4x8x8xf32>
      %105 = arith.subf %101, %104 : vector<4x8x8xf32>
      %106 = math.exp %105 : vector<4x8x8xf32>
      %cst_72 = arith.constant dense<0.000000e+00> : vector<4x8xf32>
      %107 = vector.multi_reduction <add>, %106, %cst_72 [2] : vector<4x8x8xf32> to vector<4x8xf32>
      %108 = vector.shape_cast %107 : vector<4x8xf32> to vector<4x8x1xf32>
      %109 = tpu.reciprocal %108 {approx = true} : vector<4x8x1xf32> -> vector<4x8x1xf32>
      %110 = vector.broadcast %109 : vector<4x8x1xf32> to vector<4x8x8xf32>
      %111 = arith.mulf %106, %110 : vector<4x8x8xf32>
      %112 = arith.truncf %111 : vector<4x8x8xf32> to vector<4x8x8xbf16>
      "tpu.trace_start"() <{level = 10 : i32, message = "bqk,bkd->bqd"}> : () -> ()
      %cst_73 = arith.constant dense<0.000000e+00> : vector<4x8x32xf32>
      %113 = tpu.matmul %112, %100, %cst_73 {dimension_numbers = #tpu.dot_dimension_numbers<[2], [1], [1], [2], [0, 0, 0, 1, 1, 2], [0], [0]>} : vector<4x8x8xbf16>, vector<4x8x32xbf16>, vector<4x8x32xf32> -> vector<4x8x32xf32>
      "tpu.trace_stop"() : () -> ()
      %114 = arith.truncf %113 : vector<4x8x32xf32> to vector<4x8x32xbf16>
      %c0_74 = arith.constant 0 : index
      %c0_75 = arith.constant 0 : index
      %c64_76 = arith.constant 64 : index
      %115 = vector.load %arg19[%c0_74, %c0_75, %c64_76] : memref<4x8x128xbf16, #tpu.memory_space<vmem>>, vector<4x8x32xbf16>
      tpu.vector_store %arg19[%c0_74, %c0_75, %c64_76], %114 {strides = array<i32>} : memref<4x8x128xbf16, #tpu.memory_space<vmem>>, vector<4x8x32xbf16>,
      %c0_77 = arith.constant 0 : index
      %c0_78 = arith.constant 0 : index
      %c96 = arith.constant 96 : index
      %116 = vector.load %arg18[%c0_77, %c0_78, %c96] : memref<4x8x384xbf16, #tpu.memory_space<vmem>>, vector<4x8x32xbf16>
      %c0_79 = arith.constant 0 : index
      %c0_80 = arith.constant 0 : index
      %c224 = arith.constant 224 : index
      %117 = vector.load %arg18[%c0_79, %c0_80, %c224] : memref<4x8x384xbf16, #tpu.memory_space<vmem>>, vector<4x8x32xbf16>
      %c0_81 = arith.constant 0 : index
      %c0_82 = arith.constant 0 : index
      %c352 = arith.constant 352 : index
      %118 = vector.load %arg18[%c0_81, %c0_82, %c352] : memref<4x8x384xbf16, #tpu.memory_space<vmem>>, vector<4x8x32xbf16>
      "tpu.trace_start"() <{level = 10 : i32, message = "bqd,bkd->bqk"}> : () -> ()
      %cst_83 = arith.constant dense<0.000000e+00> : vector<4x8x8xf32>
      %119 = tpu.matmul %116, %117, %cst_83 {dimension_numbers = #tpu.dot_dimension_numbers<[2], [2], [1], [1], [0, 0, 0, 1, 1, 1], [0], [0]>} : vector<4x8x32xbf16>, vector<4x8x32xbf16>, vector<4x8x8xf32> -> vector<4x8x8xf32>
      "tpu.trace_stop"() : () -> ()
      %cst_84 = arith.constant dense<0xFF800000> : vector<4x8xf32>
      %120 = vector.multi_reduction <maximumf>, %119, %cst_84 [2] : vector<4x8x8xf32> to vector<4x8xf32>
      %121 = vector.shape_cast %120 : vector<4x8xf32> to vector<4x8x1xf32>
      %122 = vector.broadcast %121 : vector<4x8x1xf32> to vector<4x8x8xf32>
      %123 = arith.subf %119, %122 : vector<4x8x8xf32>
      %124 = math.exp %123 : vector<4x8x8xf32>
      %cst_85 = arith.constant dense<0.000000e+00> : vector<4x8xf32>
      %125 = vector.multi_reduction <add>, %124, %cst_85 [2] : vector<4x8x8xf32> to vector<4x8xf32>
      %126 = vector.shape_cast %125 : vector<4x8xf32> to vector<4x8x1xf32>
      %127 = tpu.reciprocal %126 {approx = true} : vector<4x8x1xf32> -> vector<4x8x1xf32>
      %128 = vector.broadcast %127 : vector<4x8x1xf32> to vector<4x8x8xf32>
      %129 = arith.mulf %124, %128 : vector<4x8x8xf32>
      %130 = arith.truncf %129 : vector<4x8x8xf32> to vector<4x8x8xbf16>
      "tpu.trace_start"() <{level = 10 : i32, message = "bqk,bkd->bqd"}> : () -> ()
      %cst_86 = arith.constant dense<0.000000e+00> : vector<4x8x32xf32>
      %131 = tpu.matmul %130, %118, %cst_86 {dimension_numbers = #tpu.dot_dimension_numbers<[2], [1], [1], [2], [0, 0, 0, 1, 1, 2], [0], [0]>} : vector<4x8x8xbf16>, vector<4x8x32xbf16>, vector<4x8x32xf32> -> vector<4x8x32xf32>
      "tpu.trace_stop"() : () -> ()
      %132 = arith.truncf %131 : vector<4x8x32xf32> to vector<4x8x32xbf16>
      %c0_87 = arith.constant 0 : index
      %c0_88 = arith.constant 0 : index
      %c96_89 = arith.constant 96 : index
      %133 = vector.load %arg19[%c0_87, %c0_88, %c96_89] : memref<4x8x128xbf16, #tpu.memory_space<vmem>>, vector<4x8x32xbf16>
      tpu.vector_store %arg19[%c0_87, %c0_88, %c96_89], %132 {strides = array<i32>} : memref<4x8x128xbf16, #tpu.memory_space<vmem>>, vector<4x8x32xbf16>,
      %c0_90 = arith.constant 0 : index
      %c0_91 = arith.constant 0 : index
      %c0_92 = arith.constant 0 : index
      %134 = vector.load %arg19[%c0_90, %c0_91, %c0_92] : memref<4x8x128xbf16, #tpu.memory_space<vmem>>, vector<4x8x128xbf16>
      %135 = vector.shape_cast %134 : vector<4x8x128xbf16> to vector<32x128xbf16>
      %c0_93 = arith.constant 0 : index
      %c0_94 = arith.constant 0 : index
      %136 = vector.load %arg7[%c0_93, %c0_94] : memref<128x128xbf16, #tpu.memory_space<vmem>>, vector<128x128xbf16>
      %cst_95 = arith.constant dense<0.000000e+00> : vector<32x128xf32>
      %137 = tpu.matmul %135, %136, %cst_95 {dimension_numbers = #tpu.dot_dimension_numbers<[1], [0], [0], [1], [0, 0, 1, 1], [], []>} : vector<32x128xbf16>, vector<128x128xbf16>, vector<32x128xf32> -> vector<32x128xf32>
      %c0_96 = arith.constant 0 : index
      %c0_97 = arith.constant 0 : index
      %138 = vector.load %arg8[%c0_96, %c0_97] : memref<1x128xf32, #tpu.memory_space<vmem>>, vector<1x128xf32>
      %139 = vector.broadcast %138 : vector<1x128xf32> to vector<32x128xf32>
      %140 = arith.addf %137, %139 : vector<32x128xf32>
      %141 = arith.addf %28, %140 : vector<32x128xf32>
      %c0_98 = arith.constant 0 : index
      %c0_99 = arith.constant 0 : index
      %142 = vector.load %arg16[%c0_98, %c0_99] : memref<32x128xf32, #tpu.memory_space<vmem>>, vector<32x128xf32>
      tpu.vector_store %arg16[%c0_98, %c0_99], %141 {strides = array<i32>} : memref<32x128xf32, #tpu.memory_space<vmem>>, vector<32x128xf32>,
      %c0_100 = arith.constant 0 : index
      %c0_101 = arith.constant 0 : index
      %143 = vector.load %arg9[%c0_100, %c0_101] : memref<1x128xf32, #tpu.memory_space<vmem>>, vector<1x128xf32>
      %c0_102 = arith.constant 0 : index
      %c0_103 = arith.constant 0 : index
      %144 = vector.load %arg10[%c0_102, %c0_103] : memref<1x128xf32, #tpu.memory_space<vmem>>, vector<1x128xf32>
      %cst_104 = arith.constant dense<0.000000e+00> : vector<32xf32>
      %145 = vector.multi_reduction <add>, %141, %cst_104 [1] : vector<32x128xf32> to vector<32xf32>
      %146 = vector.shape_cast %145 : vector<32xf32> to vector<32x1xf32>
      %cst_105 = arith.constant 1.280000e+02 : f32
      %147 = vector.broadcast %cst_105 : f32 to vector<32x1xf32>
      %148 = arith.divf %146, %147 : vector<32x1xf32>
      %149 = vector.broadcast %148 : vector<32x1xf32> to vector<32x128xf32>
      %150 = arith.subf %141, %149 : vector<32x128xf32>
      %151 = arith.mulf %150, %150 : vector<32x128xf32>
      %cst_106 = arith.constant dense<0.000000e+00> : vector<32xf32>
      %152 = vector.multi_reduction <add>, %151, %cst_106 [1] : vector<32x128xf32> to vector<32xf32>
      %153 = vector.shape_cast %152 : vector<32xf32> to vector<32x1xf32>
      %cst_107 = arith.constant 1.280000e+02 : f32
      %154 = vector.broadcast %cst_107 : f32 to vector<32x1xf32>
      %155 = arith.divf %153, %154 : vector<32x1xf32>
      %156 = vector.broadcast %148 : vector<32x1xf32> to vector<32x128xf32>
      %157 = arith.subf %141, %156 : vector<32x128xf32>
      %cst_108 = arith.constant 9.99999974E-6 : f32
      %158 = vector.broadcast %cst_108 : f32 to vector<32x1xf32>
      %159 = arith.addf %155, %158 : vector<32x1xf32>
      %160 = math.rsqrt %159 : vector<32x1xf32>
      %161 = vector.broadcast %160 : vector<32x1xf32> to vector<32x128xf32>
      %162 = arith.mulf %157, %161 : vector<32x128xf32>
      %163 = vector.broadcast %143 : vector<1x128xf32> to vector<32x128xf32>
      %164 = arith.mulf %162, %163 : vector<32x128xf32>
      %165 = vector.broadcast %144 : vector<1x128xf32> to vector<32x128xf32>
      %166 = arith.addf %164, %165 : vector<32x128xf32>
      %167 = arith.truncf %166 : vector<32x128xf32> to vector<32x128xbf16>
      %c0_109 = arith.constant 0 : index
      %c0_110 = arith.constant 0 : index
      %168 = vector.load %arg17[%c0_109, %c0_110] : memref<32x128xbf16, #tpu.memory_space<vmem>>, vector<32x128xbf16>
      tpu.vector_store %arg17[%c0_109, %c0_110], %167 {strides = array<i32>} : memref<32x128xbf16, #tpu.memory_space<vmem>>, vector<32x128xbf16>,
      %cst_111 = arith.constant 0.000000e+00 : f32
      %169 = vector.broadcast %cst_111 : f32 to vector<32x128xf32>
      %c0_112 = arith.constant 0 : index
      %c0_113 = arith.constant 0 : index
      %170 = vector.load %arg20[%c0_112, %c0_113] : memref<32x128xf32, #tpu.memory_space<vmem>>, vector<32x128xf32>
      tpu.vector_store %arg20[%c0_112, %c0_113], %169 {strides = array<i32>} : memref<32x128xf32, #tpu.memory_space<vmem>>, vector<32x128xf32>,
    } else {
    }
    %c0 = arith.constant 0 : index
    %c0_1 = arith.constant 0 : index
    %3 = vector.load %arg17[%c0, %c0_1] : memref<32x128xbf16, #tpu.memory_space<vmem>>, vector<32x128xbf16>
    %c0_2 = arith.constant 0 : index
    %c0_3 = arith.constant 0 : index
    %4 = vector.load %arg11[%c0_2, %c0_3] : memref<128x512xbf16, #tpu.memory_space<vmem>>, vector<128x512xbf16>
    %cst = arith.constant dense<0.000000e+00> : vector<32x512xf32>
    %5 = tpu.matmul %3, %4, %cst {dimension_numbers = #tpu.dot_dimension_numbers<[1], [0], [0], [1], [0, 0, 1, 1], [], []>} : vector<32x128xbf16>, vector<128x512xbf16>, vector<32x512xf32> -> vector<32x512xf32>
    %c0_4 = arith.constant 0 : index
    %c0_5 = arith.constant 0 : index
    %6 = vector.load %arg12[%c0_4, %c0_5] : memref<1x512xf32, #tpu.memory_space<vmem>>, vector<1x512xf32>
    %7 = vector.broadcast %6 : vector<1x512xf32> to vector<32x512xf32>
    %8 = arith.addf %5, %7 : vector<32x512xf32>
    %cst_6 = arith.constant 1.702000e+00 : f32
    %9 = vector.broadcast %cst_6 : f32 to vector<32x512xf32>
    %10 = arith.mulf %9, %8 : vector<32x512xf32>
    %11 = arith.negf %10 : vector<32x512xf32>
    %12 = math.exp %11 : vector<32x512xf32>
    %cst_7 = arith.constant 1.000000e+00 : f32
    %13 = vector.broadcast %cst_7 : f32 to vector<32x512xf32>
    %14 = arith.addf %13, %12 : vector<32x512xf32>
    %15 = arith.divf %13, %14 : vector<32x512xf32>
    %16 = arith.mulf %8, %15 : vector<32x512xf32>
    %c0_8 = arith.constant 0 : index
    %c0_9 = arith.constant 0 : index
    %17 = vector.load %arg20[%c0_8, %c0_9] : memref<32x128xf32, #tpu.memory_space<vmem>>, vector<32x128xf32>
    %18 = arith.truncf %16 : vector<32x512xf32> to vector<32x512xbf16>
    %c0_10 = arith.constant 0 : index
    %c0_11 = arith.constant 0 : index
    %19 = vector.load %arg13[%c0_10, %c0_11] : memref<512x128xbf16, #tpu.memory_space<vmem>>, vector<512x128xbf16>
    %cst_12 = arith.constant dense<0.000000e+00> : vector<32x128xf32>
    %20 = tpu.matmul %18, %19, %cst_12 {dimension_numbers = #tpu.dot_dimension_numbers<[1], [0], [0], [1], [0, 0, 1, 1], [], []>} : vector<32x512xbf16>, vector<512x128xbf16>, vector<32x128xf32> -> vector<32x128xf32>
    %21 = arith.addf %17, %20 : vector<32x128xf32>
    %c0_13 = arith.constant 0 : index
    %c0_14 = arith.constant 0 : index
    %22 = vector.load %arg20[%c0_13, %c0_14] : memref<32x128xf32, #tpu.memory_space<vmem>>, vector<32x128xf32>
    tpu.vector_store %arg20[%c0_13, %c0_14], %21 {strides = array<i32>} : memref<32x128xf32, #tpu.memory_space<vmem>>, vector<32x128xf32>,
    %c0_i32_15 = arith.constant 0 : i32
    %23 = arith.cmpi eq, %arg1, %c0_i32_15 : i32
    %24 = arith.extui %23 : i1 to i32
    %c0_i32_16 = arith.constant 0 : i32
    %25 = arith.cmpi ne, %24, %c0_i32_16 : i32
    scf.if %25 {
      %c0_17 = arith.constant 0 : index
      %c0_18 = arith.constant 0 : index
      %26 = vector.load %arg16[%c0_17, %c0_18] : memref<32x128xf32, #tpu.memory_space<vmem>>, vector<32x128xf32>
      %c0_19 = arith.constant 0 : index
      %c0_20 = arith.constant 0 : index
      %27 = vector.load %arg20[%c0_19, %c0_20] : memref<32x128xf32, #tpu.memory_space<vmem>>, vector<32x128xf32>
      %28 = arith.addf %26, %27 : vector<32x128xf32>
      %c0_21 = arith.constant 0 : index
      %c0_22 = arith.constant 0 : index
      %29 = vector.load %arg14[%c0_21, %c0_22] : memref<1x128xf32, #tpu.memory_space<vmem>>, vector<1x128xf32>
      %30 = vector.broadcast %29 : vector<1x128xf32> to vector<32x128xf32>
      %31 = arith.addf %28, %30 : vector<32x128xf32>
      %32 = vector.shape_cast %31 : vector<32x128xf32> to vector<4x8x128xf32>
      %33 = arith.truncf %32 : vector<4x8x128xf32> to vector<4x8x128xbf16>
      %c0_23 = arith.constant 0 : index
      %c0_24 = arith.constant 0 : index
      %c0_25 = arith.constant 0 : index
      %34 = vector.load %arg15[%c0_23, %c0_24, %c0_25] : memref<4x8x128xbf16, #tpu.memory_space<vmem>>, vector<4x8x128xbf16>
      tpu.vector_store %arg15[%c0_23, %c0_24, %c0_25], %33 {strides = array<i32>} : memref<4x8x128xbf16, #tpu.memory_space<vmem>>, vector<4x8x128xbf16>,
    } else {
    }
    return
  }
  func.func @transform_0(%arg0: i32, %arg1: i32) -> (i32, i32, i32) {
    %c0_i32 = arith.constant 0 : i32
    %c0_i32_0 = arith.constant 0 : i32
    %c0_i32_1 = arith.constant 0 : i32
    return %arg0, %c0_i32, %c0_i32_0 : i32, i32, i32
  }
  func.func @transform_1(%arg0: i32, %arg1: i32) -> (i32, i32) {
    %c0_i32 = arith.constant 0 : i32
    %c0_i32_0 = arith.constant 0 : i32
    %c0_i32_1 = arith.constant 0 : i32
    return %c0_i32, %c0_i32_0 : i32, i32
  }
  func.func @transform_2(%arg0: i32, %arg1: i32) -> (i32, i32) {
    %c0_i32 = arith.constant 0 : i32
    %c0_i32_0 = arith.constant 0 : i32
    %c0_i32_1 = arith.constant 0 : i32
    return %c0_i32, %c0_i32_0 : i32, i32
  }
  func.func @transform_3(%arg0: i32, %arg1: i32) -> (i32, i32) {
    %c0_i32 = arith.constant 0 : i32
    %c0_i32_0 = arith.constant 0 : i32
    %c0_i32_1 = arith.constant 0 : i32
    return %c0_i32, %c0_i32_0 : i32, i32
  }
  func.func @transform_4(%arg0: i32, %arg1: i32) -> (i32, i32) {
    %c0_i32 = arith.constant 0 : i32
    %c0_i32_0 = arith.constant 0 : i32
    %c0_i32_1 = arith.constant 0 : i32
    return %c0_i32, %c0_i32_0 : i32, i32
  }
  func.func @transform_5(%arg0: i32, %arg1: i32) -> (i32, i32) {
    %c0_i32 = arith.constant 0 : i32
    %c0_i32_0 = arith.constant 0 : i32
    %c0_i32_1 = arith.constant 0 : i32
    return %c0_i32, %c0_i32_0 : i32, i32
  }
  func.func @transform_6(%arg0: i32, %arg1: i32) -> (i32, i32) {
    %c0_i32 = arith.constant 0 : i32
    %c0_i32_0 = arith.constant 0 : i32
    %c0_i32_1 = arith.constant 0 : i32
    return %c0_i32, %c0_i32_0 : i32, i32
  }
  func.func @transform_7(%arg0: i32, %arg1: i32) -> (i32, i32) {
    %c0_i32 = arith.constant 0 : i32
    %c0_i32_0 = arith.constant 0 : i32
    %c0_i32_1 = arith.constant 0 : i32
    return %c0_i32, %c0_i32_0 : i32, i32
  }
  func.func @transform_8(%arg0: i32, %arg1: i32) -> (i32, i32) {
    %c0_i32 = arith.constant 0 : i32
    %c0_i32_0 = arith.constant 0 : i32
    %c0_i32_1 = arith.constant 0 : i32
    return %c0_i32, %c0_i32_0 : i32, i32
  }
  func.func @transform_9(%arg0: i32, %arg1: i32) -> (i32, i32) {
    %c0_i32 = arith.constant 0 : i32
    %c0_i32_0 = arith.constant 0 : i32
    return %c0_i32, %arg1 : i32, i32
  }
  func.func @transform_10(%arg0: i32, %arg1: i32) -> (i32, i32) {
    %c0_i32 = arith.constant 0 : i32
    %c0_i32_0 = arith.constant 0 : i32
    return %c0_i32, %arg1 : i32, i32
  }
  func.func @transform_11(%arg0: i32, %arg1: i32) -> (i32, i32) {
    %c0_i32 = arith.constant 0 : i32
    %c0_i32_0 = arith.constant 0 : i32
    return %arg1, %c0_i32 : i32, i32
  }
  func.func @transform_12(%arg0: i32, %arg1: i32) -> (i32, i32) {
    %c0_i32 = arith.constant 0 : i32
    %c0_i32_0 = arith.constant 0 : i32
    %c0_i32_1 = arith.constant 0 : i32
    return %c0_i32, %c0_i32_0 : i32, i32
  }
  func.func @transform_13(%arg0: i32, %arg1: i32) -> (i32, i32, i32) {
    %c0_i32 = arith.constant 0 : i32
    %c0_i32_0 = arith.constant 0 : i32
    %c0_i32_1 = arith.constant 0 : i32
    return %arg0, %c0_i32, %c0_i32_0 : i32, i32, i32
  }
}

module attributes {stable_mosaic.version = 11 : i64} {
  func.func @_block_kernel(%arg0: i32, %arg1: i32, %arg2: memref<4x8x128xbf16, #tpu.memory_space<vmem>>, %arg3: memref<1x128xf32, #tpu.memory_space<vmem>>, %arg4: memref<1x128xf32, #tpu.memory_space<vmem>>, %arg5: memref<128x384xbf16, #tpu.memory_space<vmem>>, %arg6: memref<1x384xf32, #tpu.memory_space<vmem>>, %arg7: memref<128x128xbf16, #tpu.memory_space<vmem>>, %arg8: memref<1x128xf32, #tpu.memory_space<vmem>>, %arg9: memref<1x128xf32, #tpu.memory_space<vmem>>, %arg10: memref<1x128xf32, #tpu.memory_space<vmem>>, %arg11: memref<128x512xbf16, #tpu.memory_space<vmem>>, %arg12: memref<1x512xf32, #tpu.memory_space<vmem>>, %arg13: memref<512x128xbf16, #tpu.memory_space<vmem>>, %arg14: memref<1x128xf32, #tpu.memory_space<vmem>>, %arg15: memref<4x8x128xbf16, #tpu.memory_space<vmem>>, %arg16: memref<32x128xf32, #tpu.memory_space<vmem>>, %arg17: memref<32x128xbf16, #tpu.memory_space<vmem>>, %arg18: memref<4x8x384xbf16, #tpu.memory_space<vmem>>, %arg19: memref<4x8x128xbf16, #tpu.memory_space<vmem>>, %arg20: memref<32x128xf32, #tpu.memory_space<vmem>>) attributes {dimension_semantics = [#tpu.dimension_semantics<parallel>, #tpu.dimension_semantics<arbitrary>], iteration_bounds = array<i64: 1, 1>, scalar_prefetch = 0 : i64, scratch_operands = 5 : i64, tpu.core_type = #tpu.core_type<tc>, window_params = [{transform_indices = @transform_0, window_bounds = array<i64: 4, 8, 128>}, {pipeline_mode = #tpu.pipeline_mode<synchronous>, transform_indices = @transform_1, window_bounds = array<i64: 1, 128>}, {pipeline_mode = #tpu.pipeline_mode<synchronous>, transform_indices = @transform_2, window_bounds = array<i64: 1, 128>}, {pipeline_mode = #tpu.pipeline_mode<synchronous>, transform_indices = @transform_3, window_bounds = array<i64: 128, 384>}, {pipeline_mode = #tpu.pipeline_mode<synchronous>, transform_indices = @transform_4, window_bounds = array<i64: 1, 384>}, {pipeline_mode = #tpu.pipeline_mode<synchronous>, transform_indices = @transform_5, window_bounds = array<i64: 128, 128>}, {pipeline_mode = #tpu.pipeline_mode<synchronous>, transform_indices = @transform_6, window_bounds = array<i64: 1, 128>}, {pipeline_mode = #tpu.pipeline_mode<synchronous>, transform_indices = @transform_7, window_bounds = array<i64: 1, 128>}, {pipeline_mode = #tpu.pipeline_mode<synchronous>, transform_indices = @transform_8, window_bounds = array<i64: 1, 128>}, {transform_indices = @transform_9, window_bounds = array<i64: 128, 512>}, {transform_indices = @transform_10, window_bounds = array<i64: 1, 512>}, {transform_indices = @transform_11, window_bounds = array<i64: 512, 128>}, {pipeline_mode = #tpu.pipeline_mode<synchronous>, transform_indices = @transform_12, window_bounds = array<i64: 1, 128>}, {transform_indices = @transform_13, window_bounds = array<i64: 4, 8, 128>}]} {
    %c0_i32 = arith.constant 0 : i32
    %0 = arith.cmpi eq, %arg1, %c0_i32 : i32
    %1 = arith.extui %0 : i1 to i32
    %c0_i32_0 = arith.constant 0 : i32
    %2 = arith.cmpi ne, %1, %c0_i32_0 : i32
    scf.if %2 {
      %c0_17 = arith.constant 0 : index
      %c0_18 = arith.constant 0 : index
      %c0_19 = arith.constant 0 : index
      %26 = vector.load %arg2[%c0_17, %c0_18, %c0_19] : memref<4x8x128xbf16, #tpu.memory_space<vmem>>, vector<4x8x128xbf16>
      %27 = arith.extf %26 : vector<4x8x128xbf16> to vector<4x8x128xf32>
      %28 = vector.shape_cast %27 : vector<4x8x128xf32> to vector<32x128xf32>
      %c0_20 = arith.constant 0 : index
      %c0_21 = arith.constant 0 : index
      %29 = vector.load %arg3[%c0_20, %c0_21] : memref<1x128xf32, #tpu.memory_space<vmem>>, vector<1x128xf32>
      %c0_22 = arith.constant 0 : index
      %c0_23 = arith.constant 0 : index
      %30 = vector.load %arg4[%c0_22, %c0_23] : memref<1x128xf32, #tpu.memory_space<vmem>>, vector<1x128xf32>
      %cst_24 = arith.constant dense<0.000000e+00> : vector<32xf32>
      %31 = vector.multi_reduction <add>, %28, %cst_24 [1] : vector<32x128xf32> to vector<32xf32>
      %32 = vector.shape_cast %31 : vector<32xf32> to vector<32x1xf32>
      %cst_25 = arith.constant 1.280000e+02 : f32
      %33 = vector.broadcast %cst_25 : f32 to vector<32x1xf32>
      %34 = arith.divf %32, %33 : vector<32x1xf32>
      %35 = vector.broadcast %34 : vector<32x1xf32> to vector<32x128xf32>
      %36 = arith.subf %28, %35 : vector<32x128xf32>
      %37 = arith.mulf %36, %36 : vector<32x128xf32>
      %cst_26 = arith.constant dense<0.000000e+00> : vector<32xf32>
      %38 = vector.multi_reduction <add>, %37, %cst_26 [1] : vector<32x128xf32> to vector<32xf32>
      %39 = vector.shape_cast %38 : vector<32xf32> to vector<32x1xf32>
      %cst_27 = arith.constant 1.280000e+02 : f32
      %40 = vector.broadcast %cst_27 : f32 to vector<32x1xf32>
      %41 = arith.divf %39, %40 : vector<32x1xf32>
      %42 = vector.broadcast %34 : vector<32x1xf32> to vector<32x128xf32>
      %43 = arith.subf %28, %42 : vector<32x128xf32>
      %cst_28 = arith.constant 9.99999974E-6 : f32
      %44 = vector.broadcast %cst_28 : f32 to vector<32x1xf32>
      %45 = arith.addf %41, %44 : vector<32x1xf32>
      %46 = math.rsqrt %45 : vector<32x1xf32>
      %47 = vector.broadcast %46 : vector<32x1xf32> to vector<32x128xf32>
      %48 = arith.mulf %43, %47 : vector<32x128xf32>
      %49 = vector.broadcast %29 : vector<1x128xf32> to vector<32x128xf32>
      %50 = arith.mulf %48, %49 : vector<32x128xf32>
      %51 = vector.broadcast %30 : vector<1x128xf32> to vector<32x128xf32>
      %52 = arith.addf %50, %51 : vector<32x128xf32>
      %53 = arith.truncf %52 : vector<32x128xf32> to vector<32x128xbf16>
      %c0_29 = arith.constant 0 : index
      %c0_30 = arith.constant 0 : index
      %54 = vector.load %arg5[%c0_29, %c0_30] : memref<128x384xbf16, #tpu.memory_space<vmem>>, vector<128x384xbf16>
      %cst_31 = arith.constant dense<0.000000e+00> : vector<32x384xf32>
      %55 = tpu.matmul %53, %54, %cst_31 {dimension_numbers = #tpu.dot_dimension_numbers<[1], [0], [0], [1], [0, 0, 1, 1], [], []>} : vector<32x128xbf16>, vector<128x384xbf16>, vector<32x384xf32> -> vector<32x384xf32>
      %c0_32 = arith.constant 0 : index
      %c0_33 = arith.constant 0 : index
      %56 = vector.load %arg6[%c0_32, %c0_33] : memref<1x384xf32, #tpu.memory_space<vmem>>, vector<1x384xf32>
      %57 = vector.broadcast %56 : vector<1x384xf32> to vector<32x384xf32>
      %58 = arith.addf %55, %57 : vector<32x384xf32>
      %59 = vector.shape_cast %58 : vector<32x384xf32> to vector<4x8x384xf32>
      %60 = arith.truncf %59 : vector<4x8x384xf32> to vector<4x8x384xbf16>
      %c0_34 = arith.constant 0 : index
      %c0_35 = arith.constant 0 : index
      %c0_36 = arith.constant 0 : index
      %61 = vector.load %arg18[%c0_34, %c0_35, %c0_36] : memref<4x8x384xbf16, #tpu.memory_space<vmem>>, vector<4x8x384xbf16>
      tpu.vector_store %arg18[%c0_34, %c0_35, %c0_36], %60 {strides = array<i32>} : memref<4x8x384xbf16, #tpu.memory_space<vmem>>, vector<4x8x384xbf16>,
      %c0_37 = arith.constant 0 : index
      %c0_38 = arith.constant 0 : index
      %c0_39 = arith.constant 0 : index
      %62 = vector.load %arg18[%c0_37, %c0_38, %c0_39] : memref<4x8x384xbf16, #tpu.memory_space<vmem>>, vector<4x8x32xbf16>
      %c0_40 = arith.constant 0 : index
      %c0_41 = arith.constant 0 : index
      %c128 = arith.constant 128 : index
      %63 = vector.load %arg18[%c0_40, %c0_41, %c128] : memref<4x8x384xbf16, #tpu.memory_space<vmem>>, vector<4x8x32xbf16>
      %c0_42 = arith.constant 0 : index
      %c0_43 = arith.constant 0 : index
      %c256 = arith.constant 256 : index
      %64 = vector.load %arg18[%c0_42, %c0_43, %c256] : memref<4x8x384xbf16, #tpu.memory_space<vmem>>, vector<4x8x32xbf16>
      "tpu.trace_start"() <{level = 10 : i32, message = "bqd,bkd->bqk"}> : () -> ()
      %cst_44 = arith.constant dense<0.000000e+00> : vector<4x8x8xf32>
      %65 = tpu.matmul %62, %63, %cst_44 {dimension_numbers = #tpu.dot_dimension_numbers<[2], [2], [1], [1], [0, 0, 0, 1, 1, 1], [0], [0]>} : vector<4x8x32xbf16>, vector<4x8x32xbf16>, vector<4x8x8xf32> -> vector<4x8x8xf32>
      "tpu.trace_stop"() : () -> ()
      %cst_45 = arith.constant dense<0xFF800000> : vector<4x8xf32>
      %66 = vector.multi_reduction <maximumf>, %65, %cst_45 [2] : vector<4x8x8xf32> to vector<4x8xf32>
      %67 = vector.shape_cast %66 : vector<4x8xf32> to vector<4x8x1xf32>
      %68 = vector.broadcast %67 : vector<4x8x1xf32> to vector<4x8x8xf32>
      %69 = arith.subf %65, %68 : vector<4x8x8xf32>
      %70 = math.exp %69 : vector<4x8x8xf32>
      %cst_46 = arith.constant dense<0.000000e+00> : vector<4x8xf32>
      %71 = vector.multi_reduction <add>, %70, %cst_46 [2] : vector<4x8x8xf32> to vector<4x8xf32>
      %72 = vector.shape_cast %71 : vector<4x8xf32> to vector<4x8x1xf32>
      %73 = tpu.reciprocal %72 {approx = true} : vector<4x8x1xf32> -> vector<4x8x1xf32>
      %74 = vector.broadcast %73 : vector<4x8x1xf32> to vector<4x8x8xf32>
      %75 = arith.mulf %70, %74 : vector<4x8x8xf32>
      %76 = arith.truncf %75 : vector<4x8x8xf32> to vector<4x8x8xbf16>
      "tpu.trace_start"() <{level = 10 : i32, message = "bqk,bkd->bqd"}> : () -> ()
      %cst_47 = arith.constant dense<0.000000e+00> : vector<4x8x32xf32>
      %77 = tpu.matmul %76, %64, %cst_47 {dimension_numbers = #tpu.dot_dimension_numbers<[2], [1], [1], [2], [0, 0, 0, 1, 1, 2], [0], [0]>} : vector<4x8x8xbf16>, vector<4x8x32xbf16>, vector<4x8x32xf32> -> vector<4x8x32xf32>
      "tpu.trace_stop"() : () -> ()
      %78 = arith.truncf %77 : vector<4x8x32xf32> to vector<4x8x32xbf16>
      %c0_48 = arith.constant 0 : index
      %c0_49 = arith.constant 0 : index
      %c0_50 = arith.constant 0 : index
      %79 = vector.load %arg19[%c0_48, %c0_49, %c0_50] : memref<4x8x128xbf16, #tpu.memory_space<vmem>>, vector<4x8x32xbf16>
      tpu.vector_store %arg19[%c0_48, %c0_49, %c0_50], %78 {strides = array<i32>} : memref<4x8x128xbf16, #tpu.memory_space<vmem>>, vector<4x8x32xbf16>,
      %c0_51 = arith.constant 0 : index
      %c0_52 = arith.constant 0 : index
      %c32 = arith.constant 32 : index
      %80 = vector.load %arg18[%c0_51, %c0_52, %c32] : memref<4x8x384xbf16, #tpu.memory_space<vmem>>, vector<4x8x32xbf16>
      %c0_53 = arith.constant 0 : index
      %c0_54 = arith.constant 0 : index
      %c160 = arith.constant 160 : index
      %81 = vector.load %arg18[%c0_53, %c0_54, %c160] : memref<4x8x384xbf16, #tpu.memory_space<vmem>>, vector<4x8x32xbf16>
      %c0_55 = arith.constant 0 : index
      %c0_56 = arith.constant 0 : index
      %c288 = arith.constant 288 : index
      %82 = vector.load %arg18[%c0_55, %c0_56, %c288] : memref<4x8x384xbf16, #tpu.memory_space<vmem>>, vector<4x8x32xbf16>
      "tpu.trace_start"() <{level = 10 : i32, message = "bqd,bkd->bqk"}> : () -> ()
      %cst_57 = arith.constant dense<0.000000e+00> : vector<4x8x8xf32>
      %83 = tpu.matmul %80, %81, %cst_57 {dimension_numbers = #tpu.dot_dimension_numbers<[2], [2], [1], [1], [0, 0, 0, 1, 1, 1], [0], [0]>} : vector<4x8x32xbf16>, vector<4x8x32xbf16>, vector<4x8x8xf32> -> vector<4x8x8xf32>
      "tpu.trace_stop"() : () -> ()
      %cst_58 = arith.constant dense<0xFF800000> : vector<4x8xf32>
      %84 = vector.multi_reduction <maximumf>, %83, %cst_58 [2] : vector<4x8x8xf32> to vector<4x8xf32>
      %85 = vector.shape_cast %84 : vector<4x8xf32> to vector<4x8x1xf32>
      %86 = vector.broadcast %85 : vector<4x8x1xf32> to vector<4x8x8xf32>
      %87 = arith.subf %83, %86 : vector<4x8x8xf32>
      %88 = math.exp %87 : vector<4x8x8xf32>
      %cst_59 = arith.constant dense<0.000000e+00> : vector<4x8xf32>
      %89 = vector.multi_reduction <add>, %88, %cst_59 [2] : vector<4x8x8xf32> to vector<4x8xf32>
      %90 = vector.shape_cast %89 : vector<4x8xf32> to vector<4x8x1xf32>
      %91 = tpu.reciprocal %90 {approx = true} : vector<4x8x1xf32> -> vector<4x8x1xf32>
      %92 = vector.broadcast %91 : vector<4x8x1xf32> to vector<4x8x8xf32>
      %93 = arith.mulf %88, %92 : vector<4x8x8xf32>
      %94 = arith.truncf %93 : vector<4x8x8xf32> to vector<4x8x8xbf16>
      "tpu.trace_start"() <{level = 10 : i32, message = "bqk,bkd->bqd"}> : () -> ()
      %cst_60 = arith.constant dense<0.000000e+00> : vector<4x8x32xf32>
      %95 = tpu.matmul %94, %82, %cst_60 {dimension_numbers = #tpu.dot_dimension_numbers<[2], [1], [1], [2], [0, 0, 0, 1, 1, 2], [0], [0]>} : vector<4x8x8xbf16>, vector<4x8x32xbf16>, vector<4x8x32xf32> -> vector<4x8x32xf32>
      "tpu.trace_stop"() : () -> ()
      %96 = arith.truncf %95 : vector<4x8x32xf32> to vector<4x8x32xbf16>
      %c0_61 = arith.constant 0 : index
      %c0_62 = arith.constant 0 : index
      %c32_63 = arith.constant 32 : index
      %97 = vector.load %arg19[%c0_61, %c0_62, %c32_63] : memref<4x8x128xbf16, #tpu.memory_space<vmem>>, vector<4x8x32xbf16>
      tpu.vector_store %arg19[%c0_61, %c0_62, %c32_63], %96 {strides = array<i32>} : memref<4x8x128xbf16, #tpu.memory_space<vmem>>, vector<4x8x32xbf16>,
      %c0_64 = arith.constant 0 : index
      %c0_65 = arith.constant 0 : index
      %c64 = arith.constant 64 : index
      %98 = vector.load %arg18[%c0_64, %c0_65, %c64] : memref<4x8x384xbf16, #tpu.memory_space<vmem>>, vector<4x8x32xbf16>
      %c0_66 = arith.constant 0 : index
      %c0_67 = arith.constant 0 : index
      %c192 = arith.constant 192 : index
      %99 = vector.load %arg18[%c0_66, %c0_67, %c192] : memref<4x8x384xbf16, #tpu.memory_space<vmem>>, vector<4x8x32xbf16>
      %c0_68 = arith.constant 0 : index
      %c0_69 = arith.constant 0 : index
      %c320 = arith.constant 320 : index
      %100 = vector.load %arg18[%c0_68, %c0_69, %c320] : memref<4x8x384xbf16, #tpu.memory_space<vmem>>, vector<4x8x32xbf16>
      "tpu.trace_start"() <{level = 10 : i32, message = "bqd,bkd->bqk"}> : () -> ()
      %cst_70 = arith.constant dense<0.000000e+00> : vector<4x8x8xf32>
      %101 = tpu.matmul %98, %99, %cst_70 {dimension_numbers = #tpu.dot_dimension_numbers<[2], [2], [1], [1], [0, 0, 0, 1, 1, 1], [0], [0]>} : vector<4x8x32xbf16>, vector<4x8x32xbf16>, vector<4x8x8xf32> -> vector<4x8x8xf32>
      "tpu.trace_stop"() : () -> ()
      %cst_71 = arith.constant dense<0xFF800000> : vector<4x8xf32>
      %102 = vector.multi_reduction <maximumf>, %101, %cst_71 [2] : vector<4x8x8xf32> to vector<4x8xf32>
      %103 = vector.shape_cast %102 : vector<4x8xf32> to vector<4x8x1xf32>
      %104 = vector.broadcast %103 : vector<4x8x1xf32> to vector<4x8x8xf32>
      %105 = arith.subf %101, %104 : vector<4x8x8xf32>
      %106 = math.exp %105 : vector<4x8x8xf32>
      %cst_72 = arith.constant dense<0.000000e+00> : vector<4x8xf32>
      %107 = vector.multi_reduction <add>, %106, %cst_72 [2] : vector<4x8x8xf32> to vector<4x8xf32>
      %108 = vector.shape_cast %107 : vector<4x8xf32> to vector<4x8x1xf32>
      %109 = tpu.reciprocal %108 {approx = true} : vector<4x8x1xf32> -> vector<4x8x1xf32>
      %110 = vector.broadcast %109 : vector<4x8x1xf32> to vector<4x8x8xf32>
      %111 = arith.mulf %106, %110 : vector<4x8x8xf32>
      %112 = arith.truncf %111 : vector<4x8x8xf32> to vector<4x8x8xbf16>
      "tpu.trace_start"() <{level = 10 : i32, message = "bqk,bkd->bqd"}> : () -> ()
      %cst_73 = arith.constant dense<0.000000e+00> : vector<4x8x32xf32>
      %113 = tpu.matmul %112, %100, %cst_73 {dimension_numbers = #tpu.dot_dimension_numbers<[2], [1], [1], [2], [0, 0, 0, 1, 1, 2], [0], [0]>} : vector<4x8x8xbf16>, vector<4x8x32xbf16>, vector<4x8x32xf32> -> vector<4x8x32xf32>
      "tpu.trace_stop"() : () -> ()
      %114 = arith.truncf %113 : vector<4x8x32xf32> to vector<4x8x32xbf16>
      %c0_74 = arith.constant 0 : index
      %c0_75 = arith.constant 0 : index
      %c64_76 = arith.constant 64 : index
      %115 = vector.load %arg19[%c0_74, %c0_75, %c64_76] : memref<4x8x128xbf16, #tpu.memory_space<vmem>>, vector<4x8x32xbf16>
      tpu.vector_store %arg19[%c0_74, %c0_75, %c64_76], %114 {strides = array<i32>} : memref<4x8x128xbf16, #tpu.memory_space<vmem>>, vector<4x8x32xbf16>,
      %c0_77 = arith.constant 0 : index
      %c0_78 = arith.constant 0 : index
      %c96 = arith.constant 96 : index
      %116 = vector.load %arg18[%c0_77, %c0_78, %c96] : memref<4x8x384xbf16, #tpu.memory_space<vmem>>, vector<4x8x32xbf16>
      %c0_79 = arith.constant 0 : index
      %c0_80 = arith.constant 0 : index
      %c224 = arith.constant 224 : index
      %117 = vector.load %arg18[%c0_79, %c0_80, %c224] : memref<4x8x384xbf16, #tpu.memory_space<vmem>>, vector<4x8x32xbf16>
      %c0_81 = arith.constant 0 : index
      %c0_82 = arith.constant 0 : index
      %c352 = arith.constant 352 : index
      %118 = vector.load %arg18[%c0_81, %c0_82, %c352] : memref<4x8x384xbf16, #tpu.memory_space<vmem>>, vector<4x8x32xbf16>
      "tpu.trace_start"() <{level = 10 : i32, message = "bqd,bkd->bqk"}> : () -> ()
      %cst_83 = arith.constant dense<0.000000e+00> : vector<4x8x8xf32>
      %119 = tpu.matmul %116, %117, %cst_83 {dimension_numbers = #tpu.dot_dimension_numbers<[2], [2], [1], [1], [0, 0, 0, 1, 1, 1], [0], [0]>} : vector<4x8x32xbf16>, vector<4x8x32xbf16>, vector<4x8x8xf32> -> vector<4x8x8xf32>
      "tpu.trace_stop"() : () -> ()
      %cst_84 = arith.constant dense<0xFF800000> : vector<4x8xf32>
      %120 = vector.multi_reduction <maximumf>, %119, %cst_84 [2] : vector<4x8x8xf32> to vector<4x8xf32>
      %121 = vector.shape_cast %120 : vector<4x8xf32> to vector<4x8x1xf32>
      %122 = vector.broadcast %121 : vector<4x8x1xf32> to vector<4x8x8xf32>
      %123 = arith.subf %119, %122 : vector<4x8x8xf32>
      %124 = math.exp %123 : vector<4x8x8xf32>
      %cst_85 = arith.constant dense<0.000000e+00> : vector<4x8xf32>
      %125 = vector.multi_reduction <add>, %124, %cst_85 [2] : vector<4x8x8xf32> to vector<4x8xf32>
      %126 = vector.shape_cast %125 : vector<4x8xf32> to vector<4x8x1xf32>
      %127 = tpu.reciprocal %126 {approx = true} : vector<4x8x1xf32> -> vector<4x8x1xf32>
      %128 = vector.broadcast %127 : vector<4x8x1xf32> to vector<4x8x8xf32>
      %129 = arith.mulf %124, %128 : vector<4x8x8xf32>
      %130 = arith.truncf %129 : vector<4x8x8xf32> to vector<4x8x8xbf16>
      "tpu.trace_start"() <{level = 10 : i32, message = "bqk,bkd->bqd"}> : () -> ()
      %cst_86 = arith.constant dense<0.000000e+00> : vector<4x8x32xf32>
      %131 = tpu.matmul %130, %118, %cst_86 {dimension_numbers = #tpu.dot_dimension_numbers<[2], [1], [1], [2], [0, 0, 0, 1, 1, 2], [0], [0]>} : vector<4x8x8xbf16>, vector<4x8x32xbf16>, vector<4x8x32xf32> -> vector<4x8x32xf32>
      "tpu.trace_stop"() : () -> ()
      %132 = arith.truncf %131 : vector<4x8x32xf32> to vector<4x8x32xbf16>
      %c0_87 = arith.constant 0 : index
      %c0_88 = arith.constant 0 : index
      %c96_89 = arith.constant 96 : index
      %133 = vector.load %arg19[%c0_87, %c0_88, %c96_89] : memref<4x8x128xbf16, #tpu.memory_space<vmem>>, vector<4x8x32xbf16>
      tpu.vector_store %arg19[%c0_87, %c0_88, %c96_89], %132 {strides = array<i32>} : memref<4x8x128xbf16, #tpu.memory_space<vmem>>, vector<4x8x32xbf16>,
      %c0_90 = arith.constant 0 : index
      %c0_91 = arith.constant 0 : index
      %c0_92 = arith.constant 0 : index
      %134 = vector.load %arg19[%c0_90, %c0_91, %c0_92] : memref<4x8x128xbf16, #tpu.memory_space<vmem>>, vector<4x8x128xbf16>
      %135 = vector.shape_cast %134 : vector<4x8x128xbf16> to vector<32x128xbf16>
      %c0_93 = arith.constant 0 : index
      %c0_94 = arith.constant 0 : index
      %136 = vector.load %arg7[%c0_93, %c0_94] : memref<128x128xbf16, #tpu.memory_space<vmem>>, vector<128x128xbf16>
      %cst_95 = arith.constant dense<0.000000e+00> : vector<32x128xf32>
      %137 = tpu.matmul %135, %136, %cst_95 {dimension_numbers = #tpu.dot_dimension_numbers<[1], [0], [0], [1], [0, 0, 1, 1], [], []>} : vector<32x128xbf16>, vector<128x128xbf16>, vector<32x128xf32> -> vector<32x128xf32>
      %c0_96 = arith.constant 0 : index
      %c0_97 = arith.constant 0 : index
      %138 = vector.load %arg8[%c0_96, %c0_97] : memref<1x128xf32, #tpu.memory_space<vmem>>, vector<1x128xf32>
      %139 = vector.broadcast %138 : vector<1x128xf32> to vector<32x128xf32>
      %140 = arith.addf %137, %139 : vector<32x128xf32>
      %141 = arith.addf %28, %140 : vector<32x128xf32>
      %c0_98 = arith.constant 0 : index
      %c0_99 = arith.constant 0 : index
      %142 = vector.load %arg16[%c0_98, %c0_99] : memref<32x128xf32, #tpu.memory_space<vmem>>, vector<32x128xf32>
      tpu.vector_store %arg16[%c0_98, %c0_99], %141 {strides = array<i32>} : memref<32x128xf32, #tpu.memory_space<vmem>>, vector<32x128xf32>,
      %c0_100 = arith.constant 0 : index
      %c0_101 = arith.constant 0 : index
      %143 = vector.load %arg9[%c0_100, %c0_101] : memref<1x128xf32, #tpu.memory_space<vmem>>, vector<1x128xf32>
      %c0_102 = arith.constant 0 : index
      %c0_103 = arith.constant 0 : index
      %144 = vector.load %arg10[%c0_102, %c0_103] : memref<1x128xf32, #tpu.memory_space<vmem>>, vector<1x128xf32>
      %cst_104 = arith.constant dense<0.000000e+00> : vector<32xf32>
      %145 = vector.multi_reduction <add>, %141, %cst_104 [1] : vector<32x128xf32> to vector<32xf32>
      %146 = vector.shape_cast %145 : vector<32xf32> to vector<32x1xf32>
      %cst_105 = arith.constant 1.280000e+02 : f32
      %147 = vector.broadcast %cst_105 : f32 to vector<32x1xf32>
      %148 = arith.divf %146, %147 : vector<32x1xf32>
      %149 = vector.broadcast %148 : vector<32x1xf32> to vector<32x128xf32>
      %150 = arith.subf %141, %149 : vector<32x128xf32>
      %151 = arith.mulf %150, %150 : vector<32x128xf32>
      %cst_106 = arith.constant dense<0.000000e+00> : vector<32xf32>
      %152 = vector.multi_reduction <add>, %151, %cst_106 [1] : vector<32x128xf32> to vector<32xf32>
      %153 = vector.shape_cast %152 : vector<32xf32> to vector<32x1xf32>
      %cst_107 = arith.constant 1.280000e+02 : f32
      %154 = vector.broadcast %cst_107 : f32 to vector<32x1xf32>
      %155 = arith.divf %153, %154 : vector<32x1xf32>
      %156 = vector.broadcast %148 : vector<32x1xf32> to vector<32x128xf32>
      %157 = arith.subf %141, %156 : vector<32x128xf32>
      %cst_108 = arith.constant 9.99999974E-6 : f32
      %158 = vector.broadcast %cst_108 : f32 to vector<32x1xf32>
      %159 = arith.addf %155, %158 : vector<32x1xf32>
      %160 = math.rsqrt %159 : vector<32x1xf32>
      %161 = vector.broadcast %160 : vector<32x1xf32> to vector<32x128xf32>
      %162 = arith.mulf %157, %161 : vector<32x128xf32>
      %163 = vector.broadcast %143 : vector<1x128xf32> to vector<32x128xf32>
      %164 = arith.mulf %162, %163 : vector<32x128xf32>
      %165 = vector.broadcast %144 : vector<1x128xf32> to vector<32x128xf32>
      %166 = arith.addf %164, %165 : vector<32x128xf32>
      %167 = arith.truncf %166 : vector<32x128xf32> to vector<32x128xbf16>
      %c0_109 = arith.constant 0 : index
      %c0_110 = arith.constant 0 : index
      %168 = vector.load %arg17[%c0_109, %c0_110] : memref<32x128xbf16, #tpu.memory_space<vmem>>, vector<32x128xbf16>
      tpu.vector_store %arg17[%c0_109, %c0_110], %167 {strides = array<i32>} : memref<32x128xbf16, #tpu.memory_space<vmem>>, vector<32x128xbf16>,
      %cst_111 = arith.constant 0.000000e+00 : f32
      %169 = vector.broadcast %cst_111 : f32 to vector<32x128xf32>
      %c0_112 = arith.constant 0 : index
      %c0_113 = arith.constant 0 : index
      %170 = vector.load %arg20[%c0_112, %c0_113] : memref<32x128xf32, #tpu.memory_space<vmem>>, vector<32x128xf32>
      tpu.vector_store %arg20[%c0_112, %c0_113], %169 {strides = array<i32>} : memref<32x128xf32, #tpu.memory_space<vmem>>, vector<32x128xf32>,
    } else {
    }
    %c0 = arith.constant 0 : index
    %c0_1 = arith.constant 0 : index
    %3 = vector.load %arg17[%c0, %c0_1] : memref<32x128xbf16, #tpu.memory_space<vmem>>, vector<32x128xbf16>
    %c0_2 = arith.constant 0 : index
    %c0_3 = arith.constant 0 : index
    %4 = vector.load %arg11[%c0_2, %c0_3] : memref<128x512xbf16, #tpu.memory_space<vmem>>, vector<128x512xbf16>
    %cst = arith.constant dense<0.000000e+00> : vector<32x512xf32>
    %5 = tpu.matmul %3, %4, %cst {dimension_numbers = #tpu.dot_dimension_numbers<[1], [0], [0], [1], [0, 0, 1, 1], [], []>} : vector<32x128xbf16>, vector<128x512xbf16>, vector<32x512xf32> -> vector<32x512xf32>
    %c0_4 = arith.constant 0 : index
    %c0_5 = arith.constant 0 : index
    %6 = vector.load %arg12[%c0_4, %c0_5] : memref<1x512xf32, #tpu.memory_space<vmem>>, vector<1x512xf32>
    %7 = vector.broadcast %6 : vector<1x512xf32> to vector<32x512xf32>
    %8 = arith.addf %5, %7 : vector<32x512xf32>
    %cst_6 = arith.constant 1.702000e+00 : f32
    %9 = vector.broadcast %cst_6 : f32 to vector<32x512xf32>
    %10 = arith.mulf %9, %8 : vector<32x512xf32>
    %11 = arith.negf %10 : vector<32x512xf32>
    %12 = math.exp %11 : vector<32x512xf32>
    %cst_7 = arith.constant 1.000000e+00 : f32
    %13 = vector.broadcast %cst_7 : f32 to vector<32x512xf32>
    %14 = arith.addf %13, %12 : vector<32x512xf32>
    %15 = arith.divf %13, %14 : vector<32x512xf32>
    %16 = arith.mulf %8, %15 : vector<32x512xf32>
    %c0_8 = arith.constant 0 : index
    %c0_9 = arith.constant 0 : index
    %17 = vector.load %arg20[%c0_8, %c0_9] : memref<32x128xf32, #tpu.memory_space<vmem>>, vector<32x128xf32>
    %18 = arith.truncf %16 : vector<32x512xf32> to vector<32x512xbf16>
    %c0_10 = arith.constant 0 : index
    %c0_11 = arith.constant 0 : index
    %19 = vector.load %arg13[%c0_10, %c0_11] : memref<512x128xbf16, #tpu.memory_space<vmem>>, vector<512x128xbf16>
    %cst_12 = arith.constant dense<0.000000e+00> : vector<32x128xf32>
    %20 = tpu.matmul %18, %19, %cst_12 {dimension_numbers = #tpu.dot_dimension_numbers<[1], [0], [0], [1], [0, 0, 1, 1], [], []>} : vector<32x512xbf16>, vector<512x128xbf16>, vector<32x128xf32> -> vector<32x128xf32>
    %21 = arith.addf %17, %20 : vector<32x128xf32>
    %c0_13 = arith.constant 0 : index
    %c0_14 = arith.constant 0 : index
    %22 = vector.load %arg20[%c0_13, %c0_14] : memref<32x128xf32, #tpu.memory_space<vmem>>, vector<32x128xf32>
    tpu.vector_store %arg20[%c0_13, %c0_14], %21 {strides = array<i32>} : memref<32x128xf32, #tpu.memory_space<vmem>>, vector<32x128xf32>,
    %c0_i32_15 = arith.constant 0 : i32
    %23 = arith.cmpi eq, %arg1, %c0_i32_15 : i32
    %24 = arith.extui %23 : i1 to i32
    %c0_i32_16 = arith.constant 0 : i32
    %25 = arith.cmpi ne, %24, %c0_i32_16 : i32
    scf.if %25 {
      %c0_17 = arith.constant 0 : index
      %c0_18 = arith.constant 0 : index
      %26 = vector.load %arg16[%c0_17, %c0_18] : memref<32x128xf32, #tpu.memory_space<vmem>>, vector<32x128xf32>
      %c0_19 = arith.constant 0 : index
      %c0_20 = arith.constant 0 : index
      %27 = vector.load %arg20[%c0_19, %c0_20] : memref<32x128xf32, #tpu.memory_space<vmem>>, vector<32x128xf32>
      %28 = arith.addf %26, %27 : vector<32x128xf32>
      %c0_21 = arith.constant 0 : index
      %c0_22 = arith.constant 0 : index
      %29 = vector.load %arg14[%c0_21, %c0_22] : memref<1x128xf32, #tpu.memory_space<vmem>>, vector<1x128xf32>
      %30 = vector.broadcast %29 : vector<1x128xf32> to vector<32x128xf32>
      %31 = arith.addf %28, %30 : vector<32x128xf32>
      %32 = vector.shape_cast %31 : vector<32x128xf32> to vector<4x8x128xf32>
      %33 = arith.truncf %32 : vector<4x8x128xf32> to vector<4x8x128xbf16>
      %c0_23 = arith.constant 0 : index
      %c0_24 = arith.constant 0 : index
      %c0_25 = arith.constant 0 : index
      %34 = vector.load %arg15[%c0_23, %c0_24, %c0_25] : memref<4x8x128xbf16, #tpu.memory_space<vmem>>, vector<4x8x128xbf16>
      tpu.vector_store %arg15[%c0_23, %c0_24, %c0_25], %33 {strides = array<i32>} : memref<4x8x128xbf16, #tpu.memory_space<vmem>>, vector<4x8x128xbf16>,
    } else {
    }
    return
  }
  func.func @transform_0(%arg0: i32, %arg1: i32) -> (i32, i32, i32) {
    %c0_i32 = arith.constant 0 : i32
    %c0_i32_0 = arith.constant 0 : i32
    %c0_i32_1 = arith.constant 0 : i32
    return %arg0, %c0_i32, %c0_i32_0 : i32, i32, i32
  }
  func.func @transform_1(%arg0: i32, %arg1: i32) -> (i32, i32) {
    %c0_i32 = arith.constant 0 : i32
    %c0_i32_0 = arith.constant 0 : i32
    %c0_i32_1 = arith.constant 0 : i32
    return %c0_i32, %c0_i32_0 : i32, i32
  }
  func.func @transform_2(%arg0: i32, %arg1: i32) -> (i32, i32) {
    %c0_i32 = arith.constant 0 : i32
    %c0_i32_0 = arith.constant 0 : i32
    %c0_i32_1 = arith.constant 0 : i32
    return %c0_i32, %c0_i32_0 : i32, i32
  }
  func.func @transform_3(%arg0: i32, %arg1: i32) -> (i32, i32) {
    %c0_i32 = arith.constant 0 : i32
    %c0_i32_0 = arith.constant 0 : i32
    %c0_i32_1 = arith.constant 0 : i32
    return %c0_i32, %c0_i32_0 : i32, i32
  }
  func.func @transform_4(%arg0: i32, %arg1: i32) -> (i32, i32) {
    %c0_i32 = arith.constant 0 : i32
    %c0_i32_0 = arith.constant 0 : i32
    %c0_i32_1 = arith.constant 0 : i32
    return %c0_i32, %c0_i32_0 : i32, i32
  }
  func.func @transform_5(%arg0: i32, %arg1: i32) -> (i32, i32) {
    %c0_i32 = arith.constant 0 : i32
    %c0_i32_0 = arith.constant 0 : i32
    %c0_i32_1 = arith.constant 0 : i32
    return %c0_i32, %c0_i32_0 : i32, i32
  }
  func.func @transform_6(%arg0: i32, %arg1: i32) -> (i32, i32) {
    %c0_i32 = arith.constant 0 : i32
    %c0_i32_0 = arith.constant 0 : i32
    %c0_i32_1 = arith.constant 0 : i32
    return %c0_i32, %c0_i32_0 : i32, i32
  }
  func.func @transform_7(%arg0: i32, %arg1: i32) -> (i32, i32) {
    %c0_i32 = arith.constant 0 : i32
    %c0_i32_0 = arith.constant 0 : i32
    %c0_i32_1 = arith.constant 0 : i32
    return %c0_i32, %c0_i32_0 : i32, i32
  }
  func.func @transform_8(%arg0: i32, %arg1: i32) -> (i32, i32) {
    %c0_i32 = arith.constant 0 : i32
    %c0_i32_0 = arith.constant 0 : i32
    %c0_i32_1 = arith.constant 0 : i32
    return %c0_i32, %c0_i32_0 : i32, i32
  }
  func.func @transform_9(%arg0: i32, %arg1: i32) -> (i32, i32) {
    %c0_i32 = arith.constant 0 : i32
    %c0_i32_0 = arith.constant 0 : i32
    return %c0_i32, %arg1 : i32, i32
  }
  func.func @transform_10(%arg0: i32, %arg1: i32) -> (i32, i32) {
    %c0_i32 = arith.constant 0 : i32
    %c0_i32_0 = arith.constant 0 : i32
    return %c0_i32, %arg1 : i32, i32
  }
  func.func @transform_11(%arg0: i32, %arg1: i32) -> (i32, i32) {
    %c0_i32 = arith.constant 0 : i32
    %c0_i32_0 = arith.constant 0 : i32
    return %arg1, %c0_i32 : i32, i32
  }
  func.func @transform_12(%arg0: i32, %arg1: i32) -> (i32, i32) {
    %c0_i32 = arith.constant 0 : i32
    %c0_i32_0 = arith.constant 0 : i32
    %c0_i32_1 = arith.constant 0 : i32
    return %c0_i32, %c0_i32_0 : i32, i32
  }
  func.func @transform_13(%arg0: i32, %arg1: i32) -> (i32, i32, i32) {
    %c0_i32 = arith.constant 0 : i32
    %c0_i32_0 = arith.constant 0 : i32
    %c0_i32_1 = arith.constant 0 : i32
    return %arg0, %c0_i32, %c0_i32_0 : i32, i32, i32
  }
}

</mosaic_0001>

<bundles_post_ra>
// kernel: tpu_custom_call.1
= control target key start
LH: loop header
LB: loop body
LE: loop exit
PB: predicated region body
PF: predicated region fallthrough
CT: control target
= control target key end

     0   :  { %18 = vsyncpa [#allocation8], 0  ;;  %s4774_s0 = inlined_call_operand.hbm [shape: bf16[4,8,128], index: 0, kind: input, shape index: {}]   ;;  %s4775_s1 = inlined_call_operand.hbm [shape: f32[1,128], index: 1, kind: input, shape index: {}]   ;;  %s4776_s2 = inlined_call_operand.hbm [shape: f32[1,128], index: 2, kind: input, shape index: {}]   ;;  %s4777_s3 = inlined_call_operand.hbm [shape: bf16[128,384], index: 3, kind: input, shape index: {}]   ;;  %s4778_s4 = inlined_call_operand.vmem [shape: f32[1,384], index: 4, kind: input, shape index: {}]   ;;  %s4779_s5 = inlined_call_operand.hbm [shape: bf16[128,128], index: 5, kind: input, shape index: {}]   ;;  %s4780_s6 = inlined_call_operand.hbm [shape: f32[1,128], index: 6, kind: input, shape index: {}]   ;;  %s4781_s7 = inlined_call_operand.hbm [shape: f32[1,128], index: 7, kind: input, shape index: {}]   ;;  %s4782_s8 = inlined_call_operand.hbm [shape: f32[1,128], index: 8, kind: input, shape index: {}]   ;;  %s4783_s9 = inlined_call_operand.hbm [shape: bf16[128,512], index: 9, kind: input, shape index: {}]   ;;  %s4784_s10 = inlined_call_operand.vmem [shape: f32[1,512], index: 10, kind: input, shape index: {}]   ;;  %s4785_s11 = inlined_call_operand.hbm [shape: bf16[512,128], index: 11, kind: input, shape index: {}]   ;;  %s4786_s12 = inlined_call_operand.vmem [shape: f32[1,128], index: 12, kind: input, shape index: {}]   ;;  %s4787_s13 = inlined_call_operand.hbm [shape: bf16[4,8,128], index: 13, kind: output, shape index: {}]  }
   0x1   :  { %19 = vsyncpa [#allocation11], 0 }
   0x2   :  { %20 = vsyncpa [#allocation14], 0 }
   0x3   :  { %21 = vsyncpa [#allocation17], 0 }
   0x4   :  { %22 = vsyncpa [#allocation20], 0 }
   0x5   :  { %23 = vsyncpa [#allocation23], 0  ;;  %s43_s27 = sshll.u32 %s4775_s1, 4  ;;  %s44_s27 = int_to_ptr.hbm [resolvable:$true] %s43_s27 }
   0x6   :  { %24 = vsyncpa [#allocation9], 0  ;;  %s3874_s28 = smov [#allocation10]   ;;  %s64_s15 = sshll.u32 %s4777_s3, 4  ;;  %s65_s15 = int_to_ptr.hbm [resolvable:$true] %s64_s15 }
   0x7   :  { %s45_s29 = sshll.u32 %s3874_s28, 4  ;;  %s3875_s16 = smov [#allocation13]   ;;  %s46_s29 = int_to_ptr.vmem [resolvable:$true] %s45_s29 }
   0x8   :  { %48 = dma.hbm_to_vmem [thread:$0]  %s44_s27, 16, %s46_s29, [#allocation11]  }
   0x9   :  { %s66_s17 = sshll.u32 %s3875_s16, 4  ;;  %s3876_s18 = smov 192   ;;  %s67_s17 = int_to_ptr.vmem [resolvable:$true] %s66_s17 }
   0xa   :  { %s3877_s19 = smov 12   ;;  %s93_s1 = sshll.u32 %s4780_s6, 4  ;;  %s94_s1 = int_to_ptr.hbm [resolvable:$true] %s93_s1 }
   0xb   :  { %72 = dma.hbm_to_vmem [thread:$0]  %s65_s15, 3072, %s67_s17, [#allocation14], %s3876_s18, %s3876_s18, %s3877_s19  }
   0xc   :  { %s3878_s22 = smov [#allocation16]   ;;  %s115_s3 = sshll.u32 %s4782_s8, 4  ;;  %s116_s3 = int_to_ptr.hbm [resolvable:$true] %s115_s3 }
   0xd   :  { %s95_s23 = sshll.u32 %s3878_s22, 4  ;;  %s3879_s26 = smov [#allocation19]   ;;  %s96_s23 = int_to_ptr.vmem [resolvable:$true] %s95_s23 }
   0xe   :  { %98 = dma.hbm_to_vmem [thread:$0]  %s94_s1, 16, %s96_s23, [#allocation17]  }
   0xf   :  { %s117_s27 = sshll.u32 %s3879_s26, 4  ;;  %s29_s30 = sshll.u32 %s4774_s0, 4  ;;  %s118_s27 = int_to_ptr.vmem [resolvable:$true] %s117_s27  ;;  %s30_s30 = int_to_ptr.hbm [resolvable:$true] %s29_s30 }
  0x10   :  { %120 = dma.hbm_to_vmem [thread:$0]  %s116_s3, 16, %s118_s27, [#allocation20]  }
  0x11   :  { %s3880_s6 = smov [#allocation7]   ;;  %s54_s17 = sshll.u32 %s4776_s2, 4  ;;  %s55_s17 = int_to_ptr.hbm [resolvable:$true] %s54_s17 }
  0x12   :  { %s31_s14 = sshll.u32 %s3880_s6, 4  ;;  %s3881_s18 = smov 64   ;;  %s32_s14 = int_to_ptr.vmem [resolvable:$true] %s31_s14 }
  0x13   :  { %s3882_s8 = smov 4   ;;  %s3883_s19 = smov [#allocation12]  }
  0x14   :  { %37 = dma.hbm_to_vmem [thread:$0]  %s30_s30, 256, %s32_s14, [#allocation8], %s3881_s18, %s3881_s18, %s3882_s8  }
  0x15   :  { %s56_s20 = sshll.u32 %s3883_s19, 4  ;;  %s79_s1 = sshll.u32 %s4779_s5, 4  ;;  %s57_s20 = int_to_ptr.vmem [resolvable:$true] %s56_s20  ;;  %s80_s1 = int_to_ptr.hbm [resolvable:$true] %s79_s1 }
  0x16   :  { %59 = dma.hbm_to_vmem [thread:$0]  %s55_s17, 16, %s57_s20, [#allocation11]  }
  0x17   :  { %s104_s2 = sshll.u32 %s4781_s7, 4  ;;  %s3884_s24 = smov [#allocation15]   ;;  %s105_s2 = int_to_ptr.hbm [resolvable:$true] %s104_s2 }
  0x18   :  { %s81_s25 = sshll.u32 %s3884_s24, 4  ;;  %s3885_s3 = smov [#allocation18]   ;;  %s82_s25 = int_to_ptr.vmem [resolvable:$true] %s81_s25 }
  0x19   :  { %87 = dma.hbm_to_vmem [thread:$0]  %s80_s1, 1024, %s82_s25, [#allocation14], %s3881_s18, %s3881_s18, %s3882_s8  }
  0x1a   :  { %s106_s26 = sshll.u32 %s3885_s3, 4  ;;  %s125_s5 = sshll.u32 %s4783_s9, 4  ;;  %s107_s26 = int_to_ptr.vmem [resolvable:$true] %s106_s26  ;;  %s126_s5 = int_to_ptr.hbm [resolvable:$true] %s125_s5 }
  0x1b   :  { %109 = dma.hbm_to_vmem [thread:$0]  %s105_s2, 16, %s107_s26, [#allocation17]  }
  0x1c   :  { %s3886_s29 = smov [#allocation21]   ;;  %s140_s14 = sshll.u32 %s4785_s11, 4  ;;  %s141_s14 = int_to_ptr.hbm [resolvable:$true] %s140_s14 }
  0x1d   :  { %s127_s30 = sshll.u32 %s3886_s29, 4  ;;  %s3887_s15 = smov 256   ;;  %s128_s30 = int_to_ptr.vmem [resolvable:$true] %s127_s30 }
  0x1e   :  { %s3888_s16 = smov 16   ;;  %s3889_s17 = smov [#allocation22]  }
  0x1f   :  { %133 = dma.hbm_to_vmem [thread:$0]  %s126_s5, 4096, %s128_s30, [#allocation20], %s3887_s15, %s3887_s15, %s3888_s16  }
  0x20   :  { %s142_s19 = sshll.u32 %s3889_s17, 4  ;;  %s143_s19 = int_to_ptr.vmem [resolvable:$true] %s142_s19 }
  0x21   :  { %148 = dma.hbm_to_vmem [thread:$0]  %s141_s14, 4096, %s143_s19, [#allocation23], %s3881_s18, %s3881_s18, %s3882_s8  }
  0x22   :  { %3860 = dma.done.wait [#allocation8], 256  }
  0x23   :  { %3861 = vsyncadd [#allocation8], 4294967040 }
  0x24   :  { %3862 = dma.done.wait [#allocation11], 32  }
  0x25   :  { %3863 = vsyncadd [#allocation11], 4294967264 }
  0x26   :  { %3864 = dma.done.wait [#allocation14], 4096  }
  0x27   :  { %3865 = vsyncadd [#allocation14], 4294963200 }
  0x28   :  { %3866 = dma.done.wait [#allocation17], 32  }
  0x29   :  { %3867 = vsyncadd [#allocation17], 4294967264 }
  0x2a   :  { %3868 = dma.done.wait [#allocation20], 4112  }
  0x2b   :  { %3869 = vsyncadd [#allocation20], 4294963184 }
  0x2c   :  { %3870 = dma.done.wait [#allocation23], 4096  }
  0x2d   :  { %3871 = vsyncadd [#allocation23], 4294963200  ;;  %v3421_v0 = vld [vmem:[#allocation7 + $0x8] sm:$0xff]   ;;  %v3394_v1 = vld [vmem:[#allocation7] sm:$0xff]   ;;  %v3890_v6 = vmov 128.0   ;;  %vm564_vm13 = vcmask 261120  }
  0x2e   :  { %v4003_v2 = vunpack.c.l.bf16 %v3421_v0  ;;  %v4005_v3 = vunpack.c.l.bf16 %v3394_v1  ;;  %v4009_v4 = vunpack.c.h.bf16 %v3421_v0  ;;  %v4011_v5 = vunpack.c.h.bf16 %v3394_v1  ;;  %v2931_v29 = vld [vmem:[#allocation13 + $0xa8] sm:$0xf]  ;;  %v3315_v30 = vld [vmem:[#allocation13 + $0xb0] sm:$0xf0]  ;;  %v3314_v31 = vld [vmem:[#allocation13 + $0xac] sm:$0xf] }
  0x2f   :  { %3450 = vrcp.f32 %v3890_v6  ;;  %v2932_v32 = vor.u32 %v3315_v30, %v2931_v29  ;;  %v2933_v33 = vld [vmem:[#allocation13 + $0xb4] sm:$0xf0]  ;;  %v2939_v34 = vld [vmem:[#allocation13 + $0xb0] sm:$0xf]  ;;  %v3316_v35 = vld [vmem:[#allocation13 + $0xb8] sm:$0xf0] }
  0x30   :  { %210 = vadd.xlane.f32.xlu1 %v4003_v2  ;;  %206 = vadd.xlane.f32.xlu0 %v4005_v3  ;;  %v2936_v36 = vor.u32 %v3314_v31, %v2933_v33  ;;  %v2940_v37 = vor.u32 %v3316_v35, %v2939_v34  ;;  %v2919_v38 = vld [vmem:[#allocation13 + $0x90] sm:$0xf]  ;;  %v3312_v39 = vld [vmem:[#allocation13 + $0x98] sm:$0xf0]  ;;  %v3311_v40 = vld [vmem:[#allocation13 + $0x94] sm:$0xf] }
  0x31   :  { %477 = vmatpush.bf16.msra.mxu0 %v2932_v32  ;;  %v2920_v41 = vor.u32 %v3312_v39, %v2919_v38  ;;  %v2921_v42 = vld [vmem:[#allocation13 + $0x9c] sm:$0xf0]  ;;  %v2927_v43 = vld [vmem:[#allocation13 + $0x98] sm:$0xf]  ;;  %v3313_v44 = vld [vmem:[#allocation13 + $0xa0] sm:$0xf0] }
  0x32   :  { %496 = vmatpush.bf16.msra.mxu1 %v2936_v36  ;;  %515 = vmatpush.bf16.msra.mxu2 %v2940_v37  ;;  %v2924_v45 = vor.u32 %v3311_v40, %v2921_v42  ;;  %v2928_v46 = vor.u32 %v3313_v44, %v2927_v43  ;;  %v2907_v47 = vld [vmem:[#allocation13 + $0x78] sm:$0xf]  ;;  %v3309_v48 = vld [vmem:[#allocation13 + $0x80] sm:$0xf0]  ;;  %v3308_v49 = vld [vmem:[#allocation13 + $0x7c] sm:$0xf] }
  0x33   :  { %v2908_v50 = vor.u32 %v3309_v48, %v2907_v47  ;;  %v2909_v51 = vld [vmem:[#allocation13 + $0x84] sm:$0xf0]  ;;  %v2915_v52 = vld [vmem:[#allocation13 + $0x80] sm:$0xf]  ;;  %v3310_v53 = vld [vmem:[#allocation13 + $0x88] sm:$0xf0] }
  0x34   :  { %v2912_v54 = vor.u32 %v3308_v49, %v2909_v51  ;;  %v2916_v55 = vor.u32 %v3310_v53, %v2915_v52  ;;  %v2895_v56 = vld [vmem:[#allocation13 + $0x60] sm:$0xf]  ;;  %v3306_v57 = vld [vmem:[#allocation13 + $0x68] sm:$0xf0]  ;;  %v3305_v58 = vld [vmem:[#allocation13 + $0x64] sm:$0xf] }
  0x35   :  { %v3451_v7 = vpop.eup %3450  ;;  %478 = vmatpush.bf16.msra.mxu0 %v2920_v41  ;;  %v2896_v59 = vor.u32 %v3306_v57, %v2895_v56  ;;  %v2897_v60 = vld [vmem:[#allocation13 + $0x6c] sm:$0xf0]  ;;  %v2903_v61 = vld [vmem:[#allocation13 + $0x68] sm:$0xf]  ;;  %v3307_v62 = vld [vmem:[#allocation13 + $0x70] sm:$0xf0] }
  0x36   :  { %v215_v8 = vmul.f32 128.0, %v3451_v7  ;;  %vm219_vm0 = vweird.f32 %v3451_v7  ;;  %497 = vmatpush.bf16.msra.mxu1 %v2924_v45  ;;  %516 = vmatpush.bf16.msra.mxu2 %v2928_v46  ;;  %v2900_v63 = vor.u32 %v3305_v58, %v2897_v60  ;;  %v2904_v0 = vor.u32 %v3307_v62, %v2903_v61  ;;  %v2883_v1 = vld [vmem:[#allocation13 + $0x48] sm:$0xf]  ;;  %v3303_v6 = vld [vmem:[#allocation13 + $0x50] sm:$0xf0]  ;;  %s3892_s20 = smov 32  }
  0x37   :  { %v3297_v29 = vld [vmem:[#allocation13 + $0x20] sm:$0xf0]  ;;  %v3296_v30 = vld [vmem:[#allocation13 + $0x1c] sm:$0xf]  ;;  %v2861_v32 = vld [vmem:[#allocation13 + $0x24] sm:$0xf0] }
  0x38   :  { %212 = vadd.xlane.f32.xlu1 %v4009_v4  ;;  %208 = vadd.xlane.f32.xlu0 %v4011_v5  ;;  %v216_v9 = vsub.f32 1.0, %v215_v8  ;;  %v2884_v8 = vor.u32 %v3303_v6, %v2883_v1  ;;  %v2867_v33 = vld [vmem:[#allocation13 + $0x20] sm:$0xf]  ;;  %v3298_v34 = vld [vmem:[#allocation13 + $0x28] sm:$0xf0]  ;;  %v2864_v36 = vor.u32 %v3296_v30, %v2861_v32  ;;  %vm693_vm14 = vcmask 1043456  }
  0x39   :  { %479 = vmatpush.bf16.msra.mxu0 %v2908_v50  ;;  %v2868_v37 = vor.u32 %v3298_v34, %v2867_v33  ;;  %v2847_v38 = vld [vmem:[#allocation13] sm:$0xf]  ;;  %v3294_v39 = vld [vmem:[#allocation13 + $0x8] sm:$0xf0]  ;;  %v3293_v40 = vld [vmem:[#allocation13 + $0x4] sm:$0xf] }
  0x3a   :  { %v217_v10 = vmul.f32 %v3451_v7, %v216_v9  ;;  %498 = vmatpush.bf16.msra.mxu1 %v2912_v54  ;;  %517 = vmatpush.bf16.msra.mxu2 %v2916_v55  ;;  %v2885_v9 = vld [vmem:[#allocation13 + $0x54] sm:$0xf0]  ;;  %v2848_v43 = vor.u32 %v3294_v39, %v2847_v38  ;;  %v2849_v44 = vld [vmem:[#allocation13 + $0xc] sm:$0xf0]  ;;  %v2855_v45 = vld [vmem:[#allocation13 + $0x8] sm:$0xf] }
  0x3b   :  { %v3295_v46 = vld [vmem:[#allocation13 + $0x10] sm:$0xf0]  ;;  %v2852_v47 = vor.u32 %v3293_v40, %v2849_v44  ;;  %v3445_v30 = vld [vmem:[#allocation12] ss:$0 sm:$0xff]  ;;  %vm641_vm15 = vcmask 64512   ;;  %s2827_s24 = sshll.u32 %s4787_s13, 4  ;;  %s2828_s24 = int_to_ptr.hbm [resolvable:$true] %s2827_s24 }
  0x3c   :  { %v218_v11 = vadd.f32 %v3451_v7, %v217_v10  ;;  %v2891_v10 = vld [vmem:[#allocation13 + $0x50] sm:$0xf]  ;;  %v2856_v48 = vor.u32 %v3295_v46, %v2855_v45  ;;  %v341_v45 = vld [vmem:[%s4778_s4] sm:$0x7]  ;;  %s3891_s4 = smov 96  }
  0x3d   :  { %480 = vmatpush.bf16.msra.mxu0 %v2896_v59  ;;  %v343_v46 = vperm.slane %v341_v45, 0 }
  0x3e   :  { %v4015_v12 = vsel %vm219_vm0, %v3451_v7, %v218_v11  ;;  %499 = vmatpush.bf16.msra.mxu1 %v2900_v63  ;;  %518 = vmatpush.bf16.msra.mxu2 %v2904_v0  ;;  %v3302_v7 = vld [vmem:[#allocation13 + $0x4c] sm:$0xf]  ;;  %v3304_v11 = vld [vmem:[#allocation13 + $0x58] sm:$0xf0]  ;;  %vm1572_vm0 = vcmask 785408  }
  0x41   :  { %481 = vmatpush.bf16.msra.mxu0 %v2884_v8 }
  0xa3   :  { %v211_v13 = vpop.xlane.xlu1 %210  ;;  %v207_v14 = vpop.xlane.xlu0 %206 }
  0xa4   :  { %v223_v15 = vmul.f32 %v4015_v12, %v211_v13  ;;  %v221_v16 = vmul.f32 %v4015_v12, %v207_v14  ;;  %v2888_v13 = vor.u32 %v3302_v7, %v2885_v9  ;;  %v2892_v14 = vor.u32 %v3304_v11, %v2891_v10 }
  0xa6   :  { %v4020_v17 = vsub.f32 %v4003_v2, %v223_v15  ;;  %v4023_v18 = vsub.f32 %v4005_v3, %v221_v16  ;;  %500 = vmatpush.bf16.msra.mxu1 %v2888_v13  ;;  %519 = vmatpush.bf16.msra.mxu2 %v2892_v14  ;;  %v2871_v15 = vld [vmem:[#allocation13 + $0x30] sm:$0xf]  ;;  %v3300_v16 = vld [vmem:[#allocation13 + $0x38] sm:$0xf0] }
  0xa8   :  { %v231_v19 = vmul.f32 %v4020_v17, %v4020_v17  ;;  %v229_v20 = vmul.f32 %v4023_v18, %v4023_v18 }
  0xaa   :  { %237 = vadd.xlane.f32.xlu0 %v231_v19  ;;  %233 = vadd.xlane.f32.xlu2 %v229_v20  ;;  %v3299_v19 = vld [vmem:[#allocation13 + $0x34] sm:$0xf]  ;;  %v2872_v20 = vor.u32 %v3300_v16, %v2871_v15 }
  0xab   :  { %v213_v21 = vpop.xlane.xlu1 %212  ;;  %v209_v22 = vpop.xlane.xlu0 %208 }
  0xac   :  { %v224_v23 = vmul.f32 %v4015_v12, %v213_v21  ;;  %v222_v24 = vmul.f32 %v4015_v12, %v209_v22  ;;  %v2873_v21 = vld [vmem:[#allocation13 + $0x3c] sm:$0xf0]  ;;  %v2879_v22 = vld [vmem:[#allocation13 + $0x38] sm:$0xf]  ;;  %482 = vmatpush.bf16.msra.mxu0 %v2872_v20 }
  0xae   :  { %v4032_v25 = vsub.f32 %v4009_v4, %v224_v23  ;;  %v4035_v26 = vsub.f32 %v4011_v5, %v222_v24  ;;  %v3301_v23 = vld [vmem:[#allocation13 + $0x40] sm:$0xf0]  ;;  %v2876_v24 = vor.u32 %v3299_v19, %v2873_v21  ;;  %v3444_v21 = vld [vmem:[#allocation10] ss:$0 sm:$0xff] }
  0xb0   :  { %v232_v27 = vmul.f32 %v4032_v25, %v4032_v25  ;;  %v230_v28 = vmul.f32 %v4035_v26, %v4035_v26  ;;  %501 = vmatpush.bf16.msra.mxu1 %v2876_v24 }
  0xb2   :  { %239 = vadd.xlane.f32.xlu1 %v232_v27  ;;  %235 = vadd.xlane.f32.xlu2 %v230_v28  ;;  %v2880_v27 = vor.u32 %v3301_v23, %v2879_v22  ;;  %v2859_v28 = vld [vmem:[#allocation13 + $0x18] sm:$0xf] }
  0xb3   :  { %v2860_v31 = vor.u32 %v3297_v29, %v2859_v28 }
  0xb4   :  { %520 = vmatpush.bf16.msra.mxu2 %v2880_v27  ;;  %502 = vmatpush.bf16.msra.mxu1 %v2864_v36 }
  0xb5   :  { %483 = vmatpush.bf16.msra.mxu0 %v2860_v31 }
  0xb8   :  { %521 = vmatpush.bf16.msra.mxu2 %v2868_v37  ;;  %503 = vmatpush.bf16.msra.mxu1 %v2852_v47  ;;  %v344_v47 = vperm.slane %v341_v45, 1 }
  0xb9   :  { %484 = vmatpush.bf16.msra.mxu0 %v2848_v43 }
  0xbc   :  { %522 = vmatpush.bf16.msra.mxu2 %v2856_v48 }
 0x11d   :  { %v234_v35 = vpop.xlane.xlu2 %233  ;;  %v238_v42 = vpop.xlane.xlu0 %237 }
 0x11e   :  { %v241_v41 = vmul.f32 %v234_v35, %v4015_v12  ;;  %v243_v50 = vmul.f32 %v238_v42, %v4015_v12 }
 0x120   :  { %v245_v49 = vadd.f32 1e-05, %v241_v41  ;;  %v247_v51 = vadd.f32 1e-05, %v243_v50 }
 0x122   :  { %3452 = vrsqrt.f32 %v245_v49  ;;  %vm255_vm2 = vweird.f32 %v245_v49  ;;  %vm275_vm9 = vweird.f32 %v247_v51 }
 0x123   :  { %3454 = vrsqrt.f32 %v247_v51 }
 0x125   :  { %v240_v52 = vpop.xlane.xlu1 %239  ;;  %v236_v53 = vpop.xlane.xlu2 %235 }
 0x126   :  { %v244_v54 = vmul.f32 %v240_v52, %v4015_v12  ;;  %v242_v55 = vmul.f32 %v236_v53, %v4015_v12 }
 0x128   :  { %v3453_v56 = vpop.eup %3452  ;;  %v248_v57 = vadd.f32 1e-05, %v244_v54  ;;  %v246_v58 = vadd.f32 1e-05, %v242_v55 }
 0x129   :  { %v250_v59 = vmul.f32 %v3453_v56, %v245_v49  ;;  %v3455_v62 = vpop.eup %3454  ;;  %vm256_vm1 = vweird.f32 %v3453_v56 }
 0x12a   :  { %3456 = vrsqrt.f32 %v248_v57  ;;  %v270_v8 = vmul.f32 %v3455_v62, %v247_v51  ;;  %vm257_vm3 = vmor %vm255_vm2, %vm256_vm1  ;;  %vm265_vm5 = vweird.f32 %v246_v58  ;;  %vm285_vm7 = vweird.f32 %v248_v57 }
 0x12b   :  { %v251_v60 = vmul.f32 %v3453_v56, %v250_v59  ;;  %3458 = vrsqrt.f32 %v246_v58  ;;  %vm276_vm10 = vweird.f32 %v3455_v62  ;;  %vm1563_vm1 = vcmask 523264  }
 0x12c   :  { %v271_v14 = vmul.f32 %v3455_v62, %v270_v8  ;;  %vm277_vm12 = vmor %vm275_vm9, %vm276_vm10 }
 0x12d   :  { %v252_v61 = vmul.f32 0.5, %v251_v60 }
 0x12e   :  { %v272_v22 = vmul.f32 0.5, %v271_v14 }
 0x12f   :  { %v253_v63 = vsub.f32 1.5, %v252_v61 }
 0x130   :  { %v3457_v0 = vpop.eup %3456  ;;  %v273_v31 = vsub.f32 1.5, %v272_v22 }
 0x131   :  { %v3459_v1 = vpop.eup %3458  ;;  %v280_v6 = vmul.f32 %v3457_v0, %v248_v57  ;;  %v254_v7 = vmul.f32 %v3453_v56, %v253_v63  ;;  %vm286_vm8 = vweird.f32 %v3457_v0 }
 0x132   :  { %v260_v9 = vmul.f32 %v3459_v1, %v246_v58  ;;  %vm266_vm4 = vweird.f32 %v3459_v1  ;;  %vm287_vm11 = vmor %vm285_vm7, %vm286_vm8  ;;  %v274_v35 = vmul.f32 %v3455_v62, %v273_v31 }
 0x133   :  { %v281_v10 = vmul.f32 %v3457_v0, %v280_v6  ;;  %v258_v13 = vsel %vm257_vm3, %v3453_v56, %v254_v7  ;;  %vm267_vm6 = vmor %vm265_vm5, %vm266_vm4 }
 0x134   :  { %v261_v11 = vmul.f32 %v3459_v1, %v260_v9  ;;  %v289_v20 = vmul.f32 %v258_v13, %v4023_v18  ;;  %v278_v38 = vsel %vm277_vm12, %v3455_v62, %v274_v35 }
 0x135   :  { %v282_v16 = vmul.f32 0.5, %v281_v10  ;;  %v291_v39 = vmul.f32 %v278_v38, %v4020_v17  ;;  %v345_v17 = vperm.slane %v341_v45, 2 }
 0x136   :  { %v262_v15 = vmul.f32 0.5, %v261_v11  ;;  %v296_v29 = vmul.f32 %v3444_v21, %v289_v20 }
 0x137   :  { %v283_v24 = vsub.f32 1.5, %v282_v16  ;;  %v298_v41 = vmul.f32 %v3444_v21, %v291_v39 }
 0x138   :  { %v263_v19 = vsub.f32 1.5, %v262_v15  ;;  %v303_v18 = vadd.f32 %v3445_v30, %v296_v29 }
 0x139   :  { %v284_v33 = vmul.f32 %v3457_v0, %v283_v24  ;;  %v305_v43 = vadd.f32 %v3445_v30, %v298_v41 }
 0x13a   :  { %v264_v23 = vmul.f32 %v3459_v1, %v263_v19 }
 0x13b   :  { %v288_v37 = vsel %vm287_vm11, %v3457_v0, %v284_v33 }
 0x13c   :  { %v268_v27 = vsel %vm267_vm6, %v3459_v1, %v264_v23 }
 0x13d   :  { %v290_v28 = vmul.f32 %v268_v27, %v4035_v26  ;;  %v292_v26 = vmul.f32 %v288_v37, %v4032_v25 }
 0x13f   :  { %v297_v32 = vmul.f32 %v3444_v21, %v290_v28  ;;  %v299_v40 = vmul.f32 %v3444_v21, %v292_v26 }
 0x141   :  { %v304_v34 = vadd.f32 %v3445_v30, %v297_v32  ;;  %v306_v42 = vadd.f32 %v3445_v30, %v299_v40 }
 0x143   :  { %v307_v36 = vpack.c.bf16 %v304_v34, %v303_v18  ;;  %v308_v44 = vpack.c.bf16 %v306_v42, %v305_v43 }
 0x145   :  { %485 = vmatmul.bf16.vlgmr.msra.gmra.mxu0 %v307_v36  ;;  %504 = vmatmul.bf16.vlgmr.msra.gmra.mxu1 %v307_v36 }
 0x146   :  { %523 = vmatmul.bf16.vlgmr.msra.gmra.mxu2 %v307_v36 }
 0x155   :  { %490 = vmatmul.bf16.gmra.mxu0 %v308_v44  ;;  %509 = vmatmul.bf16.gmra.mxu1 %v308_v44 }
 0x156   :  { %528 = vmatmul.bf16.gmra.mxu2 %v308_v44 }
 0x1c2   :  { %v486_v48 = vpop.f32.mrf.mxu0  ;;  %v505_v49 = vpop.f32.mrf.mxu1 }
 0x1c3   :  { %v487_v50 = vadd.f32 %v486_v48, %v343_v46  ;;  %v506_v25 = vadd.f32 %v505_v49, %v344_v47 }
 0x1c5   :  { %v534_v51 = vpack.c.bf16 %v506_v25, %v487_v50 }
 0x1c7   :  { %542 = vst [vmem:[#allocation4] sm:$0xff] %v534_v51 }
 0x1c9   :  { %v524_v52 = vpop.f32.mrf.mxu2 }
 0x1ca   :  { %v525_v53 = vadd.f32 %v524_v52, %v345_v17  ;;  %v488_v54 = vpop.f32.mrf.mxu0  ;;  %v507_v55 = vpop.f32.mrf.mxu1 }
 0x1cb   :  { %v489_v56 = vadd.f32 %v488_v54, %v343_v46  ;;  %v508_v57 = vadd.f32 %v507_v55, %v344_v47 }
 0x1cc   :  { %v535_v58 = vpack.c.bf16 %v525_v53, %v525_v53 }
 0x1cd   :  { %v536_v59 = vpack.c.bf16 %v508_v57, %v489_v56 }
 0x1ce   :  { %543 = vst [vmem:[#allocation4 + $0x8] sm:$0xf] %v535_v58  ;;  %v4052_v60 = vld [vmem:[#allocation4 + $0x4] sm:$0xf]  ;;  %v4058_v11 = vld [vmem:[#allocation4] sm:$0xf] }
 0x1cf   :  { %544 = vst [vmem:[#allocation4 + $0xc] sm:$0xff] %v536_v59  ;;  %v569_v61 = vsel %vm564_vm13, %v4052_v60, 0  ;;  %v777_v59 = vunpack.c.l.b16 %v4052_v60 }
 0x1d0   :  { %578 = vmatpush.bf16.xpose.msra.mxu3 %v569_v61 }
 0x1d1   :  { %v526_v62 = vpop.f32.mrf.mxu2 }
 0x1d2   :  { %v527_v63 = vadd.f32 %v526_v62, %v345_v17  ;;  %v491_v0 = vpop.f32.mrf.mxu0  ;;  %v510_v1 = vpop.f32.mrf.mxu1 }
 0x1d3   :  { %v492_v6 = vadd.f32 %v491_v0, %v343_v46  ;;  %v511_v7 = vadd.f32 %v510_v1, %v344_v47 }
 0x1d4   :  { %v537_v8 = vpack.c.bf16 %v527_v63, %v527_v63  ;;  %v4108_v63 = vpack.c.b16 %v777_v59, %v777_v59 }
 0x1d5   :  { %v538_v9 = vpack.c.bf16 %v511_v7, %v492_v6  ;;  %v4056_v10 = vld [vmem:[#allocation4 + $0x8] sm:$0xf] }
 0x1d6   :  { %545 = vst [vmem:[#allocation4 + $0x14] sm:$0xf] %v537_v8  ;;  %v695_v13 = vsel %vm693_vm14, %v4056_v10, 0  ;;  %v4062_v14 = vld [vmem:[#allocation4 + $0x10] sm:$0xf] }
 0x1d7   :  { %546 = vst [vmem:[#allocation4 + $0x18] sm:$0xff] %v538_v9  ;;  %704 = vmatpush.bf16.msrb.mxu1 %v695_v13  ;;  %2941 = vmatmul.msk.bf16.vlgmr.msra.gmra.mxu3 %vm564_vm13, %v4058_v11  ;;  %v588_v15 = vsel %vm564_vm13, %v4062_v14, 0  ;;  %v4079_v37 = vld [vmem:[#allocation4 + $0xc] sm:$0xf]  ;;  %v806_v56 = vunpack.c.l.b16 %v4062_v14 }
 0x1d8   :  { %597 = vmatpush.bf16.xpose.msrb.mxu3 %v588_v15 }
 0x1d9   :  { %v529_v16 = vpop.f32.mrf.mxu2  ;;  %v4102_v57 = vpack.c.b16 %v806_v56, %v806_v56 }
 0x1da   :  { %v530_v19 = vadd.f32 %v529_v16, %v345_v17  ;;  %v493_v20 = vpop.f32.mrf.mxu0  ;;  %v512_v21 = vpop.f32.mrf.mxu1 }
 0x1db   :  { %v494_v22 = vadd.f32 %v493_v20, %v343_v46  ;;  %v513_v23 = vadd.f32 %v512_v21, %v344_v47 }
 0x1dc   :  { %v539_v24 = vpack.c.bf16 %v530_v19, %v530_v19 }
 0x1dd   :  { %v540_v27 = vpack.c.bf16 %v513_v23, %v494_v22  ;;  %v4068_v28 = vld [vmem:[#allocation4 + $0x14] sm:$0xf] }
 0x1de   :  { %547 = vst [vmem:[#allocation4 + $0x20] sm:$0xf] %v539_v24  ;;  %v714_v29 = vsel %vm693_vm14, %v4068_v28, 0  ;;  %v557_v30 = vld [vmem:[#allocation4 + $0x1c] sm:$0xf] }
 0x1df   :  { %548 = vst [vmem:[#allocation4 + $0x24] sm:$0xff] %v540_v27  ;;  %723 = vmatpush.bf16.msra.mxu1 %v714_v29  ;;  %v607_v31 = vsel %vm564_vm13, %v557_v30, 0  ;;  %v835_v32 = vunpack.c.l.b16 %v557_v30  ;;  %v552_v43 = vld [vmem:[#allocation4 + $0x18] sm:$0xf] }
 0x1e0   :  { %616 = vmatpush.bf16.xpose.msra.mxu3 %v607_v31  ;;  %v830_v1 = vunpack.c.l.b16 %v552_v43 }
 0x1e1   :  { %v531_v33 = vpop.f32.mrf.mxu2  ;;  %v4073_v18 = vpack.c.b16 %v835_v32, %v835_v32 }
 0x1e2   :  { %v532_v34 = vadd.f32 %v531_v33, %v345_v17  ;;  %v4112_v6 = vpack.c.b16 %v830_v1, %v830_v1 }
 0x1e3   :  { %837 = vrot.lane.b32.xlu1 %v4073_v18, %s3891_s4 }
 0x1e4   :  { %v541_v35 = vpack.c.bf16 %v532_v34, %v532_v34 }
 0x1e5   :  { %v4077_v36 = vld [vmem:[#allocation4 + $0x20] sm:$0xf] }
 0x1e6   :  { %549 = vst [vmem:[#allocation4 + $0x2c] sm:$0xf] %v541_v35  ;;  %v733_v38 = vsel %vm693_vm14, %v4077_v36, 0  ;;  %v558_v26 = vld [vmem:[#allocation4 + $0x28] sm:$0xf] }
 0x1e7   :  { %742 = vmatpush.bf16.msrb.mxu2 %v733_v38  ;;  %2942 = vmatmul.msk.bf16.vlgmr.msrb.gmra.mxu3 %vm564_vm13, %v4079_v37  ;;  %v626_v39 = vsel %vm564_vm13, %v558_v26, 0  ;;  %v864_v40 = vunpack.c.l.b16 %v558_v26  ;;  %v553_v45 = vld [vmem:[#allocation4 + $0x24] sm:$0xf] }
 0x1e8   :  { %635 = vmatpush.bf16.xpose.msrb.mxu3 %v626_v39  ;;  %v859_v27 = vunpack.c.l.b16 %v553_v45  ;;  %v801_v39 = vunpack.c.l.b16 %v4079_v37 }
 0x1e9   :  { %v4086_v41 = vpack.c.b16 %v864_v40, %v864_v40 }
 0x1ea   :  { %v4119_v30 = vpack.c.b16 %v859_v27, %v859_v27  ;;  %v4126_v40 = vpack.c.b16 %v801_v39, %v801_v39 }
 0x1eb   :  { %866 = vrot.lane.b32.xlu2 %v4086_v41, %s3891_s4 }
 0x1ed   :  { %v4090_v42 = vld [vmem:[#allocation4 + $0x2c] sm:$0xf] }
 0x1ee   :  { %v752_v44 = vsel %vm693_vm14, %v4090_v42, 0 }
 0x1f7   :  { %2943 = vmatmul.msk.bf16.vlgmr.msra.gmra.mxu3 %vm564_vm13, %v552_v43  ;;  %v772_v43 = vunpack.c.l.b16 %v4058_v11 }
 0x1f8   :  { %761 = vmatpush.bf16.msra.mxu3 %v752_v44 }
 0x1f9   :  { %v4131_v44 = vpack.c.b16 %v772_v43, %v772_v43 }
 0x207   :  { %2944 = vmatmul.msk.bf16.vlgmr.msrb.gmra.mxu3 %vm564_vm13, %v553_v45  ;;  %v936_v45 = vunpack.c.l.b16 %v4056_v10 }
 0x245   :  { %v867_v46 = vpop.permute.xlu2 %866 }
 0x246   :  { %v872_v47 = vsel %vm564_vm13, %v867_v46, 0  ;;  %v4136_v46 = vpack.c.b16 %v936_v45, %v936_v45 }
 0x247   :  { %881 = vmatpush.bf16.xpose.msrb.mxu3 %v872_v47 }
 0x255   :  { %v838_v48 = vpop.permute.xlu1 %837 }
 0x256   :  { %v843_v49 = vsel %vm564_vm13, %v838_v48, 0 }
 0x257   :  { %852 = vmatpush.bf16.xpose.msra.mxu2 %v843_v49 }
 0x25a   :  { %v580_v50 = vpop.f32.mrf.mxu3 }
 0x25b   :  { %v642_v25 = vsel %vm641_vm15, %v580_v50, -inf }
 0x25c   :  { %643 = vmax.xlane.f32.xlu2 %v642_v25 }
 0x262   :  { %v582_v51 = vpop.f32.mrf.mxu3 }
 0x26a   :  { %v599_v17 = vpop.f32.mrf.mxu3 }
 0x26b   :  { %v645_v52 = vsel %vm641_vm15, %v599_v17, -inf }
 0x26c   :  { %646 = vmax.xlane.f32.xlu2 %v645_v52 }
 0x272   :  { %v601_v53 = vpop.f32.mrf.mxu3 }
 0x27a   :  { %v618_v54 = vpop.f32.mrf.mxu3 }
 0x27b   :  { %v648_v55 = vsel %vm641_vm15, %v618_v54, -inf }
 0x27c   :  { %649 = vmax.xlane.f32.xlu0 %v648_v55 }
 0x282   :  { %v620_v58 = vpop.f32.mrf.mxu3 }
 0x284   :  { %808 = vrot.lane.b32.xlu2 %v4102_v57, %s3891_s4 }
 0x28a   :  { %v637_v61 = vpop.f32.mrf.mxu3 }
 0x28b   :  { %v651_v62 = vsel %vm641_vm15, %v637_v61, -inf }
 0x28c   :  { %652 = vmax.xlane.f32.xlu1 %v651_v62 }
 0x290   :  { %779 = vrot.lane.b32.xlu0 %v4108_v63, %s3891_s4 }
 0x292   :  { %v639_v0 = vpop.f32.mrf.mxu3 }
 0x2a5   :  { %832 = vrot.lane.b32.xlu1 %v4112_v6, %s3891_s4 }
 0x2cf   :  { %v644_v7 = vpop.xlane.xlu2 %643 }
 0x2d0   :  { %v654_v8 = vsub.f32 %v580_v50, %v644_v7 }
 0x2d2   :  { %v658_v9 = vmul.f32 1.442695, %v654_v8 }
 0x2d4   :  { %3460 = vpow2.f32 %v658_v9 }
 0x2da   :  { %v3461_v60 = vpop.eup %3460 }
 0x2db   :  { %v666_v13 = vsel %vm641_vm15, %v3461_v60, 0.0 }
 0x2dc   :  { %667 = vadd.xlane.f32.xlu0 %v666_v13 }
 0x2df   :  { %v647_v14 = vpop.xlane.xlu2 %646 }
 0x2e0   :  { %v655_v15 = vsub.f32 %v599_v17, %v647_v14 }
 0x2e2   :  { %v660_v16 = vmul.f32 1.442695, %v655_v15 }
 0x2e4   :  { %3462 = vpow2.f32 %v660_v16 }
 0x2e7   :  { %v809_v11 = vpop.permute.xlu2 %808 }
 0x2e8   :  { %v814_v50 = vsel %vm564_vm13, %v809_v11, 0 }
 0x2ea   :  { %v3463_v19 = vpop.eup %3462 }
 0x2eb   :  { %v669_v20 = vsel %vm641_vm15, %v3463_v19, 0.0 }
 0x2ec   :  { %670 = vadd.xlane.f32.xlu0 %v669_v20 }
 0x2ef   :  { %v650_v21 = vpop.xlane.xlu0 %649 }
 0x2f0   :  { %v656_v22 = vsub.f32 %v618_v54, %v650_v21 }
 0x2f2   :  { %v662_v23 = vmul.f32 1.442695, %v656_v22 }
 0x2f4   :  { %3464 = vpow2.f32 %v662_v23 }
 0x2fa   :  { %v3465_v24 = vpop.eup %3464 }
 0x2fb   :  { %v672_v29 = vsel %vm641_vm15, %v3465_v24, 0.0 }
 0x2fc   :  { %673 = vadd.xlane.f32.xlu1 %v672_v29 }
 0x2ff   :  { %v653_v31 = vpop.xlane.xlu1 %652 }
 0x300   :  { %v657_v32 = vsub.f32 %v637_v61, %v653_v31  ;;  %861 = vrot.lane.b32.xlu0 %v4119_v30, %s3891_s4 }
 0x302   :  { %v664_v33 = vmul.f32 1.442695, %v657_v32  ;;  %v780_v34 = vpop.permute.xlu0 %779 }
 0x303   :  { %v785_v35 = vsel %vm564_vm13, %v780_v34, 0 }
 0x304   :  { %3466 = vpow2.f32 %v664_v33  ;;  %794 = vmatpush.bf16.xpose.msrb.mxu0 %v785_v35  ;;  %v984_v35 = vunpack.c.l.b16 %v4077_v36 }
 0x30a   :  { %v3467_v38 = vpop.eup %3466 }
 0x30b   :  { %v675_v26 = vsel %vm641_vm15, %v3467_v38, 0.0 }
 0x30c   :  { %676 = vadd.xlane.f32.xlu2 %v675_v26 }
 0x315   :  { %803 = vrot.lane.b32.xlu1 %v4126_v40, %s3891_s4 }
 0x317   :  { %v833_v51 = vpop.permute.xlu1 %832 }
 0x324   :  { %774 = vrot.lane.b32.xlu2 %v4131_v44, %s3891_s4 }
 0x32c   :  { %938 = vrot.lane.b32.xlu2 %v4136_v46, %s3891_s4 }
 0x334   :  { %1106 = vrot.lane.b32.xlu2 %v4086_v41, %s3881_s18 }
 0x34f   :  { %v668_v37 = vpop.xlane.xlu0 %667 }
 0x350   :  { %3468 = vrcp.f32 %v668_v37 }
 0x356   :  { %v3469_v47 = vpop.eup %3468 }
 0x357   :  { %v682_v48 = vmul.f32 %v3469_v47, %v3461_v60 }
 0x359   :  { %v686_v49 = vpack.c.bf16 %v682_v48, %v682_v48 }
 0x35b   :  { %2945 = vmatmul.msk.bf16.vlgmr.msrb.gmra.mxu1 %vm641_vm15, %v686_v49 }
 0x35c   :  { %823 = vmatpush.bf16.xpose.msrb.mxu1 %v814_v50 }
 0x35f   :  { %v671_v10 = vpop.xlane.xlu0 %670 }
 0x360   :  { %3470 = vrcp.f32 %v671_v10 }
 0x366   :  { %v3471_v25 = vpop.eup %3470 }
 0x367   :  { %v683_v17 = vmul.f32 %v3471_v25, %v3463_v19 }
 0x369   :  { %v687_v52 = vpack.c.bf16 %v683_v17, %v683_v17 }
 0x36b   :  { %2946 = vmatmul.msk.bf16.vlgmr.msra.gmra.mxu1 %vm641_vm15, %v687_v52 }
 0x36f   :  { %v674_v53 = vpop.xlane.xlu1 %673 }
 0x370   :  { %3472 = vrcp.f32 %v674_v53 }
 0x372   :  { %v862_v9 = vpop.permute.xlu0 %861 }
 0x376   :  { %v3473_v54 = vpop.eup %3472 }
 0x377   :  { %v684_v55 = vmul.f32 %v3473_v54, %v3465_v24 }
 0x379   :  { %v688_v56 = vpack.c.bf16 %v684_v55, %v684_v55 }
 0x37b   :  { %2947 = vmatmul.msk.bf16.vlgmr.msrb.gmra.mxu2 %vm641_vm15, %v688_v56  ;;  %v1008_v56 = vunpack.c.l.b16 %v4090_v42 }
 0x37f   :  { %v677_v58 = vpop.xlane.xlu2 %676 }
 0x380   :  { %3474 = vrcp.f32 %v677_v58 }
 0x386   :  { %v3475_v59 = vpop.eup %3474 }
 0x387   :  { %v685_v61 = vmul.f32 %v3475_v59, %v3467_v38  ;;  %v775_v62 = vpop.permute.xlu2 %774  ;;  %v804_v0 = vpop.permute.xlu1 %803  ;;  %v4164_v38 = vpack.c.b16 %v984_v35, %v984_v35 }
 0x388   :  { %2949 = vmatmul.msk.bf16.vlgmr.msrb.gmra.mxu0 %vm564_vm13, %v775_v62  ;;  %2950 = vmatmul.msk.bf16.vlgmr.msrb.gmra.mxu1 %vm564_vm13, %v804_v0  ;;  %v4179_v62 = vpack.c.b16 %v1008_v56, %v1008_v56 }
 0x389   :  { %v689_v1 = vpack.c.bf16 %v685_v61, %v685_v61 }
 0x38b   :  { %2948 = vmatmul.msk.bf16.vlgmr.msra.gmra.mxu3 %vm641_vm15, %v689_v1  ;;  %2951 = vmatmul.msk.bf16.vlgmr.msra.gmra.mxu2 %vm564_vm13, %v833_v51 }
 0x38f   :  { %v939_v7 = vpop.permute.xlu2 %938 }
 0x390   :  { %v944_v8 = vsel %vm693_vm14, %v939_v7, 0 }
 0x391   :  { %953 = vmatpush.bf16.msra.mxu0 %v944_v8  ;;  %v960_v8 = vunpack.c.l.b16 %v4068_v28 }
 0x397   :  { %v1107_v49 = vpop.permute.xlu2 %1106 }
 0x39b   :  { %2952 = vmatmul.msk.bf16.vlgmr.msrb.gmra.mxu3 %vm564_vm13, %v862_v9 }
 0x3d8   :  { %v4152_v60 = vpop.f32.mrf.mxu1 }
 0x3e0   :  { %v708_v13 = vpop.f32.mrf.mxu1 }
 0x3e8   :  { %v4154_v14 = vpop.f32.mrf.mxu1 }
 0x3f0   :  { %v727_v15 = vpop.f32.mrf.mxu1 }
 0x3f1   :  { %v4187_v15 = vpack.c.b16 %v960_v8, %v960_v8 }
 0x3fe   :  { %v4156_v16 = vpop.f32.mrf.mxu2 }
 0x405   :  { %v796_v19 = vpop.f32.mrf.mxu0  ;;  %v825_v20 = vpop.f32.mrf.mxu1 }
 0x406   :  { %v746_v21 = vpop.f32.mrf.mxu2  ;;  %v887_v22 = vsel %vm641_vm15, %v796_v19, -inf  ;;  %v890_v34 = vsel %vm641_vm15, %v825_v20, -inf }
 0x407   :  { %888 = vmax.xlane.f32.xlu1 %v887_v22 }
 0x40d   :  { %v798_v23 = vpop.f32.mrf.mxu0  ;;  %v827_v24 = vpop.f32.mrf.mxu1 }
 0x40e   :  { %v4159_v27 = vpop.f32.mrf.mxu3  ;;  %v854_v29 = vpop.f32.mrf.mxu2 }
 0x40f   :  { %v893_v31 = vsel %vm641_vm15, %v854_v29, -inf }
 0x410   :  { %894 = vmax.xlane.f32.xlu0 %v893_v31 }
 0x416   :  { %v765_v32 = vpop.f32.mrf.mxu3  ;;  %v856_v33 = vpop.f32.mrf.mxu2 }
 0x417   :  { %v1112_v32 = vsel %vm564_vm13, %v1107_v49, 0 }
 0x418   :  { %891 = vmax.xlane.f32.xlu0 %v890_v34 }
 0x41e   :  { %v883_v26 = vpop.f32.mrf.mxu3 }
 0x41f   :  { %v896_v39 = vsel %vm641_vm15, %v883_v26, -inf }
 0x420   :  { %986 = vrot.lane.b32.xlu1 %v4164_v38, %s3891_s4  ;;  %897 = vmax.xlane.f32.xlu2 %v896_v39 }
 0x426   :  { %v885_v43 = vpop.f32.mrf.mxu3 }
 0x428   :  { %1083 = vrot.lane.b32.xlu1 %v4073_v18, %s3881_s18 }
 0x430   :  { %1060 = vrot.lane.b32.xlu1 %v4102_v57, %s3881_s18 }
 0x438   :  { %1081 = vrot.lane.b32.xlu2 %v4112_v6, %s3881_s18 }
 0x47a   :  { %v889_v36 = vpop.xlane.xlu1 %888 }
 0x47b   :  { %v899_v45 = vsub.f32 %v796_v19, %v889_v36 }
 0x47d   :  { %v903_v37 = vmul.f32 1.442695, %v899_v45 }
 0x47f   :  { %3476 = vpow2.f32 %v903_v37 }
 0x483   :  { %v895_v47 = vpop.xlane.xlu0 %894 }
 0x484   :  { %v901_v25 = vsub.f32 %v854_v29, %v895_v47 }
 0x485   :  { %v3477_v48 = vpop.eup %3476 }
 0x486   :  { %v911_v11 = vsel %vm641_vm15, %v3477_v48, 0.0  ;;  %v907_v17 = vmul.f32 1.442695, %v901_v25 }
 0x487   :  { %912 = vadd.xlane.f32.xlu0 %v911_v11 }
 0x48b   :  { %v892_v50 = vpop.xlane.xlu0 %891 }
 0x48c   :  { %v900_v10 = vsub.f32 %v825_v20, %v892_v50 }
 0x48e   :  { %v905_v51 = vmul.f32 1.442695, %v900_v10 }
 0x490   :  { %3478 = vpow2.f32 %v905_v51 }
 0x491   :  { %3480 = vpow2.f32 %v907_v17 }
 0x492   :  { %v987_v52 = vpop.permute.xlu1 %986 }
 0x493   :  { %v992_v53 = vsel %vm693_vm14, %v987_v52, 0  ;;  %v898_v54 = vpop.xlane.xlu2 %897 }
 0x494   :  { %v902_v55 = vsub.f32 %v883_v26, %v898_v54  ;;  %1001 = vmatpush.bf16.msrb.mxu2 %v992_v53 }
 0x496   :  { %v3479_v58 = vpop.eup %3478  ;;  %v909_v59 = vmul.f32 1.442695, %v902_v55 }
 0x497   :  { %v914_v61 = vsel %vm641_vm15, %v3479_v58, 0.0  ;;  %v3481_v7 = vpop.eup %3480 }
 0x498   :  { %3482 = vpow2.f32 %v909_v59  ;;  %915 = vadd.xlane.f32.xlu2 %v914_v61  ;;  %v917_v9 = vsel %vm641_vm15, %v3481_v7, 0.0 }
 0x49a   :  { %v1084_v0 = vpop.permute.xlu1 %1083 }
 0x49b   :  { %v1089_v1 = vsel %vm564_vm13, %v1084_v0, 0  ;;  %1010 = vrot.lane.b32.xlu0 %v4179_v62, %s3891_s4  ;;  %v1082_v21 = vpop.permute.xlu2 %1081 }
 0x49c   :  { %1098 = vmatpush.bf16.xpose.msra.mxu2 %v1089_v1 }
 0x49e   :  { %v3483_v42 = vpop.eup %3482 }
 0x49f   :  { %v920_v13 = vsel %vm641_vm15, %v3483_v42, 0.0 }
 0x4a0   :  { %918 = vadd.xlane.f32.xlu2 %v917_v9  ;;  %921 = vadd.xlane.f32.xlu1 %v920_v13 }
 0x4a2   :  { %v1061_v23 = vpop.permute.xlu1 %1060 }
 0x4a3   :  { %962 = vrot.lane.b32.xlu0 %v4187_v15, %s3891_s4  ;;  %v1066_v39 = vsel %vm564_vm13, %v1061_v23, 0 }
 0x4ab   :  { %1037 = vrot.lane.b32.xlu0 %v4108_v63, %s3881_s18 }
 0x4b3   :  { %1104 = vrot.lane.b32.xlu0 %v4119_v30, %s3881_s18 }
 0x4b8   :  { %1058 = vrot.lane.b32.xlu2 %v4126_v40, %s3881_s18 }
 0x4b9   :  { %1035 = vrot.lane.b32.xlu1 %v4131_v44, %s3881_s18 }
 0x4c0   :  { %1175 = vrot.lane.b32.xlu2 %v4136_v46, %s3881_s18 }
 0x4c1   :  { %1217 = vrot.lane.b32.xlu1 %v4164_v38, %s3881_s18 }
 0x4c8   :  { %1265 = vrot.lane.b32.xlu2 %v4108_v63, %s3892_s20 }
 0x4c9   :  { %1288 = vrot.lane.b32.xlu1 %v4102_v57, %s3892_s20 }
 0x4fa   :  { %v913_v28 = vpop.xlane.xlu0 %912 }
 0x4fb   :  { %3484 = vrcp.f32 %v913_v28 }
 0x501   :  { %v3485_v19 = vpop.eup %3484 }
 0x502   :  { %v927_v20 = vmul.f32 %v3485_v19, %v3477_v48 }
 0x504   :  { %v931_v22 = vpack.c.bf16 %v927_v20, %v927_v20 }
 0x506   :  { %2953 = vmatmul.msk.bf16.vlgmr.msra.gmra.mxu0 %vm641_vm15, %v931_v22 }
 0x50b   :  { %v916_v24 = vpop.xlane.xlu2 %915 }
 0x50c   :  { %3486 = vrcp.f32 %v916_v24 }
 0x50d   :  { %v1011_v29 = vpop.permute.xlu0 %1010 }
 0x50e   :  { %v1016_v31 = vsel %vm693_vm14, %v1011_v29, 0 }
 0x50f   :  { %1025 = vmatpush.bf16.msra.mxu3 %v1016_v31 }
 0x512   :  { %v3487_v63 = vpop.eup %3486 }
 0x513   :  { %1121 = vmatpush.bf16.xpose.msrb.mxu3 %v1112_v32  ;;  %v922_v57 = vpop.xlane.xlu1 %921  ;;  %v919_v33 = vpop.xlane.xlu2 %918  ;;  %v928_v34 = vmul.f32 %v3487_v63, %v3479_v58 }
 0x514   :  { %3488 = vrcp.f32 %v922_v57 }
 0x515   :  { %3490 = vrcp.f32 %v919_v33  ;;  %v963_v35 = vpop.permute.xlu0 %962  ;;  %v932_v43 = vpack.c.bf16 %v928_v34, %v928_v34 }
 0x516   :  { %v968_v26 = vsel %vm693_vm14, %v963_v35, 0 }
 0x517   :  { %977 = vmatpush.bf16.msra.mxu1 %v968_v26 }
 0x51a   :  { %v3489_v36 = vpop.eup %3488  ;;  %2954 = vmatmul.msk.bf16.vlgmr.msra.gmra.mxu1 %vm641_vm15, %v932_v43 }
 0x51b   :  { %1075 = vmatpush.bf16.xpose.msrb.mxu1 %v1066_v39  ;;  %v3491_v45 = vpop.eup %3490  ;;  %v930_v37 = vmul.f32 %v3489_v36, %v3483_v42  ;;  %v1059_v47 = vpop.permute.xlu2 %1058 }
 0x51c   :  { %v929_v48 = vmul.f32 %v3491_v45, %v3481_v7 }
 0x51d   :  { %v934_v11 = vpack.c.bf16 %v930_v37, %v930_v37  ;;  %v1038_v49 = vpop.permute.xlu0 %1037 }
 0x51e   :  { %v933_v50 = vpack.c.bf16 %v929_v48, %v929_v48  ;;  %v1043_v10 = vsel %vm564_vm13, %v1038_v49, 0 }
 0x51f   :  { %2956 = vmatmul.msk.bf16.vlgmr.msra.gmra.mxu3 %vm641_vm15, %v934_v11  ;;  %1052 = vmatpush.bf16.xpose.msrb.mxu0 %v1043_v10 }
 0x520   :  { %2955 = vmatmul.msk.bf16.vlgmr.msrb.gmra.mxu2 %vm641_vm15, %v933_v50 }
 0x523   :  { %v1176_v25 = vpop.permute.xlu2 %1175 }
 0x524   :  { %v1181_v51 = vsel %vm693_vm14, %v1176_v25, 0 }
 0x525   :  { %v1105_v54 = vpop.permute.xlu0 %1104 }
 0x527   :  { %1190 = vmatpush.bf16.msra.mxu0 %v1181_v51 }
 0x52a   :  { %2958 = vmatmul.msk.bf16.vlgmr.msrb.gmra.mxu1 %vm564_vm13, %v1059_v47 }
 0x52b   :  { %v1036_v17 = vpop.permute.xlu1 %1035  ;;  %v1266_v52 = vpop.permute.xlu2 %1265 }
 0x52c   :  { %v1271_v53 = vsel %vm564_vm13, %v1266_v52, 0  ;;  %2957 = vmatmul.msk.bf16.vlgmr.msrb.gmra.mxu0 %vm564_vm13, %v1036_v17 }
 0x52d   :  { %1280 = vmatpush.bf16.xpose.msrb.mxu0 %v1271_v53 }
 0x52f   :  { %2960 = vmatmul.msk.bf16.vlgmr.msrb.gmra.mxu3 %vm564_vm13, %v1105_v54 }
 0x530   :  { %2959 = vmatmul.msk.bf16.vlgmr.msra.gmra.mxu2 %vm564_vm13, %v1082_v21 }
 0x533   :  { %v1218_v55 = vpop.permute.xlu1 %1217 }
 0x534   :  { %v1223_v56 = vsel %vm693_vm14, %v1218_v55, 0 }
 0x535   :  { %1232 = vmatpush.bf16.msrb.mxu2 %v1223_v56 }
 0x53b   :  { %v1289_v43 = vpop.permute.xlu1 %1288 }
 0x53c   :  { %v1294_v37 = vsel %vm564_vm13, %v1289_v43, 0 }
 0x583   :  { %v4223_v58 = vpop.f32.mrf.mxu0 }
 0x58b   :  { %v957_v59 = vpop.f32.mrf.mxu0 }
 0x597   :  { %v4225_v61 = vpop.f32.mrf.mxu1 }
 0x59f   :  { %v981_v0 = vpop.f32.mrf.mxu1 }
 0x5a2   :  { %v4227_v1 = vpop.f32.mrf.mxu3 }
 0x5a3   :  { %v4229_v7 = vpop.f32.mrf.mxu2 }
 0x5a7   :  { %v4231_v8 = vpop.f32.mrf.mxu1 }
 0x5a8   :  { %v1130_v45 = vsel %vm641_vm15, %v4231_v8, -inf }
 0x5a9   :  { %v1054_v42 = vpop.f32.mrf.mxu0 }
 0x5aa   :  { %v1029_v9 = vpop.f32.mrf.mxu3  ;;  %v1127_v13 = vsel %vm641_vm15, %v1054_v42, -inf }
 0x5ab   :  { %v1005_v28 = vpop.f32.mrf.mxu2  ;;  %1128 = vmax.xlane.f32.xlu0 %v1127_v13 }
 0x5af   :  { %v1079_v19 = vpop.f32.mrf.mxu1 }
 0x5b1   :  { %v1056_v20 = vpop.f32.mrf.mxu0 }
 0x5b2   :  { %v1123_v21 = vpop.f32.mrf.mxu3 }
 0x5b3   :  { %v1100_v22 = vpop.f32.mrf.mxu2  ;;  %v1136_v31 = vsel %vm641_vm15, %v1123_v21, -inf }
 0x5b4   :  { %v1133_v23 = vsel %vm641_vm15, %v1100_v22, -inf }
 0x5b5   :  { %1134 = vmax.xlane.f32.xlu2 %v1133_v23 }
 0x5ba   :  { %v1125_v24 = vpop.f32.mrf.mxu3 }
 0x5bb   :  { %v1102_v29 = vpop.f32.mrf.mxu2 }
 0x5bf   :  { %1196 = vrot.lane.b32.xlu0 %v4187_v15, %s3881_s18 }
 0x5c7   :  { %1238 = vrot.lane.b32.xlu0 %v4179_v62, %s3881_s18 }
 0x5cd   :  { %1334 = vrot.lane.b32.xlu2 %v4086_v41, %s3892_s20 }
 0x5f1   :  { %1137 = vmax.xlane.f32.xlu0 %v1136_v31 }
 0x605   :  { %1311 = vrot.lane.b32.xlu0 %v4073_v18, %s3892_s20 }
 0x61e   :  { %v1129_v32 = vpop.xlane.xlu0 %1128 }
 0x61f   :  { %v1139_v63 = vsub.f32 %v1054_v42, %v1129_v32 }
 0x621   :  { %v1143_v57 = vmul.f32 1.442695, %v1139_v63 }
 0x623   :  { %3492 = vpow2.f32 %v1143_v57 }
 0x628   :  { %v1135_v33 = vpop.xlane.xlu2 %1134 }
 0x629   :  { %v3493_v34 = vpop.eup %3492  ;;  %v1141_v35 = vsub.f32 %v1100_v22, %v1135_v33 }
 0x62a   :  { %v1151_v26 = vsel %vm641_vm15, %v3493_v34, 0.0 }
 0x62b   :  { %v1147_v39 = vmul.f32 1.442695, %v1141_v35  ;;  %1152 = vadd.xlane.f32.xlu1 %v1151_v26 }
 0x62d   :  { %3494 = vpow2.f32 %v1147_v39 }
 0x630   :  { %v1335_v48 = vpop.permute.xlu2 %1334 }
 0x631   :  { %v1197_v41 = vpop.permute.xlu0 %1196  ;;  %v1340_v50 = vsel %vm564_vm13, %v1335_v48, 0 }
 0x632   :  { %v1202_v36 = vsel %vm693_vm14, %v1197_v41, 0 }
 0x633   :  { %v3495_v18 = vpop.eup %3494  ;;  %1211 = vmatpush.bf16.msra.mxu1 %v1202_v36  ;;  %1131 = vmax.xlane.f32.xlu1 %v1130_v45 }
 0x634   :  { %v1157_v47 = vsel %vm641_vm15, %v3495_v18, 0.0 }
 0x635   :  { %1158 = vadd.xlane.f32.xlu0 %v1157_v47 }
 0x637   :  { %1303 = vmatpush.bf16.xpose.msrb.mxu1 %v1294_v37 }
 0x639   :  { %v1239_v11 = vpop.permute.xlu0 %1238 }
 0x63a   :  { %v1244_v49 = vsel %vm693_vm14, %v1239_v11, 0  ;;  %v1032_v11 = vpack.c.bf16 %v4225_v61, %v4225_v61 }
 0x63b   :  { %1253 = vmatpush.bf16.msra.mxu3 %v1244_v49 }
 0x63c   :  { %v1496_v49 = vunpack.c.l.b16 %v1032_v11  ;;  %v1033_v11 = vpack.c.bf16 %v4229_v7, %v4229_v7 }
 0x63f   :  { %1349 = vmatpush.bf16.xpose.msrb.mxu3 %v1340_v50  ;;  %v1500_v50 = vpack.c.b16 %v1496_v49, %v1496_v49  ;;  %v1497_v49 = vunpack.c.l.b16 %v1033_v11  ;;  %v3323_v11 = vld [vmem:[#allocation15 + $0x20] sm:$0xff] }
 0x649   :  { %1286 = vrot.lane.b32.xlu0 %v4126_v40, %s3892_s20 }
 0x64c   :  { %1263 = vrot.lane.b32.xlu1 %v4131_v44, %s3892_s20 }
 0x664   :  { %v1138_v10 = vpop.xlane.xlu0 %1137 }
 0x665   :  { %v1142_v25 = vsub.f32 %v1123_v21, %v1138_v10 }
 0x667   :  { %v1149_v51 = vmul.f32 1.442695, %v1142_v25 }
 0x669   :  { %3496 = vpow2.f32 %v1149_v51 }
 0x66f   :  { %v3497_v17 = vpop.eup %3496 }
 0x670   :  { %v1160_v52 = vsel %vm641_vm15, %v3497_v17, 0.0 }
 0x676   :  { %1161 = vadd.xlane.f32.xlu1 %v1160_v52 }
 0x677   :  { %v1312_v53 = vpop.permute.xlu0 %1311 }
 0x678   :  { %v1317_v54 = vsel %vm564_vm13, %v1312_v53, 0 }
 0x679   :  { %1326 = vmatpush.bf16.xpose.msra.mxu2 %v1317_v54 }
 0x68f   :  { %1332 = vrot.lane.b32.xlu1 %v4119_v30, %s3892_s20 }
 0x69e   :  { %v1153_v55 = vpop.xlane.xlu1 %1152 }
 0x69f   :  { %3498 = vrcp.f32 %v1153_v55 }
 0x6a5   :  { %v3499_v40 = vpop.eup %3498 }
 0x6a6   :  { %v1167_v56 = vmul.f32 %v3499_v40, %v3493_v34  ;;  %v1132_v44 = vpop.xlane.xlu1 %1131 }
 0x6a7   :  { %v1140_v59 = vsub.f32 %v4231_v8, %v1132_v44 }
 0x6a8   :  { %v1171_v0 = vpack.c.bf16 %v1167_v56, %v1167_v56  ;;  %v1159_v42 = vpop.xlane.xlu0 %1158 }
 0x6a9   :  { %v1145_v9 = vmul.f32 1.442695, %v1140_v59  ;;  %3500 = vrcp.f32 %v1159_v42  ;;  %v1031_v42 = vpack.c.bf16 %v4223_v58, %v4223_v58 }
 0x6aa   :  { %2961 = vmatmul.msk.bf16.vlgmr.msra.gmra.mxu0 %vm641_vm15, %v1171_v0 }
 0x6ab   :  { %3502 = vpow2.f32 %v1145_v9  ;;  %v1495_v9 = vunpack.c.l.b16 %v1031_v42 }
 0x6af   :  { %v3501_v13 = vpop.eup %3500 }
 0x6b0   :  { %v1169_v28 = vmul.f32 %v3501_v13, %v3495_v18  ;;  %v1499_v13 = vpack.c.b16 %v1495_v9, %v1495_v9 }
 0x6b1   :  { %v3503_v19 = vpop.eup %3502 }
 0x6b2   :  { %v1173_v20 = vpack.c.bf16 %v1169_v28, %v1169_v28  ;;  %v1154_v30 = vsel %vm641_vm15, %v3503_v19, 0.0 }
 0x6b3   :  { %1155 = vadd.xlane.f32.xlu2 %v1154_v30 }
 0x6b4   :  { %2963 = vmatmul.msk.bf16.vlgmr.msrb.gmra.mxu2 %vm641_vm15, %v1173_v20 }
 0x6bb   :  { %v1287_v41 = vpop.permute.xlu0 %1286 }
 0x6be   :  { %v1264_v21 = vpop.permute.xlu1 %1263 }
 0x6bf   :  { %2965 = vmatmul.msk.bf16.vlgmr.msrb.gmra.mxu0 %vm564_vm13, %v1264_v21 }
 0x6cb   :  { %1309 = vrot.lane.b32.xlu2 %v4112_v6, %s3892_s20 }
 0x6e9   :  { %v1162_v8 = vpop.xlane.xlu1 %1161 }
 0x6ea   :  { %3504 = vrcp.f32 %v1162_v8 }
 0x6f0   :  { %v3505_v22 = vpop.eup %3504 }
 0x6f1   :  { %v1170_v23 = vmul.f32 %v3505_v22, %v3497_v17 }
 0x6f3   :  { %v1174_v24 = vpack.c.bf16 %v1170_v23, %v1170_v23 }
 0x6f5   :  { %2964 = vmatmul.msk.bf16.vlgmr.msra.gmra.mxu3 %vm641_vm15, %v1174_v24 }
 0x701   :  { %v1333_v29 = vpop.permute.xlu1 %1332 }
 0x705   :  { %2968 = vmatmul.msk.bf16.vlgmr.msrb.gmra.mxu3 %vm564_vm13, %v1333_v29 }
 0x726   :  { %v1156_v31 = vpop.xlane.xlu2 %1155 }
 0x727   :  { %3506 = vrcp.f32 %v1156_v31  ;;  %v1192_v32 = vpop.f32.mrf.mxu0 }
 0x728   :  { %v1259_v28 = vpack.c.bf16 %v1192_v32, %v1192_v32 }
 0x72d   :  { %v3507_v63 = vpop.eup %3506 }
 0x72e   :  { %v1168_v57 = vmul.f32 %v3507_v63, %v3503_v19  ;;  %v1310_v33 = vpop.permute.xlu2 %1309  ;;  %v1515_v19 = vunpack.c.l.b16 %v1259_v28 }
 0x72f   :  { %v1194_v34 = vpop.f32.mrf.mxu0  ;;  %2967 = vmatmul.msk.bf16.vlgmr.msra.gmra.mxu2 %vm564_vm13, %v1310_v33 }
 0x730   :  { %v1172_v6 = vpack.c.bf16 %v1168_v57, %v1168_v57  ;;  %v1519_v20 = vpack.c.b16 %v1515_v19, %v1515_v19 }
 0x732   :  { %2962 = vmatmul.msk.bf16.vlgmr.msra.gmra.mxu1 %vm641_vm15, %v1172_v6 }
 0x737   :  { %v4271_v35 = vpop.f32.mrf.mxu2 }
 0x73c   :  { %v1282_v26 = vpop.f32.mrf.mxu0 }
 0x73d   :  { %v1355_v39 = vsel %vm641_vm15, %v1282_v26, -inf }
 0x73e   :  { %1356 = vmax.xlane.f32.xlu0 %v1355_v39 }
 0x73f   :  { %v1236_v43 = vpop.f32.mrf.mxu2 }
 0x742   :  { %2966 = vmatmul.msk.bf16.vlgmr.msrb.gmra.mxu1 %vm564_vm13, %v1287_v41 }
 0x744   :  { %v1284_v36 = vpop.f32.mrf.mxu0 }
 0x778   :  { %v4275_v45 = vpop.f32.mrf.mxu3 }
 0x780   :  { %v1257_v18 = vpop.f32.mrf.mxu3 }
 0x788   :  { %v1351_v37 = vpop.f32.mrf.mxu3 }
 0x789   :  { %v1364_v47 = vsel %vm641_vm15, %v1351_v37, -inf }
 0x78a   :  { %1365 = vmax.xlane.f32.xlu0 %v1364_v47 }
 0x790   :  { %v1353_v48 = vpop.f32.mrf.mxu3 }
 0x79e   :  { %1403 = vrot.lane.b32.xlu0 %v4136_v46, %s3892_s20 }
 0x7a6   :  { %1445 = vrot.lane.b32.xlu0 %v4164_v38, %s3892_s20 }
 0x7ae   :  { %1505 = vrot.lane.b32.xlu0 %v1500_v50, %s3892_s20  ;;  %v1501_v50 = vpack.c.b16 %v1497_v49, %v1497_v49  ;;  %v3322_v49 = vld [vmem:[#allocation15 + $0x18] sm:$0xff] }
 0x7af   :  { %v1213_v10 = vpop.f32.mrf.mxu1 }
 0x7b0   :  { %v1260_v25 = vpack.c.bf16 %v1213_v10, %v1213_v10  ;;  %v1262_v10 = vpack.c.bf16 %v4275_v45, %v4275_v45 }
 0x7b1   :  { %v1357_v53 = vpop.xlane.xlu0 %1356 }
 0x7b2   :  { %v1516_v51 = vunpack.c.l.b16 %v1260_v25  ;;  %v1328_v17 = vpop.f32.mrf.mxu2  ;;  %v1367_v46 = vsub.f32 %v1282_v26, %v1357_v53  ;;  %v1518_v25 = vunpack.c.l.b16 %v1262_v10  ;;  %v3320_v10 = vld [vmem:[#allocation15 + $0x8] sm:$0xff] }
 0x7b3   :  { %v1361_v52 = vsel %vm641_vm15, %v1328_v17, -inf }
 0x7b4   :  { %1362 = vmax.xlane.f32.xlu1 %v1361_v52  ;;  %v1520_v54 = vpack.c.b16 %v1516_v51, %v1516_v51  ;;  %v1371_v40 = vmul.f32 1.442695, %v1367_v46  ;;  %v1522_v51 = vpack.c.b16 %v1518_v25, %v1518_v25  ;;  %v3319_v25 = vld [vmem:[#allocation15] sm:$0xff] }
 0x7b6   :  { %1525 = vrot.lane.b32.xlu0 %v1520_v54, %s3881_s18  ;;  %3508 = vpow2.f32 %v1371_v40 }
 0x7b7   :  { %v1215_v61 = vpop.f32.mrf.mxu1 }
 0x7ba   :  { %v1330_v55 = vpop.f32.mrf.mxu2 }
 0x7bc   :  { %v3509_v44 = vpop.eup %3508 }
 0x7bd   :  { %v1379_v0 = vsel %vm641_vm15, %v3509_v44, 0.0 }
 0x7bf   :  { %v1305_v38 = vpop.f32.mrf.mxu1 }
 0x7c0   :  { %v1358_v56 = vsel %vm641_vm15, %v1305_v38, -inf }
 0x7c1   :  { %1359 = vmax.xlane.f32.xlu2 %v1358_v56 }
 0x7c7   :  { %v1307_v59 = vpop.f32.mrf.mxu1 }
 0x7c9   :  { %1380 = vadd.xlane.f32.xlu2 %v1379_v0 }
 0x7e1   :  { %1424 = vrot.lane.b32.xlu2 %v4187_v15, %s3892_s20 }
 0x7e9   :  { %1503 = vrot.lane.b32.xlu2 %v1499_v13, %s3892_s20 }
 0x7f1   :  { %1523 = vrot.lane.b32.xlu2 %v1519_v20, %s3881_s18 }
 0x7fd   :  { %v1366_v30 = vpop.xlane.xlu0 %1365 }
 0x7fe   :  { %v1370_v33 = vsub.f32 %v1351_v37, %v1366_v30 }
 0x800   :  { %v1377_v26 = vmul.f32 1.442695, %v1370_v33 }
 0x810   :  { %v1404_v21 = vpop.permute.xlu0 %1403 }
 0x811   :  { %v1409_v8 = vsel %vm693_vm14, %v1404_v21, 0  ;;  %v767_v21 = vpack.c.bf16 %v4152_v60, %v4152_v60 }
 0x812   :  { %1418 = vmatpush.bf16.msra.mxu0 %v1409_v8 }
 0x818   :  { %v1446_v22 = vpop.permute.xlu0 %1445 }
 0x819   :  { %v1451_v58 = vsel %vm693_vm14, %v1446_v22, 0 }
 0x81a   :  { %1460 = vmatpush.bf16.msrb.mxu2 %v1451_v58 }
 0x827   :  { %v1363_v23 = vpop.xlane.xlu1 %1362 }
 0x828   :  { %v1369_v29 = vsub.f32 %v1328_v17, %v1363_v23 }
 0x82a   :  { %v1375_v32 = vmul.f32 1.442695, %v1369_v29 }
 0x834   :  { %v1360_v15 = vpop.xlane.xlu2 %1359 }
 0x835   :  { %v1368_v24 = vsub.f32 %v1305_v38, %v1360_v15  ;;  %v1034_v38 = vpack.c.bf16 %v4227_v1, %v4227_v1 }
 0x837   :  { %v1373_v31 = vmul.f32 1.442695, %v1368_v24  ;;  %v1498_v59 = vunpack.c.l.b16 %v1034_v38 }
 0x839   :  { %3510 = vpow2.f32 %v1373_v31  ;;  %v1502_v42 = vpack.c.b16 %v1498_v59, %v1498_v59  ;;  %v1261_v31 = vpack.c.bf16 %v4271_v35, %v4271_v35  ;;  %v770_v59 = vpack.c.bf16 %v4159_v27, %v4159_v27 }
 0x83c   :  { %v1381_v63 = vpop.xlane.xlu2 %1380 }
 0x83d   :  { %3512 = vrcp.f32 %v1381_v63  ;;  %v1517_v63 = vunpack.c.l.b16 %v1261_v31 }
 0x83e   :  { %3514 = vpow2.f32 %v1375_v32 }
 0x83f   :  { %v3511_v57 = vpop.eup %3510  ;;  %3516 = vpow2.f32 %v1377_v26 }
 0x840   :  { %v1382_v34 = vsel %vm641_vm15, %v3511_v57, 0.0 }
 0x841   :  { %1383 = vadd.xlane.f32.xlu1 %v1382_v34 }
 0x843   :  { %v3513_v6 = vpop.eup %3512 }
 0x844   :  { %v1395_v39 = vmul.f32 %v3513_v6, %v3509_v44  ;;  %v1425_v43 = vpop.permute.xlu2 %1424  ;;  %v3515_v41 = vpop.eup %3514  ;;  %v3326_v6 = vld [vmem:[#allocation15 + $0x38] sm:$0xff] }
 0x845   :  { %v1430_v36 = vsel %vm693_vm14, %v1425_v43, 0  ;;  %v1385_v47 = vsel %vm641_vm15, %v3515_v41, 0.0  ;;  %v3517_v37 = vpop.eup %3516  ;;  %1673 = vmatpush.bf16.msrb.mxu0 %v3326_v6 }
 0x846   :  { %v1399_v18 = vpack.c.bf16 %v1395_v39, %v1395_v39  ;;  %1439 = vmatpush.bf16.msra.mxu1 %v1430_v36  ;;  %v1388_v48 = vsel %vm641_vm15, %v3517_v37, 0.0  ;;  %v3325_v39 = vld [vmem:[#allocation15 + $0x30] sm:$0xff] }
 0x848   :  { %2969 = vmatmul.msk.bf16.vlgmr.msra.gmra.mxu0 %vm641_vm15, %v1399_v18 }
 0x849   :  { %1386 = vadd.xlane.f32.xlu1 %v1385_v47  ;;  %1674 = vmatpush.bf16.msrb.mxu0 %v3325_v39 }
 0x84c   :  { %v1504_v1 = vpop.permute.xlu2 %1503 }
 0x84d   :  { %v1553_v8 = vsel %vm564_vm13, %v767_v21, %v1504_v1 }
 0x851   :  { %1389 = vadd.xlane.f32.xlu1 %v1388_v48 }
 0x854   :  { %v1524_v30 = vpop.permute.xlu2 %1523 }
 0x855   :  { %v1565_v22 = vsel %vm1563_vm1, %v1553_v8, %v1524_v30 }
 0x86a   :  { %1466 = vrot.lane.b32.xlu1 %v4179_v62, %s3892_s20 }
 0x872   :  { %1507 = vrot.lane.b32.xlu1 %v1501_v50, %s3892_s20  ;;  %v3321_v50 = vld [vmem:[#allocation15 + $0x10] sm:$0xff] }
 0x87a   :  { %1529 = vrot.lane.b32.xlu1 %v1522_v51, %s3881_s18  ;;  %v1506_v51 = vpop.permute.xlu0 %1505 }
 0x8b4   :  { %v1384_v17 = vpop.xlane.xlu1 %1383 }
 0x8b5   :  { %3518 = vrcp.f32 %v1384_v17  ;;  %v1526_v17 = vpop.permute.xlu0 %1525 }
 0x8bb   :  { %v3519_v52 = vpop.eup %3518 }
 0x8bc   :  { %v1396_v53 = vmul.f32 %v3519_v52, %v3511_v57  ;;  %v1387_v54 = vpop.xlane.xlu1 %1386  ;;  %v1521_v57 = vpack.c.b16 %v1517_v63, %v1517_v63  ;;  %v768_v52 = vpack.c.bf16 %v4154_v14, %v4154_v14 }
 0x8bd   :  { %3520 = vrcp.f32 %v1387_v54 }
 0x8be   :  { %v1400_v7 = vpack.c.bf16 %v1396_v53, %v1396_v53  ;;  %v1556_v53 = vsel %vm564_vm13, %v768_v52, %v1506_v51  ;;  %v3355_v52 = vld [vmem:[#allocation21 + $0xcc] sm:$0xf0] }
 0x8bf   :  { %v1567_v54 = vsel %vm1563_vm1, %v1556_v53, %v1526_v17  ;;  %v3119_v17 = vld [vmem:[#allocation21 + $0xc0] sm:$0xf]  ;;  %v3353_v53 = vld [vmem:[#allocation21 + $0xc4] sm:$0xf] }
 0x8c0   :  { %2970 = vmatmul.msk.bf16.vlgmr.msra.gmra.mxu1 %vm641_vm15, %v1400_v7 }
 0x8c3   :  { %v3521_v62 = vpop.eup %3520 }
 0x8c4   :  { %v1397_v46 = vmul.f32 %v3521_v62, %v3515_v41  ;;  %v1390_v0 = vpop.xlane.xlu1 %1389  ;;  %v3324_v41 = vld [vmem:[#allocation15 + $0x28] sm:$0xff] }
 0x8c5   :  { %v1420_v61 = vpop.f32.mrf.mxu0  ;;  %3522 = vrcp.f32 %v1390_v0  ;;  %1675 = vmatpush.bf16.msrb.mxu0 %v3324_v41 }
 0x8c6   :  { %v1401_v55 = vpack.c.bf16 %v1397_v46, %v1397_v46  ;;  %v1487_v45 = vpack.c.bf16 %v1420_v61, %v1420_v61 }
 0x8c8   :  { %v1535_v40 = vunpack.c.l.b16 %v1487_v45  ;;  %2971 = vmatmul.msk.bf16.vlgmr.msrb.gmra.mxu2 %vm641_vm15, %v1401_v55  ;;  %v769_v55 = vpack.c.bf16 %v4156_v16, %v4156_v16 }
 0x8c9   :  { %1676 = vmatpush.bf16.msrb.mxu0 %v3323_v11  ;;  %v3360_v11 = vld [vmem:[#allocation21 + $0xf4] sm:$0xf0] }
 0x8ca   :  { %v1539_v56 = vpack.c.b16 %v1535_v40, %v1535_v40 }
 0x8cb   :  { %v3523_v9 = vpop.eup %3522 }
 0x8cc   :  { %1543 = vrot.lane.b32.xlu2 %v1539_v56, %s3891_s4  ;;  %v1398_v13 = vmul.f32 %v3523_v9, %v3517_v37 }
 0x8cd   :  { %v1422_v44 = vpop.f32.mrf.mxu0  ;;  %1677 = vmatpush.bf16.msrb.mxu0 %v3322_v49 }
 0x8ce   :  { %v1402_v20 = vpack.c.bf16 %v1398_v13, %v1398_v13 }
 0x8d1   :  { %1678 = vmatpush.bf16.msrb.mxu0 %v3321_v50 }
 0x8d4   :  { %1509 = vrot.lane.b32.xlu2 %v1502_v42, %s3892_s20 }
 0x8d5   :  { %1679 = vmatpush.bf16.msrb.mxu0 %v3320_v10  ;;  %v3358_v10 = vld [vmem:[#allocation21 + $0xec] sm:$0xf] }
 0x8d9   :  { %1680 = vmatpush.bf16.msrb.mxu0 %v3319_v25  ;;  %v3145_v25 = vld [vmem:[#allocation21 + $0xf8] sm:$0xf0] }
 0x8da   :  { %v3148_v51 = vor.u32 %v3358_v10, %v3145_v25  ;;  %v3339_v10 = vld [vmem:[#allocation21 + $0x4c] sm:$0xf0] }
 0x8dc   :  { %v1467_v28 = vpop.permute.xlu1 %1466 }
 0x8dd   :  { %v1472_v19 = vsel %vm693_vm14, %v1467_v28, 0  ;;  %2083 = vmatpush.bf16.msra.mxu0 %v3148_v51  ;;  %v3337_v51 = vld [vmem:[#allocation21 + $0x44] sm:$0xf] }
 0x8de   :  { %1481 = vmatpush.bf16.msra.mxu3 %v1472_v19  ;;  %v3446_v19 = vld [vmem:[#allocation16] ss:$0 sm:$0xff] }
 0x8e1   :  { %2972 = vmatmul.msk.bf16.vlgmr.msra.gmra.mxu3 %vm641_vm15, %v1402_v20 }
 0x8e4   :  { %v1508_v61 = vpop.permute.xlu1 %1507 }
 0x8e5   :  { %v1559_v45 = vsel %vm564_vm13, %v769_v55, %v1508_v61 }
 0x8ec   :  { %v1530_v42 = vpop.permute.xlu1 %1529 }
 0x926   :  { %v1544_v58 = vpop.permute.xlu2 %1543 }
 0x927   :  { %v1574_v23 = vsel %vm1572_vm0, %v1565_v22, %v1544_v58 }
 0x928   :  { %1585 = vst [vmem:[#allocation5] sm:$0xf] %v1574_v23 }
 0x92e   :  { %v1510_v62 = vpop.permute.xlu2 %1509 }
 0x92f   :  { %v1562_v0 = vsel %vm564_vm13, %v770_v59, %v1510_v62  ;;  %v3127_v62 = vld [vmem:[#allocation21 + $0xc8] sm:$0xf] }
 0x930   :  { %v1571_v9 = vsel %vm1563_vm1, %v1562_v0, %v1530_v42  ;;  %v3105_v0 = vld [vmem:[#allocation21 + $0xb0] sm:$0xf0]  ;;  %v3111_v42 = vld [vmem:[#allocation21 + $0xa8] sm:$0xf] }
 0x93d   :  { %v1441_v15 = vpop.f32.mrf.mxu1 }
 0x93e   :  { %v1488_v24 = vpack.c.bf16 %v1441_v15, %v1441_v15 }
 0x940   :  { %v1536_v29 = vunpack.c.l.b16 %v1488_v24 }
 0x942   :  { %v1540_v32 = vpack.c.b16 %v1536_v29, %v1536_v29 }
 0x944   :  { %1545 = vrot.lane.b32.xlu0 %v1540_v32, %s3891_s4 }
 0x945   :  { %v1443_v60 = vpop.f32.mrf.mxu1 }
 0x94b   :  { %v1462_v33 = vpop.f32.mrf.mxu2 }
 0x94c   :  { %v1489_v34 = vpack.c.bf16 %v1462_v33, %v1462_v33  ;;  %1527 = vrot.lane.b32.xlu0 %v1521_v57, %s3881_s18 }
 0x94e   :  { %v1537_v26 = vunpack.c.l.b16 %v1489_v34 }
 0x950   :  { %v1541_v43 = vpack.c.b16 %v1537_v26, %v1537_v26 }
 0x952   :  { %1547 = vrot.lane.b32.xlu2 %v1541_v43, %s3891_s4 }
 0x953   :  { %v1464_v35 = vpop.f32.mrf.mxu2 }
 0x954   :  { %v3135_v35 = vld [vmem:[#allocation21 + $0xe0] sm:$0xf] }
 0x964   :  { %v1483_v36 = vpop.f32.mrf.mxu3 }
 0x965   :  { %v1490_v18 = vpack.c.bf16 %v1483_v36, %v1483_v36  ;;  %v3359_v36 = vld [vmem:[#allocation21 + $0xec] sm:$0xf0] }
 0x967   :  { %v1538_v47 = vunpack.c.l.b16 %v1490_v18  ;;  %v3357_v18 = vld [vmem:[#allocation21 + $0xe4] sm:$0xf] }
 0x969   :  { %v1542_v37 = vpack.c.b16 %v1538_v47, %v1538_v47  ;;  %v3136_v47 = vor.u32 %v3359_v36, %v3135_v35  ;;  %v3344_v35 = vld [vmem:[#allocation21 + $0x74] sm:$0xf0] }
 0x96b   :  { %1549 = vrot.lane.b32.xlu0 %v1542_v37, %s3891_s4  ;;  %v3137_v37 = vld [vmem:[#allocation21 + $0xf0] sm:$0xf0]  ;;  %2026 = vmatpush.bf16.msrb.mxu1 %v3136_v47 }
 0x96c   :  { %v1485_v48 = vpop.f32.mrf.mxu3  ;;  %v3140_v49 = vor.u32 %v3357_v18, %v3137_v37  ;;  %v3342_v37 = vld [vmem:[#allocation21 + $0x6c] sm:$0xf] }
 0x96d   :  { %v3143_v48 = vld [vmem:[#allocation21 + $0xe8] sm:$0xf] }
 0x96e   :  { %v3144_v50 = vor.u32 %v3360_v11, %v3143_v48  ;;  %2045 = vmatpush.bf16.msra.mxu2 %v3140_v49  ;;  %v3081_v48 = vld [vmem:[#allocation21 + $0x78] sm:$0xf0] }
 0x96f   :  { %v3084_v11 = vor.u32 %v3342_v37, %v3081_v48  ;;  %v3447_v37 = vld [vmem:[#allocation18] ss:$0 sm:$0xff] }
 0x970   :  { %2064 = vmatpush.bf16.msrb.mxu3 %v3144_v50  ;;  %v3055_v50 = vld [vmem:[#allocation21 + $0x40] sm:$0xf] }
 0x971   :  { %v3056_v25 = vor.u32 %v3339_v10, %v3055_v50  ;;  %v3448_v10 = vld [vmem:[#allocation19] ss:$0 sm:$0xff] }
 0x9ac   :  { %v1548_v38 = vpop.permute.xlu2 %1547 }
 0x9b6   :  { %v1546_v7 = vpop.permute.xlu0 %1545 }
 0x9b7   :  { %v1577_v46 = vsel %vm1572_vm0, %v1567_v54, %v1546_v7  ;;  %v3120_v54 = vor.u32 %v3355_v52, %v3119_v17  ;;  %v3121_v7 = vld [vmem:[#allocation21 + $0xd0] sm:$0xf0]  ;;  %v3063_v52 = vld [vmem:[#allocation21 + $0x48] sm:$0xf] }
 0x9b8   :  { %1586 = vst [vmem:[#allocation5 + $0x4] sm:$0xf] %v1577_v46  ;;  %v3356_v46 = vld [vmem:[#allocation21 + $0xd4] sm:$0xf0]  ;;  %v3124_v61 = vor.u32 %v3353_v53, %v3121_v7  ;;  %v3057_v17 = vld [vmem:[#allocation21 + $0x50] sm:$0xf0] }
 0x9b9   :  { %v3128_v55 = vor.u32 %v3356_v46, %v3127_v62  ;;  %2027 = vmatpush.bf16.msrb.mxu1 %v3120_v54  ;;  %v3060_v53 = vor.u32 %v3337_v51, %v3057_v17  ;;  %v3340_v54 = vld [vmem:[#allocation21 + $0x54] sm:$0xf0]  ;;  %v3338_v7 = vld [vmem:[#allocation21 + $0x4c] sm:$0xf]  ;;  %v3065_v62 = vld [vmem:[#allocation21 + $0x58] sm:$0xf0] }
 0x9ba   :  { %2046 = vmatpush.bf16.msra.mxu2 %v3124_v61  ;;  %v3064_v46 = vor.u32 %v3340_v54, %v3063_v52  ;;  %v3068_v61 = vor.u32 %v3338_v7, %v3065_v62 }
 0x9bb   :  { %2065 = vmatpush.bf16.msrb.mxu3 %v3128_v55  ;;  %v3039_v55 = vld [vmem:[#allocation21 + $0x20] sm:$0xf] }
 0x9be   :  { %v1528_v40 = vpop.permute.xlu0 %1527 }
 0x9bf   :  { %v1569_v56 = vsel %vm1563_vm1, %v1559_v45, %v1528_v40  ;;  %v3317_v14 = vld [vmem:[#allocation5] sm:$0xff]  ;;  %v3354_v45 = vld [vmem:[#allocation21 + $0xcc] sm:$0xf] }
 0x9c0   :  { %v1580_v44 = vsel %vm1572_vm0, %v1569_v56, %v1548_v38  ;;  %1681 = vmatmul.bf16.vlgmr.msrb.gmra.mxu0 %v3317_v14  ;;  %v3129_v40 = vld [vmem:[#allocation21 + $0xd8] sm:$0xf0]  ;;  %v3103_v56 = vld [vmem:[#allocation21 + $0xa0] sm:$0xf]  ;;  %v3351_v14 = vld [vmem:[#allocation21 + $0xac] sm:$0xf0] }
 0x9c1   :  { %1587 = vst [vmem:[#allocation5 + $0x8] sm:$0xf] %v1580_v44  ;;  %v3132_v38 = vor.u32 %v3354_v45, %v3129_v40  ;;  %v3349_v44 = vld [vmem:[#allocation21 + $0xa4] sm:$0xf]  ;;  %v3104_v59 = vor.u32 %v3351_v14, %v3103_v56  ;;  %v3335_v45 = vld [vmem:[#allocation21 + $0x2c] sm:$0xf0] }
 0x9c2   :  { %v3333_v40 = vld [vmem:[#allocation21 + $0x24] sm:$0xf]  ;;  %v3040_v56 = vor.u32 %v3335_v45, %v3039_v55  ;;  %v3041_v14 = vld [vmem:[#allocation21 + $0x30] sm:$0xf0] }
 0x9c3   :  { %2084 = vmatpush.bf16.msra.mxu0 %v3132_v38  ;;  %2028 = vmatpush.bf16.msrb.mxu1 %v3104_v59  ;;  %v3336_v59 = vld [vmem:[#allocation21 + $0x34] sm:$0xf0] }
 0x9dd   :  { %v1550_v16 = vpop.permute.xlu0 %1549 }
 0x9de   :  { %v1583_v13 = vsel %vm1572_vm0, %v1571_v9, %v1550_v16  ;;  %v3352_v9 = vld [vmem:[#allocation21 + $0xb4] sm:$0xf0]  ;;  %v3108_v16 = vor.u32 %v3349_v44, %v3105_v0  ;;  %v3047_v44 = vld [vmem:[#allocation21 + $0x28] sm:$0xf] }
 0x9df   :  { %1588 = vst [vmem:[#allocation5 + $0xc] sm:$0xf] %v1583_v13  ;;  %v3112_v13 = vor.u32 %v3352_v9, %v3111_v42  ;;  %v3044_v42 = vor.u32 %v3333_v40, %v3041_v14  ;;  %v3048_v9 = vor.u32 %v3336_v59, %v3047_v44 }
 0x9e0   :  { %2047 = vmatpush.bf16.msra.mxu2 %v3108_v16  ;;  %v3334_v16 = vld [vmem:[#allocation21 + $0x2c] sm:$0xf] }
 0x9e1   :  { %2066 = vmatpush.bf16.msrb.mxu3 %v3112_v13  ;;  %v3049_v13 = vld [vmem:[#allocation21 + $0x38] sm:$0xf0] }
 0x9e6   :  { %v3318_v28 = vld [vmem:[#allocation5 + $0x8] sm:$0xff] }
 0x9e7   :  { %1686 = vmatmul.bf16.gmra.mxu0 %v3318_v28  ;;  %v3350_v28 = vld [vmem:[#allocation21 + $0xac] sm:$0xf] }
 0xa3d   :  { %v1682_v20 = vpop.f32.mrf.mxu0 }
 0xa3e   :  { %v1683_v1 = vadd.f32 %v3446_v19, %v1682_v20 }
 0xa40   :  { %v4345_v30 = vadd.f32 %v4005_v3, %v1683_v1  ;;  %v3087_v1 = vld [vmem:[#allocation21 + $0x80] sm:$0xf] }
 0xa42   :  { %1702 = vadd.xlane.f32.xlu1 %v4345_v30 }
 0xa45   :  { %v1684_v27 = vpop.f32.mrf.mxu0 }
 0xa46   :  { %v1685_v21 = vadd.f32 %v3446_v19, %v1684_v27  ;;  %v3347_v27 = vld [vmem:[#allocation21 + $0x8c] sm:$0xf0] }
 0xa48   :  { %v4349_v8 = vadd.f32 %v4011_v5, %v1685_v21  ;;  %v3345_v21 = vld [vmem:[#allocation21 + $0x84] sm:$0xf] }
 0xa4a   :  { %1704 = vadd.xlane.f32.xlu2 %v4349_v8 }
 0xa64   :  { %v1687_v22 = vpop.f32.mrf.mxu0 }
 0xa65   :  { %v1688_v58 = vadd.f32 %v3446_v19, %v1687_v22  ;;  %v3088_v22 = vor.u32 %v3347_v27, %v3087_v1  ;;  %v3023_v1 = vld [vmem:[#allocation21] sm:$0xf]  ;;  %v3331_v27 = vld [vmem:[#allocation21 + $0xc] sm:$0xf0] }
 0xa67   :  { %v4353_v23 = vadd.f32 %v4003_v2, %v1688_v58  ;;  %v3089_v58 = vld [vmem:[#allocation21 + $0x90] sm:$0xf0]  ;;  %2029 = vmatpush.bf16.msrb.mxu1 %v3088_v22  ;;  %v3024_v22 = vor.u32 %v3331_v27, %v3023_v1 }
 0xa69   :  { %1706 = vadd.xlane.f32.xlu0 %v4353_v23 }
 0xa6c   :  { %v1689_v15 = vpop.f32.mrf.mxu0 }
 0xa6d   :  { %v1690_v24 = vadd.f32 %v3446_v19, %v1689_v15  ;;  %v3113_v19 = vld [vmem:[#allocation21 + $0xb8] sm:$0xf0]  ;;  %v3095_v15 = vld [vmem:[#allocation21 + $0x88] sm:$0xf] }
 0xa6e   :  { %v3116_v20 = vor.u32 %v3350_v28, %v3113_v19  ;;  %v3052_v28 = vor.u32 %v3334_v16, %v3049_v13 }
 0xa6f   :  { %v4357_v3 = vadd.f32 %v4009_v4, %v1690_v24  ;;  %v3348_v24 = vld [vmem:[#allocation21 + $0x94] sm:$0xf0] }
 0xa70   :  { %2085 = vmatpush.bf16.msra.mxu0 %v3116_v20 }
 0xa71   :  { %1708 = vadd.xlane.f32.xlu1 %v4357_v3 }
 0xab5   :  { %v1703_v29 = vpop.xlane.xlu1 %1702 }
 0xab6   :  { %v1710_v5 = vmul.f32 %v1703_v29, %v4015_v12  ;;  %v3092_v29 = vor.u32 %v3345_v21, %v3089_v58  ;;  %v3329_v58 = vld [vmem:[#allocation21 + $0x4] sm:$0xf] }
 0xab8   :  { %v4362_v31 = vsub.f32 %v4345_v30, %v1710_v5  ;;  %v3096_v5 = vor.u32 %v3348_v24, %v3095_v15  ;;  %2048 = vmatpush.bf16.msra.mxu2 %v3092_v29  ;;  %v3025_v15 = vld [vmem:[#allocation21 + $0x10] sm:$0xf0]  ;;  %v3031_v24 = vld [vmem:[#allocation21 + $0x8] sm:$0xf] }
 0xab9   :  { %v3028_v29 = vor.u32 %v3329_v58, %v3025_v15 }
 0xaba   :  { %v1718_v32 = vmul.f32 %v4362_v31, %v4362_v31  ;;  %2067 = vmatpush.bf16.msrb.mxu3 %v3096_v5  ;;  %v3332_v5 = vld [vmem:[#allocation21 + $0x14] sm:$0xf0] }
 0xabc   :  { %1722 = vadd.xlane.f32.xlu2 %v1718_v32  ;;  %v3346_v32 = vld [vmem:[#allocation21 + $0x8c] sm:$0xf] }
 0xabd   :  { %v1705_v2 = vpop.xlane.xlu2 %1704 }
 0xabe   :  { %v1711_v60 = vmul.f32 %v1705_v2, %v4015_v12  ;;  %v3097_v2 = vld [vmem:[#allocation21 + $0x98] sm:$0xf0] }
 0xac0   :  { %v4368_v63 = vsub.f32 %v4349_v8, %v1711_v60  ;;  %v3100_v60 = vor.u32 %v3346_v32, %v3097_v2  ;;  %v3330_v32 = vld [vmem:[#allocation21 + $0xc] sm:$0xf] }
 0xac2   :  { %v1719_v4 = vmul.f32 %v4368_v63, %v4368_v63  ;;  %2086 = vmatpush.bf16.msra.mxu0 %v3100_v60  ;;  %v3032_v60 = vor.u32 %v3332_v5, %v3031_v24 }
 0xac4   :  { %1724 = vadd.xlane.f32.xlu0 %v1719_v4  ;;  %v3071_v4 = vld [vmem:[#allocation21 + $0x60] sm:$0xf] }
 0xac6   :  { %2087 = vmatpush.bf16.msra.mxu0 %v3084_v11 }
 0xaca   :  { %2088 = vmatpush.bf16.msra.mxu0 %v3068_v61 }
 0xace   :  { %2089 = vmatpush.bf16.msra.mxu0 %v3052_v28 }
 0xadc   :  { %v1707_v57 = vpop.xlane.xlu0 %1706 }
 0xadd   :  { %v1712_v33 = vmul.f32 %v1707_v57, %v4015_v12  ;;  %v3343_v57 = vld [vmem:[#allocation21 + $0x6c] sm:$0xf0] }
 0xadf   :  { %v4374_v34 = vsub.f32 %v4353_v23, %v1712_v33  ;;  %v3341_v33 = vld [vmem:[#allocation21 + $0x64] sm:$0xf] }
 0xae1   :  { %v1720_v6 = vmul.f32 %v4374_v34, %v4374_v34 }
 0xae3   :  { %1726 = vadd.xlane.f32.xlu1 %v1720_v6 }
 0xae4   :  { %v1709_v26 = vpop.xlane.xlu1 %1708 }
 0xae5   :  { %v1713_v39 = vmul.f32 %v1709_v26, %v4015_v12  ;;  %v3072_v26 = vor.u32 %v3343_v57, %v3071_v4  ;;  %v3033_v4 = vld [vmem:[#allocation21 + $0x18] sm:$0xf0] }
 0xae6   :  { %v3036_v57 = vor.u32 %v3330_v32, %v3033_v4 }
 0xae7   :  { %v4380_v43 = vsub.f32 %v4357_v3, %v1713_v39  ;;  %v3073_v39 = vld [vmem:[#allocation21 + $0x70] sm:$0xf0]  ;;  %2030 = vmatpush.bf16.msrb.mxu1 %v3072_v26 }
 0xae8   :  { %v3076_v18 = vor.u32 %v3341_v33, %v3073_v39  ;;  %2090 = vmatpush.bf16.msra.mxu0 %v3036_v57 }
 0xae9   :  { %v1721_v41 = vmul.f32 %v4380_v43, %v4380_v43 }
 0xaea   :  { %2049 = vmatpush.bf16.msra.mxu2 %v3076_v18 }
 0xaeb   :  { %1728 = vadd.xlane.f32.xlu2 %v1721_v41  ;;  %v3079_v41 = vld [vmem:[#allocation21 + $0x68] sm:$0xf]  ;;  %2031 = vmatpush.bf16.msrb.mxu1 %v3056_v25 }
 0xaec   :  { %v3080_v47 = vor.u32 %v3344_v35, %v3079_v41 }
 0xaee   :  { %2068 = vmatpush.bf16.msrb.mxu3 %v3080_v47  ;;  %2050 = vmatpush.bf16.msra.mxu2 %v3060_v53 }
 0xaef   :  { %2032 = vmatpush.bf16.msrb.mxu1 %v3040_v56 }
 0xaf2   :  { %2069 = vmatpush.bf16.msrb.mxu3 %v3064_v46  ;;  %2051 = vmatpush.bf16.msra.mxu2 %v3044_v42 }
 0xaf3   :  { %2033 = vmatpush.bf16.msrb.mxu1 %v3024_v22 }
 0xaf6   :  { %2070 = vmatpush.bf16.msrb.mxu3 %v3048_v9  ;;  %2052 = vmatpush.bf16.msra.mxu2 %v3028_v29  ;;  %v3368_v29 = vld [vmem:[#allocation22 + $0x38] sm:$0xff] }
 0xaf7   :  { %2706 = vmatpush.bf16.msra.mxu1 %v3368_v29  ;;  %v3372_v29 = vld [vmem:[#allocation22 + $0x58] sm:$0xff] }
 0xafa   :  { %2071 = vmatpush.bf16.msrb.mxu3 %v3032_v60 }
 0xb2f   :  { %v1723_v6 = vpop.xlane.xlu2 %1722 }
 0xb30   :  { %v1730_v36 = vmul.f32 %v1723_v6, %v4015_v12 }
 0xb32   :  { %v4385_v49 = vadd.f32 1e-05, %v1730_v36 }
 0xb34   :  { %3524 = vrsqrt.f32 %v4385_v49  ;;  %vm1744_vm3 = vweird.f32 %v4385_v49 }
 0xb37   :  { %v1725_v38 = vpop.xlane.xlu0 %1724 }
 0xb38   :  { %v1731_v0 = vmul.f32 %v1725_v38, %v4015_v12 }
 0xb3a   :  { %v3525_v19 = vpop.eup %3524  ;;  %v1735_v20 = vadd.f32 1e-05, %v1731_v0 }
 0xb3b   :  { %v1739_v21 = vmul.f32 %v3525_v19, %v4385_v49  ;;  %vm1745_vm2 = vweird.f32 %v3525_v19 }
 0xb3c   :  { %3526 = vrsqrt.f32 %v1735_v20  ;;  %vm1746_vm4 = vmor %vm1744_vm3, %vm1745_vm2  ;;  %vm1754_vm6 = vweird.f32 %v1735_v20 }
 0xb3d   :  { %v1740_v2 = vmul.f32 %v3525_v19, %v1739_v21 }
 0xb3f   :  { %v1741_v33 = vmul.f32 0.5, %v1740_v2 }
 0xb41   :  { %v1742_v6 = vsub.f32 1.5, %v1741_v33  ;;  %v3367_v33 = vld [vmem:[#allocation22 + $0x30] sm:$0xff] }
 0xb42   :  { %v3527_v26 = vpop.eup %3526  ;;  %2707 = vmatpush.bf16.msra.mxu1 %v3367_v33 }
 0xb43   :  { %v1743_v39 = vmul.f32 %v3525_v19, %v1742_v6  ;;  %v1749_v41 = vmul.f32 %v3527_v26, %v1735_v20  ;;  %vm1755_vm5 = vweird.f32 %v3527_v26  ;;  %v3391_v6 = vld [vmem:[#allocation22 + $0xf0] sm:$0xff] }
 0xb44   :  { %vm1756_vm7 = vmor %vm1754_vm6, %vm1755_vm5 }
 0xb45   :  { %v1750_v35 = vmul.f32 %v3527_v26, %v1749_v41  ;;  %v1747_v36 = vsel %vm1746_vm4, %v3525_v19, %v1743_v39 }
 0xb46   :  { %v1778_v48 = vmul.f32 %v1747_v36, %v4362_v31  ;;  %v3384_v36 = vld [vmem:[#allocation22 + $0xb8] sm:$0xff] }
 0xb47   :  { %v1751_v18 = vmul.f32 0.5, %v1750_v35  ;;  %v3376_v35 = vld [vmem:[#allocation22 + $0x78] sm:$0xff]  ;;  %2744 = vmatpush.bf16.msra.mxu3 %v3384_v36 }
 0xb48   :  { %v1785_v25 = vmul.f32 %v3447_v37, %v1778_v48  ;;  %2725 = vmatpush.bf16.msrb.mxu2 %v3376_v35 }
 0xb49   :  { %v1752_v47 = vsub.f32 1.5, %v1751_v18 }
 0xb4a   :  { %v1792_v52 = vadd.f32 %v3448_v10, %v1785_v25 }
 0xb4b   :  { %v1753_v11 = vmul.f32 %v3527_v26, %v1752_v47 }
 0xb4d   :  { %v1757_v50 = vsel %vm1756_vm7, %v3527_v26, %v1753_v11  ;;  %v3366_v11 = vld [vmem:[#allocation22 + $0x28] sm:$0xff] }
 0xb4e   :  { %v1779_v51 = vmul.f32 %v1757_v50, %v4368_v63  ;;  %v3390_v50 = vld [vmem:[#allocation22 + $0xe8] sm:$0xff]  ;;  %2708 = vmatpush.bf16.msra.mxu1 %v3366_v11  ;;  %v3371_v11 = vld [vmem:[#allocation22 + $0x50] sm:$0xff] }
 0xb50   :  { %v1786_v17 = vmul.f32 %v3447_v37, %v1779_v51 }
 0xb52   :  { %v1793_v49 = vadd.f32 %v3448_v10, %v1786_v17 }
 0xb54   :  { %v3404_v53 = vpack.c.bf16 %v1793_v49, %v1792_v52  ;;  %v3375_v49 = vld [vmem:[#allocation22 + $0x70] sm:$0xff] }
 0xb55   :  { %2726 = vmatpush.bf16.msrb.mxu2 %v3375_v49 }
 0xb56   :  { %3405 = vst [vmem:[#allocation3] sm:$0xff] %v3404_v53   ;;  %v1727_v54 = vpop.xlane.xlu1 %1726  ;;  %v3383_v53 = vld [vmem:[#allocation22 + $0xb0] sm:$0xff] }
 0xb57   :  { %v1732_v7 = vmul.f32 %v1727_v54, %v4015_v12  ;;  %2745 = vmatpush.bf16.msra.mxu3 %v3383_v53  ;;  %v3361_v53 = vld [vmem:[#allocation22] sm:$0xff] }
 0xb59   :  { %v1736_v62 = vadd.f32 1e-05, %v1732_v7 }
 0xb5b   :  { %3528 = vrsqrt.f32 %v1736_v62  ;;  %vm1764_vm9 = vweird.f32 %v1736_v62 }
 0xb5d   :  { %v3327_v46 = vld [vmem:[#allocation3] sm:$0xff] }
 0xb5e   :  { %v1729_v31 = vpop.xlane.xlu2 %1728  ;;  %2034 = vmatmul.bf16.vlgmr.msrb.gmra.mxu1 %v3327_v46  ;;  %2053 = vmatmul.bf16.vlgmr.msra.gmra.mxu2 %v3327_v46 }
 0xb5f   :  { %v1733_v61 = vmul.f32 %v1729_v31, %v4015_v12  ;;  %2072 = vmatmul.bf16.vlgmr.msrb.gmra.mxu3 %v3327_v46  ;;  %2091 = vmatmul.bf16.vlgmr.msra.gmra.mxu0 %v3327_v46  ;;  %v3365_v31 = vld [vmem:[#allocation22 + $0x20] sm:$0xff] }
 0xb60   :  { %2709 = vmatpush.bf16.msra.mxu1 %v3365_v31 }
 0xb61   :  { %v3529_v55 = vpop.eup %3528  ;;  %v1737_v63 = vadd.f32 1e-05, %v1733_v61  ;;  %v3389_v61 = vld [vmem:[#allocation22 + $0xe0] sm:$0xff] }
 0xb62   :  { %v1759_v45 = vmul.f32 %v3529_v55, %v1736_v62  ;;  %vm1765_vm8 = vweird.f32 %v3529_v55 }
 0xb63   :  { %3530 = vrsqrt.f32 %v1737_v63  ;;  %vm1766_vm10 = vmor %vm1764_vm9, %vm1765_vm8  ;;  %vm1774_vm12 = vweird.f32 %v1737_v63 }
 0xb64   :  { %v1760_v40 = vmul.f32 %v3529_v55, %v1759_v45 }
 0xb66   :  { %v1761_v38 = vmul.f32 0.5, %v1760_v40 }
 0xb68   :  { %v1762_v56 = vsub.f32 1.5, %v1761_v38  ;;  %v3374_v38 = vld [vmem:[#allocation22 + $0x68] sm:$0xff] }
 0xb69   :  { %v3531_v14 = vpop.eup %3530  ;;  %2727 = vmatpush.bf16.msrb.mxu2 %v3374_v38  ;;  %v3378_v38 = vld [vmem:[#allocation22 + $0x88] sm:$0xff] }
 0xb6a   :  { %v1763_v44 = vmul.f32 %v3529_v55, %v1762_v56  ;;  %v1769_v59 = vmul.f32 %v3531_v14, %v1737_v63  ;;  %vm1775_vm11 = vweird.f32 %v3531_v14  ;;  %v3382_v56 = vld [vmem:[#allocation22 + $0xa8] sm:$0xff] }
 0xb6b   :  { %vm1776_vm13 = vmor %vm1774_vm12, %vm1775_vm11  ;;  %2746 = vmatpush.bf16.msra.mxu3 %v3382_v56 }
 0xb6c   :  { %v1770_v0 = vmul.f32 %v3531_v14, %v1769_v59  ;;  %v1767_v42 = vsel %vm1766_vm10, %v3529_v55, %v1763_v44 }
 0xb6d   :  { %v1780_v16 = vmul.f32 %v1767_v42, %v4374_v34  ;;  %v1844_v34 = vld [vmem:[%s4784_s10] sm:$0xf] }
 0xb6e   :  { %v1771_v12 = vmul.f32 0.5, %v1770_v0  ;;  %v4400_v15 = vperm.slane %v1844_v34, 0  ;;  %v4402_v24 = vperm.slane %v1844_v34, 3  ;;  %v4411_v57 = vperm.slane %v1844_v34, 1 }
 0xb6f   :  { %v1787_v19 = vmul.f32 %v3447_v37, %v1780_v16  ;;  %v4414_v39 = vperm.slane %v1844_v34, 2  ;;  %v3388_v16 = vld [vmem:[#allocation22 + $0xd8] sm:$0xff] }
 0xb70   :  { %v1772_v9 = vsub.f32 1.5, %v1771_v12 }
 0xb71   :  { %v1794_v27 = vadd.f32 %v3448_v10, %v1787_v19 }
 0xb72   :  { %v1773_v13 = vmul.f32 %v3531_v14, %v1772_v9  ;;  %v3364_v9 = vld [vmem:[#allocation22 + $0x18] sm:$0xff] }
 0xb73   :  { %2710 = vmatpush.bf16.msra.mxu1 %v3364_v9 }
 0xb74   :  { %v1777_v28 = vsel %vm1776_vm13, %v3531_v14, %v1773_v13  ;;  %v3373_v13 = vld [vmem:[#allocation22 + $0x60] sm:$0xff] }
 0xb75   :  { %v1781_v20 = vmul.f32 %v1777_v28, %v4380_v43  ;;  %v3392_v43 = vld [vmem:[#allocation22 + $0xf8] sm:$0xff]  ;;  %v3381_v28 = vld [vmem:[#allocation22 + $0xa0] sm:$0xff]  ;;  %2728 = vmatpush.bf16.msrb.mxu2 %v3373_v13 }
 0xb76   :  { %2763 = vmatpush.bf16.msrb.mxu0 %v3392_v43  ;;  %2747 = vmatpush.bf16.msra.mxu3 %v3381_v28  ;;  %v3380_v43 = vld [vmem:[#allocation22 + $0x98] sm:$0xff] }
 0xb77   :  { %v1788_v1 = vmul.f32 %v3447_v37, %v1781_v20 }
 0xb79   :  { %v1795_v21 = vadd.f32 %v3448_v10, %v1788_v1  ;;  %v3363_v1 = vld [vmem:[#allocation22 + $0x10] sm:$0xff]  ;;  %2729 = vmatpush.bf16.msrb.mxu2 %v3372_v29  ;;  %v3369_v29 = vld [vmem:[#allocation22 + $0x40] sm:$0xff] }
 0xb7a   :  { %2764 = vmatpush.bf16.msrb.mxu0 %v3391_v6  ;;  %2711 = vmatpush.bf16.msra.mxu1 %v3363_v1 }
 0xb7b   :  { %v3409_v22 = vpack.c.bf16 %v1795_v21, %v1794_v27  ;;  %v3387_v27 = vld [vmem:[#allocation22 + $0xd0] sm:$0xff]  ;;  %2748 = vmatpush.bf16.msra.mxu3 %v3380_v43  ;;  %v3377_v43 = vld [vmem:[#allocation22 + $0x80] sm:$0xff] }
 0xb7d   :  { %3422 = vst [vmem:[#allocation3 + $0x8] sm:$0xff] %v3409_v22   ;;  %2730 = vmatpush.bf16.msrb.mxu2 %v3371_v11 }
 0xb7e   :  { %2765 = vmatpush.bf16.msrb.mxu0 %v3390_v50 }
 0xb82   :  { %2766 = vmatpush.bf16.msrb.mxu0 %v3389_v61 }
 0xb84   :  { %v3328_v58 = vld [vmem:[#allocation3 + $0x8] sm:$0xff] }
 0xb85   :  { %2039 = vmatmul.bf16.gmra.mxu1 %v3328_v58  ;;  %2058 = vmatmul.bf16.gmra.mxu2 %v3328_v58 }
 0xb86   :  { %2077 = vmatmul.bf16.gmra.mxu3 %v3328_v58  ;;  %2096 = vmatmul.bf16.gmra.mxu0 %v3328_v58 }
 0xb87   :  { %2767 = vmatpush.bf16.msrb.mxu0 %v3388_v16 }
 0xb8b   :  { %2768 = vmatpush.bf16.msrb.mxu0 %v3387_v27 }
 0xbdb   :  { %v2035_v5 = vpop.f32.mrf.mxu1 }
 0xbdc   :  { %v4405_v32 = vadd.f32 %v2035_v5, %v4400_v15  ;;  %v2092_v2 = vpop.f32.mrf.mxu0 }
 0xbdd   :  { %v4408_v60 = vadd.f32 %v2092_v2, %v4402_v24 }
 0xbde   :  { %v3149_v4 = vmul.f32 -1.702, %v4405_v32 }
 0xbdf   :  { %v3152_v26 = vmul.f32 -1.702, %v4408_v60 }
 0xbe0   :  { %v2134_v41 = vmul.f32 1.442695, %v3149_v4 }
 0xbe1   :  { %v2140_v18 = vmul.f32 1.442695, %v3152_v26  ;;  %v2054_v47 = vpop.f32.mrf.mxu2  ;;  %v3362_v26 = vld [vmem:[#allocation22 + $0x8] sm:$0xff] }
 0xbe2   :  { %3532 = vpow2.f32 %v2134_v41  ;;  %v4417_v37 = vadd.f32 %v2054_v47, %v4411_v57  ;;  %v2073_v48 = vpop.f32.mrf.mxu3  ;;  %v3386_v41 = vld [vmem:[#allocation22 + $0xc8] sm:$0xff]  ;;  %2712 = vmatpush.bf16.msra.mxu1 %v3362_v26 }
 0xbe3   :  { %3534 = vpow2.f32 %v2140_v18  ;;  %v4420_v10 = vadd.f32 %v2073_v48, %v4414_v39  ;;  %v2037_v25 = vpop.f32.mrf.mxu1  ;;  %2769 = vmatpush.bf16.msrb.mxu0 %v3386_v41 }
 0xbe4   :  { %v3150_v51 = vmul.f32 -1.702, %v4417_v37  ;;  %v4424_v17 = vadd.f32 %v2037_v25, %v4400_v15  ;;  %v2094_v52 = vpop.f32.mrf.mxu0 }
 0xbe5   :  { %v3151_v54 = vmul.f32 -1.702, %v4420_v10  ;;  %v4428_v7 = vadd.f32 %v2094_v52, %v4402_v24 }
 0xbe6   :  { %v2136_v62 = vmul.f32 1.442695, %v3150_v51  ;;  %v3153_v46 = vmul.f32 -1.702, %v4424_v17  ;;  %v3379_v51 = vld [vmem:[#allocation22 + $0x90] sm:$0xff]  ;;  %2713 = vmatpush.bf16.msra.mxu1 %v3361_v53 }
 0xbe7   :  { %v2138_v55 = vmul.f32 1.442695, %v3151_v54  ;;  %v3156_v63 = vmul.f32 -1.702, %v4428_v7  ;;  %v3385_v54 = vld [vmem:[#allocation22 + $0xc0] sm:$0xff]  ;;  %2749 = vmatpush.bf16.msra.mxu3 %v3379_v51 }
 0xbe8   :  { %v3533_v45 = vpop.eup %3532  ;;  %3536 = vpow2.f32 %v2136_v62  ;;  %v2142_v40 = vmul.f32 1.442695, %v3153_v46  ;;  %2770 = vmatpush.bf16.msrb.mxu0 %v3385_v54 }
 0xbe9   :  { %v3535_v14 = vpop.eup %3534  ;;  %v4432_v44 = vadd.f32 1.0, %v3533_v45  ;;  %3538 = vpow2.f32 %v2138_v55  ;;  %v2148_v59 = vmul.f32 1.442695, %v3156_v63  ;;  %v2056_v0 = vpop.f32.mrf.mxu2 }
 0xbea   :  { %v4434_v42 = vadd.f32 1.0, %v3535_v14  ;;  %3540 = vpow2.f32 %v2142_v40  ;;  %v4437_v12 = vadd.f32 %v2056_v0, %v4411_v57  ;;  %v2075_v4 = vpop.f32.mrf.mxu3  ;;  %v3370_v40 = vld [vmem:[#allocation22 + $0x48] sm:$0xff] }
 0xbeb   :  { %3542 = vrcp.f32 %v4432_v44  ;;  %v4459_v48 = vadd.f32 %v2075_v4, %v4414_v39  ;;  %v2191_v49 = vand.u32 2147483647, %v4432_v44  ;;  %v2193_v46 = vand.u32 2147483648, %v4432_v44  ;;  %2731 = vmatpush.bf16.msrb.mxu2 %v3370_v40  ;;  %2750 = vmatpush.bf16.msra.mxu3 %v3378_v38 }
 0xbec   :  { %3544 = vrcp.f32 %v4434_v42  ;;  %v3154_v19 = vmul.f32 -1.702, %v4437_v12  ;;  %v2236_v61 = vand.u32 2147483647, %v4434_v42  ;;  %v2238_v55 = vand.u32 2147483648, %v4434_v42 }
 0xbed   :  { %3546 = vpow2.f32 %v2148_v59  ;;  %v3155_v45 = vmul.f32 -1.702, %v4459_v48  ;;  %vm2187_vm0 = vweird.f32 %v4432_v44  ;;  %vm4483_vm1 = vcmp.eq.f32.partialorder %v2191_v49, 8.507059e+37 }
 0xbee   :  { %v3537_v20 = vpop.eup %3536  ;;  %v2144_v2 = vmul.f32 1.442695, %v3154_v19  ;;  %vm2232_vm2 = vweird.f32 %v4434_v42  ;;  %v2194_v28 = vor.u32 1.1754944e-38, %v2193_v46  ;;  %vm4494_vm4 = vcmp.eq.f32.partialorder %v2236_v61, 8.507059e+37 }
 0xbef   :  { %v3539_v21 = vpop.eup %3538  ;;  %v4442_v22 = vadd.f32 1.0, %v3537_v20  ;;  %v2239_v27 = vor.u32 1.1754944e-38, %v2238_v55  ;;  %2732 = vmatpush.bf16.msrb.mxu2 %v3369_v29  ;;  %2751 = vmatpush.bf16.msra.mxu3 %v3377_v43 }
 0xbf0   :  { %v3541_v58 = vpop.eup %3540  ;;  %v4444_v34 = vadd.f32 1.0, %v3539_v21 }
 0xbf1   :  { %v4446_v5 = vpop.eup %3542  ;;  %3548 = vrcp.f32 %v4442_v22  ;;  %v4456_v47 = vadd.f32 1.0, %v3541_v58  ;;  %vm2202_vm6 = vweird.f32 %v4442_v22  ;;  %v2208_v21 = vand.u32 2147483648, %v4442_v22 }
 0xbf2   :  { %v4449_v33 = vpop.eup %3544  ;;  %v2183_v6 = vmul.f32 %v4446_v5, %v4432_v44  ;;  %3550 = vrcp.f32 %v4444_v34  ;;  %vm2188_vm14 = vweird.f32 %v4446_v5  ;;  %v2206_v44 = vand.u32 2147483647, %v4442_v22 }
 0xbf3   :  { %v3547_v35 = vpop.eup %3546  ;;  %v2228_v36 = vmul.f32 %v4449_v33, %v4434_v42  ;;  %3552 = vpow2.f32 %v2144_v2  ;;  %vm2233_vm15 = vweird.f32 %v4449_v33  ;;  %vm4490_vm3 = vmor %vm2187_vm0, %vm2188_vm14  ;;  %v2251_v20 = vand.u32 2147483647, %v4456_v47 }
 0xbf4   :  { %v2184_v18 = vsub.f32 1.0, %v2183_v6  ;;  %v4461_v25 = vadd.f32 1.0, %v3547_v35  ;;  %3554 = vrcp.f32 %v4456_v47  ;;  %vm4502_vm5 = vmor %vm2232_vm2, %vm2233_vm15  ;;  %v2146_v58 = vmul.f32 1.442695, %v3155_v45 }
 0xbf5   :  { %v2229_v50 = vsub.f32 1.0, %v2228_v36  ;;  %vm2247_vm7 = vweird.f32 %v4456_v47  ;;  %v2253_v36 = vand.u32 2147483648, %v4456_v47  ;;  %vm4525_vm9 = vcmp.eq.f32.partialorder %v2251_v20, 8.507059e+37 }
 0xbf6   :  { %v2185_v52 = vmul.f32 %v4446_v5, %v2184_v18  ;;  %3556 = vrcp.f32 %v4461_v25  ;;  %v2298_v54 = vand.u32 2147483648, %v4461_v25  ;;  %vm2292_vm11 = vweird.f32 %v4461_v25 }
 0xbf7   :  { %v4466_v62 = vpop.eup %3548  ;;  %v2230_v31 = vmul.f32 %v4449_v33, %v2229_v50  ;;  %v2254_v61 = vor.u32 1.1754944e-38, %v2253_v36  ;;  %vm2207_vm2 = vcmp.eq.f32.partialorder %v2206_v44, 8.507059e+37 }
 0xbf8   :  { %v2198_v63 = vmul.f32 %v4466_v62, %v4442_v22  ;;  %v2186_v56 = vadd.f32 %v4446_v5, %v2185_v52  ;;  %v4480_v59 = vpop.eup %3550  ;;  %vm2203_vm8 = vweird.f32 %v4466_v62  ;;  %v2296_v52 = vand.u32 2147483647, %v4461_v25 }
 0xbf9   :  { %v2231_v14 = vadd.f32 %v4449_v33, %v2230_v31  ;;  %v3553_v16 = vpop.eup %3552  ;;  %v4519_v35 = vmul.f32 %v4480_v59, %v4444_v34  ;;  %vm4557_vm14 = vmor %vm2202_vm6, %vm2203_vm8  ;;  %vm2218_vm6 = vweird.f32 %v4480_v59 }
 0xbfa   :  { %v2199_v9 = vsub.f32 1.0, %v2198_v63  ;;  %v3555_v42 = vpop.eup %3554  ;;  %v2190_v2 = vsel %vm4490_vm3, %v4446_v5, %v2186_v56  ;;  %v4522_v18 = vadd.f32 1.0, %v3553_v16  ;;  %vm2297_vm15 = vcmp.eq.f32.partialorder %v2296_v52, 8.507059e+37 }
 0xbfb   :  { %v2235_v4 = vsel %vm4502_vm5, %v4449_v33, %v2231_v14  ;;  %v2243_v6 = vmul.f32 %v3555_v42, %v4456_v47  ;;  %v2195_v50 = vsel %vm4483_vm1, %v2194_v28, %v2190_v2  ;;  %vm2248_vm10 = vweird.f32 %v3555_v42 }
 0xbfc   :  { %v3557_v26 = vpop.eup %3556  ;;  %v2200_v41 = vmul.f32 %v4466_v62, %v2199_v9  ;;  %v2240_v51 = vsel %vm4494_vm4, %v2239_v27, %v2235_v4  ;;  %3558 = vrcp.f32 %v4522_v18  ;;  %v2214_v31 = vsub.f32 1.0, %v4519_v35  ;;  %vm2249_vm13 = vmor %vm2247_vm7, %vm2248_vm10 }
 0xbfd   :  { %v2244_v5 = vsub.f32 1.0, %v2243_v6  ;;  %v2288_v11 = vmul.f32 %v3557_v26, %v4461_v25  ;;  %vm2293_vm12 = vweird.f32 %v3557_v26  ;;  %3560 = vpow2.f32 %v2146_v58 }
 0xbfe   :  { %v4538_v46 = vadd.f32 %v4466_v62, %v2200_v41  ;;  %v2422_v38 = vmul.f32 %v2195_v50, %v4405_v32  ;;  %v2425_v56 = vmul.f32 %v2240_v51, %v4408_v60  ;;  %v2299_v16 = vor.u32 1.1754944e-38, %v2298_v54  ;;  %vm2294_vm0 = vmor %vm2292_vm11, %vm2293_vm12 }
 0xbff   :  { %v2245_v49 = vmul.f32 %v3555_v42, %v2244_v5  ;;  %v2289_v53 = vsub.f32 1.0, %v2288_v11  ;;  %v2266_v58 = vand.u32 2147483647, %v4522_v18  ;;  %v2209_v52 = vor.u32 1.1754944e-38, %v2208_v21 }
 0xc00   :  { %v2205_v13 = vsel %vm4557_vm14, %v4466_v62, %v4538_v46  ;;  %v2268_v62 = vand.u32 2147483648, %v4522_v18  ;;  %vm2262_vm3 = vweird.f32 %v4522_v18  ;;  %vm2217_vm7 = vweird.f32 %v4444_v34 }
 0xc01   :  { %v2246_v63 = vadd.f32 %v3555_v42, %v2245_v49  ;;  %v2290_v45 = vmul.f32 %v3557_v26, %v2289_v53  ;;  %vm2267_vm5 = vcmp.eq.f32.partialorder %v2266_v58, 8.507059e+37  ;;  %vm4617_vm8 = vmor %vm2217_vm7, %vm2218_vm6 }
 0xc02   :  { %v2040_v55 = vpop.f32.mrf.mxu1  ;;  %v3559_v47 = vpop.eup %3558  ;;  %v2269_v44 = vor.u32 1.1754944e-38, %v2268_v62 }
 0xc03   :  { %v2097_v40 = vpop.f32.mrf.mxu0  ;;  %v4548_v14 = vadd.f32 %v2040_v55, %v4400_v15  ;;  %v2250_v32 = vsel %vm2249_vm13, %v3555_v42, %v2246_v63  ;;  %v2291_v60 = vadd.f32 %v3557_v26, %v2290_v45  ;;  %v2258_v27 = vmul.f32 %v3559_v47, %v4522_v18  ;;  %v3561_v6 = vpop.eup %3560 }
 0xc04   :  { %v4551_v0 = vadd.f32 %v2097_v40, %v4402_v24  ;;  %v2255_v28 = vsel %vm4525_vm9, %v2254_v61, %v2250_v32  ;;  %vm2263_vm1 = vweird.f32 %v3559_v47  ;;  %v2210_v61 = vsel %vm2207_vm2, %v2209_v52, %v2205_v13 }
 0xc05   :  { %v3157_v19 = vmul.f32 -1.702, %v4548_v14  ;;  %v2426_v42 = vmul.f32 %v2255_v28, %v4424_v17  ;;  %v2295_v1 = vsel %vm2294_vm0, %v3557_v26, %v2291_v60  ;;  %v2259_v35 = vsub.f32 1.0, %v2258_v27  ;;  %vm2264_vm4 = vmor %vm2262_vm3, %vm2263_vm1 }
 0xc06   :  { %v3160_v20 = vmul.f32 -1.702, %v4551_v0  ;;  %v2300_v29 = vsel %vm2297_vm15, %v2299_v16, %v2295_v1  ;;  %v4580_v26 = vadd.f32 1.0, %v3561_v6  ;;  %v2215_v55 = vmul.f32 %v4480_v59, %v2214_v31 }
 0xc07   :  { %v2150_v43 = vmul.f32 1.442695, %v3157_v19  ;;  %v2442_v25 = vpack.c.bf16 %v2426_v42, %v2422_v38  ;;  %v2429_v41 = vmul.f32 %v2300_v29, %v4428_v7  ;;  %v2260_v50 = vmul.f32 %v3559_v47, %v2259_v35 }
 0xc08   :  { %v2156_v2 = vmul.f32 1.442695, %v3160_v20  ;;  %v2059_v4 = vpop.f32.mrf.mxu2  ;;  %v2223_v45 = vand.u32 2147483648, %v4444_v34  ;;  %v2423_v31 = vmul.f32 %v2210_v61, %v4417_v37  ;;  %v2216_v60 = vadd.f32 %v4480_v59, %v2215_v55 }
 0xc09   :  { %v4578_v36 = vadd.f32 %v2059_v4, %v4411_v57  ;;  %v2078_v17 = vpop.f32.mrf.mxu3  ;;  %3562 = vpow2.f32 %v2150_v43  ;;  %v2445_v11 = vpack.c.bf16 %v2429_v41, %v2425_v56  ;;  %2714 = vmatmul.bf16.vlgmr.msra.gmra.mxu1 %v2442_v25  ;;  %v2261_v49 = vadd.f32 %v3559_v47, %v2260_v50 }
 0xc0a   :  { %v4583_v5 = vadd.f32 %v2078_v17, %v4414_v39  ;;  %v2042_v33 = vpop.f32.mrf.mxu1  ;;  %3564 = vpow2.f32 %v2156_v2  ;;  %v2221_v37 = vand.u32 2147483647, %v4444_v34  ;;  %v2220_v1 = vsel %vm4617_vm8, %v4480_v59, %v2216_v60 }
 0xc0b   :  { %v3158_v51 = vmul.f32 -1.702, %v4578_v36  ;;  %v2099_v7 = vpop.f32.mrf.mxu0  ;;  %3566 = vrcp.f32 %v4580_v26  ;;  %2771 = vmatmul.bf16.vlgmr.msrb.gmra.mxu0 %v2445_v11  ;;  %v4594_v46 = vadd.f32 %v2042_v33, %v4400_v15  ;;  %v2265_v21 = vsel %vm2264_vm4, %v3559_v47, %v2261_v49 }
 0xc0c   :  { %v3159_v54 = vmul.f32 -1.702, %v4583_v5  ;;  %v4599_v22 = vadd.f32 %v2099_v7, %v4402_v24  ;;  %v2270_v40 = vsel %vm2267_vm5, %v2269_v44, %v2265_v21  ;;  %v2224_v27 = vor.u32 1.1754944e-38, %v2223_v45 }
 0xc0d   :  { %v2152_v53 = vmul.f32 1.442695, %v3158_v51  ;;  %v3161_v18 = vmul.f32 -1.702, %v4594_v46  ;;  %v2427_v56 = vmul.f32 %v2270_v40, %v4437_v12  ;;  %v2283_v58 = vand.u32 2147483648, %v4580_v26 }
 0xc0e   :  { %v3164_v15 = vmul.f32 -1.702, %v4599_v22  ;;  %v2154_v24 = vmul.f32 1.442695, %v3159_v54  ;;  %v2281_v34 = vand.u32 2147483647, %v4580_v26  ;;  %vm2277_vm11 = vweird.f32 %v4580_v26 }
 0xc0f   :  { %v3563_v63 = vpop.eup %3562  ;;  %3568 = vpow2.f32 %v2152_v53  ;;  %v2158_v47 = vmul.f32 1.442695, %v3161_v18  ;;  %v2443_v13 = vpack.c.bf16 %v2427_v56, %v2423_v31  ;;  %vm2222_vm10 = vcmp.eq.f32.partialorder %v2221_v37, 8.507059e+37 }
 0xc10   :  { %v3565_v38 = vpop.eup %3564  ;;  %v4606_v9 = vadd.f32 1.0, %v3563_v63  ;;  %v2164_v19 = vmul.f32 1.442695, %v3164_v15  ;;  %v2061_v62 = vpop.f32.mrf.mxu2  ;;  %v2225_v2 = vsel %vm2222_vm10, %v2224_v27, %v2220_v1  ;;  %v2284_v25 = vor.u32 1.1754944e-38, %v2283_v58 }
 0xc11   :  { %v3567_v32 = vpop.eup %3566  ;;  %v4610_v16 = vadd.f32 1.0, %v3565_v38  ;;  %2733 = vmatmul.bf16.vlgmr.msrb.gmra.mxu2 %v2443_v13  ;;  %v4636_v35 = vadd.f32 %v2061_v62, %v4411_v57  ;;  %vm2282_vm13 = vcmp.eq.f32.partialorder %v2281_v34, 8.507059e+37  ;;  %v2080_v50 = vpop.f32.mrf.mxu3  ;;  %v2424_v51 = vmul.f32 %v2225_v2, %v4420_v10 }
 0xc12   :  { %v2273_v28 = vmul.f32 %v3567_v32, %v4580_v26  ;;  %3570 = vrcp.f32 %v4606_v9  ;;  %vm2278_vm9 = vweird.f32 %v3567_v32  ;;  %v4649_v55 = vadd.f32 %v2080_v50, %v4414_v39 }
 0xc13   :  { %3572 = vrcp.f32 %v4610_v16  ;;  %vm2279_vm12 = vmor %vm2277_vm11, %vm2278_vm9  ;;  %v3162_v61 = vmul.f32 -1.702, %v4636_v35  ;;  %v2311_v39 = vand.u32 2147483647, %v4606_v9  ;;  %v2313_v15 = vand.u32 2147483648, %v4606_v9 }
 0xc14   :  { %v2274_v20 = vsub.f32 1.0, %v2273_v28  ;;  %3574 = vpow2.f32 %v2154_v24  ;;  %v3163_v63 = vmul.f32 -1.702, %v4649_v55  ;;  %v2356_v38 = vand.u32 2147483647, %v4610_v16 }
 0xc15   :  { %v3569_v42 = vpop.eup %3568  ;;  %3576 = vpow2.f32 %v2158_v47  ;;  %v2358_v56 = vand.u32 2147483648, %v4610_v16  ;;  %vm2307_vm15 = vweird.f32 %v4606_v9  ;;  %vm2352_vm0 = vweird.f32 %v4610_v16 }
 0xc16   :  { %v2275_v29 = vmul.f32 %v3567_v32, %v2274_v20  ;;  %3578 = vpow2.f32 %v2164_v19  ;;  %v4629_v6 = vadd.f32 1.0, %v3569_v42  ;;  %v2162_v60 = vmul.f32 1.442695, %v3163_v63 }
 0xc17   :  { %vm4678_vm3 = vcmp.eq.f32.partialorder %v2311_v39, 8.507059e+37  ;;  %v2314_v37 = vor.u32 1.1754944e-38, %v2313_v15  ;;  %vm4682_vm4 = vcmp.eq.f32.partialorder %v2356_v38, 8.507059e+37  ;;  %v2359_v42 = vor.u32 1.1754944e-38, %v2358_v56 }
 0xc18   :  { %v4626_v43 = vpop.eup %3570  ;;  %v2276_v4 = vadd.f32 %v3567_v32, %v2275_v29  ;;  %3580 = vrcp.f32 %v4629_v6 }
 0xc19   :  { %v4631_v59 = vpop.eup %3572  ;;  %v2303_v41 = vmul.f32 %v4626_v43, %v4606_v9  ;;  %vm2308_vm14 = vweird.f32 %v4626_v43 }
 0xc1a   :  { %v3575_v17 = vpop.eup %3574  ;;  %v2280_v33 = vsel %vm2279_vm12, %v3567_v32, %v2276_v4  ;;  %v2348_v11 = vmul.f32 %v4631_v59, %v4610_v16  ;;  %vm2353_vm1 = vweird.f32 %v4631_v59  ;;  %vm4674_vm2 = vmor %vm2307_vm15, %vm2308_vm14  ;;  %vm2322_vm15 = vweird.f32 %v4629_v6 }
 0xc1b   :  { %v3577_v26 = vpop.eup %3576  ;;  %v2285_v7 = vsel %vm2282_vm13, %v2284_v25, %v2280_v33  ;;  %v2304_v53 = vsub.f32 1.0, %v2303_v41  ;;  %v4651_v18 = vadd.f32 1.0, %v3575_v17  ;;  %vm4692_vm5 = vmor %vm2352_vm0, %vm2353_vm1 }
 0xc1c   :  { %v3579_v52 = vpop.eup %3578  ;;  %v2428_v49 = vmul.f32 %v2285_v7, %v4459_v48  ;;  %v4643_v54 = vadd.f32 1.0, %v3577_v26  ;;  %v2349_v21 = vsub.f32 1.0, %v2348_v11  ;;  %v2160_v48 = vmul.f32 1.442695, %v3162_v61 }
 0xc1d   :  { %v4645_v57 = vadd.f32 1.0, %v3579_v52  ;;  %v2305_v10 = vmul.f32 %v4626_v43, %v2304_v53 }
 0xc1e   :  { %v2444_v44 = vpack.c.bf16 %v2428_v49, %v2424_v51  ;;  %3582 = vrcp.f32 %v4643_v54  ;;  %v4657_v45 = vpop.eup %3580  ;;  %v2350_v40 = vmul.f32 %v4631_v59, %v2349_v21  ;;  %vm2367_vm6 = vweird.f32 %v4643_v54 }
 0xc1f   :  { %3584 = vrcp.f32 %v4645_v57  ;;  %v2306_v31 = vadd.f32 %v4626_v43, %v2305_v10  ;;  %v2318_v32 = vmul.f32 %v4657_v45, %v4629_v6  ;;  %v2371_v34 = vand.u32 2147483647, %v4643_v54 }
 0xc20   :  { %2752 = vmatmul.bf16.vlgmr.msra.gmra.mxu3 %v2444_v44  ;;  %3586 = vrcp.f32 %v4651_v18  ;;  %v2351_v47 = vadd.f32 %v4631_v59, %v2350_v40  ;;  %v2373_v62 = vand.u32 2147483648, %v4643_v54  ;;  %v2416_v33 = vand.u32 2147483647, %v4645_v57 }
 0xc21   :  { %3588 = vpow2.f32 %v2160_v48  ;;  %v2310_v20 = vsel %vm4674_vm2, %v4626_v43, %v2306_v31  ;;  %v2319_v29 = vsub.f32 1.0, %v2318_v32  ;;  %v2418_v11 = vand.u32 2147483648, %v4645_v57 }
 0xc22   :  { %3590 = vpow2.f32 %v2162_v60  ;;  %v2355_v2 = vsel %vm4692_vm5, %v4631_v59, %v2351_v47  ;;  %v2315_v41 = vsel %vm4678_vm3, %v2314_v37, %v2310_v20  ;;  %vm2372_vm10 = vcmp.eq.f32.partialorder %v2371_v34, 8.507059e+37 }
 0xc23   :  { %v2360_v7 = vsel %vm4682_vm4, %v2359_v42, %v2355_v2  ;;  %v2320_v52 = vmul.f32 %v4657_v45, %v2319_v29  ;;  %v2374_v49 = vor.u32 1.1754944e-38, %v2373_v62  ;;  %vm2412_vm11 = vweird.f32 %v4645_v57 }
 0xc24   :  { %v3583_v24 = vpop.eup %3582  ;;  %v2419_v10 = vor.u32 1.1754944e-38, %v2418_v11  ;;  %vm2417_vm13 = vcmp.eq.f32.partialorder %v2416_v33, 8.507059e+37  ;;  %v2433_v15 = vmul.f32 %v2360_v7, %v4551_v0  ;;  %vm2323_vm14 = vweird.f32 %v4657_v45 }
 0xc25   :  { %v2363_v13 = vmul.f32 %v3583_v24, %v4643_v54  ;;  %v3585_v28 = vpop.eup %3584  ;;  %vm2368_vm7 = vweird.f32 %v3583_v24  ;;  %v2430_v54 = vmul.f32 %v2315_v41, %v4548_v14  ;;  %v2321_v31 = vadd.f32 %v4657_v45, %v2320_v52  ;;  %vm4731_vm0 = vmor %vm2322_vm15, %vm2323_vm14 }
 0xc26   :  { %v4686_v16 = vpop.eup %3586  ;;  %v2408_v27 = vmul.f32 %v3585_v28, %v4645_v57  ;;  %vm2413_vm8 = vweird.f32 %v3585_v28  ;;  %vm2369_vm9 = vmor %vm2367_vm6, %vm2368_vm7  ;;  %v2326_v57 = vand.u32 2147483647, %v4629_v6  ;;  %v2328_v32 = vand.u32 2147483648, %v4629_v6 }
 0xc27   :  { %v2364_v1 = vsub.f32 1.0, %v2363_v13  ;;  %v3589_v25 = vpop.eup %3588  ;;  %v2333_v17 = vmul.f32 %v4686_v16, %v4651_v18  ;;  %vm2414_vm12 = vmor %vm2412_vm11, %vm2413_vm8  ;;  %v2325_v47 = vsel %vm4731_vm0, %v4657_v45, %v2321_v31  ;;  %vm2338_vm2 = vweird.f32 %v4686_v16 }
 0xc28   :  { %v2409_v4 = vsub.f32 1.0, %v2408_v27  ;;  %v4708_v51 = vadd.f32 1.0, %v3589_v25  ;;  %v3591_v59 = vpop.eup %3590  ;;  %vm2327_vm1 = vcmp.eq.f32.partialorder %v2326_v57, 8.507059e+37  ;;  %v2329_v6 = vor.u32 1.1754944e-38, %v2328_v32 }
 0xc29   :  { %v2365_v43 = vmul.f32 %v3583_v24, %v2364_v1  ;;  %v2334_v44 = vsub.f32 1.0, %v2333_v17  ;;  %v4717_v48 = vadd.f32 1.0, %v3591_v59  ;;  %vm2337_vm3 = vweird.f32 %v4651_v18 }
 0xc2a   :  { %v2410_v26 = vmul.f32 %v3585_v28, %v2409_v4  ;;  %3592 = vrcp.f32 %v4708_v51  ;;  %v2388_v19 = vand.u32 2147483648, %v4708_v51  ;;  %v2343_v37 = vand.u32 2147483648, %v4651_v18  ;;  %vm4745_vm5 = vmor %vm2337_vm3, %vm2338_vm2 }
 0xc2b   :  { %v2366_v50 = vadd.f32 %v3583_v24, %v2365_v43  ;;  %3594 = vrcp.f32 %v4717_v48  ;;  %v2335_v56 = vmul.f32 %v4686_v16, %v2334_v44  ;;  %v2386_v20 = vand.u32 2147483647, %v4708_v51 }
 0xc2c   :  { %v2411_v61 = vadd.f32 %v3585_v28, %v2410_v26  ;;  %v2330_v42 = vsel %vm2327_vm1, %v2329_v6, %v2325_v47  ;;  %v2341_v1 = vand.u32 2147483647, %v4651_v18  ;;  %vm2382_vm6 = vweird.f32 %v4708_v51 }
 0xc2d   :  { %v2370_v53 = vsel %vm2369_vm9, %v3583_v24, %v2366_v50  ;;  %v2336_v13 = vadd.f32 %v4686_v16, %v2335_v56  ;;  %v2403_v34 = vand.u32 2147483648, %v4717_v48  ;;  %v2389_v62 = vor.u32 1.1754944e-38, %v2388_v19 }
 0xc2e   :  { %v2375_v21 = vsel %vm2372_vm10, %v2374_v49, %v2370_v53  ;;  %v2415_v40 = vsel %vm2414_vm12, %v3585_v28, %v2411_v61  ;;  %v2401_v43 = vand.u32 2147483647, %v4717_v48  ;;  %v2344_v4 = vor.u32 1.1754944e-38, %v2343_v37 }
 0xc2f   :  { %v2434_v63 = vmul.f32 %v2375_v21, %v4594_v46  ;;  %v2420_v39 = vsel %vm2417_vm13, %v2419_v10, %v2415_v40  ;;  %v2340_v58 = vsel %vm4745_vm5, %v4686_v16, %v2336_v13  ;;  %vm2387_vm9 = vcmp.eq.f32.partialorder %v2386_v20, 8.507059e+37 }
 0xc30   :  { %v2437_v38 = vmul.f32 %v2420_v39, %v4599_v22  ;;  %v3593_v24 = vpop.eup %3592  ;;  %vm2342_vm10 = vcmp.eq.f32.partialorder %v2341_v1, 8.507059e+37  ;;  %vm2397_vm11 = vweird.f32 %v4717_v48  ;;  %v2431_v16 = vmul.f32 %v2330_v42, %v4578_v36 }
 0xc31   :  { %v2446_v46 = vpack.c.bf16 %v2434_v63, %v2430_v54  ;;  %v2378_v60 = vmul.f32 %v3593_v24, %v4708_v51  ;;  %v3595_v22 = vpop.eup %3594  ;;  %vm2383_vm4 = vweird.f32 %v3593_v24  ;;  %v2345_v17 = vsel %vm2342_vm10, %v2344_v4, %v2340_v58 }
 0xc32   :  { %v2449_v14 = vpack.c.bf16 %v2437_v38, %v2433_v15  ;;  %v2393_v9 = vmul.f32 %v3595_v22, %v4717_v48  ;;  %vm2384_vm7 = vmor %vm2382_vm6, %vm2383_vm4  ;;  %vm2398_vm8 = vweird.f32 %v3595_v22  ;;  %v2404_v11 = vor.u32 1.1754944e-38, %v2403_v34 }
 0xc33   :  { %2719 = vmatmul.bf16.gmra.mxu1 %v2446_v46  ;;  %v2379_v28 = vsub.f32 1.0, %v2378_v60  ;;  %vm2399_vm12 = vmor %vm2397_vm11, %vm2398_vm8  ;;  %vm2402_vm13 = vcmp.eq.f32.partialorder %v2401_v43, 8.507059e+37  ;;  %v2432_v59 = vmul.f32 %v2345_v17, %v4583_v5 }
 0xc34   :  { %2776 = vmatmul.bf16.gmra.mxu0 %v2449_v14  ;;  %v2394_v27 = vsub.f32 1.0, %v2393_v9 }
 0xc35   :  { %v2380_v12 = vmul.f32 %v3593_v24, %v2379_v28 }
 0xc36   :  { %v2395_v2 = vmul.f32 %v3595_v22, %v2394_v27 }
 0xc37   :  { %v2381_v29 = vadd.f32 %v3593_v24, %v2380_v12 }
 0xc38   :  { %v2396_v41 = vadd.f32 %v3595_v22, %v2395_v2 }
 0xc39   :  { %v2385_v25 = vsel %vm2384_vm7, %v3593_v24, %v2381_v29 }
 0xc3a   :  { %v2390_v18 = vsel %vm2387_vm9, %v2389_v62, %v2385_v25  ;;  %v2400_v50 = vsel %vm2399_vm12, %v3595_v22, %v2396_v41 }
 0xc3b   :  { %v2435_v33 = vmul.f32 %v2390_v18, %v4636_v35  ;;  %v2405_v26 = vsel %vm2402_vm13, %v2404_v11, %v2400_v50 }
 0xc3c   :  { %v2436_v7 = vmul.f32 %v2405_v26, %v4649_v55  ;;  %v3449_v55 = vld [vmem:[%s4786_s12] ss:$0 sm:$0xff]  ;;  %s3893_s12 = smov [#allocation24]  }
 0xc3d   :  { %v2447_v51 = vpack.c.bf16 %v2435_v33, %v2431_v16  ;;  %s2825_s22 = sshll.u32 %s3893_s12, 4  ;;  %s2826_s22 = int_to_ptr.vmem [resolvable:$true] %s2825_s22 }
 0xc3e   :  { %v2448_v52 = vpack.c.bf16 %v2436_v7, %v2432_v59 }
 0xc3f   :  { %2738 = vmatmul.bf16.gmra.mxu2 %v2447_v51 }
 0xc40   :  { %2757 = vmatmul.bf16.gmra.mxu3 %v2448_v52 }
 0xc86   :  { %v2715_v53 = vpop.f32.mrf.mxu1 }
 0xc88   :  { %v2772_v36 = vpop.f32.mrf.mxu0 }
 0xc8e   :  { %v2717_v10 = vpop.f32.mrf.mxu1 }
 0xc90   :  { %v2774_v39 = vpop.f32.mrf.mxu0 }
 0xc94   :  { %v2734_v49 = vpop.f32.mrf.mxu2 }
 0xc95   :  { %v2735_v61 = vadd.f32 %v2734_v49, %v2715_v53 }
 0xc9c   :  { %v2736_v21 = vpop.f32.mrf.mxu2 }
 0xc9d   :  { %v2737_v48 = vadd.f32 %v2736_v21, %v2717_v10 }
 0xca3   :  { %v2753_v44 = vpop.f32.mrf.mxu3 }
 0xca4   :  { %v2754_v35 = vadd.f32 %v2753_v44, %v2735_v61 }
 0xca6   :  { %v2773_v63 = vadd.f32 %v2772_v36, %v2754_v35 }
 0xca8   :  { %v2801_v5 = vadd.f32 %v2773_v63, %v4345_v30 }
 0xcaa   :  { %v2809_v38 = vadd.f32 %v3449_v55, %v2801_v5 }
 0xcab   :  { %v2755_v40 = vpop.f32.mrf.mxu3 }
 0xcac   :  { %v2756_v54 = vadd.f32 %v2755_v40, %v2737_v48 }
 0xcae   :  { %v2775_v15 = vadd.f32 %v2774_v39, %v2756_v54 }
 0xcb0   :  { %v2802_v57 = vadd.f32 %v2775_v15, %v4349_v8  ;;  %v2720_v46 = vpop.f32.mrf.mxu1 }
 0xcb1   :  { %v2777_v14 = vpop.f32.mrf.mxu0 }
 0xcb2   :  { %v2810_v31 = vadd.f32 %v3449_v55, %v2802_v57 }
 0xcb4   :  { %v3414_v56 = vpack.c.bf16 %v2810_v31, %v2809_v38 }
 0xcb6   :  { %3415 = vst [vmem:[#allocation24] sm:$0xff] %v3414_v56  }
 0xcb8   :  { %v2722_v22 = vpop.f32.mrf.mxu1 }
 0xcb9   :  { %v2779_v19 = vpop.f32.mrf.mxu0 }
 0xcc2   :  { %v2739_v24 = vpop.f32.mrf.mxu2 }
 0xcc3   :  { %v2740_v32 = vadd.f32 %v2739_v24, %v2720_v46  ;;  %v2758_v60 = vpop.f32.mrf.mxu3 }
 0xcc5   :  { %v2759_v0 = vadd.f32 %v2758_v60, %v2740_v32 }
 0xcc7   :  { %v2778_v13 = vadd.f32 %v2777_v14, %v2759_v0 }
 0xcc9   :  { %v2803_v9 = vadd.f32 %v2778_v13, %v4353_v23 }
 0xcca   :  { %v2741_v47 = vpop.f32.mrf.mxu2 }
 0xccb   :  { %v2742_v30 = vadd.f32 %v2741_v47, %v2722_v22  ;;  %v2760_v28 = vpop.f32.mrf.mxu3  ;;  %v2811_v12 = vadd.f32 %v3449_v55, %v2803_v9 }
 0xccd   :  { %v2761_v6 = vadd.f32 %v2760_v28, %v2742_v30 }
 0xccf   :  { %v2780_v8 = vadd.f32 %v2779_v19, %v2761_v6 }
 0xcd1   :  { %v2804_v37 = vadd.f32 %v2780_v8, %v4357_v3 }
 0xcd3   :  { %v2812_v20 = vadd.f32 %v3449_v55, %v2804_v37 }
 0xcd5   :  { %v3419_v42 = vpack.c.bf16 %v2812_v20, %v2811_v12 }
 0xcd7   :  { %3423 = vst [vmem:[#allocation24 + $0x8] sm:$0xff] %v3419_v42  }
 0xcd8   :  { %2833 = dma.vmem_to_hbm [thread:$0]  %s2826_s22, 256, %s2828_s24, [#allocation9], %s3881_s18, %s3881_s18, %s3882_s8  }
 0xcd9   :  { %3872 = dma.done.wait [#allocation9], 256  }
 0xcda   :  { %3873 = vsyncadd [#allocation9], 4294967040 }
 0xcdb   :  { %2838 = vsyncpa [#allocation8], 1 }
 0xcdc   :  { %2839 = vsyncpa [#allocation11], 1 }
 0xcdd   :  { %2840 = vsyncpa [#allocation14], 1 }
 0xcde   :  { %2841 = vsyncpa [#allocation17], 1 }
 0xcdf   :  { %2842 = vsyncpa [#allocation20], 1 }
 0xce0   :  { %2843 = vsyncpa [#allocation23], 1 }
 0xce1   :  { %2844 = vsyncpa [#allocation9], 1 }

// kernel: tpu_custom_call.1
= control target key start
LH: loop header
LB: loop body
LE: loop exit
PB: predicated region body
PF: predicated region fallthrough
CT: control target
= control target key end

     0   :  { %18 = vsyncpa [#allocation8], 0  ;;  %s4880_s0 = inlined_call_operand.hbm [shape: bf16[4,8,128], index: 0, kind: input, shape index: {}]   ;;  %s4881_s1 = inlined_call_operand.hbm [shape: f32[1,128], index: 1, kind: input, shape index: {}]   ;;  %s4882_s2 = inlined_call_operand.hbm [shape: f32[1,128], index: 2, kind: input, shape index: {}]   ;;  %s4883_s3 = inlined_call_operand.hbm [shape: bf16[128,384], index: 3, kind: input, shape index: {}]   ;;  %s4884_s4 = inlined_call_operand.vmem [shape: f32[1,384], index: 4, kind: input, shape index: {}]   ;;  %s4885_s5 = inlined_call_operand.hbm [shape: bf16[128,128], index: 5, kind: input, shape index: {}]   ;;  %s4886_s6 = inlined_call_operand.hbm [shape: f32[1,128], index: 6, kind: input, shape index: {}]   ;;  %s4887_s7 = inlined_call_operand.hbm [shape: f32[1,128], index: 7, kind: input, shape index: {}]   ;;  %s4888_s8 = inlined_call_operand.hbm [shape: f32[1,128], index: 8, kind: input, shape index: {}]   ;;  %s4889_s9 = inlined_call_operand.hbm [shape: bf16[128,512], index: 9, kind: input, shape index: {}]   ;;  %s4890_s10 = inlined_call_operand.vmem [shape: f32[1,512], index: 10, kind: input, shape index: {}]   ;;  %s4891_s11 = inlined_call_operand.hbm [shape: bf16[512,128], index: 11, kind: input, shape index: {}]   ;;  %s4892_s12 = inlined_call_operand.vmem [shape: f32[1,128], index: 12, kind: input, shape index: {}]   ;;  %s4893_s13 = inlined_call_operand.hbm [shape: bf16[4,8,128], index: 13, kind: output, shape index: {}]  }
   0x1   :  { %19 = vsyncpa [#allocation11], 0 }
   0x2   :  { %20 = vsyncpa [#allocation14], 0 }
   0x3   :  { %21 = vsyncpa [#allocation17], 0 }
   0x4   :  { %22 = vsyncpa [#allocation20], 0 }
   0x5   :  { %23 = vsyncpa [#allocation23], 0  ;;  %s43_s27 = sshll.u32 %s4881_s1, 4  ;;  %s44_s27 = int_to_ptr.hbm [resolvable:$true] %s43_s27 }
   0x6   :  { %24 = vsyncpa [#allocation9], 0  ;;  %s4007_s28 = smov [#allocation10]   ;;  %s64_s15 = sshll.u32 %s4883_s3, 4  ;;  %s65_s15 = int_to_ptr.hbm [resolvable:$true] %s64_s15 }
   0x7   :  { %s45_s29 = sshll.u32 %s4007_s28, 4  ;;  %s4008_s16 = smov [#allocation13]   ;;  %s46_s29 = int_to_ptr.vmem [resolvable:$true] %s45_s29 }
   0x8   :  { %48 = dma.hbm_to_vmem [thread:$0]  %s44_s27, 16, %s46_s29, [#allocation11]  }
   0x9   :  { %s66_s17 = sshll.u32 %s4008_s16, 4  ;;  %s4009_s18 = smov 192   ;;  %s67_s17 = int_to_ptr.vmem [resolvable:$true] %s66_s17 }
   0xa   :  { %s4010_s19 = smov 12   ;;  %s93_s1 = sshll.u32 %s4886_s6, 4  ;;  %s94_s1 = int_to_ptr.hbm [resolvable:$true] %s93_s1 }
   0xb   :  { %72 = dma.hbm_to_vmem [thread:$0]  %s65_s15, 3072, %s67_s17, [#allocation14], %s4009_s18, %s4009_s18, %s4010_s19  }
   0xc   :  { %s4011_s22 = smov [#allocation16]   ;;  %s115_s3 = sshll.u32 %s4888_s8, 4  ;;  %s116_s3 = int_to_ptr.hbm [resolvable:$true] %s115_s3 }
   0xd   :  { %s95_s23 = sshll.u32 %s4011_s22, 4  ;;  %s4012_s26 = smov [#allocation19]   ;;  %s96_s23 = int_to_ptr.vmem [resolvable:$true] %s95_s23 }
   0xe   :  { %98 = dma.hbm_to_vmem [thread:$0]  %s94_s1, 16, %s96_s23, [#allocation17]  }
   0xf   :  { %s117_s27 = sshll.u32 %s4012_s26, 4  ;;  %s29_s30 = sshll.u32 %s4880_s0, 4  ;;  %s118_s27 = int_to_ptr.vmem [resolvable:$true] %s117_s27  ;;  %s30_s30 = int_to_ptr.hbm [resolvable:$true] %s29_s30 }
  0x10   :  { %120 = dma.hbm_to_vmem [thread:$0]  %s116_s3, 16, %s118_s27, [#allocation20]  }
  0x11   :  { %s4013_s6 = smov [#allocation7]   ;;  %s54_s17 = sshll.u32 %s4882_s2, 4  ;;  %s55_s17 = int_to_ptr.hbm [resolvable:$true] %s54_s17 }
  0x12   :  { %s31_s14 = sshll.u32 %s4013_s6, 4  ;;  %s4014_s18 = smov 64   ;;  %s32_s14 = int_to_ptr.vmem [resolvable:$true] %s31_s14 }
  0x13   :  { %s4015_s8 = smov 4   ;;  %s4016_s19 = smov [#allocation12]  }
  0x14   :  { %37 = dma.hbm_to_vmem [thread:$0]  %s30_s30, 256, %s32_s14, [#allocation8], %s4014_s18, %s4014_s18, %s4015_s8  }
  0x15   :  { %s56_s20 = sshll.u32 %s4016_s19, 4  ;;  %s79_s1 = sshll.u32 %s4885_s5, 4  ;;  %s57_s20 = int_to_ptr.vmem [resolvable:$true] %s56_s20  ;;  %s80_s1 = int_to_ptr.hbm [resolvable:$true] %s79_s1 }
  0x16   :  { %59 = dma.hbm_to_vmem [thread:$0]  %s55_s17, 16, %s57_s20, [#allocation11]  }
  0x17   :  { %s104_s2 = sshll.u32 %s4887_s7, 4  ;;  %s4017_s24 = smov [#allocation15]   ;;  %s105_s2 = int_to_ptr.hbm [resolvable:$true] %s104_s2 }
  0x18   :  { %s81_s25 = sshll.u32 %s4017_s24, 4  ;;  %s4018_s3 = smov [#allocation18]   ;;  %s82_s25 = int_to_ptr.vmem [resolvable:$true] %s81_s25 }
  0x19   :  { %87 = dma.hbm_to_vmem [thread:$0]  %s80_s1, 1024, %s82_s25, [#allocation14], %s4014_s18, %s4014_s18, %s4015_s8  }
  0x1a   :  { %s106_s26 = sshll.u32 %s4018_s3, 4  ;;  %s125_s5 = sshll.u32 %s4889_s9, 4  ;;  %s107_s26 = int_to_ptr.vmem [resolvable:$true] %s106_s26  ;;  %s126_s5 = int_to_ptr.hbm [resolvable:$true] %s125_s5 }
  0x1b   :  { %109 = dma.hbm_to_vmem [thread:$0]  %s105_s2, 16, %s107_s26, [#allocation17]  }
  0x1c   :  { %s4019_s29 = smov [#allocation21]   ;;  %s140_s14 = sshll.u32 %s4891_s11, 4  ;;  %s141_s14 = int_to_ptr.hbm [resolvable:$true] %s140_s14 }
  0x1d   :  { %s127_s30 = sshll.u32 %s4019_s29, 4  ;;  %s4020_s15 = smov 256   ;;  %s128_s30 = int_to_ptr.vmem [resolvable:$true] %s127_s30 }
  0x1e   :  { %s4021_s16 = smov 16   ;;  %s4022_s17 = smov [#allocation22]  }
  0x1f   :  { %133 = dma.hbm_to_vmem [thread:$0]  %s126_s5, 4096, %s128_s30, [#allocation20], %s4020_s15, %s4020_s15, %s4021_s16  }
  0x20   :  { %s142_s19 = sshll.u32 %s4022_s17, 4  ;;  %s143_s19 = int_to_ptr.vmem [resolvable:$true] %s142_s19 }
  0x21   :  { %148 = dma.hbm_to_vmem [thread:$0]  %s141_s14, 4096, %s143_s19, [#allocation23], %s4014_s18, %s4014_s18, %s4015_s8  }
  0x22   :  { %3993 = dma.done.wait [#allocation8], 256  }
  0x23   :  { %3994 = vsyncadd [#allocation8], 4294967040 }
  0x24   :  { %3995 = dma.done.wait [#allocation11], 32  }
  0x25   :  { %3996 = vsyncadd [#allocation11], 4294967264 }
  0x26   :  { %3997 = dma.done.wait [#allocation14], 4096  }
  0x27   :  { %3998 = vsyncadd [#allocation14], 4294963200 }
  0x28   :  { %3999 = dma.done.wait [#allocation17], 32  }
  0x29   :  { %4000 = vsyncadd [#allocation17], 4294967264 }
  0x2a   :  { %4001 = dma.done.wait [#allocation20], 4112  }
  0x2b   :  { %4002 = vsyncadd [#allocation20], 4294963184 }
  0x2c   :  { %4003 = dma.done.wait [#allocation23], 4096  }
  0x2d   :  { %4004 = vsyncadd [#allocation23], 4294963200  ;;  %v3545_v0 = vld [vmem:[#allocation7 + $0x8] sm:$0xff]   ;;  %v3470_v1 = vld [vmem:[#allocation7] sm:$0xff]   ;;  %v4023_v6 = vmov 128.0   ;;  %vm562_vm13 = vcmask 261120  }
  0x2e   :  { %v4136_v2 = vunpack.c.l.bf16 %v3545_v0  ;;  %v4138_v3 = vunpack.c.l.bf16 %v3470_v1  ;;  %v4142_v4 = vunpack.c.h.bf16 %v3545_v0  ;;  %v4144_v5 = vunpack.c.h.bf16 %v3470_v1  ;;  %v3007_v29 = vld [vmem:[#allocation13 + $0xa8] sm:$0xf]  ;;  %v3391_v30 = vld [vmem:[#allocation13 + $0xb0] sm:$0xf0]  ;;  %v3390_v31 = vld [vmem:[#allocation13 + $0xac] sm:$0xf] }
  0x2f   :  { %3583 = vrcp.f32 %v4023_v6  ;;  %v3008_v32 = vor.u32 %v3391_v30, %v3007_v29  ;;  %v3009_v33 = vld [vmem:[#allocation13 + $0xb4] sm:$0xf0]  ;;  %v3015_v34 = vld [vmem:[#allocation13 + $0xb0] sm:$0xf]  ;;  %v3392_v35 = vld [vmem:[#allocation13 + $0xb8] sm:$0xf0] }
  0x30   :  { %210 = vadd.xlane.f32.xlu1 %v4136_v2  ;;  %206 = vadd.xlane.f32.xlu0 %v4138_v3  ;;  %v3012_v36 = vor.u32 %v3390_v31, %v3009_v33  ;;  %v3016_v37 = vor.u32 %v3392_v35, %v3015_v34  ;;  %v2995_v38 = vld [vmem:[#allocation13 + $0x90] sm:$0xf]  ;;  %v3388_v39 = vld [vmem:[#allocation13 + $0x98] sm:$0xf0]  ;;  %v3387_v40 = vld [vmem:[#allocation13 + $0x94] sm:$0xf] }
  0x31   :  { %477 = vmatpush.bf16.msra.mxu0 %v3008_v32  ;;  %v2996_v41 = vor.u32 %v3388_v39, %v2995_v38  ;;  %v2997_v42 = vld [vmem:[#allocation13 + $0x9c] sm:$0xf0]  ;;  %v3003_v43 = vld [vmem:[#allocation13 + $0x98] sm:$0xf]  ;;  %v3389_v44 = vld [vmem:[#allocation13 + $0xa0] sm:$0xf0] }
  0x32   :  { %496 = vmatpush.bf16.msra.mxu1 %v3012_v36  ;;  %515 = vmatpush.bf16.msra.mxu2 %v3016_v37  ;;  %v3000_v45 = vor.u32 %v3387_v40, %v2997_v42  ;;  %v3004_v46 = vor.u32 %v3389_v44, %v3003_v43  ;;  %v2983_v47 = vld [vmem:[#allocation13 + $0x78] sm:$0xf]  ;;  %v3385_v48 = vld [vmem:[#allocation13 + $0x80] sm:$0xf0]  ;;  %v3384_v49 = vld [vmem:[#allocation13 + $0x7c] sm:$0xf] }
  0x33   :  { %v2984_v50 = vor.u32 %v3385_v48, %v2983_v47  ;;  %v2985_v51 = vld [vmem:[#allocation13 + $0x84] sm:$0xf0]  ;;  %v2991_v52 = vld [vmem:[#allocation13 + $0x80] sm:$0xf]  ;;  %v3386_v53 = vld [vmem:[#allocation13 + $0x88] sm:$0xf0] }
  0x34   :  { %v2988_v54 = vor.u32 %v3384_v49, %v2985_v51  ;;  %v2992_v55 = vor.u32 %v3386_v53, %v2991_v52  ;;  %v2971_v56 = vld [vmem:[#allocation13 + $0x60] sm:$0xf]  ;;  %v3382_v57 = vld [vmem:[#allocation13 + $0x68] sm:$0xf0]  ;;  %v3381_v58 = vld [vmem:[#allocation13 + $0x64] sm:$0xf] }
  0x35   :  { %v3584_v7 = vpop.eup %3583  ;;  %478 = vmatpush.bf16.msra.mxu0 %v2996_v41  ;;  %v2972_v59 = vor.u32 %v3382_v57, %v2971_v56  ;;  %v2973_v60 = vld [vmem:[#allocation13 + $0x6c] sm:$0xf0]  ;;  %v2979_v61 = vld [vmem:[#allocation13 + $0x68] sm:$0xf]  ;;  %v3383_v62 = vld [vmem:[#allocation13 + $0x70] sm:$0xf0] }
  0x36   :  { %v215_v8 = vmul.f32 128.0, %v3584_v7  ;;  %vm219_vm0 = vweird.f32 %v3584_v7  ;;  %497 = vmatpush.bf16.msra.mxu1 %v3000_v45  ;;  %516 = vmatpush.bf16.msra.mxu2 %v3004_v46  ;;  %v2976_v63 = vor.u32 %v3381_v58, %v2973_v60  ;;  %v2980_v0 = vor.u32 %v3383_v62, %v2979_v61  ;;  %v2959_v1 = vld [vmem:[#allocation13 + $0x48] sm:$0xf]  ;;  %v3379_v6 = vld [vmem:[#allocation13 + $0x50] sm:$0xf0]  ;;  %s4025_s20 = smov 32  }
  0x37   :  { %v3373_v29 = vld [vmem:[#allocation13 + $0x20] sm:$0xf0]  ;;  %v3372_v30 = vld [vmem:[#allocation13 + $0x1c] sm:$0xf]  ;;  %v2937_v32 = vld [vmem:[#allocation13 + $0x24] sm:$0xf0] }
  0x38   :  { %212 = vadd.xlane.f32.xlu1 %v4142_v4  ;;  %208 = vadd.xlane.f32.xlu0 %v4144_v5  ;;  %v216_v9 = vsub.f32 1.0, %v215_v8  ;;  %v2960_v8 = vor.u32 %v3379_v6, %v2959_v1  ;;  %v2943_v33 = vld [vmem:[#allocation13 + $0x20] sm:$0xf]  ;;  %v3374_v34 = vld [vmem:[#allocation13 + $0x28] sm:$0xf0]  ;;  %v2940_v36 = vor.u32 %v3372_v30, %v2937_v32  ;;  %vm691_vm14 = vcmask 1043456  }
  0x39   :  { %479 = vmatpush.bf16.msra.mxu0 %v2984_v50  ;;  %v2944_v37 = vor.u32 %v3374_v34, %v2943_v33  ;;  %v2923_v38 = vld [vmem:[#allocation13] sm:$0xf]  ;;  %v3370_v39 = vld [vmem:[#allocation13 + $0x8] sm:$0xf0]  ;;  %v3369_v40 = vld [vmem:[#allocation13 + $0x4] sm:$0xf] }
  0x3a   :  { %v217_v10 = vmul.f32 %v3584_v7, %v216_v9  ;;  %498 = vmatpush.bf16.msra.mxu1 %v2988_v54  ;;  %517 = vmatpush.bf16.msra.mxu2 %v2992_v55  ;;  %v2961_v9 = vld [vmem:[#allocation13 + $0x54] sm:$0xf0]  ;;  %v2924_v43 = vor.u32 %v3370_v39, %v2923_v38  ;;  %v2925_v44 = vld [vmem:[#allocation13 + $0xc] sm:$0xf0]  ;;  %v2931_v45 = vld [vmem:[#allocation13 + $0x8] sm:$0xf] }
  0x3b   :  { %v3371_v46 = vld [vmem:[#allocation13 + $0x10] sm:$0xf0]  ;;  %v2928_v47 = vor.u32 %v3369_v40, %v2925_v44  ;;  %v3578_v30 = vld [vmem:[#allocation12] ss:$0 sm:$0xff]  ;;  %vm639_vm15 = vcmask 64512   ;;  %s2903_s24 = sshll.u32 %s4893_s13, 4  ;;  %s2904_s24 = int_to_ptr.hbm [resolvable:$true] %s2903_s24 }
  0x3c   :  { %v218_v11 = vadd.f32 %v3584_v7, %v217_v10  ;;  %v2967_v10 = vld [vmem:[#allocation13 + $0x50] sm:$0xf]  ;;  %v2932_v48 = vor.u32 %v3371_v46, %v2931_v45  ;;  %v341_v45 = vld [vmem:[%s4884_s4] sm:$0x7]  ;;  %s4024_s4 = smov 96  }
  0x3d   :  { %480 = vmatpush.bf16.msra.mxu0 %v2972_v59  ;;  %v343_v46 = vperm.slane %v341_v45, 0 }
  0x3e   :  { %v4148_v12 = vsel %vm219_vm0, %v3584_v7, %v218_v11  ;;  %499 = vmatpush.bf16.msra.mxu1 %v2976_v63  ;;  %518 = vmatpush.bf16.msra.mxu2 %v2980_v0  ;;  %v3378_v7 = vld [vmem:[#allocation13 + $0x4c] sm:$0xf]  ;;  %v3380_v11 = vld [vmem:[#allocation13 + $0x58] sm:$0xf0]  ;;  %vm769_vm0 = vcmask 257024  }
  0x41   :  { %481 = vmatpush.bf16.msra.mxu0 %v2960_v8 }
  0xa3   :  { %v211_v13 = vpop.xlane.xlu1 %210  ;;  %v207_v14 = vpop.xlane.xlu0 %206 }
  0xa4   :  { %v223_v15 = vmul.f32 %v4148_v12, %v211_v13  ;;  %v221_v16 = vmul.f32 %v4148_v12, %v207_v14  ;;  %v2964_v13 = vor.u32 %v3378_v7, %v2961_v9  ;;  %v2968_v14 = vor.u32 %v3380_v11, %v2967_v10 }
  0xa6   :  { %v4153_v17 = vsub.f32 %v4136_v2, %v223_v15  ;;  %v4156_v18 = vsub.f32 %v4138_v3, %v221_v16  ;;  %500 = vmatpush.bf16.msra.mxu1 %v2964_v13  ;;  %519 = vmatpush.bf16.msra.mxu2 %v2968_v14  ;;  %v2947_v15 = vld [vmem:[#allocation13 + $0x30] sm:$0xf]  ;;  %v3376_v16 = vld [vmem:[#allocation13 + $0x38] sm:$0xf0] }
  0xa8   :  { %v231_v19 = vmul.f32 %v4153_v17, %v4153_v17  ;;  %v229_v20 = vmul.f32 %v4156_v18, %v4156_v18 }
  0xaa   :  { %237 = vadd.xlane.f32.xlu0 %v231_v19  ;;  %233 = vadd.xlane.f32.xlu2 %v229_v20  ;;  %v3375_v19 = vld [vmem:[#allocation13 + $0x34] sm:$0xf]  ;;  %v2948_v20 = vor.u32 %v3376_v16, %v2947_v15 }
  0xab   :  { %v213_v21 = vpop.xlane.xlu1 %212  ;;  %v209_v22 = vpop.xlane.xlu0 %208 }
  0xac   :  { %v224_v23 = vmul.f32 %v4148_v12, %v213_v21  ;;  %v222_v24 = vmul.f32 %v4148_v12, %v209_v22  ;;  %v2949_v21 = vld [vmem:[#allocation13 + $0x3c] sm:$0xf0]  ;;  %v2955_v22 = vld [vmem:[#allocation13 + $0x38] sm:$0xf]  ;;  %482 = vmatpush.bf16.msra.mxu0 %v2948_v20 }
  0xae   :  { %v4165_v25 = vsub.f32 %v4142_v4, %v224_v23  ;;  %v4168_v26 = vsub.f32 %v4144_v5, %v222_v24  ;;  %v3377_v23 = vld [vmem:[#allocation13 + $0x40] sm:$0xf0]  ;;  %v2952_v24 = vor.u32 %v3375_v19, %v2949_v21  ;;  %v3577_v21 = vld [vmem:[#allocation10] ss:$0 sm:$0xff] }
  0xb0   :  { %v232_v27 = vmul.f32 %v4165_v25, %v4165_v25  ;;  %v230_v28 = vmul.f32 %v4168_v26, %v4168_v26  ;;  %501 = vmatpush.bf16.msra.mxu1 %v2952_v24 }
  0xb2   :  { %239 = vadd.xlane.f32.xlu1 %v232_v27  ;;  %235 = vadd.xlane.f32.xlu2 %v230_v28  ;;  %v2956_v27 = vor.u32 %v3377_v23, %v2955_v22  ;;  %v2935_v28 = vld [vmem:[#allocation13 + $0x18] sm:$0xf] }
  0xb3   :  { %v2936_v31 = vor.u32 %v3373_v29, %v2935_v28 }
  0xb4   :  { %520 = vmatpush.bf16.msra.mxu2 %v2956_v27  ;;  %502 = vmatpush.bf16.msra.mxu1 %v2940_v36 }
  0xb5   :  { %483 = vmatpush.bf16.msra.mxu0 %v2936_v31 }
  0xb8   :  { %521 = vmatpush.bf16.msra.mxu2 %v2944_v37  ;;  %503 = vmatpush.bf16.msra.mxu1 %v2928_v47  ;;  %v344_v47 = vperm.slane %v341_v45, 1 }
  0xb9   :  { %484 = vmatpush.bf16.msra.mxu0 %v2924_v43 }
  0xbc   :  { %522 = vmatpush.bf16.msra.mxu2 %v2932_v48 }
 0x11d   :  { %v234_v35 = vpop.xlane.xlu2 %233  ;;  %v238_v42 = vpop.xlane.xlu0 %237 }
 0x11e   :  { %v241_v41 = vmul.f32 %v234_v35, %v4148_v12  ;;  %v243_v50 = vmul.f32 %v238_v42, %v4148_v12 }
 0x120   :  { %v245_v49 = vadd.f32 1e-05, %v241_v41  ;;  %v247_v51 = vadd.f32 1e-05, %v243_v50 }
 0x122   :  { %3585 = vrsqrt.f32 %v245_v49  ;;  %vm255_vm2 = vweird.f32 %v245_v49  ;;  %vm275_vm9 = vweird.f32 %v247_v51 }
 0x123   :  { %3587 = vrsqrt.f32 %v247_v51 }
 0x125   :  { %v240_v52 = vpop.xlane.xlu1 %239  ;;  %v236_v53 = vpop.xlane.xlu2 %235 }
 0x126   :  { %v244_v54 = vmul.f32 %v240_v52, %v4148_v12  ;;  %v242_v55 = vmul.f32 %v236_v53, %v4148_v12 }
 0x128   :  { %v3586_v56 = vpop.eup %3585  ;;  %v248_v57 = vadd.f32 1e-05, %v244_v54  ;;  %v246_v58 = vadd.f32 1e-05, %v242_v55 }
 0x129   :  { %v250_v59 = vmul.f32 %v3586_v56, %v245_v49  ;;  %v3588_v62 = vpop.eup %3587  ;;  %vm256_vm1 = vweird.f32 %v3586_v56 }
 0x12a   :  { %3589 = vrsqrt.f32 %v248_v57  ;;  %v270_v8 = vmul.f32 %v3588_v62, %v247_v51  ;;  %vm257_vm3 = vmor %vm255_vm2, %vm256_vm1  ;;  %vm265_vm5 = vweird.f32 %v246_v58  ;;  %vm285_vm7 = vweird.f32 %v248_v57 }
 0x12b   :  { %v251_v60 = vmul.f32 %v3586_v56, %v250_v59  ;;  %3591 = vrsqrt.f32 %v246_v58  ;;  %vm276_vm10 = vweird.f32 %v3588_v62  ;;  %vm1066_vm1 = vcmask 519424  }
 0x12c   :  { %v271_v14 = vmul.f32 %v3588_v62, %v270_v8  ;;  %vm277_vm12 = vmor %vm275_vm9, %vm276_vm10  ;;  %vm1363_vm2 = vcmask 781824  }
 0x12d   :  { %v252_v61 = vmul.f32 0.5, %v251_v60 }
 0x12e   :  { %v272_v22 = vmul.f32 0.5, %v271_v14 }
 0x12f   :  { %v253_v63 = vsub.f32 1.5, %v252_v61 }
 0x130   :  { %v3590_v0 = vpop.eup %3589  ;;  %v273_v31 = vsub.f32 1.5, %v272_v22 }
 0x131   :  { %v3592_v1 = vpop.eup %3591  ;;  %v280_v6 = vmul.f32 %v3590_v0, %v248_v57  ;;  %v254_v7 = vmul.f32 %v3586_v56, %v253_v63  ;;  %vm286_vm8 = vweird.f32 %v3590_v0 }
 0x132   :  { %v260_v9 = vmul.f32 %v3592_v1, %v246_v58  ;;  %vm266_vm4 = vweird.f32 %v3592_v1  ;;  %vm287_vm11 = vmor %vm285_vm7, %vm286_vm8  ;;  %v274_v35 = vmul.f32 %v3588_v62, %v273_v31 }
 0x133   :  { %v281_v10 = vmul.f32 %v3590_v0, %v280_v6  ;;  %v258_v13 = vsel %vm257_vm3, %v3586_v56, %v254_v7  ;;  %vm267_vm6 = vmor %vm265_vm5, %vm266_vm4  ;;  %vm1660_vm3 = vcmask 1044224  }
 0x134   :  { %v261_v11 = vmul.f32 %v3592_v1, %v260_v9  ;;  %v289_v20 = vmul.f32 %v258_v13, %v4156_v18  ;;  %v278_v38 = vsel %vm277_vm12, %v3588_v62, %v274_v35 }
 0x135   :  { %v282_v16 = vmul.f32 0.5, %v281_v10  ;;  %v291_v39 = vmul.f32 %v278_v38, %v4153_v17  ;;  %v345_v17 = vperm.slane %v341_v45, 2 }
 0x136   :  { %v262_v15 = vmul.f32 0.5, %v261_v11  ;;  %v296_v29 = vmul.f32 %v3577_v21, %v289_v20 }
 0x137   :  { %v283_v24 = vsub.f32 1.5, %v282_v16  ;;  %v298_v41 = vmul.f32 %v3577_v21, %v291_v39 }
 0x138   :  { %v263_v19 = vsub.f32 1.5, %v262_v15  ;;  %v303_v18 = vadd.f32 %v3578_v30, %v296_v29 }
 0x139   :  { %v284_v33 = vmul.f32 %v3590_v0, %v283_v24  ;;  %v305_v43 = vadd.f32 %v3578_v30, %v298_v41 }
 0x13a   :  { %v264_v23 = vmul.f32 %v3592_v1, %v263_v19 }
 0x13b   :  { %v288_v37 = vsel %vm287_vm11, %v3590_v0, %v284_v33 }
 0x13c   :  { %v268_v27 = vsel %vm267_vm6, %v3592_v1, %v264_v23 }
 0x13d   :  { %v290_v28 = vmul.f32 %v268_v27, %v4168_v26  ;;  %v292_v26 = vmul.f32 %v288_v37, %v4165_v25 }
 0x13f   :  { %v297_v32 = vmul.f32 %v3577_v21, %v290_v28  ;;  %v299_v40 = vmul.f32 %v3577_v21, %v292_v26 }
 0x141   :  { %v304_v34 = vadd.f32 %v3578_v30, %v297_v32  ;;  %v306_v42 = vadd.f32 %v3578_v30, %v299_v40 }
 0x143   :  { %v307_v36 = vpack.c.bf16 %v304_v34, %v303_v18  ;;  %v308_v44 = vpack.c.bf16 %v306_v42, %v305_v43 }
 0x145   :  { %485 = vmatmul.bf16.vlgmr.msra.gmra.mxu0 %v307_v36  ;;  %504 = vmatmul.bf16.vlgmr.msra.gmra.mxu1 %v307_v36 }
 0x146   :  { %523 = vmatmul.bf16.vlgmr.msra.gmra.mxu2 %v307_v36 }
 0x155   :  { %490 = vmatmul.bf16.gmra.mxu0 %v308_v44  ;;  %509 = vmatmul.bf16.gmra.mxu1 %v308_v44 }
 0x156   :  { %528 = vmatmul.bf16.gmra.mxu2 %v308_v44 }
 0x1c2   :  { %v486_v48 = vpop.f32.mrf.mxu0  ;;  %v505_v49 = vpop.f32.mrf.mxu1 }
 0x1c3   :  { %v487_v50 = vadd.f32 %v486_v48, %v343_v46  ;;  %v506_v25 = vadd.f32 %v505_v49, %v344_v47 }
 0x1c5   :  { %v4185_v51 = vpack.c.bf16 %v506_v25, %v487_v50 }
 0x1c7   :  { %542 = vst [vmem:[#allocation4] sm:$0xff] %v4185_v51 }
 0x1c9   :  { %v524_v52 = vpop.f32.mrf.mxu2 }
 0x1ca   :  { %v525_v53 = vadd.f32 %v524_v52, %v345_v17  ;;  %v488_v54 = vpop.f32.mrf.mxu0  ;;  %v507_v55 = vpop.f32.mrf.mxu1 }
 0x1cb   :  { %v489_v56 = vadd.f32 %v488_v54, %v343_v46  ;;  %v508_v57 = vadd.f32 %v507_v55, %v344_v47 }
 0x1cc   :  { %v535_v58 = vpack.c.bf16 %v525_v53, %v525_v53 }
 0x1cd   :  { %v536_v59 = vpack.c.bf16 %v508_v57, %v489_v56 }
 0x1ce   :  { %543 = vst [vmem:[#allocation4 + $0x8] sm:$0xf] %v535_v58  ;;  %v554_v60 = vld [vmem:[#allocation4 + $0x4] sm:$0xf]  ;;  %v550_v11 = vld [vmem:[#allocation4] sm:$0xf] }
 0x1cf   :  { %544 = vst [vmem:[#allocation4 + $0xc] sm:$0xff] %v536_v59  ;;  %v567_v61 = vsel %vm562_vm13, %v554_v60, 0 }
 0x1d0   :  { %576 = vmatpush.bf16.xpose.msra.mxu3 %v567_v61 }
 0x1d1   :  { %v526_v62 = vpop.f32.mrf.mxu2 }
 0x1d2   :  { %v527_v63 = vadd.f32 %v526_v62, %v345_v17  ;;  %v491_v0 = vpop.f32.mrf.mxu0  ;;  %v510_v1 = vpop.f32.mrf.mxu1 }
 0x1d3   :  { %v492_v6 = vadd.f32 %v491_v0, %v343_v46  ;;  %v511_v7 = vadd.f32 %v510_v1, %v344_v47 }
 0x1d4   :  { %v537_v8 = vpack.c.bf16 %v527_v63, %v527_v63  ;;  %v3480_v63 = vunpack.c.h.b16 %v4185_v51 }
 0x1d5   :  { %v4189_v9 = vpack.c.bf16 %v511_v7, %v492_v6  ;;  %v558_v10 = vld [vmem:[#allocation4 + $0x8] sm:$0xf] }
 0x1d6   :  { %545 = vst [vmem:[#allocation4 + $0x14] sm:$0xf] %v537_v8  ;;  %v693_v13 = vsel %vm691_vm14, %v558_v10, 0  ;;  %v555_v14 = vld [vmem:[#allocation4 + $0x10] sm:$0xf]  ;;  %v4229_v1 = vpack.c.b16 %v3480_v63, %v3480_v63 }
 0x1d7   :  { %546 = vst [vmem:[#allocation4 + $0x18] sm:$0xff] %v4189_v9  ;;  %702 = vmatpush.bf16.msrb.mxu1 %v693_v13  ;;  %3017 = vmatmul.msk.bf16.vlgmr.msra.gmra.mxu3 %vm562_vm13, %v550_v11  ;;  %v586_v15 = vsel %vm562_vm13, %v555_v14, 0  ;;  %v3484_v16 = vunpack.c.h.b16 %v4189_v9  ;;  %v551_v37 = vld [vmem:[#allocation4 + $0xc] sm:$0xf]  ;;  %v3483_v7 = vunpack.c.l.b16 %v4189_v9 }
 0x1d8   :  { %595 = vmatpush.bf16.xpose.msrb.mxu3 %v586_v15 }
 0x1d9   :  { %v529_v19 = vpop.f32.mrf.mxu2  ;;  %v4196_v20 = vpack.c.b16 %v3484_v16, %v3484_v16  ;;  %v4234_v8 = vpack.c.b16 %v3483_v7, %v3483_v7 }
 0x1da   :  { %v530_v21 = vadd.f32 %v529_v19, %v345_v17  ;;  %v493_v22 = vpop.f32.mrf.mxu0  ;;  %v512_v23 = vpop.f32.mrf.mxu1 }
 0x1db   :  { %v494_v24 = vadd.f32 %v493_v22, %v343_v46  ;;  %v513_v27 = vadd.f32 %v512_v23, %v344_v47  ;;  %852 = vrot.lane.b32.xlu1 %v4196_v20, %s4024_s4 }
 0x1dc   :  { %v539_v28 = vpack.c.bf16 %v530_v21, %v530_v21 }
 0x1dd   :  { %v540_v29 = vpack.c.bf16 %v513_v27, %v494_v24  ;;  %v559_v30 = vld [vmem:[#allocation4 + $0x14] sm:$0xf] }
 0x1de   :  { %547 = vst [vmem:[#allocation4 + $0x20] sm:$0xf] %v539_v28  ;;  %v712_v31 = vsel %vm691_vm14, %v559_v30, 0  ;;  %v556_v32 = vld [vmem:[#allocation4 + $0x1c] sm:$0xf]  ;;  %v4220_v58 = vld [vmem:[#allocation4 + $0x10] sm:$0xff]  }
 0x1df   :  { %548 = vst [vmem:[#allocation4 + $0x24] sm:$0xff] %v540_v29  ;;  %721 = vmatpush.bf16.msra.mxu1 %v712_v31  ;;  %v605_v33 = vsel %vm562_vm13, %v556_v32, 0  ;;  %v552_v44 = vld [vmem:[#allocation4 + $0x18] sm:$0xf]  ;;  %v3487_v59 = vunpack.c.l.b16 %v4220_v58 }
 0x1e0   :  { %614 = vmatpush.bf16.xpose.msra.mxu3 %v605_v33 }
 0x1e1   :  { %v531_v18 = vpop.f32.mrf.mxu2  ;;  %v4223_v61 = vpack.c.b16 %v3487_v59, %v3487_v59 }
 0x1e2   :  { %v532_v34 = vadd.f32 %v531_v18, %v345_v17 }
 0x1e4   :  { %v541_v35 = vpack.c.bf16 %v532_v34, %v532_v34 }
 0x1e5   :  { %v560_v36 = vld [vmem:[#allocation4 + $0x20] sm:$0xf] }
 0x1e6   :  { %549 = vst [vmem:[#allocation4 + $0x2c] sm:$0xf] %v541_v35  ;;  %v731_v38 = vsel %vm691_vm14, %v560_v36, 0  ;;  %v557_v26 = vld [vmem:[#allocation4 + $0x28] sm:$0xf]  ;;  %v4240_v28 = vld [vmem:[#allocation4 + $0x20] sm:$0xff]  }
 0x1e7   :  { %740 = vmatpush.bf16.msrb.mxu2 %v731_v38  ;;  %3018 = vmatmul.msk.bf16.vlgmr.msrb.gmra.mxu3 %vm562_vm13, %v551_v37  ;;  %v624_v39 = vsel %vm562_vm13, %v557_v26, 0  ;;  %v553_v46 = vld [vmem:[#allocation4 + $0x24] sm:$0xf]  ;;  %v874_v30 = vunpack.c.h.b16 %v4240_v28  ;;  %v775_v26 = vld [vmem:[#allocation4 + $0x8] sm:$0xff]  }
 0x1e8   :  { %633 = vmatpush.bf16.xpose.msrb.mxu3 %v624_v39  ;;  %v816_v39 = vunpack.c.h.b16 %v775_v26 }
 0x1e9   :  { %v875_v32 = vpack.c.b16 %v874_v30, %v874_v30 }
 0x1ed   :  { %v4205_v40 = vld [vmem:[#allocation4 + $0x28] sm:$0xff]  }
 0x1ee   :  { %v3491_v41 = vunpack.c.l.b16 %v4205_v40  ;;  %v561_v43 = vld [vmem:[#allocation4 + $0x2c] sm:$0xf] }
 0x1ef   :  { %v750_v45 = vsel %vm691_vm14, %v561_v43, 0  ;;  %v3479_v43 = vunpack.c.l.b16 %v4185_v51 }
 0x1f0   :  { %v4208_v42 = vpack.c.b16 %v3491_v41, %v3491_v41  ;;  %v817_v41 = vpack.c.b16 %v816_v39, %v816_v39  ;;  %v999_v39 = vunpack.c.l.b16 %v4240_v28 }
 0x1f2   :  { %881 = vrot.lane.b32.xlu2 %v4208_v42, %s4024_s4 }
 0x1f7   :  { %3019 = vmatmul.msk.bf16.vlgmr.msra.gmra.mxu3 %vm562_vm13, %v552_v44  ;;  %v4249_v44 = vpack.c.b16 %v3479_v43, %v3479_v43  ;;  %v1000_v43 = vpack.c.b16 %v999_v39, %v999_v39 }
 0x1f8   :  { %759 = vmatpush.bf16.msra.mxu3 %v750_v45  ;;  %v951_v45 = vunpack.c.l.b16 %v775_v26 }
 0x207   :  { %3020 = vmatmul.msk.bf16.vlgmr.msrb.gmra.mxu3 %vm562_vm13, %v553_v46  ;;  %v952_v46 = vpack.c.b16 %v951_v45, %v951_v45 }
 0x24c   :  { %v882_v47 = vpop.permute.xlu2 %881 }
 0x24d   :  { %v887_v48 = vsel %vm562_vm13, %v882_v47, 0  ;;  %v853_v49 = vpop.permute.xlu1 %852 }
 0x24e   :  { %896 = vmatpush.bf16.xpose.msrb.mxu3 %v887_v48  ;;  %v858_v50 = vsel %vm562_vm13, %v853_v49, 0 }
 0x24f   :  { %867 = vmatpush.bf16.xpose.msra.mxu2 %v858_v50 }
 0x25a   :  { %v578_v25 = vpop.f32.mrf.mxu3 }
 0x25b   :  { %v640_v17 = vsel %vm639_vm15, %v578_v25, -inf }
 0x25c   :  { %641 = vmax.xlane.f32.xlu2 %v640_v17 }
 0x262   :  { %v580_v52 = vpop.f32.mrf.mxu3 }
 0x26a   :  { %v597_v53 = vpop.f32.mrf.mxu3 }
 0x26b   :  { %v643_v54 = vsel %vm639_vm15, %v597_v53, -inf }
 0x26c   :  { %644 = vmax.xlane.f32.xlu2 %v643_v54 }
 0x272   :  { %v599_v55 = vpop.f32.mrf.mxu3 }
 0x27a   :  { %v616_v56 = vpop.f32.mrf.mxu3 }
 0x27b   :  { %v646_v57 = vsel %vm639_vm15, %v616_v56, -inf }
 0x27c   :  { %647 = vmax.xlane.f32.xlu0 %v646_v57 }
 0x282   :  { %v618_v60 = vpop.f32.mrf.mxu3 }
 0x284   :  { %823 = vrot.lane.b32.xlu2 %v4223_v61, %s4024_s4 }
 0x28a   :  { %v635_v62 = vpop.f32.mrf.mxu3 }
 0x28b   :  { %v649_v0 = vsel %vm639_vm15, %v635_v62, -inf }
 0x28c   :  { %650 = vmax.xlane.f32.xlu1 %v649_v0 }
 0x290   :  { %794 = vrot.lane.b32.xlu0 %v4229_v1, %s4024_s4 }
 0x292   :  { %v637_v6 = vpop.f32.mrf.mxu3 }
 0x2a5   :  { %847 = vrot.lane.b32.xlu1 %v4234_v8, %s4024_s4 }
 0x2cf   :  { %v642_v10 = vpop.xlane.xlu2 %641 }
 0x2d0   :  { %v652_v11 = vsub.f32 %v578_v25, %v642_v10 }
 0x2d2   :  { %v656_v13 = vmul.f32 1.442695, %v652_v11 }
 0x2d4   :  { %3593 = vpow2.f32 %v656_v13 }
 0x2da   :  { %v3594_v14 = vpop.eup %3593 }
 0x2db   :  { %v664_v15 = vsel %vm639_vm15, %v3594_v14, 0.0 }
 0x2dc   :  { %665 = vadd.xlane.f32.xlu0 %v664_v15 }
 0x2df   :  { %v645_v16 = vpop.xlane.xlu2 %644 }
 0x2e0   :  { %v653_v19 = vsub.f32 %v597_v53, %v645_v16 }
 0x2e2   :  { %v658_v21 = vmul.f32 1.442695, %v653_v19 }
 0x2e4   :  { %3595 = vpow2.f32 %v658_v21 }
 0x2e7   :  { %v824_v50 = vpop.permute.xlu2 %823 }
 0x2e8   :  { %v829_v51 = vsel %vm562_vm13, %v824_v50, 0 }
 0x2ea   :  { %v3596_v22 = vpop.eup %3595 }
 0x2eb   :  { %v667_v9 = vsel %vm639_vm15, %v3596_v22, 0.0 }
 0x2ec   :  { %668 = vadd.xlane.f32.xlu0 %v667_v9 }
 0x2ef   :  { %v648_v23 = vpop.xlane.xlu0 %647 }
 0x2f0   :  { %v654_v24 = vsub.f32 %v616_v56, %v648_v23 }
 0x2f2   :  { %v660_v27 = vmul.f32 1.442695, %v654_v24 }
 0x2f4   :  { %3597 = vpow2.f32 %v660_v27 }
 0x2fa   :  { %v3598_v29 = vpop.eup %3597 }
 0x2fb   :  { %v670_v31 = vsel %vm639_vm15, %v3598_v29, 0.0 }
 0x2fc   :  { %671 = vadd.xlane.f32.xlu1 %v670_v31 }
 0x2ff   :  { %v651_v33 = vpop.xlane.xlu1 %650 }
 0x300   :  { %v655_v18 = vsub.f32 %v635_v62, %v651_v33  ;;  %876 = vrot.lane.b32.xlu0 %v875_v32, %s4024_s4 }
 0x302   :  { %v662_v34 = vmul.f32 1.442695, %v655_v18  ;;  %v795_v35 = vpop.permute.xlu0 %794 }
 0x303   :  { %v800_v36 = vsel %vm562_vm13, %v795_v35, 0 }
 0x304   :  { %3599 = vpow2.f32 %v662_v34  ;;  %809 = vmatpush.bf16.xpose.msrb.mxu0 %v800_v36 }
 0x30a   :  { %v3600_v37 = vpop.eup %3599 }
 0x30b   :  { %v673_v38 = vsel %vm639_vm15, %v3600_v37, 0.0 }
 0x30c   :  { %674 = vadd.xlane.f32.xlu2 %v673_v38 }
 0x315   :  { %818 = vrot.lane.b32.xlu1 %v817_v41, %s4024_s4 }
 0x317   :  { %v848_v53 = vpop.permute.xlu1 %847 }
 0x324   :  { %789 = vrot.lane.b32.xlu2 %v4249_v44, %s4024_s4 }
 0x32c   :  { %953 = vrot.lane.b32.xlu2 %v952_v46, %s4024_s4 }
 0x334   :  { %1178 = vrot.lane.b32.xlu2 %v4208_v42, %s4014_s18 }
 0x34f   :  { %v666_v47 = vpop.xlane.xlu0 %665 }
 0x350   :  { %3601 = vrcp.f32 %v666_v47 }
 0x356   :  { %v3602_v48 = vpop.eup %3601 }
 0x357   :  { %v680_v49 = vmul.f32 %v3602_v48, %v3594_v14 }
 0x359   :  { %v684_v25 = vpack.c.bf16 %v680_v49, %v680_v49 }
 0x35b   :  { %3021 = vmatmul.msk.bf16.vlgmr.msrb.gmra.mxu1 %vm639_vm15, %v684_v25 }
 0x35c   :  { %838 = vmatpush.bf16.xpose.msrb.mxu1 %v829_v51 }
 0x35f   :  { %v669_v17 = vpop.xlane.xlu0 %668 }
 0x360   :  { %3603 = vrcp.f32 %v669_v17 }
 0x366   :  { %v3604_v52 = vpop.eup %3603 }
 0x367   :  { %v681_v54 = vmul.f32 %v3604_v52, %v3596_v22 }
 0x369   :  { %v685_v55 = vpack.c.bf16 %v681_v54, %v681_v54 }
 0x36b   :  { %3022 = vmatmul.msk.bf16.vlgmr.msra.gmra.mxu1 %vm639_vm15, %v685_v55 }
 0x36f   :  { %v672_v56 = vpop.xlane.xlu1 %671 }
 0x370   :  { %3605 = vrcp.f32 %v672_v56 }
 0x372   :  { %v877_v14 = vpop.permute.xlu0 %876 }
 0x376   :  { %v3606_v57 = vpop.eup %3605 }
 0x377   :  { %v682_v59 = vmul.f32 %v3606_v57, %v3598_v29 }
 0x379   :  { %v686_v60 = vpack.c.bf16 %v682_v59, %v682_v59 }
 0x37b   :  { %3023 = vmatmul.msk.bf16.vlgmr.msrb.gmra.mxu2 %vm639_vm15, %v686_v60 }
 0x37f   :  { %v675_v62 = vpop.xlane.xlu2 %674 }
 0x380   :  { %3607 = vrcp.f32 %v675_v62  ;;  %v3492_v62 = vunpack.c.h.b16 %v4205_v40 }
 0x386   :  { %v3608_v63 = vpop.eup %3607 }
 0x387   :  { %v683_v0 = vmul.f32 %v3608_v63, %v3600_v37  ;;  %v790_v6 = vpop.permute.xlu2 %789  ;;  %v819_v7 = vpop.permute.xlu1 %818 }
 0x388   :  { %3025 = vmatmul.msk.bf16.vlgmr.msrb.gmra.mxu0 %vm562_vm13, %v790_v6  ;;  %3026 = vmatmul.msk.bf16.vlgmr.msrb.gmra.mxu1 %vm562_vm13, %v819_v7  ;;  %v4288_v7 = vpack.c.b16 %v3492_v62, %v3492_v62 }
 0x389   :  { %v687_v10 = vpack.c.bf16 %v683_v0, %v683_v0 }
 0x38b   :  { %3024 = vmatmul.msk.bf16.vlgmr.msra.gmra.mxu3 %vm639_vm15, %v687_v10  ;;  %3027 = vmatmul.msk.bf16.vlgmr.msra.gmra.mxu2 %vm562_vm13, %v848_v53 }
 0x38f   :  { %v954_v11 = vpop.permute.xlu2 %953 }
 0x390   :  { %v959_v13 = vsel %vm691_vm14, %v954_v11, 0 }
 0x391   :  { %968 = vmatpush.bf16.msra.mxu0 %v959_v13 }
 0x397   :  { %v4283_v51 = vpop.permute.xlu2 %1178 }
 0x39b   :  { %3028 = vmatmul.msk.bf16.vlgmr.msrb.gmra.mxu3 %vm562_vm13, %v877_v14  ;;  %v3488_v14 = vunpack.c.h.b16 %v4220_v58 }
 0x3d8   :  { %v704_v15 = vpop.f32.mrf.mxu1 }
 0x3d9   :  { %v765_v16 = vpack.c.bf16 %v704_v15, %v704_v15 }
 0x3db   :  { %770 = vst.msk [vmem:[#allocation5] sm:$0xf] %vm769_vm0, %v765_v16 }
 0x3e0   :  { %v706_v19 = vpop.f32.mrf.mxu1 }
 0x3e1   :  { %v4296_v19 = vpack.c.b16 %v3488_v14, %v3488_v14 }
 0x3e8   :  { %v723_v21 = vpop.f32.mrf.mxu1 }
 0x3e9   :  { %v766_v22 = vpack.c.bf16 %v723_v21, %v723_v21  ;;  %v1074_v21 = vld [vmem:[#allocation4 + $0x20] sm:$0xff]  }
 0x3eb   :  { %771 = vst.msk [vmem:[#allocation5 + $0x4] sm:$0xf] %vm769_vm0, %v766_v22  ;;  %v1171_v22 = vunpack.c.h.b16 %v1074_v21 }
 0x3f0   :  { %v725_v9 = vpop.f32.mrf.mxu1 }
 0x3f1   :  { %v1072_v9 = vld [vmem:[#allocation4 + $0x8] sm:$0xff]  }
 0x3f2   :  { %v1113_v58 = vunpack.c.h.b16 %v1072_v9 }
 0x3fe   :  { %v742_v23 = vpop.f32.mrf.mxu2 }
 0x3ff   :  { %v767_v24 = vpack.c.bf16 %v742_v23, %v742_v23  ;;  %v1172_v23 = vpack.c.b16 %v1171_v22, %v1171_v22 }
 0x401   :  { %772 = vst.msk [vmem:[#allocation5 + $0x8] sm:$0xf] %vm769_vm0, %v767_v24  ;;  %v1114_v24 = vpack.c.b16 %v1113_v58, %v1113_v58 }
 0x405   :  { %v811_v27 = vpop.f32.mrf.mxu0  ;;  %v840_v29 = vpop.f32.mrf.mxu1 }
 0x406   :  { %v744_v30 = vpop.f32.mrf.mxu2  ;;  %v902_v31 = vsel %vm639_vm15, %v811_v27, -inf  ;;  %v905_v26 = vsel %vm639_vm15, %v840_v29, -inf }
 0x407   :  { %903 = vmax.xlane.f32.xlu1 %v902_v31 }
 0x40d   :  { %v813_v32 = vpop.f32.mrf.mxu0  ;;  %v842_v33 = vpop.f32.mrf.mxu1 }
 0x40e   :  { %v761_v18 = vpop.f32.mrf.mxu3  ;;  %v869_v34 = vpop.f32.mrf.mxu2 }
 0x40f   :  { %v768_v35 = vpack.c.bf16 %v761_v18, %v761_v18  ;;  %v908_v36 = vsel %vm639_vm15, %v869_v34, -inf }
 0x410   :  { %909 = vmax.xlane.f32.xlu0 %v908_v36 }
 0x411   :  { %773 = vst.msk [vmem:[#allocation5 + $0xc] sm:$0xf] %vm769_vm0, %v768_v35 }
 0x416   :  { %v763_v37 = vpop.f32.mrf.mxu3  ;;  %v871_v38 = vpop.f32.mrf.mxu2 }
 0x418   :  { %906 = vmax.xlane.f32.xlu0 %v905_v26 }
 0x41e   :  { %v898_v41 = vpop.f32.mrf.mxu3 }
 0x41f   :  { %v911_v45 = vsel %vm639_vm15, %v898_v41, -inf }
 0x420   :  { %1001 = vrot.lane.b32.xlu1 %v1000_v43, %s4024_s4  ;;  %912 = vmax.xlane.f32.xlu2 %v911_v45 }
 0x426   :  { %v900_v46 = vpop.f32.mrf.mxu3 }
 0x428   :  { %1149 = vrot.lane.b32.xlu1 %v4196_v20, %s4014_s18 }
 0x430   :  { %1120 = vrot.lane.b32.xlu1 %v4223_v61, %s4014_s18 }
 0x438   :  { %1144 = vrot.lane.b32.xlu2 %v4234_v8, %s4014_s18 }
 0x47a   :  { %v904_v47 = vpop.xlane.xlu1 %903 }
 0x47b   :  { %v914_v48 = vsub.f32 %v811_v27, %v904_v47  ;;  %v1248_v27 = vunpack.c.l.b16 %v1072_v9 }
 0x47d   :  { %v918_v28 = vmul.f32 1.442695, %v914_v48  ;;  %v1249_v30 = vpack.c.b16 %v1248_v27, %v1248_v27 }
 0x47f   :  { %3609 = vpow2.f32 %v918_v28 }
 0x483   :  { %v910_v49 = vpop.xlane.xlu0 %909 }
 0x484   :  { %v916_v53 = vsub.f32 %v869_v34, %v910_v49 }
 0x485   :  { %v3610_v50 = vpop.eup %3609 }
 0x486   :  { %v926_v25 = vsel %vm639_vm15, %v3610_v50, 0.0  ;;  %v922_v55 = vmul.f32 1.442695, %v916_v53 }
 0x487   :  { %927 = vadd.xlane.f32.xlu0 %v926_v25 }
 0x48b   :  { %v907_v17 = vpop.xlane.xlu0 %906 }
 0x48c   :  { %v915_v52 = vsub.f32 %v840_v29, %v907_v17  ;;  %v1296_v29 = vunpack.c.l.b16 %v1074_v21 }
 0x48e   :  { %v920_v54 = vmul.f32 1.442695, %v915_v52  ;;  %v1297_v31 = vpack.c.b16 %v1296_v29, %v1296_v29 }
 0x490   :  { %3611 = vpow2.f32 %v920_v54 }
 0x491   :  { %3613 = vpow2.f32 %v922_v55 }
 0x492   :  { %v1002_v56 = vpop.permute.xlu1 %1001 }
 0x493   :  { %v1007_v57 = vsel %vm691_vm14, %v1002_v56, 0  ;;  %v913_v59 = vpop.xlane.xlu2 %912 }
 0x494   :  { %v917_v60 = vsub.f32 %v898_v41, %v913_v59  ;;  %1016 = vmatpush.bf16.msrb.mxu2 %v1007_v57 }
 0x496   :  { %v3612_v63 = vpop.eup %3611  ;;  %v924_v0 = vmul.f32 1.442695, %v917_v60 }
 0x497   :  { %v929_v6 = vsel %vm639_vm15, %v3612_v63, 0.0  ;;  %v3614_v13 = vpop.eup %3613 }
 0x498   :  { %3615 = vpow2.f32 %v924_v0  ;;  %930 = vadd.xlane.f32.xlu2 %v929_v6  ;;  %v932_v15 = vsel %vm639_vm15, %v3614_v13, 0.0 }
 0x49a   :  { %v1150_v10 = vpop.permute.xlu1 %1149 }
 0x49b   :  { %v1155_v11 = vsel %vm562_vm13, %v1150_v10, 0  ;;  %1025 = vrot.lane.b32.xlu0 %v4288_v7, %s4024_s4  ;;  %v1145_v34 = vpop.permute.xlu2 %1144 }
 0x49c   :  { %1164 = vmatpush.bf16.xpose.msra.mxu2 %v1155_v11 }
 0x49e   :  { %v3616_v40 = vpop.eup %3615 }
 0x49f   :  { %v935_v16 = vsel %vm639_vm15, %v3616_v40, 0.0 }
 0x4a0   :  { %933 = vadd.xlane.f32.xlu2 %v932_v15  ;;  %936 = vadd.xlane.f32.xlu1 %v935_v16 }
 0x4a2   :  { %v1121_v36 = vpop.permute.xlu1 %1120 }
 0x4a3   :  { %977 = vrot.lane.b32.xlu0 %v4296_v19, %s4024_s4  ;;  %v1126_v47 = vsel %vm562_vm13, %v1121_v36, 0 }
 0x4ab   :  { %1091 = vrot.lane.b32.xlu0 %v4229_v1, %s4014_s18 }
 0x4b3   :  { %1173 = vrot.lane.b32.xlu0 %v1172_v23, %s4014_s18 }
 0x4b8   :  { %1115 = vrot.lane.b32.xlu2 %v1114_v24, %s4014_s18 }
 0x4b9   :  { %1086 = vrot.lane.b32.xlu1 %v4249_v44, %s4014_s18 }
 0x4c0   :  { %1250 = vrot.lane.b32.xlu2 %v1249_v30, %s4014_s18 }
 0x4c1   :  { %1298 = vrot.lane.b32.xlu1 %v1297_v31, %s4014_s18 }
 0x4c8   :  { %1388 = vrot.lane.b32.xlu2 %v4229_v1, %s4025_s20  ;;  %v1184_v1 = vsel %vm562_vm13, %v4283_v51, 0 }
 0x4c9   :  { %1417 = vrot.lane.b32.xlu1 %v4223_v61, %s4025_s20 }
 0x4fa   :  { %v928_v32 = vpop.xlane.xlu0 %927 }
 0x4fb   :  { %3617 = vrcp.f32 %v928_v32 }
 0x501   :  { %v3618_v33 = vpop.eup %3617 }
 0x502   :  { %v942_v18 = vmul.f32 %v3618_v33, %v3610_v50 }
 0x504   :  { %v946_v35 = vpack.c.bf16 %v942_v18, %v942_v18 }
 0x506   :  { %3029 = vmatmul.msk.bf16.vlgmr.msra.gmra.mxu0 %vm639_vm15, %v946_v35 }
 0x50b   :  { %v931_v37 = vpop.xlane.xlu2 %930 }
 0x50c   :  { %3619 = vrcp.f32 %v931_v37 }
 0x50d   :  { %v1026_v38 = vpop.permute.xlu0 %1025 }
 0x50e   :  { %v1031_v26 = vsel %vm691_vm14, %v1026_v38, 0 }
 0x50f   :  { %1040 = vmatpush.bf16.msra.mxu3 %v1031_v26 }
 0x512   :  { %v3620_v61 = vpop.eup %3619 }
 0x513   :  { %1193 = vmatpush.bf16.xpose.msrb.mxu3 %v1184_v1  ;;  %v937_v39 = vpop.xlane.xlu1 %936  ;;  %v934_v41 = vpop.xlane.xlu2 %933  ;;  %v943_v43 = vmul.f32 %v3620_v61, %v3612_v63 }
 0x514   :  { %3621 = vrcp.f32 %v937_v39 }
 0x515   :  { %3623 = vrcp.f32 %v934_v41  ;;  %v978_v45 = vpop.permute.xlu0 %977  ;;  %v947_v48 = vpack.c.bf16 %v943_v43, %v943_v43 }
 0x516   :  { %v983_v46 = vsel %vm691_vm14, %v978_v45, 0 }
 0x517   :  { %992 = vmatpush.bf16.msra.mxu1 %v983_v46 }
 0x51a   :  { %v3622_v28 = vpop.eup %3621  ;;  %3030 = vmatmul.msk.bf16.vlgmr.msra.gmra.mxu1 %vm639_vm15, %v947_v48 }
 0x51b   :  { %1135 = vmatpush.bf16.xpose.msrb.mxu1 %v1126_v47  ;;  %v3624_v49 = vpop.eup %3623  ;;  %v945_v50 = vmul.f32 %v3622_v28, %v3616_v40  ;;  %v1116_v25 = vpop.permute.xlu2 %1115  ;;  %v4358_v28 = vld [vmem:[#allocation4 + $0x8] sm:$0xff]  }
 0x51c   :  { %v944_v51 = vmul.f32 %v3624_v49, %v3614_v13  ;;  %v1410_v49 = vunpack.c.h.b16 %v4358_v28 }
 0x51d   :  { %v949_v17 = vpack.c.bf16 %v945_v50, %v945_v50  ;;  %v1092_v52 = vpop.permute.xlu0 %1091 }
 0x51e   :  { %v948_v53 = vpack.c.bf16 %v944_v51, %v944_v51  ;;  %v1097_v54 = vsel %vm562_vm13, %v1092_v52, 0  ;;  %v1411_v50 = vpack.c.b16 %v1410_v49, %v1410_v49 }
 0x51f   :  { %3032 = vmatmul.msk.bf16.vlgmr.msra.gmra.mxu3 %vm639_vm15, %v949_v17  ;;  %1106 = vmatpush.bf16.xpose.msrb.mxu0 %v1097_v54 }
 0x520   :  { %3031 = vmatmul.msk.bf16.vlgmr.msrb.gmra.mxu2 %vm639_vm15, %v948_v53 }
 0x523   :  { %v1251_v55 = vpop.permute.xlu2 %1250 }
 0x524   :  { %v1256_v56 = vsel %vm691_vm14, %v1251_v55, 0 }
 0x525   :  { %v1174_v62 = vpop.permute.xlu0 %1173 }
 0x527   :  { %1265 = vmatpush.bf16.msra.mxu0 %v1256_v56  ;;  %v4366_v56 = vld [vmem:[#allocation4 + $0x20] sm:$0xff]  }
 0x52a   :  { %3034 = vmatmul.msk.bf16.vlgmr.msrb.gmra.mxu1 %vm562_vm13, %v1116_v25 }
 0x52b   :  { %v1087_v57 = vpop.permute.xlu1 %1086  ;;  %v1389_v59 = vpop.permute.xlu2 %1388 }
 0x52c   :  { %v1394_v60 = vsel %vm562_vm13, %v1389_v59, 0  ;;  %3033 = vmatmul.msk.bf16.vlgmr.msrb.gmra.mxu0 %vm562_vm13, %v1087_v57  ;;  %v1468_v57 = vunpack.c.h.b16 %v4366_v56 }
 0x52d   :  { %1403 = vmatpush.bf16.xpose.msrb.mxu0 %v1394_v60 }
 0x52e   :  { %v1469_v59 = vpack.c.b16 %v1468_v57, %v1468_v57 }
 0x52f   :  { %3036 = vmatmul.msk.bf16.vlgmr.msrb.gmra.mxu3 %vm562_vm13, %v1174_v62 }
 0x530   :  { %3035 = vmatmul.msk.bf16.vlgmr.msra.gmra.mxu2 %vm562_vm13, %v1145_v34 }
 0x533   :  { %v1299_v63 = vpop.permute.xlu1 %1298 }
 0x534   :  { %v1304_v0 = vsel %vm691_vm14, %v1299_v63, 0 }
 0x535   :  { %1313 = vmatpush.bf16.msrb.mxu2 %v1304_v0 }
 0x53b   :  { %v1418_v1 = vpop.permute.xlu1 %1417 }
 0x53c   :  { %v1423_v41 = vsel %vm562_vm13, %v1418_v1, 0 }
 0x583   :  { %v4329_v6 = vpop.f32.mrf.mxu0 }
 0x58b   :  { %v972_v10 = vpop.f32.mrf.mxu0 }
 0x597   :  { %v4331_v11 = vpop.f32.mrf.mxu1 }
 0x59f   :  { %v996_v13 = vpop.f32.mrf.mxu1 }
 0x5a2   :  { %v4333_v14 = vpop.f32.mrf.mxu3 }
 0x5a3   :  { %v4335_v40 = vpop.f32.mrf.mxu2 }
 0x5a7   :  { %v4337_v15 = vpop.f32.mrf.mxu1 }
 0x5a8   :  { %v1202_v39 = vsel %vm639_vm15, %v4337_v15, -inf }
 0x5a9   :  { %v1108_v16 = vpop.f32.mrf.mxu0 }
 0x5aa   :  { %v1044_v21 = vpop.f32.mrf.mxu3  ;;  %v1199_v22 = vsel %vm639_vm15, %v1108_v16, -inf }
 0x5ab   :  { %v1020_v9 = vpop.f32.mrf.mxu2  ;;  %1200 = vmax.xlane.f32.xlu0 %v1199_v22 }
 0x5af   :  { %v1139_v23 = vpop.f32.mrf.mxu1 }
 0x5b1   :  { %v1110_v58 = vpop.f32.mrf.mxu0 }
 0x5b2   :  { %v1195_v24 = vpop.f32.mrf.mxu3 }
 0x5b3   :  { %v1166_v27 = vpop.f32.mrf.mxu2  ;;  %v1208_v32 = vsel %vm639_vm15, %v1195_v24, -inf }
 0x5b4   :  { %v1205_v29 = vsel %vm639_vm15, %v1166_v27, -inf }
 0x5b5   :  { %1206 = vmax.xlane.f32.xlu2 %v1205_v29 }
 0x5ba   :  { %v1197_v30 = vpop.f32.mrf.mxu3 }
 0x5bb   :  { %v1168_v31 = vpop.f32.mrf.mxu2 }
 0x5bf   :  { %1274 = vrot.lane.b32.xlu0 %v4296_v19, %s4014_s18 }
 0x5c7   :  { %1322 = vrot.lane.b32.xlu0 %v4288_v7, %s4014_s18 }
 0x5cd   :  { %1475 = vrot.lane.b32.xlu2 %v4208_v42, %s4025_s20 }
 0x5f1   :  { %1209 = vmax.xlane.f32.xlu0 %v1208_v32 }
 0x605   :  { %1446 = vrot.lane.b32.xlu0 %v4196_v20, %s4025_s20 }
 0x61e   :  { %v1201_v33 = vpop.xlane.xlu0 %1200 }
 0x61f   :  { %v1211_v18 = vsub.f32 %v1108_v16, %v1201_v33 }
 0x621   :  { %v1215_v34 = vmul.f32 1.442695, %v1211_v18 }
 0x623   :  { %3625 = vpow2.f32 %v1215_v34 }
 0x628   :  { %v1207_v35 = vpop.xlane.xlu2 %1206 }
 0x629   :  { %v3626_v36 = vpop.eup %3625  ;;  %v1213_v37 = vsub.f32 %v1166_v27, %v1207_v35 }
 0x62a   :  { %v1223_v38 = vsel %vm639_vm15, %v3626_v36, 0.0 }
 0x62b   :  { %v1219_v26 = vmul.f32 1.442695, %v1213_v37  ;;  %1224 = vadd.xlane.f32.xlu1 %v1223_v38 }
 0x62d   :  { %3627 = vpow2.f32 %v1219_v26 }
 0x630   :  { %v1476_v45 = vpop.permute.xlu2 %1475 }
 0x631   :  { %v1275_v42 = vpop.permute.xlu0 %1274  ;;  %v1481_v48 = vsel %vm562_vm13, %v1476_v45, 0 }
 0x632   :  { %v1280_v61 = vsel %vm691_vm14, %v1275_v42, 0 }
 0x633   :  { %v3628_v20 = vpop.eup %3627  ;;  %1289 = vmatpush.bf16.msra.mxu1 %v1280_v61  ;;  %1203 = vmax.xlane.f32.xlu1 %v1202_v39 }
 0x634   :  { %v1229_v43 = vsel %vm639_vm15, %v3628_v20, 0.0 }
 0x635   :  { %1230 = vadd.xlane.f32.xlu0 %v1229_v43 }
 0x637   :  { %1432 = vmatpush.bf16.xpose.msrb.mxu1 %v1423_v41 }
 0x639   :  { %v1323_v46 = vpop.permute.xlu0 %1322 }
 0x63a   :  { %v1328_v47 = vsel %vm691_vm14, %v1323_v46, 0  ;;  %v1545_v46 = vunpack.c.l.b16 %v4358_v28 }
 0x63b   :  { %1337 = vmatpush.bf16.msra.mxu3 %v1328_v47 }
 0x63c   :  { %v1546_v47 = vpack.c.b16 %v1545_v46, %v1545_v46 }
 0x63f   :  { %1490 = vmatpush.bf16.xpose.msrb.mxu3 %v1481_v48  ;;  %v1593_v48 = vunpack.c.l.b16 %v4366_v56 }
 0x641   :  { %v1594_v49 = vpack.c.b16 %v1593_v48, %v1593_v48 }
 0x649   :  { %1412 = vrot.lane.b32.xlu0 %v1411_v50, %s4025_s20  ;;  %v1047_v50 = vpack.c.bf16 %v4331_v11, %v4331_v11 }
 0x64c   :  { %1383 = vrot.lane.b32.xlu1 %v4249_v44, %s4025_s20 }
 0x664   :  { %v1210_v25 = vpop.xlane.xlu0 %1209 }
 0x665   :  { %v1214_v51 = vsub.f32 %v1195_v24, %v1210_v25 }
 0x667   :  { %v1221_v17 = vmul.f32 1.442695, %v1214_v51 }
 0x669   :  { %3629 = vpow2.f32 %v1221_v17 }
 0x66f   :  { %v3630_v52 = vpop.eup %3629 }
 0x670   :  { %v1232_v53 = vsel %vm639_vm15, %v3630_v52, 0.0 }
 0x676   :  { %1233 = vadd.xlane.f32.xlu1 %v1232_v53 }
 0x677   :  { %v1447_v54 = vpop.permute.xlu0 %1446 }
 0x678   :  { %v1452_v55 = vsel %vm562_vm13, %v1447_v54, 0 }
 0x679   :  { %1461 = vmatpush.bf16.xpose.msra.mxu2 %v1452_v55 }
 0x68f   :  { %1470 = vrot.lane.b32.xlu1 %v1469_v59, %s4025_s20 }
 0x69e   :  { %v1225_v44 = vpop.xlane.xlu1 %1224 }
 0x69f   :  { %3631 = vrcp.f32 %v1225_v44 }
 0x6a5   :  { %v3632_v60 = vpop.eup %3631 }
 0x6a6   :  { %v1239_v62 = vmul.f32 %v3632_v60, %v3626_v36  ;;  %v1204_v63 = vpop.xlane.xlu1 %1203 }
 0x6a7   :  { %v1212_v0 = vsub.f32 %v4337_v15, %v1204_v63 }
 0x6a8   :  { %v1243_v10 = vpack.c.bf16 %v1239_v62, %v1239_v62  ;;  %v1231_v13 = vpop.xlane.xlu0 %1230  ;;  %v1046_v62 = vpack.c.bf16 %v4329_v6, %v4329_v6 }
 0x6a9   :  { %v1217_v16 = vmul.f32 1.442695, %v1212_v0  ;;  %3633 = vrcp.f32 %v1231_v13 }
 0x6aa   :  { %3037 = vmatmul.msk.bf16.vlgmr.msra.gmra.mxu0 %vm639_vm15, %v1243_v10 }
 0x6ab   :  { %3635 = vpow2.f32 %v1217_v16 }
 0x6af   :  { %v3634_v21 = vpop.eup %3633 }
 0x6b0   :  { %v1241_v22 = vmul.f32 %v3634_v21, %v3628_v20 }
 0x6b1   :  { %v3636_v9 = vpop.eup %3635 }
 0x6b2   :  { %v1245_v23 = vpack.c.bf16 %v1241_v22, %v1241_v22  ;;  %v1226_v58 = vsel %vm639_vm15, %v3636_v9, 0.0 }
 0x6b3   :  { %1227 = vadd.xlane.f32.xlu2 %v1226_v58 }
 0x6b4   :  { %3039 = vmatmul.msk.bf16.vlgmr.msrb.gmra.mxu2 %vm639_vm15, %v1245_v23 }
 0x6bb   :  { %v1413_v42 = vpop.permute.xlu0 %1412 }
 0x6be   :  { %v1384_v24 = vpop.permute.xlu1 %1383 }
 0x6bf   :  { %3041 = vmatmul.msk.bf16.vlgmr.msrb.gmra.mxu0 %vm562_vm13, %v1384_v24 }
 0x6cb   :  { %1441 = vrot.lane.b32.xlu2 %v4234_v8, %s4025_s20 }
 0x6e9   :  { %v1234_v15 = vpop.xlane.xlu1 %1233 }
 0x6ea   :  { %3637 = vrcp.f32 %v1234_v15 }
 0x6f0   :  { %v3638_v27 = vpop.eup %3637 }
 0x6f1   :  { %v1242_v29 = vmul.f32 %v3638_v27, %v3630_v52 }
 0x6f3   :  { %v1246_v30 = vpack.c.bf16 %v1242_v29, %v1242_v29 }
 0x6f5   :  { %3040 = vmatmul.msk.bf16.vlgmr.msra.gmra.mxu3 %vm639_vm15, %v1246_v30 }
 0x701   :  { %v1471_v31 = vpop.permute.xlu1 %1470 }
 0x705   :  { %3044 = vmatmul.msk.bf16.vlgmr.msrb.gmra.mxu3 %vm562_vm13, %v1471_v31 }
 0x726   :  { %v1228_v32 = vpop.xlane.xlu2 %1227 }
 0x727   :  { %3639 = vrcp.f32 %v1228_v32  ;;  %v1267_v33 = vpop.f32.mrf.mxu0 }
 0x728   :  { %v1343_v63 = vpack.c.bf16 %v1267_v33, %v1267_v33 }
 0x72d   :  { %v3640_v18 = vpop.eup %3639 }
 0x72e   :  { %v1240_v34 = vmul.f32 %v3640_v18, %v3636_v9  ;;  %v1442_v35 = vpop.permute.xlu2 %1441 }
 0x72f   :  { %v1269_v36 = vpop.f32.mrf.mxu0  ;;  %3043 = vmatmul.msk.bf16.vlgmr.msra.gmra.mxu2 %vm562_vm13, %v1442_v35 }
 0x730   :  { %v1244_v8 = vpack.c.bf16 %v1240_v34, %v1240_v34 }
 0x732   :  { %3038 = vmatmul.msk.bf16.vlgmr.msra.gmra.mxu1 %vm639_vm15, %v1244_v8 }
 0x737   :  { %v4381_v37 = vpop.f32.mrf.mxu2 }
 0x73c   :  { %v1405_v38 = vpop.f32.mrf.mxu0 }
 0x73d   :  { %v1496_v26 = vsel %vm639_vm15, %v1405_v38, -inf }
 0x73e   :  { %1497 = vmax.xlane.f32.xlu0 %v1496_v26 }
 0x73f   :  { %v1317_v1 = vpop.f32.mrf.mxu2 }
 0x742   :  { %3042 = vmatmul.msk.bf16.vlgmr.msrb.gmra.mxu1 %vm562_vm13, %v1413_v42 }
 0x744   :  { %v1407_v61 = vpop.f32.mrf.mxu0 }
 0x778   :  { %v4385_v39 = vpop.f32.mrf.mxu3 }
 0x780   :  { %v1341_v20 = vpop.f32.mrf.mxu3 }
 0x781   :  { %v1048_v20 = vpack.c.bf16 %v4335_v40, %v4335_v40 }
 0x788   :  { %v4387_v41 = vpop.f32.mrf.mxu3 }
 0x789   :  { %v1505_v43 = vsel %vm639_vm15, %v4387_v41, -inf }
 0x78a   :  { %1506 = vmax.xlane.f32.xlu0 %v1505_v43 }
 0x790   :  { %v1494_v45 = vpop.f32.mrf.mxu3 }
 0x79e   :  { %1547 = vrot.lane.b32.xlu0 %v1546_v47, %s4025_s20 }
 0x7a6   :  { %1595 = vrot.lane.b32.xlu0 %v1594_v49, %s4025_s20 }
 0x7ae   :  { %1056 = vrot.lane.b32.xlu0 %v1047_v50, %s4025_s20 }
 0x7af   :  { %v1291_v25 = vpop.f32.mrf.mxu1 }
 0x7b0   :  { %v1344_v52 = vpack.c.bf16 %v1291_v25, %v1291_v25 }
 0x7b1   :  { %v1498_v53 = vpop.xlane.xlu0 %1497 }
 0x7b2   :  { %v1463_v51 = vpop.f32.mrf.mxu2  ;;  %v1508_v28 = vsub.f32 %v1405_v38, %v1498_v53 }
 0x7b3   :  { %v1502_v17 = vsel %vm639_vm15, %v1463_v51, -inf }
 0x7b4   :  { %1503 = vmax.xlane.f32.xlu1 %v1502_v17  ;;  %v1512_v56 = vmul.f32 1.442695, %v1508_v28 }
 0x7b6   :  { %1353 = vrot.lane.b32.xlu0 %v1344_v52, %s4014_s18  ;;  %3641 = vpow2.f32 %v1512_v56 }
 0x7b7   :  { %v1293_v54 = vpop.f32.mrf.mxu1 }
 0x7ba   :  { %v1465_v55 = vpop.f32.mrf.mxu2 }
 0x7bc   :  { %v3642_v11 = vpop.eup %3641 }
 0x7bd   :  { %v1520_v60 = vsel %vm639_vm15, %v3642_v11, 0.0 }
 0x7bf   :  { %v1434_v57 = vpop.f32.mrf.mxu1 }
 0x7c0   :  { %v1499_v59 = vsel %vm639_vm15, %v1434_v57, -inf }
 0x7c1   :  { %1500 = vmax.xlane.f32.xlu2 %v1499_v59 }
 0x7c7   :  { %v1436_v44 = vpop.f32.mrf.mxu1 }
 0x7c9   :  { %1521 = vadd.xlane.f32.xlu2 %v1520_v60 }
 0x7e1   :  { %1571 = vrot.lane.b32.xlu2 %v4296_v19, %s4025_s20 }
 0x7e9   :  { %1054 = vrot.lane.b32.xlu2 %v1046_v62, %s4025_s20  ;;  %v1345_v62 = vpack.c.bf16 %v4381_v37, %v4381_v37  ;;  %v3398_v37 = vld [vmem:[#allocation15 + $0x18] sm:$0xff] }
 0x7f1   :  { %1351 = vrot.lane.b32.xlu2 %v1343_v63, %s4014_s18 }
 0x7fd   :  { %v1507_v0 = vpop.xlane.xlu0 %1506 }
 0x7fe   :  { %v1511_v30 = vsub.f32 %v4387_v41, %v1507_v0  ;;  %v1346_v41 = vpack.c.bf16 %v4385_v39, %v4385_v39 }
 0x800   :  { %v1518_v33 = vmul.f32 1.442695, %v1511_v30 }
 0x810   :  { %v1548_v10 = vpop.permute.xlu0 %1547 }
 0x811   :  { %v1553_v13 = vsel %vm691_vm14, %v1548_v10, 0  ;;  %v3402_v10 = vld [vmem:[#allocation15 + $0x38] sm:$0xff] }
 0x812   :  { %1562 = vmatpush.bf16.msra.mxu0 %v1553_v13  ;;  %v3401_v13 = vld [vmem:[#allocation15 + $0x30] sm:$0xff] }
 0x816   :  { %1749 = vmatpush.bf16.msrb.mxu0 %v3402_v10  ;;  %v3197_v10 = vld [vmem:[#allocation21 + $0xd0] sm:$0xf0] }
 0x818   :  { %v1596_v16 = vpop.permute.xlu0 %1595 }
 0x819   :  { %v1601_v21 = vsel %vm691_vm14, %v1596_v16, 0  ;;  %v3400_v16 = vld [vmem:[#allocation15 + $0x28] sm:$0xff] }
 0x81a   :  { %1610 = vmatpush.bf16.msrb.mxu2 %v1601_v21  ;;  %1750 = vmatpush.bf16.msrb.mxu0 %v3401_v13  ;;  %v3203_v13 = vld [vmem:[#allocation21 + $0xc8] sm:$0xf] }
 0x81e   :  { %1751 = vmatpush.bf16.msrb.mxu0 %v3400_v16  ;;  %v3432_v16 = vld [vmem:[#allocation21 + $0xd4] sm:$0xf0] }
 0x820   :  { %v1057_v22 = vpop.permute.xlu0 %1056 }
 0x821   :  { %1068 = vst.msk [vmem:[#allocation5 + $0x4] sm:$0xf] %vm1066_vm1, %v1057_v22 }
 0x827   :  { %v1504_v6 = vpop.xlane.xlu1 %1503 }
 0x828   :  { %v1354_v19 = vpop.permute.xlu0 %1353  ;;  %v1510_v58 = vsub.f32 %v1463_v51, %v1504_v6  ;;  %v1049_v51 = vpack.c.bf16 %v4333_v14, %v4333_v14 }
 0x829   :  { %1365 = vst.msk [vmem:[#allocation5 + $0x4] sm:$0xf] %vm1363_vm2, %v1354_v19 }
 0x82a   :  { %v1516_v15 = vmul.f32 1.442695, %v1510_v58  ;;  %v3396_v58 = vld [vmem:[#allocation15 + $0x8] sm:$0xff] }
 0x834   :  { %v1501_v9 = vpop.xlane.xlu2 %1500 }
 0x835   :  { %v1509_v23 = vsub.f32 %v1434_v57, %v1501_v9  ;;  %v3399_v9 = vld [vmem:[#allocation15 + $0x20] sm:$0xff] }
 0x836   :  { %1752 = vmatpush.bf16.msrb.mxu0 %v3399_v9 }
 0x837   :  { %v1514_v24 = vmul.f32 1.442695, %v1509_v23  ;;  %v3397_v23 = vld [vmem:[#allocation15 + $0x10] sm:$0xff] }
 0x839   :  { %3643 = vpow2.f32 %v1514_v24  ;;  %v3395_v24 = vld [vmem:[#allocation15] sm:$0xff] }
 0x83a   :  { %1753 = vmatpush.bf16.msrb.mxu0 %v3398_v37  ;;  %v3179_v37 = vld [vmem:[#allocation21 + $0xa0] sm:$0xf] }
 0x83c   :  { %v1522_v27 = vpop.xlane.xlu2 %1521 }
 0x83d   :  { %3645 = vrcp.f32 %v1522_v27 }
 0x83e   :  { %3647 = vpow2.f32 %v1516_v15  ;;  %1754 = vmatpush.bf16.msrb.mxu0 %v3397_v23  ;;  %v3427_v23 = vld [vmem:[#allocation21 + $0xac] sm:$0xf0] }
 0x83f   :  { %v3644_v29 = vpop.eup %3643  ;;  %3649 = vpow2.f32 %v1518_v33  ;;  %v3579_v33 = vld [vmem:[#allocation16] ss:$0 sm:$0xff] }
 0x840   :  { %v1523_v31 = vsel %vm639_vm15, %v3644_v29, 0.0 }
 0x841   :  { %1524 = vadd.xlane.f32.xlu1 %v1523_v31 }
 0x842   :  { %1755 = vmatpush.bf16.msrb.mxu0 %v3396_v58  ;;  %v3425_v58 = vld [vmem:[#allocation21 + $0xa4] sm:$0xf] }
 0x843   :  { %v3646_v32 = vpop.eup %3645 }
 0x844   :  { %v1536_v18 = vmul.f32 %v3646_v32, %v3642_v11  ;;  %v1572_v34 = vpop.permute.xlu2 %1571  ;;  %v3648_v35 = vpop.eup %3647 }
 0x845   :  { %v1577_v36 = vsel %vm691_vm14, %v1572_v34, 0  ;;  %v1526_v38 = vsel %vm639_vm15, %v3648_v35, 0.0  ;;  %v3650_v1 = vpop.eup %3649 }
 0x846   :  { %v1540_v8 = vpack.c.bf16 %v1536_v18, %v1536_v18  ;;  %1586 = vmatpush.bf16.msra.mxu1 %v1577_v36  ;;  %v1529_v42 = vsel %vm639_vm15, %v3650_v1, 0.0  ;;  %1756 = vmatpush.bf16.msrb.mxu0 %v3395_v24  ;;  %v3180_v24 = vor.u32 %v3427_v23, %v3179_v37 }
 0x848   :  { %3045 = vmatmul.msk.bf16.vlgmr.msra.gmra.mxu0 %vm639_vm15, %v1540_v8 }
 0x849   :  { %1527 = vadd.xlane.f32.xlu1 %v1526_v38 }
 0x84c   :  { %v1055_v26 = vpop.permute.xlu2 %1054 }
 0x84d   :  { %1067 = vst.msk [vmem:[#allocation5] sm:$0xf] %vm1066_vm1, %v1055_v26 }
 0x851   :  { %1530 = vadd.xlane.f32.xlu1 %v1529_v42 }
 0x854   :  { %v1352_v61 = vpop.permute.xlu2 %1351 }
 0x855   :  { %1364 = vst.msk [vmem:[#allocation5] sm:$0xf] %vm1363_vm2, %v1352_v61 }
 0x86a   :  { %1619 = vrot.lane.b32.xlu1 %v4288_v7, %s4025_s20 }
 0x872   :  { %1058 = vrot.lane.b32.xlu1 %v1048_v20, %s4025_s20 }
 0x87a   :  { %1357 = vrot.lane.b32.xlu1 %v1346_v41, %s4014_s18 }
 0x8b4   :  { %v1525_v43 = vpop.xlane.xlu1 %1524 }
 0x8b5   :  { %3651 = vrcp.f32 %v1525_v43 }
 0x8bb   :  { %v3652_v45 = vpop.eup %3651 }
 0x8bc   :  { %v1537_v46 = vmul.f32 %v3652_v45, %v3644_v29  ;;  %v1528_v47 = vpop.xlane.xlu1 %1527 }
 0x8bd   :  { %3653 = vrcp.f32 %v1528_v47 }
 0x8be   :  { %v1541_v48 = vpack.c.bf16 %v1537_v46, %v1537_v46 }
 0x8c0   :  { %3046 = vmatmul.msk.bf16.vlgmr.msra.gmra.mxu1 %vm639_vm15, %v1541_v48 }
 0x8c3   :  { %v3654_v7 = vpop.eup %3653 }
 0x8c4   :  { %v1538_v49 = vmul.f32 %v3654_v7, %v3648_v35  ;;  %v1531_v17 = vpop.xlane.xlu1 %1530 }
 0x8c5   :  { %v1564_v50 = vpop.f32.mrf.mxu0  ;;  %3655 = vrcp.f32 %v1531_v17  ;;  %v3211_v17 = vld [vmem:[#allocation21 + $0xe0] sm:$0xf] }
 0x8c6   :  { %v1542_v40 = vpack.c.bf16 %v1538_v49, %v1538_v49  ;;  %v1640_v25 = vpack.c.bf16 %v1564_v50, %v1564_v50 }
 0x8c8   :  { %1648 = vrot.lane.b32.xlu2 %v1640_v25, %s4024_s4  ;;  %3047 = vmatmul.msk.bf16.vlgmr.msrb.gmra.mxu2 %vm639_vm15, %v1542_v40 }
 0x8cb   :  { %v3656_v52 = vpop.eup %3655 }
 0x8cc   :  { %v1539_v53 = vmul.f32 %v3656_v52, %v3650_v1  ;;  %v3435_v52 = vld [vmem:[#allocation21 + $0xec] sm:$0xf0] }
 0x8cd   :  { %v1566_v39 = vpop.f32.mrf.mxu0 }
 0x8ce   :  { %v1543_v55 = vpack.c.bf16 %v1539_v53, %v1539_v53  ;;  %v3433_v53 = vld [vmem:[#allocation21 + $0xe4] sm:$0xf] }
 0x8d0   :  { %1060 = vrot.lane.b32.xlu2 %v1049_v51, %s4025_s20 }
 0x8dc   :  { %v1620_v28 = vpop.permute.xlu1 %1619 }
 0x8dd   :  { %v1625_v54 = vsel %vm691_vm14, %v1620_v28, 0  ;;  %v3212_v28 = vor.u32 %v3435_v52, %v3211_v17  ;;  %v3155_v17 = vld [vmem:[#allocation21 + $0x68] sm:$0xf]  ;;  %v3420_v52 = vld [vmem:[#allocation21 + $0x74] sm:$0xf0] }
 0x8de   :  { %1634 = vmatpush.bf16.msra.mxu3 %v1625_v54  ;;  %v3213_v54 = vld [vmem:[#allocation21 + $0xf0] sm:$0xf0] }
 0x8df   :  { %2102 = vmatpush.bf16.msrb.mxu1 %v3212_v28  ;;  %v3156_v28 = vor.u32 %v3420_v52, %v3155_v17 }
 0x8e1   :  { %3048 = vmatmul.msk.bf16.vlgmr.msra.gmra.mxu3 %vm639_vm15, %v1543_v55  ;;  %v3219_v55 = vld [vmem:[#allocation21 + $0xe8] sm:$0xf] }
 0x8e4   :  { %v1059_v56 = vpop.permute.xlu1 %1058 }
 0x8e5   :  { %1069 = vst.msk [vmem:[#allocation5 + $0x8] sm:$0xf] %vm1066_vm1, %v1059_v56  ;;  %v3436_v56 = vld [vmem:[#allocation21 + $0xf4] sm:$0xf0] }
 0x8ec   :  { %v1358_v59 = vpop.permute.xlu1 %1357 }
 0x922   :  { %v1649_v57 = vpop.permute.xlu2 %1648 }
 0x923   :  { %1661 = vst.msk [vmem:[#allocation5] sm:$0xf] %vm1660_vm3, %v1649_v57  ;;  %v3216_v57 = vor.u32 %v3433_v53, %v3213_v54  ;;  %v3418_v54 = vld [vmem:[#allocation21 + $0x6c] sm:$0xf] }
 0x925   :  { %2121 = vmatpush.bf16.msra.mxu2 %v3216_v57 }
 0x92a   :  { %v1061_v14 = vpop.permute.xlu2 %1060 }
 0x92b   :  { %1070 = vst.msk [vmem:[#allocation5 + $0xc] sm:$0xf] %vm1066_vm1, %v1061_v14  ;;  %v3220_v14 = vor.u32 %v3436_v56, %v3219_v55  ;;  %v3157_v55 = vld [vmem:[#allocation21 + $0x78] sm:$0xf0] }
 0x92c   :  { %1367 = vst.msk [vmem:[#allocation5 + $0xc] sm:$0xf] %vm1363_vm2, %v1358_v59  ;;  %v3434_v59 = vld [vmem:[#allocation21 + $0xec] sm:$0xf]  ;;  %v3160_v57 = vor.u32 %v3418_v54, %v3157_v55  ;;  %v3580_v54 = vld [vmem:[#allocation18] ss:$0 sm:$0xff] }
 0x92d   :  { %2140 = vmatpush.bf16.msrb.mxu3 %v3220_v14  ;;  %v3131_v14 = vld [vmem:[#allocation21 + $0x40] sm:$0xf] }
 0x93d   :  { %v1588_v11 = vpop.f32.mrf.mxu1 }
 0x93e   :  { %v1641_v44 = vpack.c.bf16 %v1588_v11, %v1588_v11  ;;  %v3221_v11 = vld [vmem:[#allocation21 + $0xf8] sm:$0xf0] }
 0x940   :  { %1650 = vrot.lane.b32.xlu0 %v1641_v44, %s4024_s4  ;;  %v3224_v44 = vor.u32 %v3434_v59, %v3221_v11  ;;  %v3415_v59 = vld [vmem:[#allocation21 + $0x4c] sm:$0xf0]  ;;  %v3413_v11 = vld [vmem:[#allocation21 + $0x44] sm:$0xf] }
 0x942   :  { %2159 = vmatpush.bf16.msra.mxu0 %v3224_v44  ;;  %v3132_v44 = vor.u32 %v3415_v59, %v3131_v14  ;;  %v3581_v59 = vld [vmem:[#allocation19] ss:$0 sm:$0xff] }
 0x945   :  { %v1590_v60 = vpop.f32.mrf.mxu1 }
 0x946   :  { %v3195_v60 = vld [vmem:[#allocation21 + $0xc0] sm:$0xf] }
 0x948   :  { %1355 = vrot.lane.b32.xlu0 %v1345_v62, %s4014_s18  ;;  %v3431_v62 = vld [vmem:[#allocation21 + $0xcc] sm:$0xf0] }
 0x94b   :  { %v1612_v63 = vpop.f32.mrf.mxu2 }
 0x94c   :  { %v1642_v0 = vpack.c.bf16 %v1612_v63, %v1612_v63  ;;  %v3429_v63 = vld [vmem:[#allocation21 + $0xc4] sm:$0xf] }
 0x94e   :  { %1652 = vrot.lane.b32.xlu2 %v1642_v0, %s4024_s4  ;;  %v3196_v0 = vor.u32 %v3431_v62, %v3195_v60  ;;  %v3133_v60 = vld [vmem:[#allocation21 + $0x50] sm:$0xf0]  ;;  %v3139_v62 = vld [vmem:[#allocation21 + $0x48] sm:$0xf] }
 0x950   :  { %2103 = vmatpush.bf16.msrb.mxu1 %v3196_v0  ;;  %v3136_v0 = vor.u32 %v3413_v11, %v3133_v60 }
 0x953   :  { %v1614_v21 = vpop.f32.mrf.mxu2 }
 0x954   :  { %v3200_v21 = vor.u32 %v3429_v63, %v3197_v10  ;;  %2104 = vmatpush.bf16.msrb.mxu1 %v3180_v24  ;;  %v3416_v63 = vld [vmem:[#allocation21 + $0x54] sm:$0xf0]  ;;  %v3123_v24 = vld [vmem:[#allocation21 + $0x28] sm:$0xf] }
 0x955   :  { %v3140_v10 = vor.u32 %v3416_v63, %v3139_v62 }
 0x956   :  { %2122 = vmatpush.bf16.msra.mxu2 %v3200_v21 }
 0x964   :  { %v1636_v22 = vpop.f32.mrf.mxu3 }
 0x965   :  { %v1643_v19 = vpack.c.bf16 %v1636_v22, %v1636_v22  ;;  %v3204_v22 = vor.u32 %v3432_v16, %v3203_v13  ;;  %v3414_v13 = vld [vmem:[#allocation21 + $0x4c] sm:$0xf]  ;;  %v3141_v16 = vld [vmem:[#allocation21 + $0x58] sm:$0xf0] }
 0x966   :  { %v3144_v21 = vor.u32 %v3414_v13, %v3141_v16 }
 0x967   :  { %1654 = vrot.lane.b32.xlu0 %v1643_v19, %s4024_s4  ;;  %v3430_v19 = vld [vmem:[#allocation21 + $0xcc] sm:$0xf]  ;;  %2141 = vmatpush.bf16.msrb.mxu3 %v3204_v22 }
 0x96c   :  { %v1638_v6 = vpop.f32.mrf.mxu3 }
 0x96d   :  { %v3205_v6 = vld [vmem:[#allocation21 + $0xd8] sm:$0xf0] }
 0x96e   :  { %v3208_v9 = vor.u32 %v3430_v19, %v3205_v6  ;;  %v3115_v19 = vld [vmem:[#allocation21 + $0x20] sm:$0xf]  ;;  %v3411_v6 = vld [vmem:[#allocation21 + $0x2c] sm:$0xf0] }
 0x96f   :  { %v3116_v23 = vor.u32 %v3411_v6, %v3115_v19 }
 0x970   :  { %2160 = vmatpush.bf16.msra.mxu0 %v3208_v9  ;;  %v3409_v9 = vld [vmem:[#allocation21 + $0x24] sm:$0xf] }
 0x9a8   :  { %v1653_v30 = vpop.permute.xlu2 %1652 }
 0x9b2   :  { %v1651_v15 = vpop.permute.xlu0 %1650 }
 0x9b3   :  { %1662 = vst.msk [vmem:[#allocation5 + $0x4] sm:$0xf] %vm1660_vm3, %v1651_v15  ;;  %v3181_v15 = vld [vmem:[#allocation21 + $0xb0] sm:$0xf0] }
 0x9ba   :  { %v1356_v27 = vpop.permute.xlu0 %1355  ;;  %v3393_v29 = vld [vmem:[#allocation5] sm:$0xff] }
 0x9bb   :  { %1366 = vst.msk [vmem:[#allocation5 + $0x8] sm:$0xf] %vm1363_vm2, %v1356_v27  ;;  %1757 = vmatmul.bf16.vlgmr.msrb.gmra.mxu0 %v3393_v29  ;;  %v3187_v27 = vld [vmem:[#allocation21 + $0xa8] sm:$0xf]  ;;  %v3428_v29 = vld [vmem:[#allocation21 + $0xb4] sm:$0xf0] }
 0x9bc   :  { %1663 = vst.msk [vmem:[#allocation5 + $0x8] sm:$0xf] %vm1660_vm3, %v1653_v30  ;;  %v3184_v30 = vor.u32 %v3425_v58, %v3181_v15  ;;  %v3117_v58 = vld [vmem:[#allocation21 + $0x30] sm:$0xf0]  ;;  %v3412_v15 = vld [vmem:[#allocation21 + $0x34] sm:$0xf0] }
 0x9be   :  { %2123 = vmatpush.bf16.msra.mxu2 %v3184_v30  ;;  %v3410_v30 = vld [vmem:[#allocation21 + $0x2c] sm:$0xf] }
 0x9d9   :  { %v1655_v31 = vpop.permute.xlu0 %1654 }
 0x9da   :  { %1664 = vst.msk [vmem:[#allocation5 + $0xc] sm:$0xf] %vm1660_vm3, %v1655_v31  ;;  %v3188_v31 = vor.u32 %v3428_v29, %v3187_v27  ;;  %v3120_v27 = vor.u32 %v3409_v9, %v3117_v58  ;;  %v3124_v29 = vor.u32 %v3412_v15, %v3123_v24 }
 0x9dc   :  { %2142 = vmatpush.bf16.msrb.mxu3 %v3188_v31  ;;  %v3125_v31 = vld [vmem:[#allocation21 + $0x38] sm:$0xf0] }
 0x9e1   :  { %v3394_v32 = vld [vmem:[#allocation5 + $0x8] sm:$0xff] }
 0x9e2   :  { %1762 = vmatmul.bf16.gmra.mxu0 %v3394_v32  ;;  %v3426_v32 = vld [vmem:[#allocation21 + $0xac] sm:$0xf] }
 0xa38   :  { %v1758_v18 = vpop.f32.mrf.mxu0 }
 0xa39   :  { %v1759_v34 = vadd.f32 %v3579_v33, %v1758_v18 }
 0xa3b   :  { %v4451_v35 = vadd.f32 %v4138_v3, %v1759_v34  ;;  %v3163_v34 = vld [vmem:[#allocation21 + $0x80] sm:$0xf] }
 0xa3d   :  { %1778 = vadd.xlane.f32.xlu1 %v4451_v35 }
 0xa40   :  { %v1760_v36 = vpop.f32.mrf.mxu0 }
 0xa41   :  { %v1761_v8 = vadd.f32 %v3579_v33, %v1760_v36  ;;  %v3423_v36 = vld [vmem:[#allocation21 + $0x8c] sm:$0xf0] }
 0xa43   :  { %v4455_v38 = vadd.f32 %v4144_v5, %v1761_v8  ;;  %v3421_v8 = vld [vmem:[#allocation21 + $0x84] sm:$0xf] }
 0xa45   :  { %1780 = vadd.xlane.f32.xlu2 %v4455_v38 }
 0xa5f   :  { %v1763_v26 = vpop.f32.mrf.mxu0 }
 0xa60   :  { %v1764_v1 = vadd.f32 %v3579_v33, %v1763_v26  ;;  %v3164_v26 = vor.u32 %v3423_v36, %v3163_v34  ;;  %v3099_v36 = vld [vmem:[#allocation21] sm:$0xf] }
 0xa62   :  { %v4459_v42 = vadd.f32 %v4136_v2, %v1764_v1  ;;  %v3165_v1 = vld [vmem:[#allocation21 + $0x90] sm:$0xf0]  ;;  %2105 = vmatpush.bf16.msrb.mxu1 %v3164_v26  ;;  %v3405_v26 = vld [vmem:[#allocation21 + $0x4] sm:$0xf] }
 0xa64   :  { %1782 = vadd.xlane.f32.xlu0 %v4459_v42 }
 0xa67   :  { %v1765_v61 = vpop.f32.mrf.mxu0 }
 0xa68   :  { %v1766_v20 = vadd.f32 %v3579_v33, %v1765_v61  ;;  %v3189_v33 = vld [vmem:[#allocation21 + $0xb8] sm:$0xf0]  ;;  %v3171_v61 = vld [vmem:[#allocation21 + $0x88] sm:$0xf] }
 0xa69   :  { %v3192_v18 = vor.u32 %v3426_v32, %v3189_v33 }
 0xa6a   :  { %v4463_v3 = vadd.f32 %v4142_v4, %v1766_v20  ;;  %v3424_v20 = vld [vmem:[#allocation21 + $0x94] sm:$0xf0] }
 0xa6b   :  { %2161 = vmatpush.bf16.msra.mxu0 %v3192_v18  ;;  %v3128_v18 = vor.u32 %v3410_v30, %v3125_v31 }
 0xa6c   :  { %1784 = vadd.xlane.f32.xlu1 %v4463_v3 }
 0xab0   :  { %v1779_v41 = vpop.xlane.xlu1 %1778 }
 0xab1   :  { %v1786_v5 = vmul.f32 %v1779_v41, %v4148_v12  ;;  %v3168_v41 = vor.u32 %v3421_v8, %v3165_v1  ;;  %v3407_v8 = vld [vmem:[#allocation21 + $0xc] sm:$0xf0] }
 0xab2   :  { %v3100_v1 = vor.u32 %v3407_v8, %v3099_v36 }
 0xab3   :  { %v4468_v43 = vsub.f32 %v4451_v35, %v1786_v5  ;;  %v3172_v5 = vor.u32 %v3424_v20, %v3171_v61  ;;  %2124 = vmatpush.bf16.msra.mxu2 %v3168_v41  ;;  %v3101_v61 = vld [vmem:[#allocation21 + $0x10] sm:$0xf0]  ;;  %v3107_v20 = vld [vmem:[#allocation21 + $0x8] sm:$0xf] }
 0xab5   :  { %v1794_v45 = vmul.f32 %v4468_v43, %v4468_v43  ;;  %2143 = vmatpush.bf16.msrb.mxu3 %v3172_v5  ;;  %v3104_v5 = vor.u32 %v3405_v26, %v3101_v61 }
 0xab7   :  { %1798 = vadd.xlane.f32.xlu2 %v1794_v45  ;;  %v3422_v45 = vld [vmem:[#allocation21 + $0x8c] sm:$0xf] }
 0xab8   :  { %v1781_v2 = vpop.xlane.xlu2 %1780 }
 0xab9   :  { %v1787_v46 = vmul.f32 %v1781_v2, %v4148_v12  ;;  %v3173_v2 = vld [vmem:[#allocation21 + $0x98] sm:$0xf0]  ;;  %2144 = vmatpush.bf16.msrb.mxu3 %v3156_v28 }
 0xabb   :  { %v4474_v47 = vsub.f32 %v4455_v38, %v1787_v46  ;;  %v3176_v46 = vor.u32 %v3422_v45, %v3173_v2  ;;  %v3408_v45 = vld [vmem:[#allocation21 + $0x14] sm:$0xf0]  ;;  %v3406_v2 = vld [vmem:[#allocation21 + $0xc] sm:$0xf] }
 0xabd   :  { %v1795_v4 = vmul.f32 %v4474_v47, %v4474_v47  ;;  %2162 = vmatpush.bf16.msra.mxu0 %v3176_v46  ;;  %2145 = vmatpush.bf16.msrb.mxu3 %v3140_v10  ;;  %v3109_v46 = vld [vmem:[#allocation21 + $0x18] sm:$0xf0] }
 0xabf   :  { %1800 = vadd.xlane.f32.xlu0 %v1795_v4 }
 0xac1   :  { %2163 = vmatpush.bf16.msra.mxu0 %v3160_v57  ;;  %2146 = vmatpush.bf16.msrb.mxu3 %v3124_v29 }
 0xac5   :  { %2164 = vmatpush.bf16.msra.mxu0 %v3144_v21 }
 0xac9   :  { %2165 = vmatpush.bf16.msra.mxu0 %v3128_v18 }
 0xad7   :  { %v1783_v48 = vpop.xlane.xlu0 %1782 }
 0xad8   :  { %v1788_v7 = vmul.f32 %v1783_v48, %v4148_v12  ;;  %v3147_v48 = vld [vmem:[#allocation21 + $0x60] sm:$0xf] }
 0xada   :  { %v4480_v49 = vsub.f32 %v4459_v42, %v1788_v7  ;;  %v3419_v7 = vld [vmem:[#allocation21 + $0x6c] sm:$0xf0] }
 0xadc   :  { %v1796_v50 = vmul.f32 %v4480_v49, %v4480_v49 }
 0xade   :  { %1802 = vadd.xlane.f32.xlu1 %v1796_v50  ;;  %v3417_v50 = vld [vmem:[#allocation21 + $0x64] sm:$0xf] }
 0xadf   :  { %v1785_v40 = vpop.xlane.xlu1 %1784 }
 0xae0   :  { %v1789_v25 = vmul.f32 %v1785_v40, %v4148_v12 }
 0xae2   :  { %v4486_v39 = vsub.f32 %v4463_v3, %v1789_v25  ;;  %v3148_v25 = vor.u32 %v3419_v7, %v3147_v48  ;;  %v3112_v48 = vor.u32 %v3406_v2, %v3109_v46 }
 0xae4   :  { %v1797_v51 = vmul.f32 %v4486_v39, %v4486_v39  ;;  %2106 = vmatpush.bf16.msrb.mxu1 %v3148_v25  ;;  %2166 = vmatpush.bf16.msra.mxu0 %v3112_v48 }
 0xae6   :  { %1804 = vadd.xlane.f32.xlu2 %v1797_v51  ;;  %v3149_v51 = vld [vmem:[#allocation21 + $0x70] sm:$0xf0] }
 0xae7   :  { %v3152_v53 = vor.u32 %v3417_v50, %v3149_v51 }
 0xae8   :  { %2107 = vmatpush.bf16.msrb.mxu1 %v3132_v44 }
 0xae9   :  { %2125 = vmatpush.bf16.msra.mxu2 %v3152_v53 }
 0xaec   :  { %2108 = vmatpush.bf16.msrb.mxu1 %v3116_v23 }
 0xaed   :  { %2126 = vmatpush.bf16.msra.mxu2 %v3136_v0 }
 0xaf0   :  { %2109 = vmatpush.bf16.msrb.mxu1 %v3100_v1 }
 0xaf1   :  { %2127 = vmatpush.bf16.msra.mxu2 %v3120_v27 }
 0xaf5   :  { %2128 = vmatpush.bf16.msra.mxu2 %v3104_v5 }
 0xb2a   :  { %v1799_v4 = vpop.xlane.xlu2 %1798 }
 0xb2b   :  { %v1806_v40 = vmul.f32 %v1799_v4, %v4148_v12  ;;  %v3108_v4 = vor.u32 %v3408_v45, %v3107_v20 }
 0xb2d   :  { %v4491_v56 = vadd.f32 1e-05, %v1806_v40  ;;  %2147 = vmatpush.bf16.msrb.mxu3 %v3108_v4 }
 0xb2f   :  { %3657 = vrsqrt.f32 %v4491_v56  ;;  %vm1820_vm5 = vweird.f32 %v4491_v56 }
 0xb32   :  { %v1801_v22 = vpop.xlane.xlu0 %1800 }
 0xb33   :  { %v1807_v37 = vmul.f32 %v1801_v22, %v4148_v12 }
 0xb35   :  { %v3658_v32 = vpop.eup %3657  ;;  %v1811_v33 = vadd.f32 1e-05, %v1807_v37 }
 0xb36   :  { %v1815_v34 = vmul.f32 %v3658_v32, %v4491_v56  ;;  %vm1821_vm4 = vweird.f32 %v3658_v32 }
 0xb37   :  { %3659 = vrsqrt.f32 %v1811_v33  ;;  %vm1822_vm6 = vmor %vm1820_vm5, %vm1821_vm4  ;;  %vm1830_vm8 = vweird.f32 %v1811_v33 }
 0xb38   :  { %v1816_v41 = vmul.f32 %v3658_v32, %v1815_v34 }
 0xb3a   :  { %v1817_v7 = vmul.f32 0.5, %v1816_v41  ;;  %v3444_v41 = vld [vmem:[#allocation22 + $0x38] sm:$0xff] }
 0xb3b   :  { %2782 = vmatpush.bf16.msra.mxu1 %v3444_v41  ;;  %v3448_v41 = vld [vmem:[#allocation22 + $0x58] sm:$0xff] }
 0xb3c   :  { %v1818_v50 = vsub.f32 1.5, %v1817_v7  ;;  %v3443_v7 = vld [vmem:[#allocation22 + $0x30] sm:$0xff] }
 0xb3d   :  { %v3660_v40 = vpop.eup %3659 }
 0xb3e   :  { %v1819_v25 = vmul.f32 %v3658_v32, %v1818_v50  ;;  %v1825_v51 = vmul.f32 %v3660_v40, %v1811_v33  ;;  %vm1831_vm7 = vweird.f32 %v3660_v40  ;;  %v3467_v50 = vld [vmem:[#allocation22 + $0xf0] sm:$0xff] }
 0xb3f   :  { %vm1832_vm9 = vmor %vm1830_vm8, %vm1831_vm7  ;;  %2783 = vmatpush.bf16.msra.mxu1 %v3443_v7 }
 0xb40   :  { %v1826_v17 = vmul.f32 %v3660_v40, %v1825_v51  ;;  %v1823_v52 = vsel %vm1822_vm6, %v3658_v32, %v1819_v25 }
 0xb41   :  { %v1854_v55 = vmul.f32 %v1823_v52, %v4468_v43  ;;  %v3460_v52 = vld [vmem:[#allocation22 + $0xb8] sm:$0xff] }
 0xb42   :  { %v1827_v53 = vmul.f32 0.5, %v1826_v17  ;;  %v3452_v17 = vld [vmem:[#allocation22 + $0x78] sm:$0xff]  ;;  %2820 = vmatpush.bf16.msra.mxu3 %v3460_v52 }
 0xb43   :  { %v1861_v11 = vmul.f32 %v3580_v54, %v1854_v55  ;;  %2801 = vmatpush.bf16.msrb.mxu2 %v3452_v17 }
 0xb44   :  { %v1828_v28 = vsub.f32 1.5, %v1827_v53 }
 0xb45   :  { %v1868_v62 = vadd.f32 %v3581_v59, %v1861_v11 }
 0xb46   :  { %v1829_v57 = vmul.f32 %v3660_v40, %v1828_v28 }
 0xb48   :  { %v1833_v14 = vsel %vm1832_vm9, %v3660_v40, %v1829_v57  ;;  %v3442_v57 = vld [vmem:[#allocation22 + $0x28] sm:$0xff] }
 0xb49   :  { %v1855_v44 = vmul.f32 %v1833_v14, %v4474_v47  ;;  %v3466_v14 = vld [vmem:[#allocation22 + $0xe8] sm:$0xff]  ;;  %2784 = vmatpush.bf16.msra.mxu1 %v3442_v57  ;;  %v3447_v57 = vld [vmem:[#allocation22 + $0x50] sm:$0xff] }
 0xb4b   :  { %v1862_v60 = vmul.f32 %v3580_v54, %v1855_v44 }
 0xb4d   :  { %v1869_v56 = vadd.f32 %v3581_v59, %v1862_v60 }
 0xb4f   :  { %v3528_v63 = vpack.c.bf16 %v1869_v56, %v1868_v62  ;;  %v3451_v56 = vld [vmem:[#allocation22 + $0x70] sm:$0xff] }
 0xb50   :  { %2802 = vmatpush.bf16.msrb.mxu2 %v3451_v56 }
 0xb51   :  { %3529 = vst [vmem:[#allocation3] sm:$0xff] %v3528_v63   ;;  %v1803_v0 = vpop.xlane.xlu1 %1802  ;;  %v3459_v63 = vld [vmem:[#allocation22 + $0xb0] sm:$0xff] }
 0xb52   :  { %v1808_v10 = vmul.f32 %v1803_v0, %v4148_v12  ;;  %2821 = vmatpush.bf16.msra.mxu3 %v3459_v63  ;;  %v3437_v63 = vld [vmem:[#allocation22] sm:$0xff] }
 0xb54   :  { %v1812_v13 = vadd.f32 1e-05, %v1808_v10 }
 0xb56   :  { %3661 = vrsqrt.f32 %v1812_v13  ;;  %vm1840_vm11 = vweird.f32 %v1812_v13 }
 0xb58   :  { %v3403_v16 = vld [vmem:[#allocation3] sm:$0xff] }
 0xb59   :  { %v1805_v43 = vpop.xlane.xlu2 %1804  ;;  %2110 = vmatmul.bf16.vlgmr.msrb.gmra.mxu1 %v3403_v16  ;;  %2129 = vmatmul.bf16.vlgmr.msra.gmra.mxu2 %v3403_v16 }
 0xb5a   :  { %v1809_v21 = vmul.f32 %v1805_v43, %v4148_v12  ;;  %2148 = vmatmul.bf16.vlgmr.msrb.gmra.mxu3 %v3403_v16  ;;  %2167 = vmatmul.bf16.vlgmr.msra.gmra.mxu0 %v3403_v16  ;;  %v3441_v43 = vld [vmem:[#allocation22 + $0x20] sm:$0xff] }
 0xb5b   :  { %2785 = vmatpush.bf16.msra.mxu1 %v3441_v43 }
 0xb5c   :  { %v3662_v22 = vpop.eup %3661  ;;  %v1813_v47 = vadd.f32 1e-05, %v1809_v21  ;;  %v3465_v21 = vld [vmem:[#allocation22 + $0xe0] sm:$0xff] }
 0xb5d   :  { %v1835_v19 = vmul.f32 %v3662_v22, %v1812_v13  ;;  %vm1841_vm10 = vweird.f32 %v3662_v22 }
 0xb5e   :  { %3663 = vrsqrt.f32 %v1813_v47  ;;  %vm1842_vm12 = vmor %vm1840_vm11, %vm1841_vm10  ;;  %vm1850_vm14 = vweird.f32 %v1813_v47 }
 0xb5f   :  { %v1836_v6 = vmul.f32 %v3662_v22, %v1835_v19 }
 0xb61   :  { %v1837_v9 = vmul.f32 0.5, %v1836_v6 }
 0xb63   :  { %v1838_v37 = vsub.f32 1.5, %v1837_v9  ;;  %v3450_v9 = vld [vmem:[#allocation22 + $0x68] sm:$0xff] }
 0xb64   :  { %v3664_v23 = vpop.eup %3663  ;;  %2803 = vmatpush.bf16.msrb.mxu2 %v3450_v9  ;;  %v3454_v9 = vld [vmem:[#allocation22 + $0x88] sm:$0xff] }
 0xb65   :  { %v1839_v58 = vmul.f32 %v3662_v22, %v1838_v37  ;;  %v1845_v24 = vmul.f32 %v3664_v23, %v1813_v47  ;;  %vm1851_vm13 = vweird.f32 %v3664_v23  ;;  %v3458_v37 = vld [vmem:[#allocation22 + $0xa8] sm:$0xff] }
 0xb66   :  { %vm1852_vm15 = vmor %vm1850_vm14, %vm1851_vm13  ;;  %2822 = vmatpush.bf16.msra.mxu3 %v3458_v37 }
 0xb67   :  { %v1846_v15 = vmul.f32 %v3664_v23, %v1845_v24  ;;  %v1843_v27 = vsel %vm1842_vm12, %v3662_v22, %v1839_v58 }
 0xb68   :  { %v1856_v30 = vmul.f32 %v1843_v27, %v4480_v49  ;;  %v1920_v49 = vld [vmem:[%s4890_s10] sm:$0xf] }
 0xb69   :  { %v1847_v12 = vmul.f32 0.5, %v1846_v15  ;;  %v4506_v61 = vperm.slane %v1920_v49, 0  ;;  %v4508_v20 = vperm.slane %v1920_v49, 3  ;;  %v4517_v48 = vperm.slane %v1920_v49, 1 }
 0xb6a   :  { %v1863_v33 = vmul.f32 %v3580_v54, %v1856_v30  ;;  %v4520_v25 = vperm.slane %v1920_v49, 2  ;;  %v3464_v30 = vld [vmem:[#allocation22 + $0xd8] sm:$0xff] }
 0xb6b   :  { %v1848_v29 = vsub.f32 1.5, %v1847_v12 }
 0xb6c   :  { %v1870_v36 = vadd.f32 %v3581_v59, %v1863_v33 }
 0xb6d   :  { %v1849_v31 = vmul.f32 %v3664_v23, %v1848_v29  ;;  %v3440_v29 = vld [vmem:[#allocation22 + $0x18] sm:$0xff] }
 0xb6e   :  { %2786 = vmatpush.bf16.msra.mxu1 %v3440_v29 }
 0xb6f   :  { %v1853_v32 = vsel %vm1852_vm15, %v3664_v23, %v1849_v31  ;;  %v3449_v31 = vld [vmem:[#allocation22 + $0x60] sm:$0xff] }
 0xb70   :  { %v1857_v18 = vmul.f32 %v1853_v32, %v4486_v39  ;;  %v3468_v39 = vld [vmem:[#allocation22 + $0xf8] sm:$0xff]  ;;  %v3457_v32 = vld [vmem:[#allocation22 + $0xa0] sm:$0xff]  ;;  %2804 = vmatpush.bf16.msrb.mxu2 %v3449_v31 }
 0xb71   :  { %2839 = vmatpush.bf16.msrb.mxu0 %v3468_v39  ;;  %2823 = vmatpush.bf16.msra.mxu3 %v3457_v32  ;;  %v3456_v39 = vld [vmem:[#allocation22 + $0x98] sm:$0xff] }
 0xb72   :  { %v1864_v34 = vmul.f32 %v3580_v54, %v1857_v18 }
 0xb74   :  { %v1871_v8 = vadd.f32 %v3581_v59, %v1864_v34  ;;  %v3439_v34 = vld [vmem:[#allocation22 + $0x10] sm:$0xff]  ;;  %2805 = vmatpush.bf16.msrb.mxu2 %v3448_v41  ;;  %v3445_v41 = vld [vmem:[#allocation22 + $0x40] sm:$0xff] }
 0xb75   :  { %2840 = vmatpush.bf16.msrb.mxu0 %v3467_v50  ;;  %2787 = vmatpush.bf16.msra.mxu1 %v3439_v34 }
 0xb76   :  { %v3533_v26 = vpack.c.bf16 %v1871_v8, %v1870_v36  ;;  %v3463_v36 = vld [vmem:[#allocation22 + $0xd0] sm:$0xff]  ;;  %2824 = vmatpush.bf16.msra.mxu3 %v3456_v39  ;;  %v3453_v39 = vld [vmem:[#allocation22 + $0x80] sm:$0xff] }
 0xb78   :  { %3555 = vst [vmem:[#allocation3 + $0x8] sm:$0xff] %v3533_v26   ;;  %2806 = vmatpush.bf16.msrb.mxu2 %v3447_v57 }
 0xb79   :  { %2841 = vmatpush.bf16.msrb.mxu0 %v3466_v14 }
 0xb7d   :  { %2842 = vmatpush.bf16.msrb.mxu0 %v3465_v21 }
 0xb7f   :  { %v3404_v1 = vld [vmem:[#allocation3 + $0x8] sm:$0xff] }
 0xb80   :  { %2115 = vmatmul.bf16.gmra.mxu1 %v3404_v1  ;;  %2134 = vmatmul.bf16.gmra.mxu2 %v3404_v1 }
 0xb81   :  { %2153 = vmatmul.bf16.gmra.mxu3 %v3404_v1  ;;  %2172 = vmatmul.bf16.gmra.mxu0 %v3404_v1 }
 0xb82   :  { %2843 = vmatpush.bf16.msrb.mxu0 %v3464_v30 }
 0xb86   :  { %2844 = vmatpush.bf16.msrb.mxu0 %v3463_v36 }
 0xbd6   :  { %v2111_v5 = vpop.f32.mrf.mxu1 }
 0xbd7   :  { %v4511_v45 = vadd.f32 %v2111_v5, %v4506_v61  ;;  %v2168_v2 = vpop.f32.mrf.mxu0 }
 0xbd8   :  { %v4514_v46 = vadd.f32 %v2168_v2, %v4508_v20 }
 0xbd9   :  { %v3225_v4 = vmul.f32 -1.702, %v4511_v45 }
 0xbda   :  { %v3228_v40 = vmul.f32 -1.702, %v4514_v46 }
 0xbdb   :  { %v2210_v51 = vmul.f32 1.442695, %v3225_v4 }
 0xbdc   :  { %v2216_v53 = vmul.f32 1.442695, %v3228_v40  ;;  %v2130_v28 = vpop.f32.mrf.mxu2  ;;  %v3438_v40 = vld [vmem:[#allocation22 + $0x8] sm:$0xff] }
 0xbdd   :  { %3665 = vpow2.f32 %v2210_v51  ;;  %v4523_v54 = vadd.f32 %v2130_v28, %v4517_v48  ;;  %v2149_v55 = vpop.f32.mrf.mxu3  ;;  %v3462_v51 = vld [vmem:[#allocation22 + $0xc8] sm:$0xff]  ;;  %2788 = vmatpush.bf16.msra.mxu1 %v3438_v40 }
 0xbde   :  { %3667 = vpow2.f32 %v2216_v53  ;;  %v4526_v59 = vadd.f32 %v2149_v55, %v4520_v25  ;;  %v2113_v11 = vpop.f32.mrf.mxu1  ;;  %2845 = vmatpush.bf16.msrb.mxu0 %v3462_v51 }
 0xbdf   :  { %v3226_v44 = vmul.f32 -1.702, %v4523_v54  ;;  %v4530_v60 = vadd.f32 %v2113_v11, %v4506_v61  ;;  %v2170_v62 = vpop.f32.mrf.mxu0 }
 0xbe0   :  { %v3227_v0 = vmul.f32 -1.702, %v4526_v59  ;;  %v4534_v10 = vadd.f32 %v2170_v62, %v4508_v20 }
 0xbe1   :  { %v2212_v13 = vmul.f32 1.442695, %v3226_v44  ;;  %v3229_v16 = vmul.f32 -1.702, %v4530_v60  ;;  %v3455_v44 = vld [vmem:[#allocation22 + $0x90] sm:$0xff]  ;;  %2789 = vmatpush.bf16.msra.mxu1 %v3437_v63 }
 0xbe2   :  { %v2214_v22 = vmul.f32 1.442695, %v3227_v0  ;;  %v3232_v47 = vmul.f32 -1.702, %v4534_v10  ;;  %v3461_v0 = vld [vmem:[#allocation22 + $0xc0] sm:$0xff]  ;;  %2825 = vmatpush.bf16.msra.mxu3 %v3455_v44 }
 0xbe3   :  { %v3666_v19 = vpop.eup %3665  ;;  %3669 = vpow2.f32 %v2212_v13  ;;  %v2218_v6 = vmul.f32 1.442695, %v3229_v16  ;;  %2846 = vmatpush.bf16.msrb.mxu0 %v3461_v0 }
 0xbe4   :  { %v3668_v23 = vpop.eup %3667  ;;  %v4538_v58 = vadd.f32 1.0, %v3666_v19  ;;  %3671 = vpow2.f32 %v2214_v22  ;;  %v2224_v24 = vmul.f32 1.442695, %v3232_v47  ;;  %v2132_v15 = vpop.f32.mrf.mxu2 }
 0xbe5   :  { %v4540_v27 = vadd.f32 1.0, %v3668_v23  ;;  %3673 = vpow2.f32 %v2218_v6  ;;  %v4543_v12 = vadd.f32 %v2132_v15, %v4517_v48  ;;  %v2151_v4 = vpop.f32.mrf.mxu3  ;;  %v3446_v6 = vld [vmem:[#allocation22 + $0x48] sm:$0xff] }
 0xbe6   :  { %3675 = vrcp.f32 %v4538_v58  ;;  %v4565_v55 = vadd.f32 %v2151_v4, %v4520_v25  ;;  %v2267_v56 = vand.u32 2147483647, %v4538_v58  ;;  %v2269_v16 = vand.u32 2147483648, %v4538_v58  ;;  %2807 = vmatpush.bf16.msrb.mxu2 %v3446_v6  ;;  %2826 = vmatpush.bf16.msra.mxu3 %v3454_v9 }
 0xbe7   :  { %3677 = vrcp.f32 %v4540_v27  ;;  %v3230_v33 = vmul.f32 -1.702, %v4543_v12  ;;  %v2312_v21 = vand.u32 2147483647, %v4540_v27  ;;  %v2314_v22 = vand.u32 2147483648, %v4540_v27 }
 0xbe8   :  { %3679 = vpow2.f32 %v2224_v24  ;;  %v3231_v19 = vmul.f32 -1.702, %v4565_v55  ;;  %vm2263_vm2 = vweird.f32 %v4538_v58  ;;  %vm4589_vm3 = vcmp.eq.f32.partialorder %v2267_v56, 8.507059e+37 }
 0xbe9   :  { %v3670_v18 = vpop.eup %3669  ;;  %v2220_v2 = vmul.f32 1.442695, %v3230_v33  ;;  %vm2308_vm4 = vweird.f32 %v4540_v27  ;;  %v2270_v32 = vor.u32 1.1754944e-38, %v2269_v16  ;;  %vm4600_vm6 = vcmp.eq.f32.partialorder %v2312_v21, 8.507059e+37 }
 0xbea   :  { %v3672_v8 = vpop.eup %3671  ;;  %v4548_v26 = vadd.f32 1.0, %v3670_v18  ;;  %v2315_v36 = vor.u32 1.1754944e-38, %v2314_v22  ;;  %2808 = vmatpush.bf16.msrb.mxu2 %v3445_v41  ;;  %2827 = vmatpush.bf16.msra.mxu3 %v3453_v39 }
 0xbeb   :  { %v3674_v1 = vpop.eup %3673  ;;  %v4550_v49 = vadd.f32 1.0, %v3672_v8 }
 0xbec   :  { %v4552_v5 = vpop.eup %3675  ;;  %3681 = vrcp.f32 %v4548_v26  ;;  %v4562_v28 = vadd.f32 1.0, %v3674_v1  ;;  %vm2278_vm8 = vweird.f32 %v4548_v26  ;;  %v2284_v8 = vand.u32 2147483648, %v4548_v26 }
 0xbed   :  { %v4555_v7 = vpop.eup %3677  ;;  %v2259_v50 = vmul.f32 %v4552_v5, %v4538_v58  ;;  %3683 = vrcp.f32 %v4550_v49  ;;  %vm2264_vm0 = vweird.f32 %v4552_v5  ;;  %v2282_v58 = vand.u32 2147483647, %v4548_v26 }
 0xbee   :  { %v3680_v17 = vpop.eup %3679  ;;  %v2304_v52 = vmul.f32 %v4555_v7, %v4540_v27  ;;  %3685 = vpow2.f32 %v2220_v2  ;;  %vm2309_vm1 = vweird.f32 %v4555_v7  ;;  %vm4596_vm5 = vmor %vm2263_vm2, %vm2264_vm0  ;;  %v2327_v18 = vand.u32 2147483647, %v4562_v28 }
 0xbef   :  { %v2260_v53 = vsub.f32 1.0, %v2259_v50  ;;  %v4567_v11 = vadd.f32 1.0, %v3680_v17  ;;  %3687 = vrcp.f32 %v4562_v28  ;;  %vm4608_vm7 = vmor %vm2308_vm4, %vm2309_vm1  ;;  %v2222_v1 = vmul.f32 1.442695, %v3231_v19 }
 0xbf0   :  { %v2305_v14 = vsub.f32 1.0, %v2304_v52  ;;  %vm2323_vm9 = vweird.f32 %v4562_v28  ;;  %v2329_v52 = vand.u32 2147483648, %v4562_v28  ;;  %vm4631_vm11 = vcmp.eq.f32.partialorder %v2327_v18, 8.507059e+37 }
 0xbf1   :  { %v2261_v62 = vmul.f32 %v4552_v5, %v2260_v53  ;;  %3689 = vrcp.f32 %v4567_v11  ;;  %v2374_v0 = vand.u32 2147483648, %v4567_v11  ;;  %vm2368_vm13 = vweird.f32 %v4567_v11 }
 0xbf2   :  { %v4572_v13 = vpop.eup %3681  ;;  %v2306_v43 = vmul.f32 %v4555_v7, %v2305_v14  ;;  %v2330_v21 = vor.u32 1.1754944e-38, %v2329_v52  ;;  %vm2283_vm4 = vcmp.eq.f32.partialorder %v2282_v58, 8.507059e+37 }
 0xbf3   :  { %v2274_v47 = vmul.f32 %v4572_v13, %v4548_v26  ;;  %v2262_v37 = vadd.f32 %v4552_v5, %v2261_v62  ;;  %v4586_v24 = vpop.eup %3683  ;;  %vm2279_vm10 = vweird.f32 %v4572_v13  ;;  %v2372_v62 = vand.u32 2147483647, %v4567_v11 }
 0xbf4   :  { %v2307_v23 = vadd.f32 %v4555_v7, %v2306_v43  ;;  %v3686_v30 = vpop.eup %3685  ;;  %v4625_v17 = vmul.f32 %v4586_v24, %v4550_v49  ;;  %vm4663_vm0 = vmor %vm2278_vm8, %vm2279_vm10  ;;  %vm2294_vm8 = vweird.f32 %v4586_v24 }
 0xbf5   :  { %v2275_v29 = vsub.f32 1.0, %v2274_v47  ;;  %v3688_v27 = vpop.eup %3687  ;;  %v2266_v2 = vsel %vm4596_vm5, %v4552_v5, %v2262_v37  ;;  %v4628_v53 = vadd.f32 1.0, %v3686_v30  ;;  %vm2373_vm1 = vcmp.eq.f32.partialorder %v2372_v62, 8.507059e+37 }
 0xbf6   :  { %v2311_v4 = vsel %vm4608_vm7, %v4555_v7, %v2307_v23  ;;  %v2319_v50 = vmul.f32 %v3688_v27, %v4562_v28  ;;  %v2271_v14 = vsel %vm4589_vm3, %v2270_v32, %v2266_v2  ;;  %vm2324_vm12 = vweird.f32 %v3688_v27 }
 0xbf7   :  { %v3690_v40 = vpop.eup %3689  ;;  %v2276_v51 = vmul.f32 %v4572_v13, %v2275_v29  ;;  %v2316_v44 = vsel %vm4600_vm6, %v2315_v36, %v2311_v4  ;;  %3691 = vrcp.f32 %v4628_v53  ;;  %v2290_v43 = vsub.f32 1.0, %v4625_v17  ;;  %vm2325_vm15 = vmor %vm2323_vm9, %vm2324_vm12 }
 0xbf8   :  { %v2320_v5 = vsub.f32 1.0, %v2319_v50  ;;  %v2364_v57 = vmul.f32 %v3690_v40, %v4567_v11  ;;  %vm2369_vm14 = vweird.f32 %v3690_v40  ;;  %3693 = vpow2.f32 %v2222_v1 }
 0xbf9   :  { %v4644_v16 = vadd.f32 %v4572_v13, %v2276_v51  ;;  %v2498_v9 = vmul.f32 %v2271_v14, %v4511_v45  ;;  %v2501_v37 = vmul.f32 %v2316_v44, %v4514_v46  ;;  %v2375_v30 = vor.u32 1.1754944e-38, %v2374_v0  ;;  %vm2370_vm2 = vmor %vm2368_vm13, %vm2369_vm14 }
 0xbfa   :  { %v2321_v56 = vmul.f32 %v3688_v27, %v2320_v5  ;;  %v2365_v63 = vsub.f32 1.0, %v2364_v57  ;;  %v2342_v1 = vand.u32 2147483647, %v4628_v53  ;;  %v2285_v62 = vor.u32 1.1754944e-38, %v2284_v8 }
 0xbfb   :  { %v2281_v31 = vsel %vm4663_vm0, %v4572_v13, %v4644_v16  ;;  %v2344_v13 = vand.u32 2147483648, %v4628_v53  ;;  %vm2338_vm5 = vweird.f32 %v4628_v53  ;;  %vm2293_vm9 = vweird.f32 %v4550_v49 }
 0xbfc   :  { %v2322_v47 = vadd.f32 %v3688_v27, %v2321_v56  ;;  %v2366_v19 = vmul.f32 %v3690_v40, %v2365_v63  ;;  %vm2343_vm7 = vcmp.eq.f32.partialorder %v2342_v1, 8.507059e+37  ;;  %vm4723_vm10 = vmor %vm2293_vm9, %vm2294_vm8 }
 0xbfd   :  { %v2116_v22 = vpop.f32.mrf.mxu1  ;;  %v3692_v28 = vpop.eup %3691  ;;  %v2345_v58 = vor.u32 1.1754944e-38, %v2344_v13 }
 0xbfe   :  { %v2173_v6 = vpop.f32.mrf.mxu0  ;;  %v4654_v23 = vadd.f32 %v2116_v22, %v4506_v61  ;;  %v2326_v45 = vsel %vm2325_vm15, %v3688_v27, %v2322_v47  ;;  %v2367_v46 = vadd.f32 %v3690_v40, %v2366_v19  ;;  %v2334_v36 = vmul.f32 %v3692_v28, %v4628_v53  ;;  %v3694_v50 = vpop.eup %3693 }
 0xbff   :  { %v4657_v15 = vadd.f32 %v2173_v6, %v4508_v20  ;;  %v2331_v32 = vsel %vm4631_vm11, %v2330_v21, %v2326_v45  ;;  %vm2339_vm3 = vweird.f32 %v3692_v28  ;;  %v2286_v21 = vsel %vm2283_vm4, %v2285_v62, %v2281_v31 }
 0xc00   :  { %v3233_v33 = vmul.f32 -1.702, %v4654_v23  ;;  %v2502_v27 = vmul.f32 %v2331_v32, %v4530_v60  ;;  %v2371_v34 = vsel %vm2370_vm2, %v3690_v40, %v2367_v46  ;;  %v2335_v17 = vsub.f32 1.0, %v2334_v36  ;;  %vm2340_vm6 = vmor %vm2338_vm5, %vm2339_vm3 }
 0xc01   :  { %v3236_v18 = vmul.f32 -1.702, %v4657_v15  ;;  %v2376_v41 = vsel %vm2373_vm1, %v2375_v30, %v2371_v34  ;;  %v4686_v40 = vadd.f32 1.0, %v3694_v50  ;;  %v2291_v22 = vmul.f32 %v4586_v24, %v2290_v43 }
 0xc02   :  { %v2226_v39 = vmul.f32 1.442695, %v3233_v33  ;;  %v2518_v11 = vpack.c.bf16 %v2502_v27, %v2498_v9  ;;  %v2505_v51 = vmul.f32 %v2376_v41, %v4534_v10  ;;  %v2336_v14 = vmul.f32 %v3692_v28, %v2335_v17 }
 0xc03   :  { %v2232_v2 = vmul.f32 1.442695, %v3236_v18  ;;  %v2135_v4 = vpop.f32.mrf.mxu2  ;;  %v2299_v19 = vand.u32 2147483648, %v4550_v49  ;;  %v2499_v43 = vmul.f32 %v2286_v21, %v4523_v54  ;;  %v2292_v46 = vadd.f32 %v4586_v24, %v2291_v22 }
 0xc04   :  { %v4684_v52 = vadd.f32 %v2135_v4, %v4517_v48  ;;  %v2154_v60 = vpop.f32.mrf.mxu3  ;;  %3695 = vpow2.f32 %v2226_v39  ;;  %v2521_v57 = vpack.c.bf16 %v2505_v51, %v2501_v37  ;;  %2790 = vmatmul.bf16.vlgmr.msra.gmra.mxu1 %v2518_v11  ;;  %v2337_v56 = vadd.f32 %v3692_v28, %v2336_v14 }
 0xc05   :  { %v4689_v5 = vadd.f32 %v2154_v60, %v4520_v25  ;;  %v2118_v7 = vpop.f32.mrf.mxu1  ;;  %3697 = vpow2.f32 %v2232_v2  ;;  %v2297_v54 = vand.u32 2147483647, %v4550_v49  ;;  %v2296_v34 = vsel %vm4723_vm10, %v4586_v24, %v2292_v46 }
 0xc06   :  { %v3234_v44 = vmul.f32 -1.702, %v4684_v52  ;;  %v2175_v10 = vpop.f32.mrf.mxu0  ;;  %3699 = vrcp.f32 %v4686_v40  ;;  %2847 = vmatmul.bf16.vlgmr.msrb.gmra.mxu0 %v2521_v57  ;;  %v4700_v16 = vadd.f32 %v2118_v7, %v4506_v61  ;;  %v2341_v8 = vsel %vm2340_vm6, %v3692_v28, %v2337_v56 }
 0xc07   :  { %v3235_v0 = vmul.f32 -1.702, %v4689_v5  ;;  %v4705_v26 = vadd.f32 %v2175_v10, %v4508_v20  ;;  %v2346_v6 = vsel %vm2343_vm7, %v2345_v58, %v2341_v8  ;;  %v2300_v36 = vor.u32 1.1754944e-38, %v2299_v19 }
 0xc08   :  { %v2228_v63 = vmul.f32 1.442695, %v3234_v44  ;;  %v3237_v53 = vmul.f32 -1.702, %v4700_v16  ;;  %v2503_v37 = vmul.f32 %v2346_v6, %v4543_v12  ;;  %v2359_v1 = vand.u32 2147483648, %v4686_v40 }
 0xc09   :  { %v3240_v61 = vmul.f32 -1.702, %v4705_v26  ;;  %v2230_v20 = vmul.f32 1.442695, %v3235_v0  ;;  %v2357_v49 = vand.u32 2147483647, %v4686_v40  ;;  %vm2353_vm13 = vweird.f32 %v4686_v40 }
 0xc0a   :  { %v3696_v47 = vpop.eup %3695  ;;  %3701 = vpow2.f32 %v2228_v63  ;;  %v2234_v28 = vmul.f32 1.442695, %v3237_v53  ;;  %v2519_v31 = vpack.c.bf16 %v2503_v37, %v2499_v43  ;;  %vm2298_vm12 = vcmp.eq.f32.partialorder %v2297_v54, 8.507059e+37 }
 0xc0b   :  { %v3698_v9 = vpop.eup %3697  ;;  %v4712_v29 = vadd.f32 1.0, %v3696_v47  ;;  %v2240_v33 = vmul.f32 1.442695, %v3240_v61  ;;  %v2137_v13 = vpop.f32.mrf.mxu2  ;;  %v2301_v2 = vsel %vm2298_vm12, %v2300_v36, %v2296_v34  ;;  %v2360_v11 = vor.u32 1.1754944e-38, %v2359_v1 }
 0xc0c   :  { %v3700_v45 = vpop.eup %3699  ;;  %v4716_v30 = vadd.f32 1.0, %v3698_v9  ;;  %2809 = vmatmul.bf16.vlgmr.msrb.gmra.mxu2 %v2519_v31  ;;  %v4742_v17 = vadd.f32 %v2137_v13, %v4517_v48  ;;  %vm2358_vm15 = vcmp.eq.f32.partialorder %v2357_v49, 8.507059e+37  ;;  %v2156_v14 = vpop.f32.mrf.mxu3  ;;  %v2500_v44 = vmul.f32 %v2301_v2, %v4526_v59 }
 0xc0d   :  { %v2349_v32 = vmul.f32 %v3700_v45, %v4686_v40  ;;  %3703 = vrcp.f32 %v4712_v29  ;;  %vm2354_vm11 = vweird.f32 %v3700_v45  ;;  %v4755_v22 = vadd.f32 %v2156_v14, %v4520_v25 }
 0xc0e   :  { %3705 = vrcp.f32 %v4716_v30  ;;  %vm2355_vm14 = vmor %vm2353_vm13, %vm2354_vm11  ;;  %v3238_v21 = vmul.f32 -1.702, %v4742_v17  ;;  %v2387_v25 = vand.u32 2147483647, %v4712_v29  ;;  %v2389_v61 = vand.u32 2147483648, %v4712_v29 }
 0xc0f   :  { %v2350_v18 = vsub.f32 1.0, %v2349_v32  ;;  %3707 = vpow2.f32 %v2230_v20  ;;  %v3239_v47 = vmul.f32 -1.702, %v4755_v22  ;;  %v2432_v9 = vand.u32 2147483647, %v4716_v30 }
 0xc10   :  { %v3702_v27 = vpop.eup %3701  ;;  %3709 = vpow2.f32 %v2234_v28  ;;  %v2434_v37 = vand.u32 2147483648, %v4716_v30  ;;  %vm2383_vm1 = vweird.f32 %v4712_v29  ;;  %vm2428_vm2 = vweird.f32 %v4716_v30 }
 0xc11   :  { %v2351_v41 = vmul.f32 %v3700_v45, %v2350_v18  ;;  %3711 = vpow2.f32 %v2240_v33  ;;  %v4735_v50 = vadd.f32 1.0, %v3702_v27  ;;  %v2238_v46 = vmul.f32 1.442695, %v3239_v47 }
 0xc12   :  { %vm4784_vm5 = vcmp.eq.f32.partialorder %v2387_v25, 8.507059e+37  ;;  %v2390_v54 = vor.u32 1.1754944e-38, %v2389_v61  ;;  %vm4788_vm6 = vcmp.eq.f32.partialorder %v2432_v9, 8.507059e+37  ;;  %v2435_v27 = vor.u32 1.1754944e-38, %v2434_v37 }
 0xc13   :  { %v4732_v39 = vpop.eup %3703  ;;  %v2352_v4 = vadd.f32 %v3700_v45, %v2351_v41  ;;  %3713 = vrcp.f32 %v4735_v50 }
 0xc14   :  { %v4737_v24 = vpop.eup %3705  ;;  %v2379_v51 = vmul.f32 %v4732_v39, %v4712_v29  ;;  %vm2384_vm0 = vweird.f32 %v4732_v39 }
 0xc15   :  { %v3708_v60 = vpop.eup %3707  ;;  %v2356_v7 = vsel %vm2355_vm14, %v3700_v45, %v2352_v4  ;;  %v2424_v57 = vmul.f32 %v4737_v24, %v4716_v30  ;;  %vm2429_vm3 = vweird.f32 %v4737_v24  ;;  %vm4780_vm4 = vmor %vm2383_vm1, %vm2384_vm0  ;;  %vm2398_vm1 = vweird.f32 %v4735_v50 }
 0xc16   :  { %v3710_v40 = vpop.eup %3709  ;;  %v2361_v10 = vsel %vm2358_vm15, %v2360_v11, %v2356_v7  ;;  %v2380_v63 = vsub.f32 1.0, %v2379_v51  ;;  %v4757_v53 = vadd.f32 1.0, %v3708_v60  ;;  %vm4798_vm7 = vmor %vm2428_vm2, %vm2429_vm3 }
 0xc17   :  { %v3712_v62 = vpop.eup %3711  ;;  %v2504_v56 = vmul.f32 %v2361_v10, %v4565_v55  ;;  %v4749_v0 = vadd.f32 1.0, %v3710_v40  ;;  %v2425_v8 = vsub.f32 1.0, %v2424_v57  ;;  %v2236_v55 = vmul.f32 1.442695, %v3238_v21 }
 0xc18   :  { %v4751_v48 = vadd.f32 1.0, %v3712_v62  ;;  %v2381_v59 = vmul.f32 %v4732_v39, %v2380_v63 }
 0xc19   :  { %v2520_v58 = vpack.c.bf16 %v2504_v56, %v2500_v44  ;;  %3715 = vrcp.f32 %v4749_v0  ;;  %v4763_v19 = vpop.eup %3713  ;;  %v2426_v6 = vmul.f32 %v4737_v24, %v2425_v8  ;;  %vm2443_vm8 = vweird.f32 %v4749_v0 }
 0xc1a   :  { %3717 = vrcp.f32 %v4751_v48  ;;  %v2382_v43 = vadd.f32 %v4732_v39, %v2381_v59  ;;  %v2394_v45 = vmul.f32 %v4763_v19, %v4735_v50  ;;  %v2447_v49 = vand.u32 2147483647, %v4749_v0 }
 0xc1b   :  { %2828 = vmatmul.bf16.vlgmr.msra.gmra.mxu3 %v2520_v58  ;;  %3719 = vrcp.f32 %v4757_v53  ;;  %v2427_v28 = vadd.f32 %v4737_v24, %v2426_v6  ;;  %v2449_v13 = vand.u32 2147483648, %v4749_v0  ;;  %v2492_v7 = vand.u32 2147483647, %v4751_v48 }
 0xc1c   :  { %3721 = vpow2.f32 %v2236_v55  ;;  %v2386_v18 = vsel %vm4780_vm4, %v4732_v39, %v2382_v43  ;;  %v2395_v41 = vsub.f32 1.0, %v2394_v45  ;;  %v2494_v57 = vand.u32 2147483648, %v4751_v48 }
 0xc1d   :  { %3723 = vpow2.f32 %v2238_v46  ;;  %v2431_v2 = vsel %vm4798_vm7, %v4737_v24, %v2427_v28  ;;  %v2391_v51 = vsel %vm4784_vm5, %v2390_v54, %v2386_v18  ;;  %vm2448_vm12 = vcmp.eq.f32.partialorder %v2447_v49, 8.507059e+37 }
 0xc1e   :  { %v2436_v10 = vsel %vm4788_vm6, %v2435_v27, %v2431_v2  ;;  %v2396_v62 = vmul.f32 %v4763_v19, %v2395_v41  ;;  %v2450_v56 = vor.u32 1.1754944e-38, %v2449_v13  ;;  %vm2488_vm13 = vweird.f32 %v4751_v48 }
 0xc1f   :  { %v3716_v20 = vpop.eup %3715  ;;  %v2495_v59 = vor.u32 1.1754944e-38, %v2494_v57  ;;  %vm2493_vm15 = vcmp.eq.f32.partialorder %v2492_v7, 8.507059e+37  ;;  %v2509_v61 = vmul.f32 %v2436_v10, %v4657_v15  ;;  %vm2399_vm0 = vweird.f32 %v4763_v19 }
 0xc20   :  { %v2439_v31 = vmul.f32 %v3716_v20, %v4749_v0  ;;  %v3718_v32 = vpop.eup %3717  ;;  %vm2444_vm9 = vweird.f32 %v3716_v20  ;;  %v2506_v0 = vmul.f32 %v2391_v51, %v4654_v23  ;;  %v2397_v43 = vadd.f32 %v4763_v19, %v2396_v62  ;;  %vm4837_vm2 = vmor %vm2398_vm1, %vm2399_vm0 }
 0xc21   :  { %v4792_v30 = vpop.eup %3719  ;;  %v2484_v36 = vmul.f32 %v3718_v32, %v4751_v48  ;;  %vm2489_vm10 = vweird.f32 %v3718_v32  ;;  %vm2445_vm11 = vmor %vm2443_vm8, %vm2444_vm9  ;;  %v2402_v48 = vand.u32 2147483647, %v4735_v50  ;;  %v2404_v45 = vand.u32 2147483648, %v4735_v50 }
 0xc22   :  { %v2440_v34 = vsub.f32 1.0, %v2439_v31  ;;  %v3722_v11 = vpop.eup %3721  ;;  %v2409_v60 = vmul.f32 %v4792_v30, %v4757_v53  ;;  %vm2490_vm14 = vmor %vm2488_vm13, %vm2489_vm10  ;;  %v2401_v28 = vsel %vm4837_vm2, %v4763_v19, %v2397_v43  ;;  %vm2414_vm4 = vweird.f32 %v4792_v30 }
 0xc23   :  { %v2485_v4 = vsub.f32 1.0, %v2484_v36  ;;  %v4814_v44 = vadd.f32 1.0, %v3722_v11  ;;  %v3724_v24 = vpop.eup %3723  ;;  %vm2403_vm3 = vcmp.eq.f32.partialorder %v2402_v48, 8.507059e+37  ;;  %v2405_v50 = vor.u32 1.1754944e-38, %v2404_v45 }
 0xc24   :  { %v2441_v39 = vmul.f32 %v3716_v20, %v2440_v34  ;;  %v2410_v58 = vsub.f32 1.0, %v2409_v60  ;;  %v4823_v55 = vadd.f32 1.0, %v3724_v24  ;;  %vm2413_vm5 = vweird.f32 %v4757_v53 }
 0xc25   :  { %v2486_v40 = vmul.f32 %v3718_v32, %v2485_v4  ;;  %3725 = vrcp.f32 %v4814_v44  ;;  %v2464_v33 = vand.u32 2147483648, %v4814_v44  ;;  %v2419_v54 = vand.u32 2147483648, %v4757_v53  ;;  %vm4851_vm7 = vmor %vm2413_vm5, %vm2414_vm4 }
 0xc26   :  { %v2442_v14 = vadd.f32 %v3716_v20, %v2441_v39  ;;  %3727 = vrcp.f32 %v4823_v55  ;;  %v2411_v37 = vmul.f32 %v4792_v30, %v2410_v58  ;;  %v2462_v18 = vand.u32 2147483647, %v4814_v44 }
 0xc27   :  { %v2487_v21 = vadd.f32 %v3718_v32, %v2486_v40  ;;  %v2406_v27 = vsel %vm2403_vm3, %v2405_v50, %v2401_v28  ;;  %v2417_v34 = vand.u32 2147483647, %v4757_v53  ;;  %vm2458_vm8 = vweird.f32 %v4814_v44 }
 0xc28   :  { %v2446_v63 = vsel %vm2445_vm11, %v3716_v20, %v2442_v14  ;;  %v2412_v31 = vadd.f32 %v4792_v30, %v2411_v37  ;;  %v2479_v49 = vand.u32 2147483648, %v4823_v55  ;;  %v2465_v13 = vor.u32 1.1754944e-38, %v2464_v33 }
 0xc29   :  { %v2451_v8 = vsel %vm2448_vm12, %v2450_v56, %v2446_v63  ;;  %v2491_v6 = vsel %vm2490_vm14, %v3718_v32, %v2487_v21  ;;  %v2477_v39 = vand.u32 2147483647, %v4823_v55  ;;  %v2420_v4 = vor.u32 1.1754944e-38, %v2419_v54 }
 0xc2a   :  { %v2510_v47 = vmul.f32 %v2451_v8, %v4700_v16  ;;  %v2496_v25 = vsel %vm2493_vm15, %v2495_v59, %v2491_v6  ;;  %v2416_v1 = vsel %vm4851_vm7, %v4792_v30, %v2412_v31  ;;  %vm2463_vm11 = vcmp.eq.f32.partialorder %v2462_v18, 8.507059e+37 }
 0xc2b   :  { %v2513_v9 = vmul.f32 %v2496_v25, %v4705_v26  ;;  %v3726_v20 = vpop.eup %3725  ;;  %vm2418_vm12 = vcmp.eq.f32.partialorder %v2417_v34, 8.507059e+37  ;;  %vm2473_vm13 = vweird.f32 %v4823_v55  ;;  %v2507_v30 = vmul.f32 %v2406_v27, %v4684_v52 }
 0xc2c   :  { %v2522_v16 = vpack.c.bf16 %v2510_v47, %v2506_v0  ;;  %v2454_v46 = vmul.f32 %v3726_v20, %v4814_v44  ;;  %v3728_v26 = vpop.eup %3727  ;;  %vm2459_vm6 = vweird.f32 %v3726_v20  ;;  %v2421_v60 = vsel %vm2418_vm12, %v2420_v4, %v2416_v1 }
 0xc2d   :  { %v2525_v23 = vpack.c.bf16 %v2513_v9, %v2509_v61  ;;  %v2469_v29 = vmul.f32 %v3728_v26, %v4823_v55  ;;  %vm2460_vm9 = vmor %vm2458_vm8, %vm2459_vm6  ;;  %vm2474_vm10 = vweird.f32 %v3728_v26  ;;  %v2480_v57 = vor.u32 1.1754944e-38, %v2479_v49 }
 0xc2e   :  { %2795 = vmatmul.bf16.gmra.mxu1 %v2522_v16  ;;  %v2455_v32 = vsub.f32 1.0, %v2454_v46  ;;  %vm2475_vm14 = vmor %vm2473_vm13, %vm2474_vm10  ;;  %vm2478_vm15 = vcmp.eq.f32.partialorder %v2477_v39, 8.507059e+37  ;;  %v2508_v24 = vmul.f32 %v2421_v60, %v4689_v5 }
 0xc2f   :  { %2852 = vmatmul.bf16.gmra.mxu0 %v2525_v23  ;;  %v2470_v36 = vsub.f32 1.0, %v2469_v29 }
 0xc30   :  { %v2456_v12 = vmul.f32 %v3726_v20, %v2455_v32 }
 0xc31   :  { %v2471_v2 = vmul.f32 %v3728_v26, %v2470_v36 }
 0xc32   :  { %v2457_v41 = vadd.f32 %v3726_v20, %v2456_v12 }
 0xc33   :  { %v2472_v51 = vadd.f32 %v3728_v26, %v2471_v2 }
 0xc34   :  { %v2461_v11 = vsel %vm2460_vm9, %v3726_v20, %v2457_v41 }
 0xc35   :  { %v2466_v53 = vsel %vm2463_vm11, %v2465_v13, %v2461_v11  ;;  %v2476_v14 = vsel %vm2475_vm14, %v3728_v26, %v2472_v51 }
 0xc36   :  { %v2511_v7 = vmul.f32 %v2466_v53, %v4742_v17  ;;  %v2481_v40 = vsel %vm2478_vm15, %v2480_v57, %v2476_v14 }
 0xc37   :  { %v2512_v10 = vmul.f32 %v2481_v40, %v4755_v22  ;;  %v3582_v22 = vld [vmem:[%s4892_s12] ss:$0 sm:$0xff]  ;;  %s4026_s12 = smov [#allocation24]  }
 0xc38   :  { %v2523_v44 = vpack.c.bf16 %v2511_v7, %v2507_v30  ;;  %s2901_s22 = sshll.u32 %s4026_s12, 4  ;;  %s2902_s22 = int_to_ptr.vmem [resolvable:$true] %s2901_s22 }
 0xc39   :  { %v2524_v62 = vpack.c.bf16 %v2512_v10, %v2508_v24 }
 0xc3a   :  { %2814 = vmatmul.bf16.gmra.mxu2 %v2523_v44 }
 0xc3b   :  { %2833 = vmatmul.bf16.gmra.mxu3 %v2524_v62 }
 0xc81   :  { %v2791_v63 = vpop.f32.mrf.mxu1 }
 0xc83   :  { %v2848_v52 = vpop.f32.mrf.mxu0 }
 0xc89   :  { %v2793_v59 = vpop.f32.mrf.mxu1 }
 0xc8b   :  { %v2850_v25 = vpop.f32.mrf.mxu0 }
 0xc8f   :  { %v2810_v56 = vpop.f32.mrf.mxu2 }
 0xc90   :  { %v2811_v21 = vadd.f32 %v2810_v56, %v2791_v63 }
 0xc97   :  { %v2812_v8 = vpop.f32.mrf.mxu2 }
 0xc98   :  { %v2813_v55 = vadd.f32 %v2812_v8, %v2793_v59 }
 0xc9e   :  { %v2829_v58 = vpop.f32.mrf.mxu3 }
 0xc9f   :  { %v2830_v17 = vadd.f32 %v2829_v58, %v2811_v21 }
 0xca1   :  { %v2849_v47 = vadd.f32 %v2848_v52, %v2830_v17 }
 0xca3   :  { %v2877_v5 = vadd.f32 %v2849_v47, %v4451_v35 }
 0xca5   :  { %v2885_v9 = vadd.f32 %v3582_v22, %v2877_v5 }
 0xca6   :  { %v2831_v6 = vpop.f32.mrf.mxu3 }
 0xca7   :  { %v2832_v0 = vadd.f32 %v2831_v6, %v2813_v55 }
 0xca9   :  { %v2851_v61 = vadd.f32 %v2850_v25, %v2832_v0 }
 0xcab   :  { %v2878_v48 = vadd.f32 %v2851_v61, %v4455_v38  ;;  %v2796_v16 = vpop.f32.mrf.mxu1 }
 0xcac   :  { %v2853_v23 = vpop.f32.mrf.mxu0 }
 0xcad   :  { %v2886_v43 = vadd.f32 %v3582_v22, %v2878_v48 }
 0xcaf   :  { %v3538_v37 = vpack.c.bf16 %v2886_v43, %v2885_v9 }
 0xcb1   :  { %3539 = vst [vmem:[#allocation24] sm:$0xff] %v3538_v37  }
 0xcb3   :  { %v2798_v26 = vpop.f32.mrf.mxu1 }
 0xcb4   :  { %v2855_v33 = vpop.f32.mrf.mxu0 }
 0xcbd   :  { %v2815_v20 = vpop.f32.mrf.mxu2 }
 0xcbe   :  { %v2816_v45 = vadd.f32 %v2815_v20, %v2796_v16  ;;  %v2834_v46 = vpop.f32.mrf.mxu3 }
 0xcc0   :  { %v2835_v15 = vadd.f32 %v2834_v46, %v2816_v45 }
 0xcc2   :  { %v2854_v31 = vadd.f32 %v2853_v23, %v2835_v15 }
 0xcc4   :  { %v2879_v29 = vadd.f32 %v2854_v31, %v4459_v42 }
 0xcc5   :  { %v2817_v28 = vpop.f32.mrf.mxu2 }
 0xcc6   :  { %v2818_v35 = vadd.f32 %v2817_v28, %v2798_v26  ;;  %v2836_v32 = vpop.f32.mrf.mxu3  ;;  %v2887_v12 = vadd.f32 %v3582_v22, %v2879_v29 }
 0xcc8   :  { %v2837_v50 = vadd.f32 %v2836_v32, %v2818_v35 }
 0xcca   :  { %v2856_v38 = vadd.f32 %v2855_v33, %v2837_v50 }
 0xccc   :  { %v2880_v54 = vadd.f32 %v2856_v38, %v4463_v3 }
 0xcce   :  { %v2888_v18 = vadd.f32 %v3582_v22, %v2880_v54 }
 0xcd0   :  { %v3543_v27 = vpack.c.bf16 %v2888_v18, %v2887_v12 }
 0xcd2   :  { %3556 = vst [vmem:[#allocation24 + $0x8] sm:$0xff] %v3543_v27  }
 0xcd3   :  { %2909 = dma.vmem_to_hbm [thread:$0]  %s2902_s22, 256, %s2904_s24, [#allocation9], %s4014_s18, %s4014_s18, %s4015_s8  }
 0xcd4   :  { %4005 = dma.done.wait [#allocation9], 256  }
 0xcd5   :  { %4006 = vsyncadd [#allocation9], 4294967040 }
 0xcd6   :  { %2914 = vsyncpa [#allocation8], 1 }
 0xcd7   :  { %2915 = vsyncpa [#allocation11], 1 }
 0xcd8   :  { %2916 = vsyncpa [#allocation14], 1 }
 0xcd9   :  { %2917 = vsyncpa [#allocation17], 1 }
 0xcda   :  { %2918 = vsyncpa [#allocation20], 1 }
 0xcdb   :  { %2919 = vsyncpa [#allocation23], 1 }
 0xcdc   :  { %2920 = vsyncpa [#allocation9], 1 }

// kernel: tpu_custom_call.1
= control target key start
LH: loop header
LB: loop body
LE: loop exit
PB: predicated region body
PF: predicated region fallthrough
CT: control target
= control target key end

     0   :  { %18 = vsyncpa [#allocation8], 0  ;;  %s4880_s0 = inlined_call_operand.hbm [shape: bf16[4,8,128], index: 0, kind: input, shape index: {}]   ;;  %s4881_s1 = inlined_call_operand.hbm [shape: f32[1,128], index: 1, kind: input, shape index: {}]   ;;  %s4882_s2 = inlined_call_operand.hbm [shape: f32[1,128], index: 2, kind: input, shape index: {}]   ;;  %s4883_s3 = inlined_call_operand.hbm [shape: bf16[128,384], index: 3, kind: input, shape index: {}]   ;;  %s4884_s4 = inlined_call_operand.vmem [shape: f32[1,384], index: 4, kind: input, shape index: {}]   ;;  %s4885_s5 = inlined_call_operand.hbm [shape: bf16[128,128], index: 5, kind: input, shape index: {}]   ;;  %s4886_s6 = inlined_call_operand.hbm [shape: f32[1,128], index: 6, kind: input, shape index: {}]   ;;  %s4887_s7 = inlined_call_operand.hbm [shape: f32[1,128], index: 7, kind: input, shape index: {}]   ;;  %s4888_s8 = inlined_call_operand.hbm [shape: f32[1,128], index: 8, kind: input, shape index: {}]   ;;  %s4889_s9 = inlined_call_operand.hbm [shape: bf16[128,512], index: 9, kind: input, shape index: {}]   ;;  %s4890_s10 = inlined_call_operand.vmem [shape: f32[1,512], index: 10, kind: input, shape index: {}]   ;;  %s4891_s11 = inlined_call_operand.hbm [shape: bf16[512,128], index: 11, kind: input, shape index: {}]   ;;  %s4892_s12 = inlined_call_operand.vmem [shape: f32[1,128], index: 12, kind: input, shape index: {}]   ;;  %s4893_s13 = inlined_call_operand.hbm [shape: bf16[4,8,128], index: 13, kind: output, shape index: {}]  }
   0x1   :  { %19 = vsyncpa [#allocation11], 0 }
   0x2   :  { %20 = vsyncpa [#allocation14], 0 }
   0x3   :  { %21 = vsyncpa [#allocation17], 0 }
   0x4   :  { %22 = vsyncpa [#allocation20], 0 }
   0x5   :  { %23 = vsyncpa [#allocation23], 0  ;;  %s43_s27 = sshll.u32 %s4881_s1, 4  ;;  %s44_s27 = int_to_ptr.hbm [resolvable:$true] %s43_s27 }
   0x6   :  { %24 = vsyncpa [#allocation9], 0  ;;  %s4007_s28 = smov [#allocation10]   ;;  %s64_s15 = sshll.u32 %s4883_s3, 4  ;;  %s65_s15 = int_to_ptr.hbm [resolvable:$true] %s64_s15 }
   0x7   :  { %s45_s29 = sshll.u32 %s4007_s28, 4  ;;  %s4008_s16 = smov [#allocation13]   ;;  %s46_s29 = int_to_ptr.vmem [resolvable:$true] %s45_s29 }
   0x8   :  { %48 = dma.hbm_to_vmem [thread:$0]  %s44_s27, 16, %s46_s29, [#allocation11]  }
   0x9   :  { %s66_s17 = sshll.u32 %s4008_s16, 4  ;;  %s4009_s18 = smov 192   ;;  %s67_s17 = int_to_ptr.vmem [resolvable:$true] %s66_s17 }
   0xa   :  { %s4010_s19 = smov 12   ;;  %s93_s1 = sshll.u32 %s4886_s6, 4  ;;  %s94_s1 = int_to_ptr.hbm [resolvable:$true] %s93_s1 }
   0xb   :  { %72 = dma.hbm_to_vmem [thread:$0]  %s65_s15, 3072, %s67_s17, [#allocation14], %s4009_s18, %s4009_s18, %s4010_s19  }
   0xc   :  { %s4011_s22 = smov [#allocation16]   ;;  %s115_s3 = sshll.u32 %s4888_s8, 4  ;;  %s116_s3 = int_to_ptr.hbm [resolvable:$true] %s115_s3 }
   0xd   :  { %s95_s23 = sshll.u32 %s4011_s22, 4  ;;  %s4012_s26 = smov [#allocation19]   ;;  %s96_s23 = int_to_ptr.vmem [resolvable:$true] %s95_s23 }
   0xe   :  { %98 = dma.hbm_to_vmem [thread:$0]  %s94_s1, 16, %s96_s23, [#allocation17]  }
   0xf   :  { %s117_s27 = sshll.u32 %s4012_s26, 4  ;;  %s29_s30 = sshll.u32 %s4880_s0, 4  ;;  %s118_s27 = int_to_ptr.vmem [resolvable:$true] %s117_s27  ;;  %s30_s30 = int_to_ptr.hbm [resolvable:$true] %s29_s30 }
  0x10   :  { %120 = dma.hbm_to_vmem [thread:$0]  %s116_s3, 16, %s118_s27, [#allocation20]  }
  0x11   :  { %s4013_s6 = smov [#allocation7]   ;;  %s54_s17 = sshll.u32 %s4882_s2, 4  ;;  %s55_s17 = int_to_ptr.hbm [resolvable:$true] %s54_s17 }
  0x12   :  { %s31_s14 = sshll.u32 %s4013_s6, 4  ;;  %s4014_s18 = smov 64   ;;  %s32_s14 = int_to_ptr.vmem [resolvable:$true] %s31_s14 }
  0x13   :  { %s4015_s8 = smov 4   ;;  %s4016_s19 = smov [#allocation12]  }
  0x14   :  { %37 = dma.hbm_to_vmem [thread:$0]  %s30_s30, 256, %s32_s14, [#allocation8], %s4014_s18, %s4014_s18, %s4015_s8  }
  0x15   :  { %s56_s20 = sshll.u32 %s4016_s19, 4  ;;  %s79_s1 = sshll.u32 %s4885_s5, 4  ;;  %s57_s20 = int_to_ptr.vmem [resolvable:$true] %s56_s20  ;;  %s80_s1 = int_to_ptr.hbm [resolvable:$true] %s79_s1 }
  0x16   :  { %59 = dma.hbm_to_vmem [thread:$0]  %s55_s17, 16, %s57_s20, [#allocation11]  }
  0x17   :  { %s104_s2 = sshll.u32 %s4887_s7, 4  ;;  %s4017_s24 = smov [#allocation15]   ;;  %s105_s2 = int_to_ptr.hbm [resolvable:$true] %s104_s2 }
  0x18   :  { %s81_s25 = sshll.u32 %s4017_s24, 4  ;;  %s4018_s3 = smov [#allocation18]   ;;  %s82_s25 = int_to_ptr.vmem [resolvable:$true] %s81_s25 }
  0x19   :  { %87 = dma.hbm_to_vmem [thread:$0]  %s80_s1, 1024, %s82_s25, [#allocation14], %s4014_s18, %s4014_s18, %s4015_s8  }
  0x1a   :  { %s106_s26 = sshll.u32 %s4018_s3, 4  ;;  %s125_s5 = sshll.u32 %s4889_s9, 4  ;;  %s107_s26 = int_to_ptr.vmem [resolvable:$true] %s106_s26  ;;  %s126_s5 = int_to_ptr.hbm [resolvable:$true] %s125_s5 }
  0x1b   :  { %109 = dma.hbm_to_vmem [thread:$0]  %s105_s2, 16, %s107_s26, [#allocation17]  }
  0x1c   :  { %s4019_s29 = smov [#allocation21]   ;;  %s140_s14 = sshll.u32 %s4891_s11, 4  ;;  %s141_s14 = int_to_ptr.hbm [resolvable:$true] %s140_s14 }
  0x1d   :  { %s127_s30 = sshll.u32 %s4019_s29, 4  ;;  %s4020_s15 = smov 256   ;;  %s128_s30 = int_to_ptr.vmem [resolvable:$true] %s127_s30 }
  0x1e   :  { %s4021_s16 = smov 16   ;;  %s4022_s17 = smov [#allocation22]  }
  0x1f   :  { %133 = dma.hbm_to_vmem [thread:$0]  %s126_s5, 4096, %s128_s30, [#allocation20], %s4020_s15, %s4020_s15, %s4021_s16  }
  0x20   :  { %s142_s19 = sshll.u32 %s4022_s17, 4  ;;  %s143_s19 = int_to_ptr.vmem [resolvable:$true] %s142_s19 }
  0x21   :  { %148 = dma.hbm_to_vmem [thread:$0]  %s141_s14, 4096, %s143_s19, [#allocation23], %s4014_s18, %s4014_s18, %s4015_s8  }
  0x22   :  { %3993 = dma.done.wait [#allocation8], 256  }
  0x23   :  { %3994 = vsyncadd [#allocation8], 4294967040 }
  0x24   :  { %3995 = dma.done.wait [#allocation11], 32  }
  0x25   :  { %3996 = vsyncadd [#allocation11], 4294967264 }
  0x26   :  { %3997 = dma.done.wait [#allocation14], 4096  }
  0x27   :  { %3998 = vsyncadd [#allocation14], 4294963200 }
  0x28   :  { %3999 = dma.done.wait [#allocation17], 32  }
  0x29   :  { %4000 = vsyncadd [#allocation17], 4294967264 }
  0x2a   :  { %4001 = dma.done.wait [#allocation20], 4112  }
  0x2b   :  { %4002 = vsyncadd [#allocation20], 4294963184 }
  0x2c   :  { %4003 = dma.done.wait [#allocation23], 4096  }
  0x2d   :  { %4004 = vsyncadd [#allocation23], 4294963200  ;;  %v3545_v0 = vld [vmem:[#allocation7 + $0x8] sm:$0xff]   ;;  %v3470_v1 = vld [vmem:[#allocation7] sm:$0xff]   ;;  %v4023_v6 = vmov 128.0   ;;  %vm562_vm13 = vcmask 261120  }
  0x2e   :  { %v4136_v2 = vunpack.c.l.bf16 %v3545_v0  ;;  %v4138_v3 = vunpack.c.l.bf16 %v3470_v1  ;;  %v4142_v4 = vunpack.c.h.bf16 %v3545_v0  ;;  %v4144_v5 = vunpack.c.h.bf16 %v3470_v1  ;;  %v3007_v29 = vld [vmem:[#allocation13 + $0xa8] sm:$0xf]  ;;  %v3391_v30 = vld [vmem:[#allocation13 + $0xb0] sm:$0xf0]  ;;  %v3390_v31 = vld [vmem:[#allocation13 + $0xac] sm:$0xf] }
  0x2f   :  { %3583 = vrcp.f32 %v4023_v6  ;;  %v3008_v32 = vor.u32 %v3391_v30, %v3007_v29  ;;  %v3009_v33 = vld [vmem:[#allocation13 + $0xb4] sm:$0xf0]  ;;  %v3015_v34 = vld [vmem:[#allocation13 + $0xb0] sm:$0xf]  ;;  %v3392_v35 = vld [vmem:[#allocation13 + $0xb8] sm:$0xf0] }
  0x30   :  { %210 = vadd.xlane.f32.xlu1 %v4136_v2  ;;  %206 = vadd.xlane.f32.xlu0 %v4138_v3  ;;  %v3012_v36 = vor.u32 %v3390_v31, %v3009_v33  ;;  %v3016_v37 = vor.u32 %v3392_v35, %v3015_v34  ;;  %v2995_v38 = vld [vmem:[#allocation13 + $0x90] sm:$0xf]  ;;  %v3388_v39 = vld [vmem:[#allocation13 + $0x98] sm:$0xf0]  ;;  %v3387_v40 = vld [vmem:[#allocation13 + $0x94] sm:$0xf] }
  0x31   :  { %477 = vmatpush.bf16.msra.mxu0 %v3008_v32  ;;  %v2996_v41 = vor.u32 %v3388_v39, %v2995_v38  ;;  %v2997_v42 = vld [vmem:[#allocation13 + $0x9c] sm:$0xf0]  ;;  %v3003_v43 = vld [vmem:[#allocation13 + $0x98] sm:$0xf]  ;;  %v3389_v44 = vld [vmem:[#allocation13 + $0xa0] sm:$0xf0] }
  0x32   :  { %496 = vmatpush.bf16.msra.mxu1 %v3012_v36  ;;  %515 = vmatpush.bf16.msra.mxu2 %v3016_v37  ;;  %v3000_v45 = vor.u32 %v3387_v40, %v2997_v42  ;;  %v3004_v46 = vor.u32 %v3389_v44, %v3003_v43  ;;  %v2983_v47 = vld [vmem:[#allocation13 + $0x78] sm:$0xf]  ;;  %v3385_v48 = vld [vmem:[#allocation13 + $0x80] sm:$0xf0]  ;;  %v3384_v49 = vld [vmem:[#allocation13 + $0x7c] sm:$0xf] }
  0x33   :  { %v2984_v50 = vor.u32 %v3385_v48, %v2983_v47  ;;  %v2985_v51 = vld [vmem:[#allocation13 + $0x84] sm:$0xf0]  ;;  %v2991_v52 = vld [vmem:[#allocation13 + $0x80] sm:$0xf]  ;;  %v3386_v53 = vld [vmem:[#allocation13 + $0x88] sm:$0xf0] }
  0x34   :  { %v2988_v54 = vor.u32 %v3384_v49, %v2985_v51  ;;  %v2992_v55 = vor.u32 %v3386_v53, %v2991_v52  ;;  %v2971_v56 = vld [vmem:[#allocation13 + $0x60] sm:$0xf]  ;;  %v3382_v57 = vld [vmem:[#allocation13 + $0x68] sm:$0xf0]  ;;  %v3381_v58 = vld [vmem:[#allocation13 + $0x64] sm:$0xf] }
  0x35   :  { %v3584_v7 = vpop.eup %3583  ;;  %478 = vmatpush.bf16.msra.mxu0 %v2996_v41  ;;  %v2972_v59 = vor.u32 %v3382_v57, %v2971_v56  ;;  %v2973_v60 = vld [vmem:[#allocation13 + $0x6c] sm:$0xf0]  ;;  %v2979_v61 = vld [vmem:[#allocation13 + $0x68] sm:$0xf]  ;;  %v3383_v62 = vld [vmem:[#allocation13 + $0x70] sm:$0xf0] }
  0x36   :  { %v215_v8 = vmul.f32 128.0, %v3584_v7  ;;  %vm219_vm0 = vweird.f32 %v3584_v7  ;;  %497 = vmatpush.bf16.msra.mxu1 %v3000_v45  ;;  %516 = vmatpush.bf16.msra.mxu2 %v3004_v46  ;;  %v2976_v63 = vor.u32 %v3381_v58, %v2973_v60  ;;  %v2980_v0 = vor.u32 %v3383_v62, %v2979_v61  ;;  %v2959_v1 = vld [vmem:[#allocation13 + $0x48] sm:$0xf]  ;;  %v3379_v6 = vld [vmem:[#allocation13 + $0x50] sm:$0xf0]  ;;  %s4025_s20 = smov 32  }
  0x37   :  { %v3373_v29 = vld [vmem:[#allocation13 + $0x20] sm:$0xf0]  ;;  %v3372_v30 = vld [vmem:[#allocation13 + $0x1c] sm:$0xf]  ;;  %v2937_v32 = vld [vmem:[#allocation13 + $0x24] sm:$0xf0] }
  0x38   :  { %212 = vadd.xlane.f32.xlu1 %v4142_v4  ;;  %208 = vadd.xlane.f32.xlu0 %v4144_v5  ;;  %v216_v9 = vsub.f32 1.0, %v215_v8  ;;  %v2960_v8 = vor.u32 %v3379_v6, %v2959_v1  ;;  %v2943_v33 = vld [vmem:[#allocation13 + $0x20] sm:$0xf]  ;;  %v3374_v34 = vld [vmem:[#allocation13 + $0x28] sm:$0xf0]  ;;  %v2940_v36 = vor.u32 %v3372_v30, %v2937_v32  ;;  %vm691_vm14 = vcmask 1043456  }
  0x39   :  { %479 = vmatpush.bf16.msra.mxu0 %v2984_v50  ;;  %v2944_v37 = vor.u32 %v3374_v34, %v2943_v33  ;;  %v2923_v38 = vld [vmem:[#allocation13] sm:$0xf]  ;;  %v3370_v39 = vld [vmem:[#allocation13 + $0x8] sm:$0xf0]  ;;  %v3369_v40 = vld [vmem:[#allocation13 + $0x4] sm:$0xf] }
  0x3a   :  { %v217_v10 = vmul.f32 %v3584_v7, %v216_v9  ;;  %498 = vmatpush.bf16.msra.mxu1 %v2988_v54  ;;  %517 = vmatpush.bf16.msra.mxu2 %v2992_v55  ;;  %v2961_v9 = vld [vmem:[#allocation13 + $0x54] sm:$0xf0]  ;;  %v2924_v43 = vor.u32 %v3370_v39, %v2923_v38  ;;  %v2925_v44 = vld [vmem:[#allocation13 + $0xc] sm:$0xf0]  ;;  %v2931_v45 = vld [vmem:[#allocation13 + $0x8] sm:$0xf] }
  0x3b   :  { %v3371_v46 = vld [vmem:[#allocation13 + $0x10] sm:$0xf0]  ;;  %v2928_v47 = vor.u32 %v3369_v40, %v2925_v44  ;;  %v3578_v30 = vld [vmem:[#allocation12] ss:$0 sm:$0xff]  ;;  %vm639_vm15 = vcmask 64512   ;;  %s2903_s24 = sshll.u32 %s4893_s13, 4  ;;  %s2904_s24 = int_to_ptr.hbm [resolvable:$true] %s2903_s24 }
  0x3c   :  { %v218_v11 = vadd.f32 %v3584_v7, %v217_v10  ;;  %v2967_v10 = vld [vmem:[#allocation13 + $0x50] sm:$0xf]  ;;  %v2932_v48 = vor.u32 %v3371_v46, %v2931_v45  ;;  %v341_v45 = vld [vmem:[%s4884_s4] sm:$0x7]  ;;  %s4024_s4 = smov 96  }
  0x3d   :  { %480 = vmatpush.bf16.msra.mxu0 %v2972_v59  ;;  %v343_v46 = vperm.slane %v341_v45, 0 }
  0x3e   :  { %v4148_v12 = vsel %vm219_vm0, %v3584_v7, %v218_v11  ;;  %499 = vmatpush.bf16.msra.mxu1 %v2976_v63  ;;  %518 = vmatpush.bf16.msra.mxu2 %v2980_v0  ;;  %v3378_v7 = vld [vmem:[#allocation13 + $0x4c] sm:$0xf]  ;;  %v3380_v11 = vld [vmem:[#allocation13 + $0x58] sm:$0xf0]  ;;  %vm769_vm0 = vcmask 257024  }
  0x41   :  { %481 = vmatpush.bf16.msra.mxu0 %v2960_v8 }
  0xa3   :  { %v211_v13 = vpop.xlane.xlu1 %210  ;;  %v207_v14 = vpop.xlane.xlu0 %206 }
  0xa4   :  { %v223_v15 = vmul.f32 %v4148_v12, %v211_v13  ;;  %v221_v16 = vmul.f32 %v4148_v12, %v207_v14  ;;  %v2964_v13 = vor.u32 %v3378_v7, %v2961_v9  ;;  %v2968_v14 = vor.u32 %v3380_v11, %v2967_v10 }
  0xa6   :  { %v4153_v17 = vsub.f32 %v4136_v2, %v223_v15  ;;  %v4156_v18 = vsub.f32 %v4138_v3, %v221_v16  ;;  %500 = vmatpush.bf16.msra.mxu1 %v2964_v13  ;;  %519 = vmatpush.bf16.msra.mxu2 %v2968_v14  ;;  %v2947_v15 = vld [vmem:[#allocation13 + $0x30] sm:$0xf]  ;;  %v3376_v16 = vld [vmem:[#allocation13 + $0x38] sm:$0xf0] }
  0xa8   :  { %v231_v19 = vmul.f32 %v4153_v17, %v4153_v17  ;;  %v229_v20 = vmul.f32 %v4156_v18, %v4156_v18 }
  0xaa   :  { %237 = vadd.xlane.f32.xlu0 %v231_v19  ;;  %233 = vadd.xlane.f32.xlu2 %v229_v20  ;;  %v3375_v19 = vld [vmem:[#allocation13 + $0x34] sm:$0xf]  ;;  %v2948_v20 = vor.u32 %v3376_v16, %v2947_v15 }
  0xab   :  { %v213_v21 = vpop.xlane.xlu1 %212  ;;  %v209_v22 = vpop.xlane.xlu0 %208 }
  0xac   :  { %v224_v23 = vmul.f32 %v4148_v12, %v213_v21  ;;  %v222_v24 = vmul.f32 %v4148_v12, %v209_v22  ;;  %v2949_v21 = vld [vmem:[#allocation13 + $0x3c] sm:$0xf0]  ;;  %v2955_v22 = vld [vmem:[#allocation13 + $0x38] sm:$0xf]  ;;  %482 = vmatpush.bf16.msra.mxu0 %v2948_v20 }
  0xae   :  { %v4165_v25 = vsub.f32 %v4142_v4, %v224_v23  ;;  %v4168_v26 = vsub.f32 %v4144_v5, %v222_v24  ;;  %v3377_v23 = vld [vmem:[#allocation13 + $0x40] sm:$0xf0]  ;;  %v2952_v24 = vor.u32 %v3375_v19, %v2949_v21  ;;  %v3577_v21 = vld [vmem:[#allocation10] ss:$0 sm:$0xff] }
  0xb0   :  { %v232_v27 = vmul.f32 %v4165_v25, %v4165_v25  ;;  %v230_v28 = vmul.f32 %v4168_v26, %v4168_v26  ;;  %501 = vmatpush.bf16.msra.mxu1 %v2952_v24 }
  0xb2   :  { %239 = vadd.xlane.f32.xlu1 %v232_v27  ;;  %235 = vadd.xlane.f32.xlu2 %v230_v28  ;;  %v2956_v27 = vor.u32 %v3377_v23, %v2955_v22  ;;  %v2935_v28 = vld [vmem:[#allocation13 + $0x18] sm:$0xf] }
  0xb3   :  { %v2936_v31 = vor.u32 %v3373_v29, %v2935_v28 }
  0xb4   :  { %520 = vmatpush.bf16.msra.mxu2 %v2956_v27  ;;  %502 = vmatpush.bf16.msra.mxu1 %v2940_v36 }
  0xb5   :  { %483 = vmatpush.bf16.msra.mxu0 %v2936_v31 }
  0xb8   :  { %521 = vmatpush.bf16.msra.mxu2 %v2944_v37  ;;  %503 = vmatpush.bf16.msra.mxu1 %v2928_v47  ;;  %v344_v47 = vperm.slane %v341_v45, 1 }
  0xb9   :  { %484 = vmatpush.bf16.msra.mxu0 %v2924_v43 }
  0xbc   :  { %522 = vmatpush.bf16.msra.mxu2 %v2932_v48 }
 0x11d   :  { %v234_v35 = vpop.xlane.xlu2 %233  ;;  %v238_v42 = vpop.xlane.xlu0 %237 }
 0x11e   :  { %v241_v41 = vmul.f32 %v234_v35, %v4148_v12  ;;  %v243_v50 = vmul.f32 %v238_v42, %v4148_v12 }
 0x120   :  { %v245_v49 = vadd.f32 1e-05, %v241_v41  ;;  %v247_v51 = vadd.f32 1e-05, %v243_v50 }
 0x122   :  { %3585 = vrsqrt.f32 %v245_v49  ;;  %vm255_vm2 = vweird.f32 %v245_v49  ;;  %vm275_vm9 = vweird.f32 %v247_v51 }
 0x123   :  { %3587 = vrsqrt.f32 %v247_v51 }
 0x125   :  { %v240_v52 = vpop.xlane.xlu1 %239  ;;  %v236_v53 = vpop.xlane.xlu2 %235 }
 0x126   :  { %v244_v54 = vmul.f32 %v240_v52, %v4148_v12  ;;  %v242_v55 = vmul.f32 %v236_v53, %v4148_v12 }
 0x128   :  { %v3586_v56 = vpop.eup %3585  ;;  %v248_v57 = vadd.f32 1e-05, %v244_v54  ;;  %v246_v58 = vadd.f32 1e-05, %v242_v55 }
 0x129   :  { %v250_v59 = vmul.f32 %v3586_v56, %v245_v49  ;;  %v3588_v62 = vpop.eup %3587  ;;  %vm256_vm1 = vweird.f32 %v3586_v56 }
 0x12a   :  { %3589 = vrsqrt.f32 %v248_v57  ;;  %v270_v8 = vmul.f32 %v3588_v62, %v247_v51  ;;  %vm257_vm3 = vmor %vm255_vm2, %vm256_vm1  ;;  %vm265_vm5 = vweird.f32 %v246_v58  ;;  %vm285_vm7 = vweird.f32 %v248_v57 }
 0x12b   :  { %v251_v60 = vmul.f32 %v3586_v56, %v250_v59  ;;  %3591 = vrsqrt.f32 %v246_v58  ;;  %vm276_vm10 = vweird.f32 %v3588_v62  ;;  %vm1066_vm1 = vcmask 519424  }
 0x12c   :  { %v271_v14 = vmul.f32 %v3588_v62, %v270_v8  ;;  %vm277_vm12 = vmor %vm275_vm9, %vm276_vm10  ;;  %vm1363_vm2 = vcmask 781824  }
 0x12d   :  { %v252_v61 = vmul.f32 0.5, %v251_v60 }
 0x12e   :  { %v272_v22 = vmul.f32 0.5, %v271_v14 }
 0x12f   :  { %v253_v63 = vsub.f32 1.5, %v252_v61 }
 0x130   :  { %v3590_v0 = vpop.eup %3589  ;;  %v273_v31 = vsub.f32 1.5, %v272_v22 }
 0x131   :  { %v3592_v1 = vpop.eup %3591  ;;  %v280_v6 = vmul.f32 %v3590_v0, %v248_v57  ;;  %v254_v7 = vmul.f32 %v3586_v56, %v253_v63  ;;  %vm286_vm8 = vweird.f32 %v3590_v0 }
 0x132   :  { %v260_v9 = vmul.f32 %v3592_v1, %v246_v58  ;;  %vm266_vm4 = vweird.f32 %v3592_v1  ;;  %vm287_vm11 = vmor %vm285_vm7, %vm286_vm8  ;;  %v274_v35 = vmul.f32 %v3588_v62, %v273_v31 }
 0x133   :  { %v281_v10 = vmul.f32 %v3590_v0, %v280_v6  ;;  %v258_v13 = vsel %vm257_vm3, %v3586_v56, %v254_v7  ;;  %vm267_vm6 = vmor %vm265_vm5, %vm266_vm4  ;;  %vm1660_vm3 = vcmask 1044224  }
 0x134   :  { %v261_v11 = vmul.f32 %v3592_v1, %v260_v9  ;;  %v289_v20 = vmul.f32 %v258_v13, %v4156_v18  ;;  %v278_v38 = vsel %vm277_vm12, %v3588_v62, %v274_v35 }
 0x135   :  { %v282_v16 = vmul.f32 0.5, %v281_v10  ;;  %v291_v39 = vmul.f32 %v278_v38, %v4153_v17  ;;  %v345_v17 = vperm.slane %v341_v45, 2 }
 0x136   :  { %v262_v15 = vmul.f32 0.5, %v261_v11  ;;  %v296_v29 = vmul.f32 %v3577_v21, %v289_v20 }
 0x137   :  { %v283_v24 = vsub.f32 1.5, %v282_v16  ;;  %v298_v41 = vmul.f32 %v3577_v21, %v291_v39 }
 0x138   :  { %v263_v19 = vsub.f32 1.5, %v262_v15  ;;  %v303_v18 = vadd.f32 %v3578_v30, %v296_v29 }
 0x139   :  { %v284_v33 = vmul.f32 %v3590_v0, %v283_v24  ;;  %v305_v43 = vadd.f32 %v3578_v30, %v298_v41 }
 0x13a   :  { %v264_v23 = vmul.f32 %v3592_v1, %v263_v19 }
 0x13b   :  { %v288_v37 = vsel %vm287_vm11, %v3590_v0, %v284_v33 }
 0x13c   :  { %v268_v27 = vsel %vm267_vm6, %v3592_v1, %v264_v23 }
 0x13d   :  { %v290_v28 = vmul.f32 %v268_v27, %v4168_v26  ;;  %v292_v26 = vmul.f32 %v288_v37, %v4165_v25 }
 0x13f   :  { %v297_v32 = vmul.f32 %v3577_v21, %v290_v28  ;;  %v299_v40 = vmul.f32 %v3577_v21, %v292_v26 }
 0x141   :  { %v304_v34 = vadd.f32 %v3578_v30, %v297_v32  ;;  %v306_v42 = vadd.f32 %v3578_v30, %v299_v40 }
 0x143   :  { %v307_v36 = vpack.c.bf16 %v304_v34, %v303_v18  ;;  %v308_v44 = vpack.c.bf16 %v306_v42, %v305_v43 }
 0x145   :  { %485 = vmatmul.bf16.vlgmr.msra.gmra.mxu0 %v307_v36  ;;  %504 = vmatmul.bf16.vlgmr.msra.gmra.mxu1 %v307_v36 }
 0x146   :  { %523 = vmatmul.bf16.vlgmr.msra.gmra.mxu2 %v307_v36 }
 0x155   :  { %490 = vmatmul.bf16.gmra.mxu0 %v308_v44  ;;  %509 = vmatmul.bf16.gmra.mxu1 %v308_v44 }
 0x156   :  { %528 = vmatmul.bf16.gmra.mxu2 %v308_v44 }
 0x1c2   :  { %v486_v48 = vpop.f32.mrf.mxu0  ;;  %v505_v49 = vpop.f32.mrf.mxu1 }
 0x1c3   :  { %v487_v50 = vadd.f32 %v486_v48, %v343_v46  ;;  %v506_v25 = vadd.f32 %v505_v49, %v344_v47 }
 0x1c5   :  { %v4185_v51 = vpack.c.bf16 %v506_v25, %v487_v50 }
 0x1c7   :  { %542 = vst [vmem:[#allocation4] sm:$0xff] %v4185_v51 }
 0x1c9   :  { %v524_v52 = vpop.f32.mrf.mxu2 }
 0x1ca   :  { %v525_v53 = vadd.f32 %v524_v52, %v345_v17  ;;  %v488_v54 = vpop.f32.mrf.mxu0  ;;  %v507_v55 = vpop.f32.mrf.mxu1 }
 0x1cb   :  { %v489_v56 = vadd.f32 %v488_v54, %v343_v46  ;;  %v508_v57 = vadd.f32 %v507_v55, %v344_v47 }
 0x1cc   :  { %v535_v58 = vpack.c.bf16 %v525_v53, %v525_v53 }
 0x1cd   :  { %v536_v59 = vpack.c.bf16 %v508_v57, %v489_v56 }
 0x1ce   :  { %543 = vst [vmem:[#allocation4 + $0x8] sm:$0xf] %v535_v58  ;;  %v554_v60 = vld [vmem:[#allocation4 + $0x4] sm:$0xf]  ;;  %v550_v11 = vld [vmem:[#allocation4] sm:$0xf] }
 0x1cf   :  { %544 = vst [vmem:[#allocation4 + $0xc] sm:$0xff] %v536_v59  ;;  %v567_v61 = vsel %vm562_vm13, %v554_v60, 0 }
 0x1d0   :  { %576 = vmatpush.bf16.xpose.msra.mxu3 %v567_v61 }
 0x1d1   :  { %v526_v62 = vpop.f32.mrf.mxu2 }
 0x1d2   :  { %v527_v63 = vadd.f32 %v526_v62, %v345_v17  ;;  %v491_v0 = vpop.f32.mrf.mxu0  ;;  %v510_v1 = vpop.f32.mrf.mxu1 }
 0x1d3   :  { %v492_v6 = vadd.f32 %v491_v0, %v343_v46  ;;  %v511_v7 = vadd.f32 %v510_v1, %v344_v47 }
 0x1d4   :  { %v537_v8 = vpack.c.bf16 %v527_v63, %v527_v63  ;;  %v3480_v63 = vunpack.c.h.b16 %v4185_v51 }
 0x1d5   :  { %v4189_v9 = vpack.c.bf16 %v511_v7, %v492_v6  ;;  %v558_v10 = vld [vmem:[#allocation4 + $0x8] sm:$0xf] }
 0x1d6   :  { %545 = vst [vmem:[#allocation4 + $0x14] sm:$0xf] %v537_v8  ;;  %v693_v13 = vsel %vm691_vm14, %v558_v10, 0  ;;  %v555_v14 = vld [vmem:[#allocation4 + $0x10] sm:$0xf]  ;;  %v4229_v1 = vpack.c.b16 %v3480_v63, %v3480_v63 }
 0x1d7   :  { %546 = vst [vmem:[#allocation4 + $0x18] sm:$0xff] %v4189_v9  ;;  %702 = vmatpush.bf16.msrb.mxu1 %v693_v13  ;;  %3017 = vmatmul.msk.bf16.vlgmr.msra.gmra.mxu3 %vm562_vm13, %v550_v11  ;;  %v586_v15 = vsel %vm562_vm13, %v555_v14, 0  ;;  %v3484_v16 = vunpack.c.h.b16 %v4189_v9  ;;  %v551_v37 = vld [vmem:[#allocation4 + $0xc] sm:$0xf]  ;;  %v3483_v7 = vunpack.c.l.b16 %v4189_v9 }
 0x1d8   :  { %595 = vmatpush.bf16.xpose.msrb.mxu3 %v586_v15 }
 0x1d9   :  { %v529_v19 = vpop.f32.mrf.mxu2  ;;  %v4196_v20 = vpack.c.b16 %v3484_v16, %v3484_v16  ;;  %v4234_v8 = vpack.c.b16 %v3483_v7, %v3483_v7 }
 0x1da   :  { %v530_v21 = vadd.f32 %v529_v19, %v345_v17  ;;  %v493_v22 = vpop.f32.mrf.mxu0  ;;  %v512_v23 = vpop.f32.mrf.mxu1 }
 0x1db   :  { %v494_v24 = vadd.f32 %v493_v22, %v343_v46  ;;  %v513_v27 = vadd.f32 %v512_v23, %v344_v47  ;;  %852 = vrot.lane.b32.xlu1 %v4196_v20, %s4024_s4 }
 0x1dc   :  { %v539_v28 = vpack.c.bf16 %v530_v21, %v530_v21 }
 0x1dd   :  { %v540_v29 = vpack.c.bf16 %v513_v27, %v494_v24  ;;  %v559_v30 = vld [vmem:[#allocation4 + $0x14] sm:$0xf] }
 0x1de   :  { %547 = vst [vmem:[#allocation4 + $0x20] sm:$0xf] %v539_v28  ;;  %v712_v31 = vsel %vm691_vm14, %v559_v30, 0  ;;  %v556_v32 = vld [vmem:[#allocation4 + $0x1c] sm:$0xf]  ;;  %v4220_v58 = vld [vmem:[#allocation4 + $0x10] sm:$0xff]  }
 0x1df   :  { %548 = vst [vmem:[#allocation4 + $0x24] sm:$0xff] %v540_v29  ;;  %721 = vmatpush.bf16.msra.mxu1 %v712_v31  ;;  %v605_v33 = vsel %vm562_vm13, %v556_v32, 0  ;;  %v552_v44 = vld [vmem:[#allocation4 + $0x18] sm:$0xf]  ;;  %v3487_v59 = vunpack.c.l.b16 %v4220_v58 }
 0x1e0   :  { %614 = vmatpush.bf16.xpose.msra.mxu3 %v605_v33 }
 0x1e1   :  { %v531_v18 = vpop.f32.mrf.mxu2  ;;  %v4223_v61 = vpack.c.b16 %v3487_v59, %v3487_v59 }
 0x1e2   :  { %v532_v34 = vadd.f32 %v531_v18, %v345_v17 }
 0x1e4   :  { %v541_v35 = vpack.c.bf16 %v532_v34, %v532_v34 }
 0x1e5   :  { %v560_v36 = vld [vmem:[#allocation4 + $0x20] sm:$0xf] }
 0x1e6   :  { %549 = vst [vmem:[#allocation4 + $0x2c] sm:$0xf] %v541_v35  ;;  %v731_v38 = vsel %vm691_vm14, %v560_v36, 0  ;;  %v557_v26 = vld [vmem:[#allocation4 + $0x28] sm:$0xf]  ;;  %v4240_v28 = vld [vmem:[#allocation4 + $0x20] sm:$0xff]  }
 0x1e7   :  { %740 = vmatpush.bf16.msrb.mxu2 %v731_v38  ;;  %3018 = vmatmul.msk.bf16.vlgmr.msrb.gmra.mxu3 %vm562_vm13, %v551_v37  ;;  %v624_v39 = vsel %vm562_vm13, %v557_v26, 0  ;;  %v553_v46 = vld [vmem:[#allocation4 + $0x24] sm:$0xf]  ;;  %v874_v30 = vunpack.c.h.b16 %v4240_v28  ;;  %v775_v26 = vld [vmem:[#allocation4 + $0x8] sm:$0xff]  }
 0x1e8   :  { %633 = vmatpush.bf16.xpose.msrb.mxu3 %v624_v39  ;;  %v816_v39 = vunpack.c.h.b16 %v775_v26 }
 0x1e9   :  { %v875_v32 = vpack.c.b16 %v874_v30, %v874_v30 }
 0x1ed   :  { %v4205_v40 = vld [vmem:[#allocation4 + $0x28] sm:$0xff]  }
 0x1ee   :  { %v3491_v41 = vunpack.c.l.b16 %v4205_v40  ;;  %v561_v43 = vld [vmem:[#allocation4 + $0x2c] sm:$0xf] }
 0x1ef   :  { %v750_v45 = vsel %vm691_vm14, %v561_v43, 0  ;;  %v3479_v43 = vunpack.c.l.b16 %v4185_v51 }
 0x1f0   :  { %v4208_v42 = vpack.c.b16 %v3491_v41, %v3491_v41  ;;  %v817_v41 = vpack.c.b16 %v816_v39, %v816_v39  ;;  %v999_v39 = vunpack.c.l.b16 %v4240_v28 }
 0x1f2   :  { %881 = vrot.lane.b32.xlu2 %v4208_v42, %s4024_s4 }
 0x1f7   :  { %3019 = vmatmul.msk.bf16.vlgmr.msra.gmra.mxu3 %vm562_vm13, %v552_v44  ;;  %v4249_v44 = vpack.c.b16 %v3479_v43, %v3479_v43  ;;  %v1000_v43 = vpack.c.b16 %v999_v39, %v999_v39 }
 0x1f8   :  { %759 = vmatpush.bf16.msra.mxu3 %v750_v45  ;;  %v951_v45 = vunpack.c.l.b16 %v775_v26 }
 0x207   :  { %3020 = vmatmul.msk.bf16.vlgmr.msrb.gmra.mxu3 %vm562_vm13, %v553_v46  ;;  %v952_v46 = vpack.c.b16 %v951_v45, %v951_v45 }
 0x24c   :  { %v882_v47 = vpop.permute.xlu2 %881 }
 0x24d   :  { %v887_v48 = vsel %vm562_vm13, %v882_v47, 0  ;;  %v853_v49 = vpop.permute.xlu1 %852 }
 0x24e   :  { %896 = vmatpush.bf16.xpose.msrb.mxu3 %v887_v48  ;;  %v858_v50 = vsel %vm562_vm13, %v853_v49, 0 }
 0x24f   :  { %867 = vmatpush.bf16.xpose.msra.mxu2 %v858_v50 }
 0x25a   :  { %v578_v25 = vpop.f32.mrf.mxu3 }
 0x25b   :  { %v640_v17 = vsel %vm639_vm15, %v578_v25, -inf }
 0x25c   :  { %641 = vmax.xlane.f32.xlu2 %v640_v17 }
 0x262   :  { %v580_v52 = vpop.f32.mrf.mxu3 }
 0x26a   :  { %v597_v53 = vpop.f32.mrf.mxu3 }
 0x26b   :  { %v643_v54 = vsel %vm639_vm15, %v597_v53, -inf }
 0x26c   :  { %644 = vmax.xlane.f32.xlu2 %v643_v54 }
 0x272   :  { %v599_v55 = vpop.f32.mrf.mxu3 }
 0x27a   :  { %v616_v56 = vpop.f32.mrf.mxu3 }
 0x27b   :  { %v646_v57 = vsel %vm639_vm15, %v616_v56, -inf }
 0x27c   :  { %647 = vmax.xlane.f32.xlu0 %v646_v57 }
 0x282   :  { %v618_v60 = vpop.f32.mrf.mxu3 }
 0x284   :  { %823 = vrot.lane.b32.xlu2 %v4223_v61, %s4024_s4 }
 0x28a   :  { %v635_v62 = vpop.f32.mrf.mxu3 }
 0x28b   :  { %v649_v0 = vsel %vm639_vm15, %v635_v62, -inf }
 0x28c   :  { %650 = vmax.xlane.f32.xlu1 %v649_v0 }
 0x290   :  { %794 = vrot.lane.b32.xlu0 %v4229_v1, %s4024_s4 }
 0x292   :  { %v637_v6 = vpop.f32.mrf.mxu3 }
 0x2a5   :  { %847 = vrot.lane.b32.xlu1 %v4234_v8, %s4024_s4 }
 0x2cf   :  { %v642_v10 = vpop.xlane.xlu2 %641 }
 0x2d0   :  { %v652_v11 = vsub.f32 %v578_v25, %v642_v10 }
 0x2d2   :  { %v656_v13 = vmul.f32 1.442695, %v652_v11 }
 0x2d4   :  { %3593 = vpow2.f32 %v656_v13 }
 0x2da   :  { %v3594_v14 = vpop.eup %3593 }
 0x2db   :  { %v664_v15 = vsel %vm639_vm15, %v3594_v14, 0.0 }
 0x2dc   :  { %665 = vadd.xlane.f32.xlu0 %v664_v15 }
 0x2df   :  { %v645_v16 = vpop.xlane.xlu2 %644 }
 0x2e0   :  { %v653_v19 = vsub.f32 %v597_v53, %v645_v16 }
 0x2e2   :  { %v658_v21 = vmul.f32 1.442695, %v653_v19 }
 0x2e4   :  { %3595 = vpow2.f32 %v658_v21 }
 0x2e7   :  { %v824_v50 = vpop.permute.xlu2 %823 }
 0x2e8   :  { %v829_v51 = vsel %vm562_vm13, %v824_v50, 0 }
 0x2ea   :  { %v3596_v22 = vpop.eup %3595 }
 0x2eb   :  { %v667_v9 = vsel %vm639_vm15, %v3596_v22, 0.0 }
 0x2ec   :  { %668 = vadd.xlane.f32.xlu0 %v667_v9 }
 0x2ef   :  { %v648_v23 = vpop.xlane.xlu0 %647 }
 0x2f0   :  { %v654_v24 = vsub.f32 %v616_v56, %v648_v23 }
 0x2f2   :  { %v660_v27 = vmul.f32 1.442695, %v654_v24 }
 0x2f4   :  { %3597 = vpow2.f32 %v660_v27 }
 0x2fa   :  { %v3598_v29 = vpop.eup %3597 }
 0x2fb   :  { %v670_v31 = vsel %vm639_vm15, %v3598_v29, 0.0 }
 0x2fc   :  { %671 = vadd.xlane.f32.xlu1 %v670_v31 }
 0x2ff   :  { %v651_v33 = vpop.xlane.xlu1 %650 }
 0x300   :  { %v655_v18 = vsub.f32 %v635_v62, %v651_v33  ;;  %876 = vrot.lane.b32.xlu0 %v875_v32, %s4024_s4 }
 0x302   :  { %v662_v34 = vmul.f32 1.442695, %v655_v18  ;;  %v795_v35 = vpop.permute.xlu0 %794 }
 0x303   :  { %v800_v36 = vsel %vm562_vm13, %v795_v35, 0 }
 0x304   :  { %3599 = vpow2.f32 %v662_v34  ;;  %809 = vmatpush.bf16.xpose.msrb.mxu0 %v800_v36 }
 0x30a   :  { %v3600_v37 = vpop.eup %3599 }
 0x30b   :  { %v673_v38 = vsel %vm639_vm15, %v3600_v37, 0.0 }
 0x30c   :  { %674 = vadd.xlane.f32.xlu2 %v673_v38 }
 0x315   :  { %818 = vrot.lane.b32.xlu1 %v817_v41, %s4024_s4 }
 0x317   :  { %v848_v53 = vpop.permute.xlu1 %847 }
 0x324   :  { %789 = vrot.lane.b32.xlu2 %v4249_v44, %s4024_s4 }
 0x32c   :  { %953 = vrot.lane.b32.xlu2 %v952_v46, %s4024_s4 }
 0x334   :  { %1178 = vrot.lane.b32.xlu2 %v4208_v42, %s4014_s18 }
 0x34f   :  { %v666_v47 = vpop.xlane.xlu0 %665 }
 0x350   :  { %3601 = vrcp.f32 %v666_v47 }
 0x356   :  { %v3602_v48 = vpop.eup %3601 }
 0x357   :  { %v680_v49 = vmul.f32 %v3602_v48, %v3594_v14 }
 0x359   :  { %v684_v25 = vpack.c.bf16 %v680_v49, %v680_v49 }
 0x35b   :  { %3021 = vmatmul.msk.bf16.vlgmr.msrb.gmra.mxu1 %vm639_vm15, %v684_v25 }
 0x35c   :  { %838 = vmatpush.bf16.xpose.msrb.mxu1 %v829_v51 }
 0x35f   :  { %v669_v17 = vpop.xlane.xlu0 %668 }
 0x360   :  { %3603 = vrcp.f32 %v669_v17 }
 0x366   :  { %v3604_v52 = vpop.eup %3603 }
 0x367   :  { %v681_v54 = vmul.f32 %v3604_v52, %v3596_v22 }
 0x369   :  { %v685_v55 = vpack.c.bf16 %v681_v54, %v681_v54 }
 0x36b   :  { %3022 = vmatmul.msk.bf16.vlgmr.msra.gmra.mxu1 %vm639_vm15, %v685_v55 }
 0x36f   :  { %v672_v56 = vpop.xlane.xlu1 %671 }
 0x370   :  { %3605 = vrcp.f32 %v672_v56 }
 0x372   :  { %v877_v14 = vpop.permute.xlu0 %876 }
 0x376   :  { %v3606_v57 = vpop.eup %3605 }
 0x377   :  { %v682_v59 = vmul.f32 %v3606_v57, %v3598_v29 }
 0x379   :  { %v686_v60 = vpack.c.bf16 %v682_v59, %v682_v59 }
 0x37b   :  { %3023 = vmatmul.msk.bf16.vlgmr.msrb.gmra.mxu2 %vm639_vm15, %v686_v60 }
 0x37f   :  { %v675_v62 = vpop.xlane.xlu2 %674 }
 0x380   :  { %3607 = vrcp.f32 %v675_v62  ;;  %v3492_v62 = vunpack.c.h.b16 %v4205_v40 }
 0x386   :  { %v3608_v63 = vpop.eup %3607 }
 0x387   :  { %v683_v0 = vmul.f32 %v3608_v63, %v3600_v37  ;;  %v790_v6 = vpop.permute.xlu2 %789  ;;  %v819_v7 = vpop.permute.xlu1 %818 }
 0x388   :  { %3025 = vmatmul.msk.bf16.vlgmr.msrb.gmra.mxu0 %vm562_vm13, %v790_v6  ;;  %3026 = vmatmul.msk.bf16.vlgmr.msrb.gmra.mxu1 %vm562_vm13, %v819_v7  ;;  %v4288_v7 = vpack.c.b16 %v3492_v62, %v3492_v62 }
 0x389   :  { %v687_v10 = vpack.c.bf16 %v683_v0, %v683_v0 }
 0x38b   :  { %3024 = vmatmul.msk.bf16.vlgmr.msra.gmra.mxu3 %vm639_vm15, %v687_v10  ;;  %3027 = vmatmul.msk.bf16.vlgmr.msra.gmra.mxu2 %vm562_vm13, %v848_v53 }
 0x38f   :  { %v954_v11 = vpop.permute.xlu2 %953 }
 0x390   :  { %v959_v13 = vsel %vm691_vm14, %v954_v11, 0 }
 0x391   :  { %968 = vmatpush.bf16.msra.mxu0 %v959_v13 }
 0x397   :  { %v4283_v51 = vpop.permute.xlu2 %1178 }
 0x39b   :  { %3028 = vmatmul.msk.bf16.vlgmr.msrb.gmra.mxu3 %vm562_vm13, %v877_v14  ;;  %v3488_v14 = vunpack.c.h.b16 %v4220_v58 }
 0x3d8   :  { %v704_v15 = vpop.f32.mrf.mxu1 }
 0x3d9   :  { %v765_v16 = vpack.c.bf16 %v704_v15, %v704_v15 }
 0x3db   :  { %770 = vst.msk [vmem:[#allocation5] sm:$0xf] %vm769_vm0, %v765_v16 }
 0x3e0   :  { %v706_v19 = vpop.f32.mrf.mxu1 }
 0x3e1   :  { %v4296_v19 = vpack.c.b16 %v3488_v14, %v3488_v14 }
 0x3e8   :  { %v723_v21 = vpop.f32.mrf.mxu1 }
 0x3e9   :  { %v766_v22 = vpack.c.bf16 %v723_v21, %v723_v21  ;;  %v1074_v21 = vld [vmem:[#allocation4 + $0x20] sm:$0xff]  }
 0x3eb   :  { %771 = vst.msk [vmem:[#allocation5 + $0x4] sm:$0xf] %vm769_vm0, %v766_v22  ;;  %v1171_v22 = vunpack.c.h.b16 %v1074_v21 }
 0x3f0   :  { %v725_v9 = vpop.f32.mrf.mxu1 }
 0x3f1   :  { %v1072_v9 = vld [vmem:[#allocation4 + $0x8] sm:$0xff]  }
 0x3f2   :  { %v1113_v58 = vunpack.c.h.b16 %v1072_v9 }
 0x3fe   :  { %v742_v23 = vpop.f32.mrf.mxu2 }
 0x3ff   :  { %v767_v24 = vpack.c.bf16 %v742_v23, %v742_v23  ;;  %v1172_v23 = vpack.c.b16 %v1171_v22, %v1171_v22 }
 0x401   :  { %772 = vst.msk [vmem:[#allocation5 + $0x8] sm:$0xf] %vm769_vm0, %v767_v24  ;;  %v1114_v24 = vpack.c.b16 %v1113_v58, %v1113_v58 }
 0x405   :  { %v811_v27 = vpop.f32.mrf.mxu0  ;;  %v840_v29 = vpop.f32.mrf.mxu1 }
 0x406   :  { %v744_v30 = vpop.f32.mrf.mxu2  ;;  %v902_v31 = vsel %vm639_vm15, %v811_v27, -inf  ;;  %v905_v26 = vsel %vm639_vm15, %v840_v29, -inf }
 0x407   :  { %903 = vmax.xlane.f32.xlu1 %v902_v31 }
 0x40d   :  { %v813_v32 = vpop.f32.mrf.mxu0  ;;  %v842_v33 = vpop.f32.mrf.mxu1 }
 0x40e   :  { %v761_v18 = vpop.f32.mrf.mxu3  ;;  %v869_v34 = vpop.f32.mrf.mxu2 }
 0x40f   :  { %v768_v35 = vpack.c.bf16 %v761_v18, %v761_v18  ;;  %v908_v36 = vsel %vm639_vm15, %v869_v34, -inf }
 0x410   :  { %909 = vmax.xlane.f32.xlu0 %v908_v36 }
 0x411   :  { %773 = vst.msk [vmem:[#allocation5 + $0xc] sm:$0xf] %vm769_vm0, %v768_v35 }
 0x416   :  { %v763_v37 = vpop.f32.mrf.mxu3  ;;  %v871_v38 = vpop.f32.mrf.mxu2 }
 0x418   :  { %906 = vmax.xlane.f32.xlu0 %v905_v26 }
 0x41e   :  { %v898_v41 = vpop.f32.mrf.mxu3 }
 0x41f   :  { %v911_v45 = vsel %vm639_vm15, %v898_v41, -inf }
 0x420   :  { %1001 = vrot.lane.b32.xlu1 %v1000_v43, %s4024_s4  ;;  %912 = vmax.xlane.f32.xlu2 %v911_v45 }
 0x426   :  { %v900_v46 = vpop.f32.mrf.mxu3 }
 0x428   :  { %1149 = vrot.lane.b32.xlu1 %v4196_v20, %s4014_s18 }
 0x430   :  { %1120 = vrot.lane.b32.xlu1 %v4223_v61, %s4014_s18 }
 0x438   :  { %1144 = vrot.lane.b32.xlu2 %v4234_v8, %s4014_s18 }
 0x47a   :  { %v904_v47 = vpop.xlane.xlu1 %903 }
 0x47b   :  { %v914_v48 = vsub.f32 %v811_v27, %v904_v47  ;;  %v1248_v27 = vunpack.c.l.b16 %v1072_v9 }
 0x47d   :  { %v918_v28 = vmul.f32 1.442695, %v914_v48  ;;  %v1249_v30 = vpack.c.b16 %v1248_v27, %v1248_v27 }
 0x47f   :  { %3609 = vpow2.f32 %v918_v28 }
 0x483   :  { %v910_v49 = vpop.xlane.xlu0 %909 }
 0x484   :  { %v916_v53 = vsub.f32 %v869_v34, %v910_v49 }
 0x485   :  { %v3610_v50 = vpop.eup %3609 }
 0x486   :  { %v926_v25 = vsel %vm639_vm15, %v3610_v50, 0.0  ;;  %v922_v55 = vmul.f32 1.442695, %v916_v53 }
 0x487   :  { %927 = vadd.xlane.f32.xlu0 %v926_v25 }
 0x48b   :  { %v907_v17 = vpop.xlane.xlu0 %906 }
 0x48c   :  { %v915_v52 = vsub.f32 %v840_v29, %v907_v17  ;;  %v1296_v29 = vunpack.c.l.b16 %v1074_v21 }
 0x48e   :  { %v920_v54 = vmul.f32 1.442695, %v915_v52  ;;  %v1297_v31 = vpack.c.b16 %v1296_v29, %v1296_v29 }
 0x490   :  { %3611 = vpow2.f32 %v920_v54 }
 0x491   :  { %3613 = vpow2.f32 %v922_v55 }
 0x492   :  { %v1002_v56 = vpop.permute.xlu1 %1001 }
 0x493   :  { %v1007_v57 = vsel %vm691_vm14, %v1002_v56, 0  ;;  %v913_v59 = vpop.xlane.xlu2 %912 }
 0x494   :  { %v917_v60 = vsub.f32 %v898_v41, %v913_v59  ;;  %1016 = vmatpush.bf16.msrb.mxu2 %v1007_v57 }
 0x496   :  { %v3612_v63 = vpop.eup %3611  ;;  %v924_v0 = vmul.f32 1.442695, %v917_v60 }
 0x497   :  { %v929_v6 = vsel %vm639_vm15, %v3612_v63, 0.0  ;;  %v3614_v13 = vpop.eup %3613 }
 0x498   :  { %3615 = vpow2.f32 %v924_v0  ;;  %930 = vadd.xlane.f32.xlu2 %v929_v6  ;;  %v932_v15 = vsel %vm639_vm15, %v3614_v13, 0.0 }
 0x49a   :  { %v1150_v10 = vpop.permute.xlu1 %1149 }
 0x49b   :  { %v1155_v11 = vsel %vm562_vm13, %v1150_v10, 0  ;;  %1025 = vrot.lane.b32.xlu0 %v4288_v7, %s4024_s4  ;;  %v1145_v34 = vpop.permute.xlu2 %1144 }
 0x49c   :  { %1164 = vmatpush.bf16.xpose.msra.mxu2 %v1155_v11 }
 0x49e   :  { %v3616_v40 = vpop.eup %3615 }
 0x49f   :  { %v935_v16 = vsel %vm639_vm15, %v3616_v40, 0.0 }
 0x4a0   :  { %933 = vadd.xlane.f32.xlu2 %v932_v15  ;;  %936 = vadd.xlane.f32.xlu1 %v935_v16 }
 0x4a2   :  { %v1121_v36 = vpop.permute.xlu1 %1120 }
 0x4a3   :  { %977 = vrot.lane.b32.xlu0 %v4296_v19, %s4024_s4  ;;  %v1126_v47 = vsel %vm562_vm13, %v1121_v36, 0 }
 0x4ab   :  { %1091 = vrot.lane.b32.xlu0 %v4229_v1, %s4014_s18 }
 0x4b3   :  { %1173 = vrot.lane.b32.xlu0 %v1172_v23, %s4014_s18 }
 0x4b8   :  { %1115 = vrot.lane.b32.xlu2 %v1114_v24, %s4014_s18 }
 0x4b9   :  { %1086 = vrot.lane.b32.xlu1 %v4249_v44, %s4014_s18 }
 0x4c0   :  { %1250 = vrot.lane.b32.xlu2 %v1249_v30, %s4014_s18 }
 0x4c1   :  { %1298 = vrot.lane.b32.xlu1 %v1297_v31, %s4014_s18 }
 0x4c8   :  { %1388 = vrot.lane.b32.xlu2 %v4229_v1, %s4025_s20  ;;  %v1184_v1 = vsel %vm562_vm13, %v4283_v51, 0 }
 0x4c9   :  { %1417 = vrot.lane.b32.xlu1 %v4223_v61, %s4025_s20 }
 0x4fa   :  { %v928_v32 = vpop.xlane.xlu0 %927 }
 0x4fb   :  { %3617 = vrcp.f32 %v928_v32 }
 0x501   :  { %v3618_v33 = vpop.eup %3617 }
 0x502   :  { %v942_v18 = vmul.f32 %v3618_v33, %v3610_v50 }
 0x504   :  { %v946_v35 = vpack.c.bf16 %v942_v18, %v942_v18 }
 0x506   :  { %3029 = vmatmul.msk.bf16.vlgmr.msra.gmra.mxu0 %vm639_vm15, %v946_v35 }
 0x50b   :  { %v931_v37 = vpop.xlane.xlu2 %930 }
 0x50c   :  { %3619 = vrcp.f32 %v931_v37 }
 0x50d   :  { %v1026_v38 = vpop.permute.xlu0 %1025 }
 0x50e   :  { %v1031_v26 = vsel %vm691_vm14, %v1026_v38, 0 }
 0x50f   :  { %1040 = vmatpush.bf16.msra.mxu3 %v1031_v26 }
 0x512   :  { %v3620_v61 = vpop.eup %3619 }
 0x513   :  { %1193 = vmatpush.bf16.xpose.msrb.mxu3 %v1184_v1  ;;  %v937_v39 = vpop.xlane.xlu1 %936  ;;  %v934_v41 = vpop.xlane.xlu2 %933  ;;  %v943_v43 = vmul.f32 %v3620_v61, %v3612_v63 }
 0x514   :  { %3621 = vrcp.f32 %v937_v39 }
 0x515   :  { %3623 = vrcp.f32 %v934_v41  ;;  %v978_v45 = vpop.permute.xlu0 %977  ;;  %v947_v48 = vpack.c.bf16 %v943_v43, %v943_v43 }
 0x516   :  { %v983_v46 = vsel %vm691_vm14, %v978_v45, 0 }
 0x517   :  { %992 = vmatpush.bf16.msra.mxu1 %v983_v46 }
 0x51a   :  { %v3622_v28 = vpop.eup %3621  ;;  %3030 = vmatmul.msk.bf16.vlgmr.msra.gmra.mxu1 %vm639_vm15, %v947_v48 }
 0x51b   :  { %1135 = vmatpush.bf16.xpose.msrb.mxu1 %v1126_v47  ;;  %v3624_v49 = vpop.eup %3623  ;;  %v945_v50 = vmul.f32 %v3622_v28, %v3616_v40  ;;  %v1116_v25 = vpop.permute.xlu2 %1115  ;;  %v4358_v28 = vld [vmem:[#allocation4 + $0x8] sm:$0xff]  }
 0x51c   :  { %v944_v51 = vmul.f32 %v3624_v49, %v3614_v13  ;;  %v1410_v49 = vunpack.c.h.b16 %v4358_v28 }
 0x51d   :  { %v949_v17 = vpack.c.bf16 %v945_v50, %v945_v50  ;;  %v1092_v52 = vpop.permute.xlu0 %1091 }
 0x51e   :  { %v948_v53 = vpack.c.bf16 %v944_v51, %v944_v51  ;;  %v1097_v54 = vsel %vm562_vm13, %v1092_v52, 0  ;;  %v1411_v50 = vpack.c.b16 %v1410_v49, %v1410_v49 }
 0x51f   :  { %3032 = vmatmul.msk.bf16.vlgmr.msra.gmra.mxu3 %vm639_vm15, %v949_v17  ;;  %1106 = vmatpush.bf16.xpose.msrb.mxu0 %v1097_v54 }
 0x520   :  { %3031 = vmatmul.msk.bf16.vlgmr.msrb.gmra.mxu2 %vm639_vm15, %v948_v53 }
 0x523   :  { %v1251_v55 = vpop.permute.xlu2 %1250 }
 0x524   :  { %v1256_v56 = vsel %vm691_vm14, %v1251_v55, 0 }
 0x525   :  { %v1174_v62 = vpop.permute.xlu0 %1173 }
 0x527   :  { %1265 = vmatpush.bf16.msra.mxu0 %v1256_v56  ;;  %v4366_v56 = vld [vmem:[#allocation4 + $0x20] sm:$0xff]  }
 0x52a   :  { %3034 = vmatmul.msk.bf16.vlgmr.msrb.gmra.mxu1 %vm562_vm13, %v1116_v25 }
 0x52b   :  { %v1087_v57 = vpop.permute.xlu1 %1086  ;;  %v1389_v59 = vpop.permute.xlu2 %1388 }
 0x52c   :  { %v1394_v60 = vsel %vm562_vm13, %v1389_v59, 0  ;;  %3033 = vmatmul.msk.bf16.vlgmr.msrb.gmra.mxu0 %vm562_vm13, %v1087_v57  ;;  %v1468_v57 = vunpack.c.h.b16 %v4366_v56 }
 0x52d   :  { %1403 = vmatpush.bf16.xpose.msrb.mxu0 %v1394_v60 }
 0x52e   :  { %v1469_v59 = vpack.c.b16 %v1468_v57, %v1468_v57 }
 0x52f   :  { %3036 = vmatmul.msk.bf16.vlgmr.msrb.gmra.mxu3 %vm562_vm13, %v1174_v62 }
 0x530   :  { %3035 = vmatmul.msk.bf16.vlgmr.msra.gmra.mxu2 %vm562_vm13, %v1145_v34 }
 0x533   :  { %v1299_v63 = vpop.permute.xlu1 %1298 }
 0x534   :  { %v1304_v0 = vsel %vm691_vm14, %v1299_v63, 0 }
 0x535   :  { %1313 = vmatpush.bf16.msrb.mxu2 %v1304_v0 }
 0x53b   :  { %v1418_v1 = vpop.permute.xlu1 %1417 }
 0x53c   :  { %v1423_v41 = vsel %vm562_vm13, %v1418_v1, 0 }
 0x583   :  { %v4329_v6 = vpop.f32.mrf.mxu0 }
 0x58b   :  { %v972_v10 = vpop.f32.mrf.mxu0 }
 0x597   :  { %v4331_v11 = vpop.f32.mrf.mxu1 }
 0x59f   :  { %v996_v13 = vpop.f32.mrf.mxu1 }
 0x5a2   :  { %v4333_v14 = vpop.f32.mrf.mxu3 }
 0x5a3   :  { %v4335_v40 = vpop.f32.mrf.mxu2 }
 0x5a7   :  { %v4337_v15 = vpop.f32.mrf.mxu1 }
 0x5a8   :  { %v1202_v39 = vsel %vm639_vm15, %v4337_v15, -inf }
 0x5a9   :  { %v1108_v16 = vpop.f32.mrf.mxu0 }
 0x5aa   :  { %v1044_v21 = vpop.f32.mrf.mxu3  ;;  %v1199_v22 = vsel %vm639_vm15, %v1108_v16, -inf }
 0x5ab   :  { %v1020_v9 = vpop.f32.mrf.mxu2  ;;  %1200 = vmax.xlane.f32.xlu0 %v1199_v22 }
 0x5af   :  { %v1139_v23 = vpop.f32.mrf.mxu1 }
 0x5b1   :  { %v1110_v58 = vpop.f32.mrf.mxu0 }
 0x5b2   :  { %v1195_v24 = vpop.f32.mrf.mxu3 }
 0x5b3   :  { %v1166_v27 = vpop.f32.mrf.mxu2  ;;  %v1208_v32 = vsel %vm639_vm15, %v1195_v24, -inf }
 0x5b4   :  { %v1205_v29 = vsel %vm639_vm15, %v1166_v27, -inf }
 0x5b5   :  { %1206 = vmax.xlane.f32.xlu2 %v1205_v29 }
 0x5ba   :  { %v1197_v30 = vpop.f32.mrf.mxu3 }
 0x5bb   :  { %v1168_v31 = vpop.f32.mrf.mxu2 }
 0x5bf   :  { %1274 = vrot.lane.b32.xlu0 %v4296_v19, %s4014_s18 }
 0x5c7   :  { %1322 = vrot.lane.b32.xlu0 %v4288_v7, %s4014_s18 }
 0x5cd   :  { %1475 = vrot.lane.b32.xlu2 %v4208_v42, %s4025_s20 }
 0x5f1   :  { %1209 = vmax.xlane.f32.xlu0 %v1208_v32 }
 0x605   :  { %1446 = vrot.lane.b32.xlu0 %v4196_v20, %s4025_s20 }
 0x61e   :  { %v1201_v33 = vpop.xlane.xlu0 %1200 }
 0x61f   :  { %v1211_v18 = vsub.f32 %v1108_v16, %v1201_v33 }
 0x621   :  { %v1215_v34 = vmul.f32 1.442695, %v1211_v18 }
 0x623   :  { %3625 = vpow2.f32 %v1215_v34 }
 0x628   :  { %v1207_v35 = vpop.xlane.xlu2 %1206 }
 0x629   :  { %v3626_v36 = vpop.eup %3625  ;;  %v1213_v37 = vsub.f32 %v1166_v27, %v1207_v35 }
 0x62a   :  { %v1223_v38 = vsel %vm639_vm15, %v3626_v36, 0.0 }
 0x62b   :  { %v1219_v26 = vmul.f32 1.442695, %v1213_v37  ;;  %1224 = vadd.xlane.f32.xlu1 %v1223_v38 }
 0x62d   :  { %3627 = vpow2.f32 %v1219_v26 }
 0x630   :  { %v1476_v45 = vpop.permute.xlu2 %1475 }
 0x631   :  { %v1275_v42 = vpop.permute.xlu0 %1274  ;;  %v1481_v48 = vsel %vm562_vm13, %v1476_v45, 0 }
 0x632   :  { %v1280_v61 = vsel %vm691_vm14, %v1275_v42, 0 }
 0x633   :  { %v3628_v20 = vpop.eup %3627  ;;  %1289 = vmatpush.bf16.msra.mxu1 %v1280_v61  ;;  %1203 = vmax.xlane.f32.xlu1 %v1202_v39 }
 0x634   :  { %v1229_v43 = vsel %vm639_vm15, %v3628_v20, 0.0 }
 0x635   :  { %1230 = vadd.xlane.f32.xlu0 %v1229_v43 }
 0x637   :  { %1432 = vmatpush.bf16.xpose.msrb.mxu1 %v1423_v41 }
 0x639   :  { %v1323_v46 = vpop.permute.xlu0 %1322 }
 0x63a   :  { %v1328_v47 = vsel %vm691_vm14, %v1323_v46, 0  ;;  %v1545_v46 = vunpack.c.l.b16 %v4358_v28 }
 0x63b   :  { %1337 = vmatpush.bf16.msra.mxu3 %v1328_v47 }
 0x63c   :  { %v1546_v47 = vpack.c.b16 %v1545_v46, %v1545_v46 }
 0x63f   :  { %1490 = vmatpush.bf16.xpose.msrb.mxu3 %v1481_v48  ;;  %v1593_v48 = vunpack.c.l.b16 %v4366_v56 }
 0x641   :  { %v1594_v49 = vpack.c.b16 %v1593_v48, %v1593_v48 }
 0x649   :  { %1412 = vrot.lane.b32.xlu0 %v1411_v50, %s4025_s20  ;;  %v1047_v50 = vpack.c.bf16 %v4331_v11, %v4331_v11 }
 0x64c   :  { %1383 = vrot.lane.b32.xlu1 %v4249_v44, %s4025_s20 }
 0x664   :  { %v1210_v25 = vpop.xlane.xlu0 %1209 }
 0x665   :  { %v1214_v51 = vsub.f32 %v1195_v24, %v1210_v25 }
 0x667   :  { %v1221_v17 = vmul.f32 1.442695, %v1214_v51 }
 0x669   :  { %3629 = vpow2.f32 %v1221_v17 }
 0x66f   :  { %v3630_v52 = vpop.eup %3629 }
 0x670   :  { %v1232_v53 = vsel %vm639_vm15, %v3630_v52, 0.0 }
 0x676   :  { %1233 = vadd.xlane.f32.xlu1 %v1232_v53 }
 0x677   :  { %v1447_v54 = vpop.permute.xlu0 %1446 }
 0x678   :  { %v1452_v55 = vsel %vm562_vm13, %v1447_v54, 0 }
 0x679   :  { %1461 = vmatpush.bf16.xpose.msra.mxu2 %v1452_v55 }
 0x68f   :  { %1470 = vrot.lane.b32.xlu1 %v1469_v59, %s4025_s20 }
 0x69e   :  { %v1225_v44 = vpop.xlane.xlu1 %1224 }
 0x69f   :  { %3631 = vrcp.f32 %v1225_v44 }
 0x6a5   :  { %v3632_v60 = vpop.eup %3631 }
 0x6a6   :  { %v1239_v62 = vmul.f32 %v3632_v60, %v3626_v36  ;;  %v1204_v63 = vpop.xlane.xlu1 %1203 }
 0x6a7   :  { %v1212_v0 = vsub.f32 %v4337_v15, %v1204_v63 }
 0x6a8   :  { %v1243_v10 = vpack.c.bf16 %v1239_v62, %v1239_v62  ;;  %v1231_v13 = vpop.xlane.xlu0 %1230  ;;  %v1046_v62 = vpack.c.bf16 %v4329_v6, %v4329_v6 }
 0x6a9   :  { %v1217_v16 = vmul.f32 1.442695, %v1212_v0  ;;  %3633 = vrcp.f32 %v1231_v13 }
 0x6aa   :  { %3037 = vmatmul.msk.bf16.vlgmr.msra.gmra.mxu0 %vm639_vm15, %v1243_v10 }
 0x6ab   :  { %3635 = vpow2.f32 %v1217_v16 }
 0x6af   :  { %v3634_v21 = vpop.eup %3633 }
 0x6b0   :  { %v1241_v22 = vmul.f32 %v3634_v21, %v3628_v20 }
 0x6b1   :  { %v3636_v9 = vpop.eup %3635 }
 0x6b2   :  { %v1245_v23 = vpack.c.bf16 %v1241_v22, %v1241_v22  ;;  %v1226_v58 = vsel %vm639_vm15, %v3636_v9, 0.0 }
 0x6b3   :  { %1227 = vadd.xlane.f32.xlu2 %v1226_v58 }
 0x6b4   :  { %3039 = vmatmul.msk.bf16.vlgmr.msrb.gmra.mxu2 %vm639_vm15, %v1245_v23 }
 0x6bb   :  { %v1413_v42 = vpop.permute.xlu0 %1412 }
 0x6be   :  { %v1384_v24 = vpop.permute.xlu1 %1383 }
 0x6bf   :  { %3041 = vmatmul.msk.bf16.vlgmr.msrb.gmra.mxu0 %vm562_vm13, %v1384_v24 }
 0x6cb   :  { %1441 = vrot.lane.b32.xlu2 %v4234_v8, %s4025_s20 }
 0x6e9   :  { %v1234_v15 = vpop.xlane.xlu1 %1233 }
 0x6ea   :  { %3637 = vrcp.f32 %v1234_v15 }
 0x6f0   :  { %v3638_v27 = vpop.eup %3637 }
 0x6f1   :  { %v1242_v29 = vmul.f32 %v3638_v27, %v3630_v52 }
 0x6f3   :  { %v1246_v30 = vpack.c.bf16 %v1242_v29, %v1242_v29 }
 0x6f5   :  { %3040 = vmatmul.msk.bf16.vlgmr.msra.gmra.mxu3 %vm639_vm15, %v1246_v30 }
 0x701   :  { %v1471_v31 = vpop.permute.xlu1 %1470 }
 0x705   :  { %3044 = vmatmul.msk.bf16.vlgmr.msrb.gmra.mxu3 %vm562_vm13, %v1471_v31 }
 0x726   :  { %v1228_v32 = vpop.xlane.xlu2 %1227 }
 0x727   :  { %3639 = vrcp.f32 %v1228_v32  ;;  %v1267_v33 = vpop.f32.mrf.mxu0 }
 0x728   :  { %v1343_v63 = vpack.c.bf16 %v1267_v33, %v1267_v33 }
 0x72d   :  { %v3640_v18 = vpop.eup %3639 }
 0x72e   :  { %v1240_v34 = vmul.f32 %v3640_v18, %v3636_v9  ;;  %v1442_v35 = vpop.permute.xlu2 %1441 }
 0x72f   :  { %v1269_v36 = vpop.f32.mrf.mxu0  ;;  %3043 = vmatmul.msk.bf16.vlgmr.msra.gmra.mxu2 %vm562_vm13, %v1442_v35 }
 0x730   :  { %v1244_v8 = vpack.c.bf16 %v1240_v34, %v1240_v34 }
 0x732   :  { %3038 = vmatmul.msk.bf16.vlgmr.msra.gmra.mxu1 %vm639_vm15, %v1244_v8 }
 0x737   :  { %v4381_v37 = vpop.f32.mrf.mxu2 }
 0x73c   :  { %v1405_v38 = vpop.f32.mrf.mxu0 }
 0x73d   :  { %v1496_v26 = vsel %vm639_vm15, %v1405_v38, -inf }
 0x73e   :  { %1497 = vmax.xlane.f32.xlu0 %v1496_v26 }
 0x73f   :  { %v1317_v1 = vpop.f32.mrf.mxu2 }
 0x742   :  { %3042 = vmatmul.msk.bf16.vlgmr.msrb.gmra.mxu1 %vm562_vm13, %v1413_v42 }
 0x744   :  { %v1407_v61 = vpop.f32.mrf.mxu0 }
 0x778   :  { %v4385_v39 = vpop.f32.mrf.mxu3 }
 0x780   :  { %v1341_v20 = vpop.f32.mrf.mxu3 }
 0x781   :  { %v1048_v20 = vpack.c.bf16 %v4335_v40, %v4335_v40 }
 0x788   :  { %v4387_v41 = vpop.f32.mrf.mxu3 }
 0x789   :  { %v1505_v43 = vsel %vm639_vm15, %v4387_v41, -inf }
 0x78a   :  { %1506 = vmax.xlane.f32.xlu0 %v1505_v43 }
 0x790   :  { %v1494_v45 = vpop.f32.mrf.mxu3 }
 0x79e   :  { %1547 = vrot.lane.b32.xlu0 %v1546_v47, %s4025_s20 }
 0x7a6   :  { %1595 = vrot.lane.b32.xlu0 %v1594_v49, %s4025_s20 }
 0x7ae   :  { %1056 = vrot.lane.b32.xlu0 %v1047_v50, %s4025_s20 }
 0x7af   :  { %v1291_v25 = vpop.f32.mrf.mxu1 }
 0x7b0   :  { %v1344_v52 = vpack.c.bf16 %v1291_v25, %v1291_v25 }
 0x7b1   :  { %v1498_v53 = vpop.xlane.xlu0 %1497 }
 0x7b2   :  { %v1463_v51 = vpop.f32.mrf.mxu2  ;;  %v1508_v28 = vsub.f32 %v1405_v38, %v1498_v53 }
 0x7b3   :  { %v1502_v17 = vsel %vm639_vm15, %v1463_v51, -inf }
 0x7b4   :  { %1503 = vmax.xlane.f32.xlu1 %v1502_v17  ;;  %v1512_v56 = vmul.f32 1.442695, %v1508_v28 }
 0x7b6   :  { %1353 = vrot.lane.b32.xlu0 %v1344_v52, %s4014_s18  ;;  %3641 = vpow2.f32 %v1512_v56 }
 0x7b7   :  { %v1293_v54 = vpop.f32.mrf.mxu1 }
 0x7ba   :  { %v1465_v55 = vpop.f32.mrf.mxu2 }
 0x7bc   :  { %v3642_v11 = vpop.eup %3641 }
 0x7bd   :  { %v1520_v60 = vsel %vm639_vm15, %v3642_v11, 0.0 }
 0x7bf   :  { %v1434_v57 = vpop.f32.mrf.mxu1 }
 0x7c0   :  { %v1499_v59 = vsel %vm639_vm15, %v1434_v57, -inf }
 0x7c1   :  { %1500 = vmax.xlane.f32.xlu2 %v1499_v59 }
 0x7c7   :  { %v1436_v44 = vpop.f32.mrf.mxu1 }
 0x7c9   :  { %1521 = vadd.xlane.f32.xlu2 %v1520_v60 }
 0x7e1   :  { %1571 = vrot.lane.b32.xlu2 %v4296_v19, %s4025_s20 }
 0x7e9   :  { %1054 = vrot.lane.b32.xlu2 %v1046_v62, %s4025_s20  ;;  %v1345_v62 = vpack.c.bf16 %v4381_v37, %v4381_v37  ;;  %v3398_v37 = vld [vmem:[#allocation15 + $0x18] sm:$0xff] }
 0x7f1   :  { %1351 = vrot.lane.b32.xlu2 %v1343_v63, %s4014_s18 }
 0x7fd   :  { %v1507_v0 = vpop.xlane.xlu0 %1506 }
 0x7fe   :  { %v1511_v30 = vsub.f32 %v4387_v41, %v1507_v0  ;;  %v1346_v41 = vpack.c.bf16 %v4385_v39, %v4385_v39 }
 0x800   :  { %v1518_v33 = vmul.f32 1.442695, %v1511_v30 }
 0x810   :  { %v1548_v10 = vpop.permute.xlu0 %1547 }
 0x811   :  { %v1553_v13 = vsel %vm691_vm14, %v1548_v10, 0  ;;  %v3402_v10 = vld [vmem:[#allocation15 + $0x38] sm:$0xff] }
 0x812   :  { %1562 = vmatpush.bf16.msra.mxu0 %v1553_v13  ;;  %v3401_v13 = vld [vmem:[#allocation15 + $0x30] sm:$0xff] }
 0x816   :  { %1749 = vmatpush.bf16.msrb.mxu0 %v3402_v10  ;;  %v3197_v10 = vld [vmem:[#allocation21 + $0xd0] sm:$0xf0] }
 0x818   :  { %v1596_v16 = vpop.permute.xlu0 %1595 }
 0x819   :  { %v1601_v21 = vsel %vm691_vm14, %v1596_v16, 0  ;;  %v3400_v16 = vld [vmem:[#allocation15 + $0x28] sm:$0xff] }
 0x81a   :  { %1610 = vmatpush.bf16.msrb.mxu2 %v1601_v21  ;;  %1750 = vmatpush.bf16.msrb.mxu0 %v3401_v13  ;;  %v3203_v13 = vld [vmem:[#allocation21 + $0xc8] sm:$0xf] }
 0x81e   :  { %1751 = vmatpush.bf16.msrb.mxu0 %v3400_v16  ;;  %v3432_v16 = vld [vmem:[#allocation21 + $0xd4] sm:$0xf0] }
 0x820   :  { %v1057_v22 = vpop.permute.xlu0 %1056 }
 0x821   :  { %1068 = vst.msk [vmem:[#allocation5 + $0x4] sm:$0xf] %vm1066_vm1, %v1057_v22 }
 0x827   :  { %v1504_v6 = vpop.xlane.xlu1 %1503 }
 0x828   :  { %v1354_v19 = vpop.permute.xlu0 %1353  ;;  %v1510_v58 = vsub.f32 %v1463_v51, %v1504_v6  ;;  %v1049_v51 = vpack.c.bf16 %v4333_v14, %v4333_v14 }
 0x829   :  { %1365 = vst.msk [vmem:[#allocation5 + $0x4] sm:$0xf] %vm1363_vm2, %v1354_v19 }
 0x82a   :  { %v1516_v15 = vmul.f32 1.442695, %v1510_v58  ;;  %v3396_v58 = vld [vmem:[#allocation15 + $0x8] sm:$0xff] }
 0x834   :  { %v1501_v9 = vpop.xlane.xlu2 %1500 }
 0x835   :  { %v1509_v23 = vsub.f32 %v1434_v57, %v1501_v9  ;;  %v3399_v9 = vld [vmem:[#allocation15 + $0x20] sm:$0xff] }
 0x836   :  { %1752 = vmatpush.bf16.msrb.mxu0 %v3399_v9 }
 0x837   :  { %v1514_v24 = vmul.f32 1.442695, %v1509_v23  ;;  %v3397_v23 = vld [vmem:[#allocation15 + $0x10] sm:$0xff] }
 0x839   :  { %3643 = vpow2.f32 %v1514_v24  ;;  %v3395_v24 = vld [vmem:[#allocation15] sm:$0xff] }
 0x83a   :  { %1753 = vmatpush.bf16.msrb.mxu0 %v3398_v37  ;;  %v3179_v37 = vld [vmem:[#allocation21 + $0xa0] sm:$0xf] }
 0x83c   :  { %v1522_v27 = vpop.xlane.xlu2 %1521 }
 0x83d   :  { %3645 = vrcp.f32 %v1522_v27 }
 0x83e   :  { %3647 = vpow2.f32 %v1516_v15  ;;  %1754 = vmatpush.bf16.msrb.mxu0 %v3397_v23  ;;  %v3427_v23 = vld [vmem:[#allocation21 + $0xac] sm:$0xf0] }
 0x83f   :  { %v3644_v29 = vpop.eup %3643  ;;  %3649 = vpow2.f32 %v1518_v33  ;;  %v3579_v33 = vld [vmem:[#allocation16] ss:$0 sm:$0xff] }
 0x840   :  { %v1523_v31 = vsel %vm639_vm15, %v3644_v29, 0.0 }
 0x841   :  { %1524 = vadd.xlane.f32.xlu1 %v1523_v31 }
 0x842   :  { %1755 = vmatpush.bf16.msrb.mxu0 %v3396_v58  ;;  %v3425_v58 = vld [vmem:[#allocation21 + $0xa4] sm:$0xf] }
 0x843   :  { %v3646_v32 = vpop.eup %3645 }
 0x844   :  { %v1536_v18 = vmul.f32 %v3646_v32, %v3642_v11  ;;  %v1572_v34 = vpop.permute.xlu2 %1571  ;;  %v3648_v35 = vpop.eup %3647 }
 0x845   :  { %v1577_v36 = vsel %vm691_vm14, %v1572_v34, 0  ;;  %v1526_v38 = vsel %vm639_vm15, %v3648_v35, 0.0  ;;  %v3650_v1 = vpop.eup %3649 }
 0x846   :  { %v1540_v8 = vpack.c.bf16 %v1536_v18, %v1536_v18  ;;  %1586 = vmatpush.bf16.msra.mxu1 %v1577_v36  ;;  %v1529_v42 = vsel %vm639_vm15, %v3650_v1, 0.0  ;;  %1756 = vmatpush.bf16.msrb.mxu0 %v3395_v24  ;;  %v3180_v24 = vor.u32 %v3427_v23, %v3179_v37 }
 0x848   :  { %3045 = vmatmul.msk.bf16.vlgmr.msra.gmra.mxu0 %vm639_vm15, %v1540_v8 }
 0x849   :  { %1527 = vadd.xlane.f32.xlu1 %v1526_v38 }
 0x84c   :  { %v1055_v26 = vpop.permute.xlu2 %1054 }
 0x84d   :  { %1067 = vst.msk [vmem:[#allocation5] sm:$0xf] %vm1066_vm1, %v1055_v26 }
 0x851   :  { %1530 = vadd.xlane.f32.xlu1 %v1529_v42 }
 0x854   :  { %v1352_v61 = vpop.permute.xlu2 %1351 }
 0x855   :  { %1364 = vst.msk [vmem:[#allocation5] sm:$0xf] %vm1363_vm2, %v1352_v61 }
 0x86a   :  { %1619 = vrot.lane.b32.xlu1 %v4288_v7, %s4025_s20 }
 0x872   :  { %1058 = vrot.lane.b32.xlu1 %v1048_v20, %s4025_s20 }
 0x87a   :  { %1357 = vrot.lane.b32.xlu1 %v1346_v41, %s4014_s18 }
 0x8b4   :  { %v1525_v43 = vpop.xlane.xlu1 %1524 }
 0x8b5   :  { %3651 = vrcp.f32 %v1525_v43 }
 0x8bb   :  { %v3652_v45 = vpop.eup %3651 }
 0x8bc   :  { %v1537_v46 = vmul.f32 %v3652_v45, %v3644_v29  ;;  %v1528_v47 = vpop.xlane.xlu1 %1527 }
 0x8bd   :  { %3653 = vrcp.f32 %v1528_v47 }
 0x8be   :  { %v1541_v48 = vpack.c.bf16 %v1537_v46, %v1537_v46 }
 0x8c0   :  { %3046 = vmatmul.msk.bf16.vlgmr.msra.gmra.mxu1 %vm639_vm15, %v1541_v48 }
 0x8c3   :  { %v3654_v7 = vpop.eup %3653 }
 0x8c4   :  { %v1538_v49 = vmul.f32 %v3654_v7, %v3648_v35  ;;  %v1531_v17 = vpop.xlane.xlu1 %1530 }
 0x8c5   :  { %v1564_v50 = vpop.f32.mrf.mxu0  ;;  %3655 = vrcp.f32 %v1531_v17  ;;  %v3211_v17 = vld [vmem:[#allocation21 + $0xe0] sm:$0xf] }
 0x8c6   :  { %v1542_v40 = vpack.c.bf16 %v1538_v49, %v1538_v49  ;;  %v1640_v25 = vpack.c.bf16 %v1564_v50, %v1564_v50 }
 0x8c8   :  { %1648 = vrot.lane.b32.xlu2 %v1640_v25, %s4024_s4  ;;  %3047 = vmatmul.msk.bf16.vlgmr.msrb.gmra.mxu2 %vm639_vm15, %v1542_v40 }
 0x8cb   :  { %v3656_v52 = vpop.eup %3655 }
 0x8cc   :  { %v1539_v53 = vmul.f32 %v3656_v52, %v3650_v1  ;;  %v3435_v52 = vld [vmem:[#allocation21 + $0xec] sm:$0xf0] }
 0x8cd   :  { %v1566_v39 = vpop.f32.mrf.mxu0 }
 0x8ce   :  { %v1543_v55 = vpack.c.bf16 %v1539_v53, %v1539_v53  ;;  %v3433_v53 = vld [vmem:[#allocation21 + $0xe4] sm:$0xf] }
 0x8d0   :  { %1060 = vrot.lane.b32.xlu2 %v1049_v51, %s4025_s20 }
 0x8dc   :  { %v1620_v28 = vpop.permute.xlu1 %1619 }
 0x8dd   :  { %v1625_v54 = vsel %vm691_vm14, %v1620_v28, 0  ;;  %v3212_v28 = vor.u32 %v3435_v52, %v3211_v17  ;;  %v3155_v17 = vld [vmem:[#allocation21 + $0x68] sm:$0xf]  ;;  %v3420_v52 = vld [vmem:[#allocation21 + $0x74] sm:$0xf0] }
 0x8de   :  { %1634 = vmatpush.bf16.msra.mxu3 %v1625_v54  ;;  %v3213_v54 = vld [vmem:[#allocation21 + $0xf0] sm:$0xf0] }
 0x8df   :  { %2102 = vmatpush.bf16.msrb.mxu1 %v3212_v28  ;;  %v3156_v28 = vor.u32 %v3420_v52, %v3155_v17 }
 0x8e1   :  { %3048 = vmatmul.msk.bf16.vlgmr.msra.gmra.mxu3 %vm639_vm15, %v1543_v55  ;;  %v3219_v55 = vld [vmem:[#allocation21 + $0xe8] sm:$0xf] }
 0x8e4   :  { %v1059_v56 = vpop.permute.xlu1 %1058 }
 0x8e5   :  { %1069 = vst.msk [vmem:[#allocation5 + $0x8] sm:$0xf] %vm1066_vm1, %v1059_v56  ;;  %v3436_v56 = vld [vmem:[#allocation21 + $0xf4] sm:$0xf0] }
 0x8ec   :  { %v1358_v59 = vpop.permute.xlu1 %1357 }
 0x922   :  { %v1649_v57 = vpop.permute.xlu2 %1648 }
 0x923   :  { %1661 = vst.msk [vmem:[#allocation5] sm:$0xf] %vm1660_vm3, %v1649_v57  ;;  %v3216_v57 = vor.u32 %v3433_v53, %v3213_v54  ;;  %v3418_v54 = vld [vmem:[#allocation21 + $0x6c] sm:$0xf] }
 0x925   :  { %2121 = vmatpush.bf16.msra.mxu2 %v3216_v57 }
 0x92a   :  { %v1061_v14 = vpop.permute.xlu2 %1060 }
 0x92b   :  { %1070 = vst.msk [vmem:[#allocation5 + $0xc] sm:$0xf] %vm1066_vm1, %v1061_v14  ;;  %v3220_v14 = vor.u32 %v3436_v56, %v3219_v55  ;;  %v3157_v55 = vld [vmem:[#allocation21 + $0x78] sm:$0xf0] }
 0x92c   :  { %1367 = vst.msk [vmem:[#allocation5 + $0xc] sm:$0xf] %vm1363_vm2, %v1358_v59  ;;  %v3434_v59 = vld [vmem:[#allocation21 + $0xec] sm:$0xf]  ;;  %v3160_v57 = vor.u32 %v3418_v54, %v3157_v55  ;;  %v3580_v54 = vld [vmem:[#allocation18] ss:$0 sm:$0xff] }
 0x92d   :  { %2140 = vmatpush.bf16.msrb.mxu3 %v3220_v14  ;;  %v3131_v14 = vld [vmem:[#allocation21 + $0x40] sm:$0xf] }
 0x93d   :  { %v1588_v11 = vpop.f32.mrf.mxu1 }
 0x93e   :  { %v1641_v44 = vpack.c.bf16 %v1588_v11, %v1588_v11  ;;  %v3221_v11 = vld [vmem:[#allocation21 + $0xf8] sm:$0xf0] }
 0x940   :  { %1650 = vrot.lane.b32.xlu0 %v1641_v44, %s4024_s4  ;;  %v3224_v44 = vor.u32 %v3434_v59, %v3221_v11  ;;  %v3415_v59 = vld [vmem:[#allocation21 + $0x4c] sm:$0xf0]  ;;  %v3413_v11 = vld [vmem:[#allocation21 + $0x44] sm:$0xf] }
 0x942   :  { %2159 = vmatpush.bf16.msra.mxu0 %v3224_v44  ;;  %v3132_v44 = vor.u32 %v3415_v59, %v3131_v14  ;;  %v3581_v59 = vld [vmem:[#allocation19] ss:$0 sm:$0xff] }
 0x945   :  { %v1590_v60 = vpop.f32.mrf.mxu1 }
 0x946   :  { %v3195_v60 = vld [vmem:[#allocation21 + $0xc0] sm:$0xf] }
 0x948   :  { %1355 = vrot.lane.b32.xlu0 %v1345_v62, %s4014_s18  ;;  %v3431_v62 = vld [vmem:[#allocation21 + $0xcc] sm:$0xf0] }
 0x94b   :  { %v1612_v63 = vpop.f32.mrf.mxu2 }
 0x94c   :  { %v1642_v0 = vpack.c.bf16 %v1612_v63, %v1612_v63  ;;  %v3429_v63 = vld [vmem:[#allocation21 + $0xc4] sm:$0xf] }
 0x94e   :  { %1652 = vrot.lane.b32.xlu2 %v1642_v0, %s4024_s4  ;;  %v3196_v0 = vor.u32 %v3431_v62, %v3195_v60  ;;  %v3133_v60 = vld [vmem:[#allocation21 + $0x50] sm:$0xf0]  ;;  %v3139_v62 = vld [vmem:[#allocation21 + $0x48] sm:$0xf] }
 0x950   :  { %2103 = vmatpush.bf16.msrb.mxu1 %v3196_v0  ;;  %v3136_v0 = vor.u32 %v3413_v11, %v3133_v60 }
 0x953   :  { %v1614_v21 = vpop.f32.mrf.mxu2 }
 0x954   :  { %v3200_v21 = vor.u32 %v3429_v63, %v3197_v10  ;;  %2104 = vmatpush.bf16.msrb.mxu1 %v3180_v24  ;;  %v3416_v63 = vld [vmem:[#allocation21 + $0x54] sm:$0xf0]  ;;  %v3123_v24 = vld [vmem:[#allocation21 + $0x28] sm:$0xf] }
 0x955   :  { %v3140_v10 = vor.u32 %v3416_v63, %v3139_v62 }
 0x956   :  { %2122 = vmatpush.bf16.msra.mxu2 %v3200_v21 }
 0x964   :  { %v1636_v22 = vpop.f32.mrf.mxu3 }
 0x965   :  { %v1643_v19 = vpack.c.bf16 %v1636_v22, %v1636_v22  ;;  %v3204_v22 = vor.u32 %v3432_v16, %v3203_v13  ;;  %v3414_v13 = vld [vmem:[#allocation21 + $0x4c] sm:$0xf]  ;;  %v3141_v16 = vld [vmem:[#allocation21 + $0x58] sm:$0xf0] }
 0x966   :  { %v3144_v21 = vor.u32 %v3414_v13, %v3141_v16 }
 0x967   :  { %1654 = vrot.lane.b32.xlu0 %v1643_v19, %s4024_s4  ;;  %v3430_v19 = vld [vmem:[#allocation21 + $0xcc] sm:$0xf]  ;;  %2141 = vmatpush.bf16.msrb.mxu3 %v3204_v22 }
 0x96c   :  { %v1638_v6 = vpop.f32.mrf.mxu3 }
 0x96d   :  { %v3205_v6 = vld [vmem:[#allocation21 + $0xd8] sm:$0xf0] }
 0x96e   :  { %v3208_v9 = vor.u32 %v3430_v19, %v3205_v6  ;;  %v3115_v19 = vld [vmem:[#allocation21 + $0x20] sm:$0xf]  ;;  %v3411_v6 = vld [vmem:[#allocation21 + $0x2c] sm:$0xf0] }
 0x96f   :  { %v3116_v23 = vor.u32 %v3411_v6, %v3115_v19 }
 0x970   :  { %2160 = vmatpush.bf16.msra.mxu0 %v3208_v9  ;;  %v3409_v9 = vld [vmem:[#allocation21 + $0x24] sm:$0xf] }
 0x9a8   :  { %v1653_v30 = vpop.permute.xlu2 %1652 }
 0x9b2   :  { %v1651_v15 = vpop.permute.xlu0 %1650 }
 0x9b3   :  { %1662 = vst.msk [vmem:[#allocation5 + $0x4] sm:$0xf] %vm1660_vm3, %v1651_v15  ;;  %v3181_v15 = vld [vmem:[#allocation21 + $0xb0] sm:$0xf0] }
 0x9ba   :  { %v1356_v27 = vpop.permute.xlu0 %1355  ;;  %v3393_v29 = vld [vmem:[#allocation5] sm:$0xff] }
 0x9bb   :  { %1366 = vst.msk [vmem:[#allocation5 + $0x8] sm:$0xf] %vm1363_vm2, %v1356_v27  ;;  %1757 = vmatmul.bf16.vlgmr.msrb.gmra.mxu0 %v3393_v29  ;;  %v3187_v27 = vld [vmem:[#allocation21 + $0xa8] sm:$0xf]  ;;  %v3428_v29 = vld [vmem:[#allocation21 + $0xb4] sm:$0xf0] }
 0x9bc   :  { %1663 = vst.msk [vmem:[#allocation5 + $0x8] sm:$0xf] %vm1660_vm3, %v1653_v30  ;;  %v3184_v30 = vor.u32 %v3425_v58, %v3181_v15  ;;  %v3117_v58 = vld [vmem:[#allocation21 + $0x30] sm:$0xf0]  ;;  %v3412_v15 = vld [vmem:[#allocation21 + $0x34] sm:$0xf0] }
 0x9be   :  { %2123 = vmatpush.bf16.msra.mxu2 %v3184_v30  ;;  %v3410_v30 = vld [vmem:[#allocation21 + $0x2c] sm:$0xf] }
 0x9d9   :  { %v1655_v31 = vpop.permute.xlu0 %1654 }
 0x9da   :  { %1664 = vst.msk [vmem:[#allocation5 + $0xc] sm:$0xf] %vm1660_vm3, %v1655_v31  ;;  %v3188_v31 = vor.u32 %v3428_v29, %v3187_v27  ;;  %v3120_v27 = vor.u32 %v3409_v9, %v3117_v58  ;;  %v3124_v29 = vor.u32 %v3412_v15, %v3123_v24 }
 0x9dc   :  { %2142 = vmatpush.bf16.msrb.mxu3 %v3188_v31  ;;  %v3125_v31 = vld [vmem:[#allocation21 + $0x38] sm:$0xf0] }
 0x9e1   :  { %v3394_v32 = vld [vmem:[#allocation5 + $0x8] sm:$0xff] }
 0x9e2   :  { %1762 = vmatmul.bf16.gmra.mxu0 %v3394_v32  ;;  %v3426_v32 = vld [vmem:[#allocation21 + $0xac] sm:$0xf] }
 0xa38   :  { %v1758_v18 = vpop.f32.mrf.mxu0 }
 0xa39   :  { %v1759_v34 = vadd.f32 %v3579_v33, %v1758_v18 }
 0xa3b   :  { %v4451_v35 = vadd.f32 %v4138_v3, %v1759_v34  ;;  %v3163_v34 = vld [vmem:[#allocation21 + $0x80] sm:$0xf] }
 0xa3d   :  { %1778 = vadd.xlane.f32.xlu1 %v4451_v35 }
 0xa40   :  { %v1760_v36 = vpop.f32.mrf.mxu0 }
 0xa41   :  { %v1761_v8 = vadd.f32 %v3579_v33, %v1760_v36  ;;  %v3423_v36 = vld [vmem:[#allocation21 + $0x8c] sm:$0xf0] }
 0xa43   :  { %v4455_v38 = vadd.f32 %v4144_v5, %v1761_v8  ;;  %v3421_v8 = vld [vmem:[#allocation21 + $0x84] sm:$0xf] }
 0xa45   :  { %1780 = vadd.xlane.f32.xlu2 %v4455_v38 }
 0xa5f   :  { %v1763_v26 = vpop.f32.mrf.mxu0 }
 0xa60   :  { %v1764_v1 = vadd.f32 %v3579_v33, %v1763_v26  ;;  %v3164_v26 = vor.u32 %v3423_v36, %v3163_v34  ;;  %v3099_v36 = vld [vmem:[#allocation21] sm:$0xf] }
 0xa62   :  { %v4459_v42 = vadd.f32 %v4136_v2, %v1764_v1  ;;  %v3165_v1 = vld [vmem:[#allocation21 + $0x90] sm:$0xf0]  ;;  %2105 = vmatpush.bf16.msrb.mxu1 %v3164_v26  ;;  %v3405_v26 = vld [vmem:[#allocation21 + $0x4] sm:$0xf] }
 0xa64   :  { %1782 = vadd.xlane.f32.xlu0 %v4459_v42 }
 0xa67   :  { %v1765_v61 = vpop.f32.mrf.mxu0 }
 0xa68   :  { %v1766_v20 = vadd.f32 %v3579_v33, %v1765_v61  ;;  %v3189_v33 = vld [vmem:[#allocation21 + $0xb8] sm:$0xf0]  ;;  %v3171_v61 = vld [vmem:[#allocation21 + $0x88] sm:$0xf] }
 0xa69   :  { %v3192_v18 = vor.u32 %v3426_v32, %v3189_v33 }
 0xa6a   :  { %v4463_v3 = vadd.f32 %v4142_v4, %v1766_v20  ;;  %v3424_v20 = vld [vmem:[#allocation21 + $0x94] sm:$0xf0] }
 0xa6b   :  { %2161 = vmatpush.bf16.msra.mxu0 %v3192_v18  ;;  %v3128_v18 = vor.u32 %v3410_v30, %v3125_v31 }
 0xa6c   :  { %1784 = vadd.xlane.f32.xlu1 %v4463_v3 }
 0xab0   :  { %v1779_v41 = vpop.xlane.xlu1 %1778 }
 0xab1   :  { %v1786_v5 = vmul.f32 %v1779_v41, %v4148_v12  ;;  %v3168_v41 = vor.u32 %v3421_v8, %v3165_v1  ;;  %v3407_v8 = vld [vmem:[#allocation21 + $0xc] sm:$0xf0] }
 0xab2   :  { %v3100_v1 = vor.u32 %v3407_v8, %v3099_v36 }
 0xab3   :  { %v4468_v43 = vsub.f32 %v4451_v35, %v1786_v5  ;;  %v3172_v5 = vor.u32 %v3424_v20, %v3171_v61  ;;  %2124 = vmatpush.bf16.msra.mxu2 %v3168_v41  ;;  %v3101_v61 = vld [vmem:[#allocation21 + $0x10] sm:$0xf0]  ;;  %v3107_v20 = vld [vmem:[#allocation21 + $0x8] sm:$0xf] }
 0xab5   :  { %v1794_v45 = vmul.f32 %v4468_v43, %v4468_v43  ;;  %2143 = vmatpush.bf16.msrb.mxu3 %v3172_v5  ;;  %v3104_v5 = vor.u32 %v3405_v26, %v3101_v61 }
 0xab7   :  { %1798 = vadd.xlane.f32.xlu2 %v1794_v45  ;;  %v3422_v45 = vld [vmem:[#allocation21 + $0x8c] sm:$0xf] }
 0xab8   :  { %v1781_v2 = vpop.xlane.xlu2 %1780 }
 0xab9   :  { %v1787_v46 = vmul.f32 %v1781_v2, %v4148_v12  ;;  %v3173_v2 = vld [vmem:[#allocation21 + $0x98] sm:$0xf0]  ;;  %2144 = vmatpush.bf16.msrb.mxu3 %v3156_v28 }
 0xabb   :  { %v4474_v47 = vsub.f32 %v4455_v38, %v1787_v46  ;;  %v3176_v46 = vor.u32 %v3422_v45, %v3173_v2  ;;  %v3408_v45 = vld [vmem:[#allocation21 + $0x14] sm:$0xf0]  ;;  %v3406_v2 = vld [vmem:[#allocation21 + $0xc] sm:$0xf] }
 0xabd   :  { %v1795_v4 = vmul.f32 %v4474_v47, %v4474_v47  ;;  %2162 = vmatpush.bf16.msra.mxu0 %v3176_v46  ;;  %2145 = vmatpush.bf16.msrb.mxu3 %v3140_v10  ;;  %v3109_v46 = vld [vmem:[#allocation21 + $0x18] sm:$0xf0] }
 0xabf   :  { %1800 = vadd.xlane.f32.xlu0 %v1795_v4 }
 0xac1   :  { %2163 = vmatpush.bf16.msra.mxu0 %v3160_v57  ;;  %2146 = vmatpush.bf16.msrb.mxu3 %v3124_v29 }
 0xac5   :  { %2164 = vmatpush.bf16.msra.mxu0 %v3144_v21 }
 0xac9   :  { %2165 = vmatpush.bf16.msra.mxu0 %v3128_v18 }
 0xad7   :  { %v1783_v48 = vpop.xlane.xlu0 %1782 }
 0xad8   :  { %v1788_v7 = vmul.f32 %v1783_v48, %v4148_v12  ;;  %v3147_v48 = vld [vmem:[#allocation21 + $0x60] sm:$0xf] }
 0xada   :  { %v4480_v49 = vsub.f32 %v4459_v42, %v1788_v7  ;;  %v3419_v7 = vld [vmem:[#allocation21 + $0x6c] sm:$0xf0] }
 0xadc   :  { %v1796_v50 = vmul.f32 %v4480_v49, %v4480_v49 }
 0xade   :  { %1802 = vadd.xlane.f32.xlu1 %v1796_v50  ;;  %v3417_v50 = vld [vmem:[#allocation21 + $0x64] sm:$0xf] }
 0xadf   :  { %v1785_v40 = vpop.xlane.xlu1 %1784 }
 0xae0   :  { %v1789_v25 = vmul.f32 %v1785_v40, %v4148_v12 }
 0xae2   :  { %v4486_v39 = vsub.f32 %v4463_v3, %v1789_v25  ;;  %v3148_v25 = vor.u32 %v3419_v7, %v3147_v48  ;;  %v3112_v48 = vor.u32 %v3406_v2, %v3109_v46 }
 0xae4   :  { %v1797_v51 = vmul.f32 %v4486_v39, %v4486_v39  ;;  %2106 = vmatpush.bf16.msrb.mxu1 %v3148_v25  ;;  %2166 = vmatpush.bf16.msra.mxu0 %v3112_v48 }
 0xae6   :  { %1804 = vadd.xlane.f32.xlu2 %v1797_v51  ;;  %v3149_v51 = vld [vmem:[#allocation21 + $0x70] sm:$0xf0] }
 0xae7   :  { %v3152_v53 = vor.u32 %v3417_v50, %v3149_v51 }
 0xae8   :  { %2107 = vmatpush.bf16.msrb.mxu1 %v3132_v44 }
 0xae9   :  { %2125 = vmatpush.bf16.msra.mxu2 %v3152_v53 }
 0xaec   :  { %2108 = vmatpush.bf16.msrb.mxu1 %v3116_v23 }
 0xaed   :  { %2126 = vmatpush.bf16.msra.mxu2 %v3136_v0 }
 0xaf0   :  { %2109 = vmatpush.bf16.msrb.mxu1 %v3100_v1 }
 0xaf1   :  { %2127 = vmatpush.bf16.msra.mxu2 %v3120_v27 }
 0xaf5   :  { %2128 = vmatpush.bf16.msra.mxu2 %v3104_v5 }
 0xb2a   :  { %v1799_v4 = vpop.xlane.xlu2 %1798 }
 0xb2b   :  { %v1806_v40 = vmul.f32 %v1799_v4, %v4148_v12  ;;  %v3108_v4 = vor.u32 %v3408_v45, %v3107_v20 }
 0xb2d   :  { %v4491_v56 = vadd.f32 1e-05, %v1806_v40  ;;  %2147 = vmatpush.bf16.msrb.mxu3 %v3108_v4 }
 0xb2f   :  { %3657 = vrsqrt.f32 %v4491_v56  ;;  %vm1820_vm5 = vweird.f32 %v4491_v56 }
 0xb32   :  { %v1801_v22 = vpop.xlane.xlu0 %1800 }
 0xb33   :  { %v1807_v37 = vmul.f32 %v1801_v22, %v4148_v12 }
 0xb35   :  { %v3658_v32 = vpop.eup %3657  ;;  %v1811_v33 = vadd.f32 1e-05, %v1807_v37 }
 0xb36   :  { %v1815_v34 = vmul.f32 %v3658_v32, %v4491_v56  ;;  %vm1821_vm4 = vweird.f32 %v3658_v32 }
 0xb37   :  { %3659 = vrsqrt.f32 %v1811_v33  ;;  %vm1822_vm6 = vmor %vm1820_vm5, %vm1821_vm4  ;;  %vm1830_vm8 = vweird.f32 %v1811_v33 }
 0xb38   :  { %v1816_v41 = vmul.f32 %v3658_v32, %v1815_v34 }
 0xb3a   :  { %v1817_v7 = vmul.f32 0.5, %v1816_v41  ;;  %v3444_v41 = vld [vmem:[#allocation22 + $0x38] sm:$0xff] }
 0xb3b   :  { %2782 = vmatpush.bf16.msra.mxu1 %v3444_v41  ;;  %v3448_v41 = vld [vmem:[#allocation22 + $0x58] sm:$0xff] }
 0xb3c   :  { %v1818_v50 = vsub.f32 1.5, %v1817_v7  ;;  %v3443_v7 = vld [vmem:[#allocation22 + $0x30] sm:$0xff] }
 0xb3d   :  { %v3660_v40 = vpop.eup %3659 }
 0xb3e   :  { %v1819_v25 = vmul.f32 %v3658_v32, %v1818_v50  ;;  %v1825_v51 = vmul.f32 %v3660_v40, %v1811_v33  ;;  %vm1831_vm7 = vweird.f32 %v3660_v40  ;;  %v3467_v50 = vld [vmem:[#allocation22 + $0xf0] sm:$0xff] }
 0xb3f   :  { %vm1832_vm9 = vmor %vm1830_vm8, %vm1831_vm7  ;;  %2783 = vmatpush.bf16.msra.mxu1 %v3443_v7 }
 0xb40   :  { %v1826_v17 = vmul.f32 %v3660_v40, %v1825_v51  ;;  %v1823_v52 = vsel %vm1822_vm6, %v3658_v32, %v1819_v25 }
 0xb41   :  { %v1854_v55 = vmul.f32 %v1823_v52, %v4468_v43  ;;  %v3460_v52 = vld [vmem:[#allocation22 + $0xb8] sm:$0xff] }
 0xb42   :  { %v1827_v53 = vmul.f32 0.5, %v1826_v17  ;;  %v3452_v17 = vld [vmem:[#allocation22 + $0x78] sm:$0xff]  ;;  %2820 = vmatpush.bf16.msra.mxu3 %v3460_v52 }
 0xb43   :  { %v1861_v11 = vmul.f32 %v3580_v54, %v1854_v55  ;;  %2801 = vmatpush.bf16.msrb.mxu2 %v3452_v17 }
 0xb44   :  { %v1828_v28 = vsub.f32 1.5, %v1827_v53 }
 0xb45   :  { %v1868_v62 = vadd.f32 %v3581_v59, %v1861_v11 }
 0xb46   :  { %v1829_v57 = vmul.f32 %v3660_v40, %v1828_v28 }
 0xb48   :  { %v1833_v14 = vsel %vm1832_vm9, %v3660_v40, %v1829_v57  ;;  %v3442_v57 = vld [vmem:[#allocation22 + $0x28] sm:$0xff] }
 0xb49   :  { %v1855_v44 = vmul.f32 %v1833_v14, %v4474_v47  ;;  %v3466_v14 = vld [vmem:[#allocation22 + $0xe8] sm:$0xff]  ;;  %2784 = vmatpush.bf16.msra.mxu1 %v3442_v57  ;;  %v3447_v57 = vld [vmem:[#allocation22 + $0x50] sm:$0xff] }
 0xb4b   :  { %v1862_v60 = vmul.f32 %v3580_v54, %v1855_v44 }
 0xb4d   :  { %v1869_v56 = vadd.f32 %v3581_v59, %v1862_v60 }
 0xb4f   :  { %v3528_v63 = vpack.c.bf16 %v1869_v56, %v1868_v62  ;;  %v3451_v56 = vld [vmem:[#allocation22 + $0x70] sm:$0xff] }
 0xb50   :  { %2802 = vmatpush.bf16.msrb.mxu2 %v3451_v56 }
 0xb51   :  { %3529 = vst [vmem:[#allocation3] sm:$0xff] %v3528_v63   ;;  %v1803_v0 = vpop.xlane.xlu1 %1802  ;;  %v3459_v63 = vld [vmem:[#allocation22 + $0xb0] sm:$0xff] }
 0xb52   :  { %v1808_v10 = vmul.f32 %v1803_v0, %v4148_v12  ;;  %2821 = vmatpush.bf16.msra.mxu3 %v3459_v63  ;;  %v3437_v63 = vld [vmem:[#allocation22] sm:$0xff] }
 0xb54   :  { %v1812_v13 = vadd.f32 1e-05, %v1808_v10 }
 0xb56   :  { %3661 = vrsqrt.f32 %v1812_v13  ;;  %vm1840_vm11 = vweird.f32 %v1812_v13 }
 0xb58   :  { %v3403_v16 = vld [vmem:[#allocation3] sm:$0xff] }
 0xb59   :  { %v1805_v43 = vpop.xlane.xlu2 %1804  ;;  %2110 = vmatmul.bf16.vlgmr.msrb.gmra.mxu1 %v3403_v16  ;;  %2129 = vmatmul.bf16.vlgmr.msra.gmra.mxu2 %v3403_v16 }
 0xb5a   :  { %v1809_v21 = vmul.f32 %v1805_v43, %v4148_v12  ;;  %2148 = vmatmul.bf16.vlgmr.msrb.gmra.mxu3 %v3403_v16  ;;  %2167 = vmatmul.bf16.vlgmr.msra.gmra.mxu0 %v3403_v16  ;;  %v3441_v43 = vld [vmem:[#allocation22 + $0x20] sm:$0xff] }
 0xb5b   :  { %2785 = vmatpush.bf16.msra.mxu1 %v3441_v43 }
 0xb5c   :  { %v3662_v22 = vpop.eup %3661  ;;  %v1813_v47 = vadd.f32 1e-05, %v1809_v21  ;;  %v3465_v21 = vld [vmem:[#allocation22 + $0xe0] sm:$0xff] }
 0xb5d   :  { %v1835_v19 = vmul.f32 %v3662_v22, %v1812_v13  ;;  %vm1841_vm10 = vweird.f32 %v3662_v22 }
 0xb5e   :  { %3663 = vrsqrt.f32 %v1813_v47  ;;  %vm1842_vm12 = vmor %vm1840_vm11, %vm1841_vm10  ;;  %vm1850_vm14 = vweird.f32 %v1813_v47 }
 0xb5f   :  { %v1836_v6 = vmul.f32 %v3662_v22, %v1835_v19 }
 0xb61   :  { %v1837_v9 = vmul.f32 0.5, %v1836_v6 }
 0xb63   :  { %v1838_v37 = vsub.f32 1.5, %v1837_v9  ;;  %v3450_v9 = vld [vmem:[#allocation22 + $0x68] sm:$0xff] }
 0xb64   :  { %v3664_v23 = vpop.eup %3663  ;;  %2803 = vmatpush.bf16.msrb.mxu2 %v3450_v9  ;;  %v3454_v9 = vld [vmem:[#allocation22 + $0x88] sm:$0xff] }
 0xb65   :  { %v1839_v58 = vmul.f32 %v3662_v22, %v1838_v37  ;;  %v1845_v24 = vmul.f32 %v3664_v23, %v1813_v47  ;;  %vm1851_vm13 = vweird.f32 %v3664_v23  ;;  %v3458_v37 = vld [vmem:[#allocation22 + $0xa8] sm:$0xff] }
 0xb66   :  { %vm1852_vm15 = vmor %vm1850_vm14, %vm1851_vm13  ;;  %2822 = vmatpush.bf16.msra.mxu3 %v3458_v37 }
 0xb67   :  { %v1846_v15 = vmul.f32 %v3664_v23, %v1845_v24  ;;  %v1843_v27 = vsel %vm1842_vm12, %v3662_v22, %v1839_v58 }
 0xb68   :  { %v1856_v30 = vmul.f32 %v1843_v27, %v4480_v49  ;;  %v1920_v49 = vld [vmem:[%s4890_s10] sm:$0xf] }
 0xb69   :  { %v1847_v12 = vmul.f32 0.5, %v1846_v15  ;;  %v4506_v61 = vperm.slane %v1920_v49, 0  ;;  %v4508_v20 = vperm.slane %v1920_v49, 3  ;;  %v4517_v48 = vperm.slane %v1920_v49, 1 }
 0xb6a   :  { %v1863_v33 = vmul.f32 %v3580_v54, %v1856_v30  ;;  %v4520_v25 = vperm.slane %v1920_v49, 2  ;;  %v3464_v30 = vld [vmem:[#allocation22 + $0xd8] sm:$0xff] }
 0xb6b   :  { %v1848_v29 = vsub.f32 1.5, %v1847_v12 }
 0xb6c   :  { %v1870_v36 = vadd.f32 %v3581_v59, %v1863_v33 }
 0xb6d   :  { %v1849_v31 = vmul.f32 %v3664_v23, %v1848_v29  ;;  %v3440_v29 = vld [vmem:[#allocation22 + $0x18] sm:$0xff] }
 0xb6e   :  { %2786 = vmatpush.bf16.msra.mxu1 %v3440_v29 }
 0xb6f   :  { %v1853_v32 = vsel %vm1852_vm15, %v3664_v23, %v1849_v31  ;;  %v3449_v31 = vld [vmem:[#allocation22 + $0x60] sm:$0xff] }
 0xb70   :  { %v1857_v18 = vmul.f32 %v1853_v32, %v4486_v39  ;;  %v3468_v39 = vld [vmem:[#allocation22 + $0xf8] sm:$0xff]  ;;  %v3457_v32 = vld [vmem:[#allocation22 + $0xa0] sm:$0xff]  ;;  %2804 = vmatpush.bf16.msrb.mxu2 %v3449_v31 }
 0xb71   :  { %2839 = vmatpush.bf16.msrb.mxu0 %v3468_v39  ;;  %2823 = vmatpush.bf16.msra.mxu3 %v3457_v32  ;;  %v3456_v39 = vld [vmem:[#allocation22 + $0x98] sm:$0xff] }
 0xb72   :  { %v1864_v34 = vmul.f32 %v3580_v54, %v1857_v18 }
 0xb74   :  { %v1871_v8 = vadd.f32 %v3581_v59, %v1864_v34  ;;  %v3439_v34 = vld [vmem:[#allocation22 + $0x10] sm:$0xff]  ;;  %2805 = vmatpush.bf16.msrb.mxu2 %v3448_v41  ;;  %v3445_v41 = vld [vmem:[#allocation22 + $0x40] sm:$0xff] }
 0xb75   :  { %2840 = vmatpush.bf16.msrb.mxu0 %v3467_v50  ;;  %2787 = vmatpush.bf16.msra.mxu1 %v3439_v34 }
 0xb76   :  { %v3533_v26 = vpack.c.bf16 %v1871_v8, %v1870_v36  ;;  %v3463_v36 = vld [vmem:[#allocation22 + $0xd0] sm:$0xff]  ;;  %2824 = vmatpush.bf16.msra.mxu3 %v3456_v39  ;;  %v3453_v39 = vld [vmem:[#allocation22 + $0x80] sm:$0xff] }
 0xb78   :  { %3555 = vst [vmem:[#allocation3 + $0x8] sm:$0xff] %v3533_v26   ;;  %2806 = vmatpush.bf16.msrb.mxu2 %v3447_v57 }
 0xb79   :  { %2841 = vmatpush.bf16.msrb.mxu0 %v3466_v14 }
 0xb7d   :  { %2842 = vmatpush.bf16.msrb.mxu0 %v3465_v21 }
 0xb7f   :  { %v3404_v1 = vld [vmem:[#allocation3 + $0x8] sm:$0xff] }
 0xb80   :  { %2115 = vmatmul.bf16.gmra.mxu1 %v3404_v1  ;;  %2134 = vmatmul.bf16.gmra.mxu2 %v3404_v1 }
 0xb81   :  { %2153 = vmatmul.bf16.gmra.mxu3 %v3404_v1  ;;  %2172 = vmatmul.bf16.gmra.mxu0 %v3404_v1 }
 0xb82   :  { %2843 = vmatpush.bf16.msrb.mxu0 %v3464_v30 }
 0xb86   :  { %2844 = vmatpush.bf16.msrb.mxu0 %v3463_v36 }
 0xbd6   :  { %v2111_v5 = vpop.f32.mrf.mxu1 }
 0xbd7   :  { %v4511_v45 = vadd.f32 %v2111_v5, %v4506_v61  ;;  %v2168_v2 = vpop.f32.mrf.mxu0 }
 0xbd8   :  { %v4514_v46 = vadd.f32 %v2168_v2, %v4508_v20 }
 0xbd9   :  { %v3225_v4 = vmul.f32 -1.702, %v4511_v45 }
 0xbda   :  { %v3228_v40 = vmul.f32 -1.702, %v4514_v46 }
 0xbdb   :  { %v2210_v51 = vmul.f32 1.442695, %v3225_v4 }
 0xbdc   :  { %v2216_v53 = vmul.f32 1.442695, %v3228_v40  ;;  %v2130_v28 = vpop.f32.mrf.mxu2  ;;  %v3438_v40 = vld [vmem:[#allocation22 + $0x8] sm:$0xff] }
 0xbdd   :  { %3665 = vpow2.f32 %v2210_v51  ;;  %v4523_v54 = vadd.f32 %v2130_v28, %v4517_v48  ;;  %v2149_v55 = vpop.f32.mrf.mxu3  ;;  %v3462_v51 = vld [vmem:[#allocation22 + $0xc8] sm:$0xff]  ;;  %2788 = vmatpush.bf16.msra.mxu1 %v3438_v40 }
 0xbde   :  { %3667 = vpow2.f32 %v2216_v53  ;;  %v4526_v59 = vadd.f32 %v2149_v55, %v4520_v25  ;;  %v2113_v11 = vpop.f32.mrf.mxu1  ;;  %2845 = vmatpush.bf16.msrb.mxu0 %v3462_v51 }
 0xbdf   :  { %v3226_v44 = vmul.f32 -1.702, %v4523_v54  ;;  %v4530_v60 = vadd.f32 %v2113_v11, %v4506_v61  ;;  %v2170_v62 = vpop.f32.mrf.mxu0 }
 0xbe0   :  { %v3227_v0 = vmul.f32 -1.702, %v4526_v59  ;;  %v4534_v10 = vadd.f32 %v2170_v62, %v4508_v20 }
 0xbe1   :  { %v2212_v13 = vmul.f32 1.442695, %v3226_v44  ;;  %v3229_v16 = vmul.f32 -1.702, %v4530_v60  ;;  %v3455_v44 = vld [vmem:[#allocation22 + $0x90] sm:$0xff]  ;;  %2789 = vmatpush.bf16.msra.mxu1 %v3437_v63 }
 0xbe2   :  { %v2214_v22 = vmul.f32 1.442695, %v3227_v0  ;;  %v3232_v47 = vmul.f32 -1.702, %v4534_v10  ;;  %v3461_v0 = vld [vmem:[#allocation22 + $0xc0] sm:$0xff]  ;;  %2825 = vmatpush.bf16.msra.mxu3 %v3455_v44 }
 0xbe3   :  { %v3666_v19 = vpop.eup %3665  ;;  %3669 = vpow2.f32 %v2212_v13  ;;  %v2218_v6 = vmul.f32 1.442695, %v3229_v16  ;;  %2846 = vmatpush.bf16.msrb.mxu0 %v3461_v0 }
 0xbe4   :  { %v3668_v23 = vpop.eup %3667  ;;  %v4538_v58 = vadd.f32 1.0, %v3666_v19  ;;  %3671 = vpow2.f32 %v2214_v22  ;;  %v2224_v24 = vmul.f32 1.442695, %v3232_v47  ;;  %v2132_v15 = vpop.f32.mrf.mxu2 }
 0xbe5   :  { %v4540_v27 = vadd.f32 1.0, %v3668_v23  ;;  %3673 = vpow2.f32 %v2218_v6  ;;  %v4543_v12 = vadd.f32 %v2132_v15, %v4517_v48  ;;  %v2151_v4 = vpop.f32.mrf.mxu3  ;;  %v3446_v6 = vld [vmem:[#allocation22 + $0x48] sm:$0xff] }
 0xbe6   :  { %3675 = vrcp.f32 %v4538_v58  ;;  %v4565_v55 = vadd.f32 %v2151_v4, %v4520_v25  ;;  %v2267_v56 = vand.u32 2147483647, %v4538_v58  ;;  %v2269_v16 = vand.u32 2147483648, %v4538_v58  ;;  %2807 = vmatpush.bf16.msrb.mxu2 %v3446_v6  ;;  %2826 = vmatpush.bf16.msra.mxu3 %v3454_v9 }
 0xbe7   :  { %3677 = vrcp.f32 %v4540_v27  ;;  %v3230_v33 = vmul.f32 -1.702, %v4543_v12  ;;  %v2312_v21 = vand.u32 2147483647, %v4540_v27  ;;  %v2314_v22 = vand.u32 2147483648, %v4540_v27 }
 0xbe8   :  { %3679 = vpow2.f32 %v2224_v24  ;;  %v3231_v19 = vmul.f32 -1.702, %v4565_v55  ;;  %vm2263_vm2 = vweird.f32 %v4538_v58  ;;  %vm4589_vm3 = vcmp.eq.f32.partialorder %v2267_v56, 8.507059e+37 }
 0xbe9   :  { %v3670_v18 = vpop.eup %3669  ;;  %v2220_v2 = vmul.f32 1.442695, %v3230_v33  ;;  %vm2308_vm4 = vweird.f32 %v4540_v27  ;;  %v2270_v32 = vor.u32 1.1754944e-38, %v2269_v16  ;;  %vm4600_vm6 = vcmp.eq.f32.partialorder %v2312_v21, 8.507059e+37 }
 0xbea   :  { %v3672_v8 = vpop.eup %3671  ;;  %v4548_v26 = vadd.f32 1.0, %v3670_v18  ;;  %v2315_v36 = vor.u32 1.1754944e-38, %v2314_v22  ;;  %2808 = vmatpush.bf16.msrb.mxu2 %v3445_v41  ;;  %2827 = vmatpush.bf16.msra.mxu3 %v3453_v39 }
 0xbeb   :  { %v3674_v1 = vpop.eup %3673  ;;  %v4550_v49 = vadd.f32 1.0, %v3672_v8 }
 0xbec   :  { %v4552_v5 = vpop.eup %3675  ;;  %3681 = vrcp.f32 %v4548_v26  ;;  %v4562_v28 = vadd.f32 1.0, %v3674_v1  ;;  %vm2278_vm8 = vweird.f32 %v4548_v26  ;;  %v2284_v8 = vand.u32 2147483648, %v4548_v26 }
 0xbed   :  { %v4555_v7 = vpop.eup %3677  ;;  %v2259_v50 = vmul.f32 %v4552_v5, %v4538_v58  ;;  %3683 = vrcp.f32 %v4550_v49  ;;  %vm2264_vm0 = vweird.f32 %v4552_v5  ;;  %v2282_v58 = vand.u32 2147483647, %v4548_v26 }
 0xbee   :  { %v3680_v17 = vpop.eup %3679  ;;  %v2304_v52 = vmul.f32 %v4555_v7, %v4540_v27  ;;  %3685 = vpow2.f32 %v2220_v2  ;;  %vm2309_vm1 = vweird.f32 %v4555_v7  ;;  %vm4596_vm5 = vmor %vm2263_vm2, %vm2264_vm0  ;;  %v2327_v18 = vand.u32 2147483647, %v4562_v28 }
 0xbef   :  { %v2260_v53 = vsub.f32 1.0, %v2259_v50  ;;  %v4567_v11 = vadd.f32 1.0, %v3680_v17  ;;  %3687 = vrcp.f32 %v4562_v28  ;;  %vm4608_vm7 = vmor %vm2308_vm4, %vm2309_vm1  ;;  %v2222_v1 = vmul.f32 1.442695, %v3231_v19 }
 0xbf0   :  { %v2305_v14 = vsub.f32 1.0, %v2304_v52  ;;  %vm2323_vm9 = vweird.f32 %v4562_v28  ;;  %v2329_v52 = vand.u32 2147483648, %v4562_v28  ;;  %vm4631_vm11 = vcmp.eq.f32.partialorder %v2327_v18, 8.507059e+37 }
 0xbf1   :  { %v2261_v62 = vmul.f32 %v4552_v5, %v2260_v53  ;;  %3689 = vrcp.f32 %v4567_v11  ;;  %v2374_v0 = vand.u32 2147483648, %v4567_v11  ;;  %vm2368_vm13 = vweird.f32 %v4567_v11 }
 0xbf2   :  { %v4572_v13 = vpop.eup %3681  ;;  %v2306_v43 = vmul.f32 %v4555_v7, %v2305_v14  ;;  %v2330_v21 = vor.u32 1.1754944e-38, %v2329_v52  ;;  %vm2283_vm4 = vcmp.eq.f32.partialorder %v2282_v58, 8.507059e+37 }
 0xbf3   :  { %v2274_v47 = vmul.f32 %v4572_v13, %v4548_v26  ;;  %v2262_v37 = vadd.f32 %v4552_v5, %v2261_v62  ;;  %v4586_v24 = vpop.eup %3683  ;;  %vm2279_vm10 = vweird.f32 %v4572_v13  ;;  %v2372_v62 = vand.u32 2147483647, %v4567_v11 }
 0xbf4   :  { %v2307_v23 = vadd.f32 %v4555_v7, %v2306_v43  ;;  %v3686_v30 = vpop.eup %3685  ;;  %v4625_v17 = vmul.f32 %v4586_v24, %v4550_v49  ;;  %vm4663_vm0 = vmor %vm2278_vm8, %vm2279_vm10  ;;  %vm2294_vm8 = vweird.f32 %v4586_v24 }
 0xbf5   :  { %v2275_v29 = vsub.f32 1.0, %v2274_v47  ;;  %v3688_v27 = vpop.eup %3687  ;;  %v2266_v2 = vsel %vm4596_vm5, %v4552_v5, %v2262_v37  ;;  %v4628_v53 = vadd.f32 1.0, %v3686_v30  ;;  %vm2373_vm1 = vcmp.eq.f32.partialorder %v2372_v62, 8.507059e+37 }
 0xbf6   :  { %v2311_v4 = vsel %vm4608_vm7, %v4555_v7, %v2307_v23  ;;  %v2319_v50 = vmul.f32 %v3688_v27, %v4562_v28  ;;  %v2271_v14 = vsel %vm4589_vm3, %v2270_v32, %v2266_v2  ;;  %vm2324_vm12 = vweird.f32 %v3688_v27 }
 0xbf7   :  { %v3690_v40 = vpop.eup %3689  ;;  %v2276_v51 = vmul.f32 %v4572_v13, %v2275_v29  ;;  %v2316_v44 = vsel %vm4600_vm6, %v2315_v36, %v2311_v4  ;;  %3691 = vrcp.f32 %v4628_v53  ;;  %v2290_v43 = vsub.f32 1.0, %v4625_v17  ;;  %vm2325_vm15 = vmor %vm2323_vm9, %vm2324_vm12 }
 0xbf8   :  { %v2320_v5 = vsub.f32 1.0, %v2319_v50  ;;  %v2364_v57 = vmul.f32 %v3690_v40, %v4567_v11  ;;  %vm2369_vm14 = vweird.f32 %v3690_v40  ;;  %3693 = vpow2.f32 %v2222_v1 }
 0xbf9   :  { %v4644_v16 = vadd.f32 %v4572_v13, %v2276_v51  ;;  %v2498_v9 = vmul.f32 %v2271_v14, %v4511_v45  ;;  %v2501_v37 = vmul.f32 %v2316_v44, %v4514_v46  ;;  %v2375_v30 = vor.u32 1.1754944e-38, %v2374_v0  ;;  %vm2370_vm2 = vmor %vm2368_vm13, %vm2369_vm14 }
 0xbfa   :  { %v2321_v56 = vmul.f32 %v3688_v27, %v2320_v5  ;;  %v2365_v63 = vsub.f32 1.0, %v2364_v57  ;;  %v2342_v1 = vand.u32 2147483647, %v4628_v53  ;;  %v2285_v62 = vor.u32 1.1754944e-38, %v2284_v8 }
 0xbfb   :  { %v2281_v31 = vsel %vm4663_vm0, %v4572_v13, %v4644_v16  ;;  %v2344_v13 = vand.u32 2147483648, %v4628_v53  ;;  %vm2338_vm5 = vweird.f32 %v4628_v53  ;;  %vm2293_vm9 = vweird.f32 %v4550_v49 }
 0xbfc   :  { %v2322_v47 = vadd.f32 %v3688_v27, %v2321_v56  ;;  %v2366_v19 = vmul.f32 %v3690_v40, %v2365_v63  ;;  %vm2343_vm7 = vcmp.eq.f32.partialorder %v2342_v1, 8.507059e+37  ;;  %vm4723_vm10 = vmor %vm2293_vm9, %vm2294_vm8 }
 0xbfd   :  { %v2116_v22 = vpop.f32.mrf.mxu1  ;;  %v3692_v28 = vpop.eup %3691  ;;  %v2345_v58 = vor.u32 1.1754944e-38, %v2344_v13 }
 0xbfe   :  { %v2173_v6 = vpop.f32.mrf.mxu0  ;;  %v4654_v23 = vadd.f32 %v2116_v22, %v4506_v61  ;;  %v2326_v45 = vsel %vm2325_vm15, %v3688_v27, %v2322_v47  ;;  %v2367_v46 = vadd.f32 %v3690_v40, %v2366_v19  ;;  %v2334_v36 = vmul.f32 %v3692_v28, %v4628_v53  ;;  %v3694_v50 = vpop.eup %3693 }
 0xbff   :  { %v4657_v15 = vadd.f32 %v2173_v6, %v4508_v20  ;;  %v2331_v32 = vsel %vm4631_vm11, %v2330_v21, %v2326_v45  ;;  %vm2339_vm3 = vweird.f32 %v3692_v28  ;;  %v2286_v21 = vsel %vm2283_vm4, %v2285_v62, %v2281_v31 }
 0xc00   :  { %v3233_v33 = vmul.f32 -1.702, %v4654_v23  ;;  %v2502_v27 = vmul.f32 %v2331_v32, %v4530_v60  ;;  %v2371_v34 = vsel %vm2370_vm2, %v3690_v40, %v2367_v46  ;;  %v2335_v17 = vsub.f32 1.0, %v2334_v36  ;;  %vm2340_vm6 = vmor %vm2338_vm5, %vm2339_vm3 }
 0xc01   :  { %v3236_v18 = vmul.f32 -1.702, %v4657_v15  ;;  %v2376_v41 = vsel %vm2373_vm1, %v2375_v30, %v2371_v34  ;;  %v4686_v40 = vadd.f32 1.0, %v3694_v50  ;;  %v2291_v22 = vmul.f32 %v4586_v24, %v2290_v43 }
 0xc02   :  { %v2226_v39 = vmul.f32 1.442695, %v3233_v33  ;;  %v2518_v11 = vpack.c.bf16 %v2502_v27, %v2498_v9  ;;  %v2505_v51 = vmul.f32 %v2376_v41, %v4534_v10  ;;  %v2336_v14 = vmul.f32 %v3692_v28, %v2335_v17 }
 0xc03   :  { %v2232_v2 = vmul.f32 1.442695, %v3236_v18  ;;  %v2135_v4 = vpop.f32.mrf.mxu2  ;;  %v2299_v19 = vand.u32 2147483648, %v4550_v49  ;;  %v2499_v43 = vmul.f32 %v2286_v21, %v4523_v54  ;;  %v2292_v46 = vadd.f32 %v4586_v24, %v2291_v22 }
 0xc04   :  { %v4684_v52 = vadd.f32 %v2135_v4, %v4517_v48  ;;  %v2154_v60 = vpop.f32.mrf.mxu3  ;;  %3695 = vpow2.f32 %v2226_v39  ;;  %v2521_v57 = vpack.c.bf16 %v2505_v51, %v2501_v37  ;;  %2790 = vmatmul.bf16.vlgmr.msra.gmra.mxu1 %v2518_v11  ;;  %v2337_v56 = vadd.f32 %v3692_v28, %v2336_v14 }
 0xc05   :  { %v4689_v5 = vadd.f32 %v2154_v60, %v4520_v25  ;;  %v2118_v7 = vpop.f32.mrf.mxu1  ;;  %3697 = vpow2.f32 %v2232_v2  ;;  %v2297_v54 = vand.u32 2147483647, %v4550_v49  ;;  %v2296_v34 = vsel %vm4723_vm10, %v4586_v24, %v2292_v46 }
 0xc06   :  { %v3234_v44 = vmul.f32 -1.702, %v4684_v52  ;;  %v2175_v10 = vpop.f32.mrf.mxu0  ;;  %3699 = vrcp.f32 %v4686_v40  ;;  %2847 = vmatmul.bf16.vlgmr.msrb.gmra.mxu0 %v2521_v57  ;;  %v4700_v16 = vadd.f32 %v2118_v7, %v4506_v61  ;;  %v2341_v8 = vsel %vm2340_vm6, %v3692_v28, %v2337_v56 }
 0xc07   :  { %v3235_v0 = vmul.f32 -1.702, %v4689_v5  ;;  %v4705_v26 = vadd.f32 %v2175_v10, %v4508_v20  ;;  %v2346_v6 = vsel %vm2343_vm7, %v2345_v58, %v2341_v8  ;;  %v2300_v36 = vor.u32 1.1754944e-38, %v2299_v19 }
 0xc08   :  { %v2228_v63 = vmul.f32 1.442695, %v3234_v44  ;;  %v3237_v53 = vmul.f32 -1.702, %v4700_v16  ;;  %v2503_v37 = vmul.f32 %v2346_v6, %v4543_v12  ;;  %v2359_v1 = vand.u32 2147483648, %v4686_v40 }
 0xc09   :  { %v3240_v61 = vmul.f32 -1.702, %v4705_v26  ;;  %v2230_v20 = vmul.f32 1.442695, %v3235_v0  ;;  %v2357_v49 = vand.u32 2147483647, %v4686_v40  ;;  %vm2353_vm13 = vweird.f32 %v4686_v40 }
 0xc0a   :  { %v3696_v47 = vpop.eup %3695  ;;  %3701 = vpow2.f32 %v2228_v63  ;;  %v2234_v28 = vmul.f32 1.442695, %v3237_v53  ;;  %v2519_v31 = vpack.c.bf16 %v2503_v37, %v2499_v43  ;;  %vm2298_vm12 = vcmp.eq.f32.partialorder %v2297_v54, 8.507059e+37 }
 0xc0b   :  { %v3698_v9 = vpop.eup %3697  ;;  %v4712_v29 = vadd.f32 1.0, %v3696_v47  ;;  %v2240_v33 = vmul.f32 1.442695, %v3240_v61  ;;  %v2137_v13 = vpop.f32.mrf.mxu2  ;;  %v2301_v2 = vsel %vm2298_vm12, %v2300_v36, %v2296_v34  ;;  %v2360_v11 = vor.u32 1.1754944e-38, %v2359_v1 }
 0xc0c   :  { %v3700_v45 = vpop.eup %3699  ;;  %v4716_v30 = vadd.f32 1.0, %v3698_v9  ;;  %2809 = vmatmul.bf16.vlgmr.msrb.gmra.mxu2 %v2519_v31  ;;  %v4742_v17 = vadd.f32 %v2137_v13, %v4517_v48  ;;  %vm2358_vm15 = vcmp.eq.f32.partialorder %v2357_v49, 8.507059e+37  ;;  %v2156_v14 = vpop.f32.mrf.mxu3  ;;  %v2500_v44 = vmul.f32 %v2301_v2, %v4526_v59 }
 0xc0d   :  { %v2349_v32 = vmul.f32 %v3700_v45, %v4686_v40  ;;  %3703 = vrcp.f32 %v4712_v29  ;;  %vm2354_vm11 = vweird.f32 %v3700_v45  ;;  %v4755_v22 = vadd.f32 %v2156_v14, %v4520_v25 }
 0xc0e   :  { %3705 = vrcp.f32 %v4716_v30  ;;  %vm2355_vm14 = vmor %vm2353_vm13, %vm2354_vm11  ;;  %v3238_v21 = vmul.f32 -1.702, %v4742_v17  ;;  %v2387_v25 = vand.u32 2147483647, %v4712_v29  ;;  %v2389_v61 = vand.u32 2147483648, %v4712_v29 }
 0xc0f   :  { %v2350_v18 = vsub.f32 1.0, %v2349_v32  ;;  %3707 = vpow2.f32 %v2230_v20  ;;  %v3239_v47 = vmul.f32 -1.702, %v4755_v22  ;;  %v2432_v9 = vand.u32 2147483647, %v4716_v30 }
 0xc10   :  { %v3702_v27 = vpop.eup %3701  ;;  %3709 = vpow2.f32 %v2234_v28  ;;  %v2434_v37 = vand.u32 2147483648, %v4716_v30  ;;  %vm2383_vm1 = vweird.f32 %v4712_v29  ;;  %vm2428_vm2 = vweird.f32 %v4716_v30 }
 0xc11   :  { %v2351_v41 = vmul.f32 %v3700_v45, %v2350_v18  ;;  %3711 = vpow2.f32 %v2240_v33  ;;  %v4735_v50 = vadd.f32 1.0, %v3702_v27  ;;  %v2238_v46 = vmul.f32 1.442695, %v3239_v47 }
 0xc12   :  { %vm4784_vm5 = vcmp.eq.f32.partialorder %v2387_v25, 8.507059e+37  ;;  %v2390_v54 = vor.u32 1.1754944e-38, %v2389_v61  ;;  %vm4788_vm6 = vcmp.eq.f32.partialorder %v2432_v9, 8.507059e+37  ;;  %v2435_v27 = vor.u32 1.1754944e-38, %v2434_v37 }
 0xc13   :  { %v4732_v39 = vpop.eup %3703  ;;  %v2352_v4 = vadd.f32 %v3700_v45, %v2351_v41  ;;  %3713 = vrcp.f32 %v4735_v50 }
 0xc14   :  { %v4737_v24 = vpop.eup %3705  ;;  %v2379_v51 = vmul.f32 %v4732_v39, %v4712_v29  ;;  %vm2384_vm0 = vweird.f32 %v4732_v39 }
 0xc15   :  { %v3708_v60 = vpop.eup %3707  ;;  %v2356_v7 = vsel %vm2355_vm14, %v3700_v45, %v2352_v4  ;;  %v2424_v57 = vmul.f32 %v4737_v24, %v4716_v30  ;;  %vm2429_vm3 = vweird.f32 %v4737_v24  ;;  %vm4780_vm4 = vmor %vm2383_vm1, %vm2384_vm0  ;;  %vm2398_vm1 = vweird.f32 %v4735_v50 }
 0xc16   :  { %v3710_v40 = vpop.eup %3709  ;;  %v2361_v10 = vsel %vm2358_vm15, %v2360_v11, %v2356_v7  ;;  %v2380_v63 = vsub.f32 1.0, %v2379_v51  ;;  %v4757_v53 = vadd.f32 1.0, %v3708_v60  ;;  %vm4798_vm7 = vmor %vm2428_vm2, %vm2429_vm3 }
 0xc17   :  { %v3712_v62 = vpop.eup %3711  ;;  %v2504_v56 = vmul.f32 %v2361_v10, %v4565_v55  ;;  %v4749_v0 = vadd.f32 1.0, %v3710_v40  ;;  %v2425_v8 = vsub.f32 1.0, %v2424_v57  ;;  %v2236_v55 = vmul.f32 1.442695, %v3238_v21 }
 0xc18   :  { %v4751_v48 = vadd.f32 1.0, %v3712_v62  ;;  %v2381_v59 = vmul.f32 %v4732_v39, %v2380_v63 }
 0xc19   :  { %v2520_v58 = vpack.c.bf16 %v2504_v56, %v2500_v44  ;;  %3715 = vrcp.f32 %v4749_v0  ;;  %v4763_v19 = vpop.eup %3713  ;;  %v2426_v6 = vmul.f32 %v4737_v24, %v2425_v8  ;;  %vm2443_vm8 = vweird.f32 %v4749_v0 }
 0xc1a   :  { %3717 = vrcp.f32 %v4751_v48  ;;  %v2382_v43 = vadd.f32 %v4732_v39, %v2381_v59  ;;  %v2394_v45 = vmul.f32 %v4763_v19, %v4735_v50  ;;  %v2447_v49 = vand.u32 2147483647, %v4749_v0 }
 0xc1b   :  { %2828 = vmatmul.bf16.vlgmr.msra.gmra.mxu3 %v2520_v58  ;;  %3719 = vrcp.f32 %v4757_v53  ;;  %v2427_v28 = vadd.f32 %v4737_v24, %v2426_v6  ;;  %v2449_v13 = vand.u32 2147483648, %v4749_v0  ;;  %v2492_v7 = vand.u32 2147483647, %v4751_v48 }
 0xc1c   :  { %3721 = vpow2.f32 %v2236_v55  ;;  %v2386_v18 = vsel %vm4780_vm4, %v4732_v39, %v2382_v43  ;;  %v2395_v41 = vsub.f32 1.0, %v2394_v45  ;;  %v2494_v57 = vand.u32 2147483648, %v4751_v48 }
 0xc1d   :  { %3723 = vpow2.f32 %v2238_v46  ;;  %v2431_v2 = vsel %vm4798_vm7, %v4737_v24, %v2427_v28  ;;  %v2391_v51 = vsel %vm4784_vm5, %v2390_v54, %v2386_v18  ;;  %vm2448_vm12 = vcmp.eq.f32.partialorder %v2447_v49, 8.507059e+37 }
 0xc1e   :  { %v2436_v10 = vsel %vm4788_vm6, %v2435_v27, %v2431_v2  ;;  %v2396_v62 = vmul.f32 %v4763_v19, %v2395_v41  ;;  %v2450_v56 = vor.u32 1.1754944e-38, %v2449_v13  ;;  %vm2488_vm13 = vweird.f32 %v4751_v48 }
 0xc1f   :  { %v3716_v20 = vpop.eup %3715  ;;  %v2495_v59 = vor.u32 1.1754944e-38, %v2494_v57  ;;  %vm2493_vm15 = vcmp.eq.f32.partialorder %v2492_v7, 8.507059e+37  ;;  %v2509_v61 = vmul.f32 %v2436_v10, %v4657_v15  ;;  %vm2399_vm0 = vweird.f32 %v4763_v19 }
 0xc20   :  { %v2439_v31 = vmul.f32 %v3716_v20, %v4749_v0  ;;  %v3718_v32 = vpop.eup %3717  ;;  %vm2444_vm9 = vweird.f32 %v3716_v20  ;;  %v2506_v0 = vmul.f32 %v2391_v51, %v4654_v23  ;;  %v2397_v43 = vadd.f32 %v4763_v19, %v2396_v62  ;;  %vm4837_vm2 = vmor %vm2398_vm1, %vm2399_vm0 }
 0xc21   :  { %v4792_v30 = vpop.eup %3719  ;;  %v2484_v36 = vmul.f32 %v3718_v32, %v4751_v48  ;;  %vm2489_vm10 = vweird.f32 %v3718_v32  ;;  %vm2445_vm11 = vmor %vm2443_vm8, %vm2444_vm9  ;;  %v2402_v48 = vand.u32 2147483647, %v4735_v50  ;;  %v2404_v45 = vand.u32 2147483648, %v4735_v50 }
 0xc22   :  { %v2440_v34 = vsub.f32 1.0, %v2439_v31  ;;  %v3722_v11 = vpop.eup %3721  ;;  %v2409_v60 = vmul.f32 %v4792_v30, %v4757_v53  ;;  %vm2490_vm14 = vmor %vm2488_vm13, %vm2489_vm10  ;;  %v2401_v28 = vsel %vm4837_vm2, %v4763_v19, %v2397_v43  ;;  %vm2414_vm4 = vweird.f32 %v4792_v30 }
 0xc23   :  { %v2485_v4 = vsub.f32 1.0, %v2484_v36  ;;  %v4814_v44 = vadd.f32 1.0, %v3722_v11  ;;  %v3724_v24 = vpop.eup %3723  ;;  %vm2403_vm3 = vcmp.eq.f32.partialorder %v2402_v48, 8.507059e+37  ;;  %v2405_v50 = vor.u32 1.1754944e-38, %v2404_v45 }
 0xc24   :  { %v2441_v39 = vmul.f32 %v3716_v20, %v2440_v34  ;;  %v2410_v58 = vsub.f32 1.0, %v2409_v60  ;;  %v4823_v55 = vadd.f32 1.0, %v3724_v24  ;;  %vm2413_vm5 = vweird.f32 %v4757_v53 }
 0xc25   :  { %v2486_v40 = vmul.f32 %v3718_v32, %v2485_v4  ;;  %3725 = vrcp.f32 %v4814_v44  ;;  %v2464_v33 = vand.u32 2147483648, %v4814_v44  ;;  %v2419_v54 = vand.u32 2147483648, %v4757_v53  ;;  %vm4851_vm7 = vmor %vm2413_vm5, %vm2414_vm4 }
 0xc26   :  { %v2442_v14 = vadd.f32 %v3716_v20, %v2441_v39  ;;  %3727 = vrcp.f32 %v4823_v55  ;;  %v2411_v37 = vmul.f32 %v4792_v30, %v2410_v58  ;;  %v2462_v18 = vand.u32 2147483647, %v4814_v44 }
 0xc27   :  { %v2487_v21 = vadd.f32 %v3718_v32, %v2486_v40  ;;  %v2406_v27 = vsel %vm2403_vm3, %v2405_v50, %v2401_v28  ;;  %v2417_v34 = vand.u32 2147483647, %v4757_v53  ;;  %vm2458_vm8 = vweird.f32 %v4814_v44 }
 0xc28   :  { %v2446_v63 = vsel %vm2445_vm11, %v3716_v20, %v2442_v14  ;;  %v2412_v31 = vadd.f32 %v4792_v30, %v2411_v37  ;;  %v2479_v49 = vand.u32 2147483648, %v4823_v55  ;;  %v2465_v13 = vor.u32 1.1754944e-38, %v2464_v33 }
 0xc29   :  { %v2451_v8 = vsel %vm2448_vm12, %v2450_v56, %v2446_v63  ;;  %v2491_v6 = vsel %vm2490_vm14, %v3718_v32, %v2487_v21  ;;  %v2477_v39 = vand.u32 2147483647, %v4823_v55  ;;  %v2420_v4 = vor.u32 1.1754944e-38, %v2419_v54 }
 0xc2a   :  { %v2510_v47 = vmul.f32 %v2451_v8, %v4700_v16  ;;  %v2496_v25 = vsel %vm2493_vm15, %v2495_v59, %v2491_v6  ;;  %v2416_v1 = vsel %vm4851_vm7, %v4792_v30, %v2412_v31  ;;  %vm2463_vm11 = vcmp.eq.f32.partialorder %v2462_v18, 8.507059e+37 }
 0xc2b   :  { %v2513_v9 = vmul.f32 %v2496_v25, %v4705_v26  ;;  %v3726_v20 = vpop.eup %3725  ;;  %vm2418_vm12 = vcmp.eq.f32.partialorder %v2417_v34, 8.507059e+37  ;;  %vm2473_vm13 = vweird.f32 %v4823_v55  ;;  %v2507_v30 = vmul.f32 %v2406_v27, %v4684_v52 }
 0xc2c   :  { %v2522_v16 = vpack.c.bf16 %v2510_v47, %v2506_v0  ;;  %v2454_v46 = vmul.f32 %v3726_v20, %v4814_v44  ;;  %v3728_v26 = vpop.eup %3727  ;;  %vm2459_vm6 = vweird.f32 %v3726_v20  ;;  %v2421_v60 = vsel %vm2418_vm12, %v2420_v4, %v2416_v1 }
 0xc2d   :  { %v2525_v23 = vpack.c.bf16 %v2513_v9, %v2509_v61  ;;  %v2469_v29 = vmul.f32 %v3728_v26, %v4823_v55  ;;  %vm2460_vm9 = vmor %vm2458_vm8, %vm2459_vm6  ;;  %vm2474_vm10 = vweird.f32 %v3728_v26  ;;  %v2480_v57 = vor.u32 1.1754944e-38, %v2479_v49 }
 0xc2e   :  { %2795 = vmatmul.bf16.gmra.mxu1 %v2522_v16  ;;  %v2455_v32 = vsub.f32 1.0, %v2454_v46  ;;  %vm2475_vm14 = vmor %vm2473_vm13, %vm2474_vm10  ;;  %vm2478_vm15 = vcmp.eq.f32.partialorder %v2477_v39, 8.507059e+37  ;;  %v2508_v24 = vmul.f32 %v2421_v60, %v4689_v5 }
 0xc2f   :  { %2852 = vmatmul.bf16.gmra.mxu0 %v2525_v23  ;;  %v2470_v36 = vsub.f32 1.0, %v2469_v29 }
 0xc30   :  { %v2456_v12 = vmul.f32 %v3726_v20, %v2455_v32 }
 0xc31   :  { %v2471_v2 = vmul.f32 %v3728_v26, %v2470_v36 }
 0xc32   :  { %v2457_v41 = vadd.f32 %v3726_v20, %v2456_v12 }
 0xc33   :  { %v2472_v51 = vadd.f32 %v3728_v26, %v2471_v2 }
 0xc34   :  { %v2461_v11 = vsel %vm2460_vm9, %v3726_v20, %v2457_v41 }
 0xc35   :  { %v2466_v53 = vsel %vm2463_vm11, %v2465_v13, %v2461_v11  ;;  %v2476_v14 = vsel %vm2475_vm14, %v3728_v26, %v2472_v51 }
 0xc36   :  { %v2511_v7 = vmul.f32 %v2466_v53, %v4742_v17  ;;  %v2481_v40 = vsel %vm2478_vm15, %v2480_v57, %v2476_v14 }
 0xc37   :  { %v2512_v10 = vmul.f32 %v2481_v40, %v4755_v22  ;;  %v3582_v22 = vld [vmem:[%s4892_s12] ss:$0 sm:$0xff]  ;;  %s4026_s12 = smov [#allocation24]  }
 0xc38   :  { %v2523_v44 = vpack.c.bf16 %v2511_v7, %v2507_v30  ;;  %s2901_s22 = sshll.u32 %s4026_s12, 4  ;;  %s2902_s22 = int_to_ptr.vmem [resolvable:$true] %s2901_s22 }
 0xc39   :  { %v2524_v62 = vpack.c.bf16 %v2512_v10, %v2508_v24 }
 0xc3a   :  { %2814 = vmatmul.bf16.gmra.mxu2 %v2523_v44 }
 0xc3b   :  { %2833 = vmatmul.bf16.gmra.mxu3 %v2524_v62 }
 0xc81   :  { %v2791_v63 = vpop.f32.mrf.mxu1 }
 0xc83   :  { %v2848_v52 = vpop.f32.mrf.mxu0 }
 0xc89   :  { %v2793_v59 = vpop.f32.mrf.mxu1 }
 0xc8b   :  { %v2850_v25 = vpop.f32.mrf.mxu0 }
 0xc8f   :  { %v2810_v56 = vpop.f32.mrf.mxu2 }
 0xc90   :  { %v2811_v21 = vadd.f32 %v2810_v56, %v2791_v63 }
 0xc97   :  { %v2812_v8 = vpop.f32.mrf.mxu2 }
 0xc98   :  { %v2813_v55 = vadd.f32 %v2812_v8, %v2793_v59 }
 0xc9e   :  { %v2829_v58 = vpop.f32.mrf.mxu3 }
 0xc9f   :  { %v2830_v17 = vadd.f32 %v2829_v58, %v2811_v21 }
 0xca1   :  { %v2849_v47 = vadd.f32 %v2848_v52, %v2830_v17 }
 0xca3   :  { %v2877_v5 = vadd.f32 %v2849_v47, %v4451_v35 }
 0xca5   :  { %v2885_v9 = vadd.f32 %v3582_v22, %v2877_v5 }
 0xca6   :  { %v2831_v6 = vpop.f32.mrf.mxu3 }
 0xca7   :  { %v2832_v0 = vadd.f32 %v2831_v6, %v2813_v55 }
 0xca9   :  { %v2851_v61 = vadd.f32 %v2850_v25, %v2832_v0 }
 0xcab   :  { %v2878_v48 = vadd.f32 %v2851_v61, %v4455_v38  ;;  %v2796_v16 = vpop.f32.mrf.mxu1 }
 0xcac   :  { %v2853_v23 = vpop.f32.mrf.mxu0 }
 0xcad   :  { %v2886_v43 = vadd.f32 %v3582_v22, %v2878_v48 }
 0xcaf   :  { %v3538_v37 = vpack.c.bf16 %v2886_v43, %v2885_v9 }
 0xcb1   :  { %3539 = vst [vmem:[#allocation24] sm:$0xff] %v3538_v37  }
 0xcb3   :  { %v2798_v26 = vpop.f32.mrf.mxu1 }
 0xcb4   :  { %v2855_v33 = vpop.f32.mrf.mxu0 }
 0xcbd   :  { %v2815_v20 = vpop.f32.mrf.mxu2 }
 0xcbe   :  { %v2816_v45 = vadd.f32 %v2815_v20, %v2796_v16  ;;  %v2834_v46 = vpop.f32.mrf.mxu3 }
 0xcc0   :  { %v2835_v15 = vadd.f32 %v2834_v46, %v2816_v45 }
 0xcc2   :  { %v2854_v31 = vadd.f32 %v2853_v23, %v2835_v15 }
 0xcc4   :  { %v2879_v29 = vadd.f32 %v2854_v31, %v4459_v42 }
 0xcc5   :  { %v2817_v28 = vpop.f32.mrf.mxu2 }
 0xcc6   :  { %v2818_v35 = vadd.f32 %v2817_v28, %v2798_v26  ;;  %v2836_v32 = vpop.f32.mrf.mxu3  ;;  %v2887_v12 = vadd.f32 %v3582_v22, %v2879_v29 }
 0xcc8   :  { %v2837_v50 = vadd.f32 %v2836_v32, %v2818_v35 }
 0xcca   :  { %v2856_v38 = vadd.f32 %v2855_v33, %v2837_v50 }
 0xccc   :  { %v2880_v54 = vadd.f32 %v2856_v38, %v4463_v3 }
 0xcce   :  { %v2888_v18 = vadd.f32 %v3582_v22, %v2880_v54 }
 0xcd0   :  { %v3543_v27 = vpack.c.bf16 %v2888_v18, %v2887_v12 }
 0xcd2   :  { %3556 = vst [vmem:[#allocation24 + $0x8] sm:$0xff] %v3543_v27  }
 0xcd3   :  { %2909 = dma.vmem_to_hbm [thread:$0]  %s2902_s22, 256, %s2904_s24, [#allocation9], %s4014_s18, %s4014_s18, %s4015_s8  }
 0xcd4   :  { %4005 = dma.done.wait [#allocation9], 256  }
 0xcd5   :  { %4006 = vsyncadd [#allocation9], 4294967040 }
 0xcd6   :  { %2914 = vsyncpa [#allocation8], 1 }
 0xcd7   :  { %2915 = vsyncpa [#allocation11], 1 }
 0xcd8   :  { %2916 = vsyncpa [#allocation14], 1 }
 0xcd9   :  { %2917 = vsyncpa [#allocation17], 1 }
 0xcda   :  { %2918 = vsyncpa [#allocation20], 1 }
 0xcdb   :  { %2919 = vsyncpa [#allocation23], 1 }
 0xcdc   :  { %2920 = vsyncpa [#allocation9], 1 }

</bundles_post_ra>
